<compile_context>
chip_gen: v6e
topology: v6e:2x2x1
jax: 0.10.0
libtpu: 0.0.40
codegen_flags: <defaults>
</compile_context>

<pallas_src>
import functools

import jax
import jax.numpy as jnp
from jax.experimental import pallas as pl
from jax.experimental.pallas import tpu as pltpu

EPS = 1e-5  # PyTorch BatchNorm1d default eps


def pool_hidden_kernel(h_ref, pos_ref, wpos_ref, w1b_ref, c1_ref, g1_ref, be1_ref,
                       w2_ref, b2_ref, g2_ref, be2_ref, out_ref, *, n_ped, seqs):
    N = n_ped
    S = seqs
    rows = N * N                       # pair rows per sequence
    mh = wpos_ref.shape[1]             # MLP hidden width (512)
    pdim = w2_ref.shape[1]             # pool_dim
    inv_rows = 1.0 / rows

    h = h_ref[...]                     # (S*N, h_dim)
    pos = pos_ref[...]                 # (S*N, 2)

    # --- Layer 1 via linearity: y1_pre[s,i,j] = A[s,j] - B[s,i] + c1 ---------
    B = jnp.dot(pos, wpos_ref[...], preferred_element_type=jnp.float32)    # (S*N, mh)
    A = B + jnp.dot(h, w1b_ref[...], preferred_element_type=jnp.float32)   # (S*N, mh)
    A = A.reshape(S, N, mh)
    B = B.reshape(S, N, mh)
    # Row index within a sequence is i*N + j  (i = axis 1, j = axis 2).
    y1 = (A[:, None, :, :] - B[:, :, None, :]).reshape(S, rows, mh) + c1_ref[...][None]

    # --- BatchNorm1d (per-sequence batch stats) + ReLU, single-pass stats ----
    s1 = jnp.sum(y1, axis=1, keepdims=True)                 # (S, 1, mh)
    s2 = jnp.sum(y1 * y1, axis=1, keepdims=True)            # (S, 1, mh)
    m1 = s1 * inv_rows
    v1 = jnp.maximum(s2 * inv_rows - m1 * m1, 0.0)
    scale1 = g1_ref[...][None] * jax.lax.rsqrt(v1 + EPS)
    shift1 = be1_ref[...][None] - m1 * scale1
    y1 = jnp.maximum(y1 * scale1 + shift1, 0.0)

    # --- Layer 2: the one real MXU matmul (M = S*N*N rows) -------------------
    y2 = jnp.dot(y1.reshape(S * rows, mh), w2_ref[...],
                 preferred_element_type=jnp.float32) + b2_ref[...]
    y2 = y2.reshape(S, rows, pdim)

    s1 = jnp.sum(y2, axis=1, keepdims=True)
    s2 = jnp.sum(y2 * y2, axis=1, keepdims=True)
    m2 = s1 * inv_rows
    v2 = jnp.maximum(s2 * inv_rows - m2 * m2, 0.0)
    scale2 = g2_ref[...][None] * jax.lax.rsqrt(v2 + EPS)
    shift2 = be2_ref[...][None] - m2 * scale2
    y2 = jnp.maximum(y2 * scale2 + shift2, 0.0)

    # --- .view(N, N, -1).max(1): max over the "other pedestrian" axis j ------
    pooled = jnp.max(y2.reshape(S, N, N, pdim), axis=2)      # (S, N, pdim)
    out_ref[...] = pooled.reshape(S * N, pdim).astype(out_ref.dtype)


def _choose_seqs_per_step(num_seq, n_ped, target_rows=512):
    """Largest divisor S of num_seq with S*n_ped^2 <= ~target_rows (MXU fill)."""
    want = max(1, target_rows // (n_ped * n_ped))
    best = 1
    for s in range(1, num_seq + 1):
        if num_seq % s == 0 and s <= want:
            best = s
    return best


def pool_hidden_net(h_states, end_pos, params, *, n_ped, pool_dim, seqs_per_step=None):
    """h_states: (num_layers, batch, h_dim); end_pos: (batch, 2).
    Assumes equal-sized sequences of n_ped pedestrians (seq_start_end implied)
    with n_ped a multiple of 8 (f32 sublane tiling).
    # TODO(synk): ragged seq_start_end would need PrefetchScalarGridSpec with
    # per-sequence offsets/lengths and masked BN statistics / max-pool.
    """
    wsp, bsp, w1a, w1b, b1, g1, be1, w2, b2, g2, be2 = params
    h_dim = h_states.shape[-1]
    h_flat = h_states.reshape(-1, h_dim)          # == h_states.view(-1, h_dim)
    total = h_flat.shape[0]
    num_seq = total // n_ped

    if seqs_per_step is None:
        seqs_per_step = _choose_seqs_per_step(num_seq, n_ped)
    S = seqs_per_step
    assert num_seq % S == 0, (num_seq, S)

    # Parameter-only precompute enabling the layer-1 linearity trick.
    w_pos = wsp @ w1a                              # (2, mlp_hidden)
    c1 = bsp @ w1a + b1                            # (1, mlp_hidden)
    kernel_params = [w_pos, w1b, c1, g1, be1, w2, b2, g2, be2]

    seq_map = lambda s: (s, 0)
    full_map = lambda s: (0, 0)
    weight_specs = [pl.BlockSpec(p.shape, full_map) for p in kernel_params]

    kernel = functools.partial(pool_hidden_kernel, n_ped=n_ped, seqs=S)

    return pl.pallas_call(
        kernel,
        out_shape=jax.ShapeDtypeStruct((total, pool_dim), jnp.float32),
        grid=(num_seq // S,),
        in_specs=[pl.BlockSpec((S * n_ped, h_dim), seq_map),
                  pl.BlockSpec((S * n_ped, 2), seq_map)] + weight_specs,
        out_specs=pl.BlockSpec((S * n_ped, pool_dim), seq_map),
        compiler_params=pltpu.CompilerParams(dimension_semantics=("parallel",)),
    )(h_flat, end_pos, *kernel_params)


def init_params(key, embedding_dim, h_dim, pool_dim, mlp_hidden=512):
    ks = jax.random.split(key, 6)
    wsp = jax.random.normal(ks[0], (2, embedding_dim), jnp.float32) * 0.1
    bsp = jax.random.normal(ks[1], (1, embedding_dim), jnp.float32) * 0.1
    w1 = jax.random.normal(ks[2], (embedding_dim + h_dim, mlp_hidden), jnp.float32) * 0.05
    b1 = jax.random.normal(ks[3], (1, mlp_hidden), jnp.float32) * 0.05
    w2 = jax.random.normal(ks[4], (mlp_hidden, pool_dim), jnp.float32) * 0.05
    b2 = jax.random.normal(ks[5], (1, pool_dim), jnp.float32) * 0.05
    g1 = jnp.ones((1, mlp_hidden), jnp.float32)   # BN weight init (PyTorch default)
    be1 = jnp.zeros((1, mlp_hidden), jnp.float32)
    g2 = jnp.ones((1, pool_dim), jnp.float32)
    be2 = jnp.zeros((1, pool_dim), jnp.float32)
    w1a, w1b = w1[:embedding_dim], w1[embedding_dim:]
    return [wsp, bsp, w1a, w1b, b1, g1, be1, w2, b2, g2, be2]


def reference(h_flat, end_pos, seq_start_end, params):
    """Pure-JAX mirror of the PyTorch forward (training-mode BN)."""
    wsp, bsp, w1a, w1b, b1, g1, be1, w2, b2, g2, be2 = params
    w1 = jnp.concatenate([w1a, w1b], axis=0)
    outs = []
    for (start, end) in seq_start_end:
        n = end - start
        ch, cp = h_flat[start:end], end_pos[start:end]
        pos1 = jnp.tile(cp, (n, 1))                 # curr_end_pos.repeat(n, 1)
        pos2 = jnp.repeat(cp, n, axis=0)            # self.repeat(curr_end_pos, n)
        rel = pos1 - pos2
        rel_emb = rel @ wsp + bsp
        hid1 = jnp.tile(ch, (n, 1))
        x = jnp.concatenate([rel_emb, hid1], axis=1)
        y1 = x @ w1 + b1
        m = y1.mean(0, keepdims=True); v = ((y1 - m) ** 2).mean(0, keepdims=True)
        y1 = jnp.maximum((y1 - m) / jnp.sqrt(v + EPS) * g1 + be1, 0.0)
        y2 = y1 @ w2 + b2
        m = y2.mean(0, keepdims=True); v = ((y2 - m) ** 2).mean(0, keepdims=True)
        y2 = jnp.maximum((y2 - m) / jnp.sqrt(v + EPS) * g2 + be2, 0.0)
        outs.append(y2.reshape(n, n, -1).max(axis=1))
    return jnp.concatenate(outs, axis=0)


if __name__ == "__main__":
    embedding_dim, h_dim, pool_dim, mlp_hidden = 32, 32, 128, 512
    n_ped, num_seq = 8, 16                         # 16 seqs -> S=8 per step, grid=(2,)
    batch = n_ped * num_seq
    seq_start_end = [(s * n_ped, (s + 1) * n_ped) for s in range(num_seq)]

    key = jax.random.PRNGKey(0)
    kp, kh, ke = jax.random.split(key, 3)
    params = init_params(kp, embedding_dim, h_dim, pool_dim, mlp_hidden)

    h_states = jax.random.normal(kh, (1, batch, h_dim), jnp.float32)   # (num_layers, batch, h_dim)
    end_pos = jax.random.normal(ke, (batch, 2), jnp.float32)           # (batch, 2)

    out = pool_hidden_net(h_states, end_pos, params, n_ped=n_ped, pool_dim=pool_dim)
    out = jax.block_until_ready(out)

    ref = reference(h_states.reshape(-1, h_dim), end_pos, seq_start_end, params)
    ref = jax.block_until_ready(ref)

    assert out.shape == (batch, pool_dim), out.shape
    max_err = float(jnp.max(jnp.abs(out - ref)))
    assert jnp.allclose(out, ref, atol=2e-3, rtol=2e-3), max_err
    print("KERNEL_OK")
</pallas_src>

<mosaic_0001>
module attributes {stable_mosaic.version = 11 : i64} {
  func.func @pool_hidden_kernel(%arg0: i32, %arg1: memref<64x32xf32, #tpu.memory_space<vmem>>, %arg2: memref<64x2xf32, #tpu.memory_space<vmem>>, %arg3: memref<2x512xf32, #tpu.memory_space<vmem>>, %arg4: memref<32x512xf32, #tpu.memory_space<vmem>>, %arg5: memref<1x512xf32, #tpu.memory_space<vmem>>, %arg6: memref<1x512xf32, #tpu.memory_space<vmem>>, %arg7: memref<1x512xf32, #tpu.memory_space<vmem>>, %arg8: memref<512x128xf32, #tpu.memory_space<vmem>>, %arg9: memref<1x128xf32, #tpu.memory_space<vmem>>, %arg10: memref<1x128xf32, #tpu.memory_space<vmem>>, %arg11: memref<1x128xf32, #tpu.memory_space<vmem>>, %arg12: memref<64x128xf32, #tpu.memory_space<vmem>>) attributes {dimension_semantics = [#tpu.dimension_semantics<parallel>], iteration_bounds = array<i64: 2>, scalar_prefetch = 0 : i64, scratch_operands = 0 : i64, tpu.core_type = #tpu.core_type<tc>, window_params = [{transform_indices = @transform_0, window_bounds = array<i64: 64, 32>}, {transform_indices = @transform_1, window_bounds = array<i64: 64, 2>}, {pipeline_mode = #tpu.pipeline_mode<synchronous>, transform_indices = @transform_2, window_bounds = array<i64: 2, 512>}, {pipeline_mode = #tpu.pipeline_mode<synchronous>, transform_indices = @transform_3, window_bounds = array<i64: 32, 512>}, {pipeline_mode = #tpu.pipeline_mode<synchronous>, transform_indices = @transform_4, window_bounds = array<i64: 1, 512>}, {pipeline_mode = #tpu.pipeline_mode<synchronous>, transform_indices = @transform_5, window_bounds = array<i64: 1, 512>}, {pipeline_mode = #tpu.pipeline_mode<synchronous>, transform_indices = @transform_6, window_bounds = array<i64: 1, 512>}, {pipeline_mode = #tpu.pipeline_mode<synchronous>, transform_indices = @transform_7, window_bounds = array<i64: 512, 128>}, {pipeline_mode = #tpu.pipeline_mode<synchronous>, transform_indices = @transform_8, window_bounds = array<i64: 1, 128>}, {pipeline_mode = #tpu.pipeline_mode<synchronous>, transform_indices = @transform_9, window_bounds = array<i64: 1, 128>}, {pipeline_mode = #tpu.pipeline_mode<synchronous>, transform_indices = @transform_10, window_bounds = array<i64: 1, 128>}, {transform_indices = @transform_11, window_bounds = array<i64: 64, 128>}]} {
    %c0 = arith.constant 0 : index
    %c0_0 = arith.constant 0 : index
    %0 = vector.load %arg1[%c0, %c0_0] : memref<64x32xf32, #tpu.memory_space<vmem>>, vector<64x32xf32>
    %c0_1 = arith.constant 0 : index
    %c0_2 = arith.constant 0 : index
    %1 = vector.load %arg2[%c0_1, %c0_2] : memref<64x2xf32, #tpu.memory_space<vmem>>, vector<64x2xf32>
    %c0_3 = arith.constant 0 : index
    %c0_4 = arith.constant 0 : index
    %2 = vector.load %arg3[%c0_3, %c0_4] : memref<2x512xf32, #tpu.memory_space<vmem>>, vector<2x512xf32>
    %cst = arith.constant dense<0.000000e+00> : vector<64x512xf32>
    %3 = tpu.matmul %1, %2, %cst {dimension_numbers = #tpu.dot_dimension_numbers<[1], [0], [0], [1], [0, 0, 1, 1], [], []>} : vector<64x2xf32>, vector<2x512xf32>, vector<64x512xf32> -> vector<64x512xf32>
    %c0_5 = arith.constant 0 : index
    %c0_6 = arith.constant 0 : index
    %4 = vector.load %arg4[%c0_5, %c0_6] : memref<32x512xf32, #tpu.memory_space<vmem>>, vector<32x512xf32>
    %cst_7 = arith.constant dense<0.000000e+00> : vector<64x512xf32>
    %5 = tpu.matmul %0, %4, %cst_7 {dimension_numbers = #tpu.dot_dimension_numbers<[1], [0], [0], [1], [0, 0, 1, 1], [], []>} : vector<64x32xf32>, vector<32x512xf32>, vector<64x512xf32> -> vector<64x512xf32>
    %6 = arith.addf %3, %5 : vector<64x512xf32>
    %7 = vector.shape_cast %6 : vector<64x512xf32> to vector<8x8x512xf32>
    %8 = vector.shape_cast %3 : vector<64x512xf32> to vector<8x8x512xf32>
    %9 = vector.shape_cast %7 : vector<8x8x512xf32> to vector<8x1x8x512xf32>
    %10 = vector.shape_cast %8 : vector<8x8x512xf32> to vector<8x8x1x512xf32>
    %11 = vector.broadcast %9 : vector<8x1x8x512xf32> to vector<8x8x8x512xf32>
    %12 = vector.broadcast %10 : vector<8x8x1x512xf32> to vector<8x8x8x512xf32>
    %13 = arith.subf %11, %12 : vector<8x8x8x512xf32>
    %14 = vector.shape_cast %13 : vector<8x8x8x512xf32> to vector<8x64x512xf32>
    %c0_8 = arith.constant 0 : index
    %c0_9 = arith.constant 0 : index
    %15 = vector.load %arg5[%c0_8, %c0_9] : memref<1x512xf32, #tpu.memory_space<vmem>>, vector<1x512xf32>
    %16 = vector.shape_cast %15 : vector<1x512xf32> to vector<1x1x512xf32>
    %17 = vector.broadcast %16 : vector<1x1x512xf32> to vector<8x64x512xf32>
    %18 = arith.addf %14, %17 : vector<8x64x512xf32>
    %cst_10 = arith.constant dense<0.000000e+00> : vector<8x512xf32>
    %19 = vector.multi_reduction <add>, %18, %cst_10 [1] : vector<8x64x512xf32> to vector<8x512xf32>
    %20 = vector.shape_cast %19 : vector<8x512xf32> to vector<8x1x512xf32>
    %21 = arith.mulf %18, %18 : vector<8x64x512xf32>
    %cst_11 = arith.constant dense<0.000000e+00> : vector<8x512xf32>
    %22 = vector.multi_reduction <add>, %21, %cst_11 [1] : vector<8x64x512xf32> to vector<8x512xf32>
    %23 = vector.shape_cast %22 : vector<8x512xf32> to vector<8x1x512xf32>
    %cst_12 = arith.constant 1.562500e-02 : f32
    %24 = vector.broadcast %cst_12 : f32 to vector<8x1x512xf32>
    %25 = arith.mulf %20, %24 : vector<8x1x512xf32>
    %cst_13 = arith.constant 1.562500e-02 : f32
    %26 = vector.broadcast %cst_13 : f32 to vector<8x1x512xf32>
    %27 = arith.mulf %23, %26 : vector<8x1x512xf32>
    %28 = arith.mulf %25, %25 : vector<8x1x512xf32>
    %29 = arith.subf %27, %28 : vector<8x1x512xf32>
    %cst_14 = arith.constant 0.000000e+00 : f32
    %30 = vector.broadcast %cst_14 : f32 to vector<8x1x512xf32>
    %31 = arith.maximumf %29, %30 : vector<8x1x512xf32>
    %c0_15 = arith.constant 0 : index
    %c0_16 = arith.constant 0 : index
    %32 = vector.load %arg6[%c0_15, %c0_16] : memref<1x512xf32, #tpu.memory_space<vmem>>, vector<1x512xf32>
    %33 = vector.shape_cast %32 : vector<1x512xf32> to vector<1x1x512xf32>
    %cst_17 = arith.constant 9.99999974E-6 : f32
    %34 = vector.broadcast %cst_17 : f32 to vector<8x1x512xf32>
    %35 = arith.addf %31, %34 : vector<8x1x512xf32>
    %36 = math.rsqrt %35 : vector<8x1x512xf32>
    %37 = vector.broadcast %33 : vector<1x1x512xf32> to vector<8x1x512xf32>
    %38 = arith.mulf %37, %36 : vector<8x1x512xf32>
    %c0_18 = arith.constant 0 : index
    %c0_19 = arith.constant 0 : index
    %39 = vector.load %arg7[%c0_18, %c0_19] : memref<1x512xf32, #tpu.memory_space<vmem>>, vector<1x512xf32>
    %40 = vector.shape_cast %39 : vector<1x512xf32> to vector<1x1x512xf32>
    %41 = arith.mulf %25, %38 : vector<8x1x512xf32>
    %42 = vector.broadcast %40 : vector<1x1x512xf32> to vector<8x1x512xf32>
    %43 = arith.subf %42, %41 : vector<8x1x512xf32>
    %44 = vector.broadcast %38 : vector<8x1x512xf32> to vector<8x64x512xf32>
    %45 = arith.mulf %18, %44 : vector<8x64x512xf32>
    %46 = vector.broadcast %43 : vector<8x1x512xf32> to vector<8x64x512xf32>
    %47 = arith.addf %45, %46 : vector<8x64x512xf32>
    %cst_20 = arith.constant 0.000000e+00 : f32
    %48 = vector.broadcast %cst_20 : f32 to vector<8x64x512xf32>
    %49 = arith.maximumf %47, %48 : vector<8x64x512xf32>
    %50 = vector.shape_cast %49 : vector<8x64x512xf32> to vector<512x512xf32>
    %c0_21 = arith.constant 0 : index
    %c0_22 = arith.constant 0 : index
    %51 = vector.load %arg8[%c0_21, %c0_22] : memref<512x128xf32, #tpu.memory_space<vmem>>, vector<512x128xf32>
    %cst_23 = arith.constant dense<0.000000e+00> : vector<512x128xf32>
    %52 = tpu.matmul %50, %51, %cst_23 {dimension_numbers = #tpu.dot_dimension_numbers<[1], [0], [0], [1], [0, 0, 1, 1], [], []>} : vector<512x512xf32>, vector<512x128xf32>, vector<512x128xf32> -> vector<512x128xf32>
    %c0_24 = arith.constant 0 : index
    %c0_25 = arith.constant 0 : index
    %53 = vector.load %arg9[%c0_24, %c0_25] : memref<1x128xf32, #tpu.memory_space<vmem>>, vector<1x128xf32>
    %54 = vector.broadcast %53 : vector<1x128xf32> to vector<512x128xf32>
    %55 = arith.addf %52, %54 : vector<512x128xf32>
    %56 = vector.shape_cast %55 : vector<512x128xf32> to vector<8x64x128xf32>
    %cst_26 = arith.constant dense<0.000000e+00> : vector<8x128xf32>
    %57 = vector.multi_reduction <add>, %56, %cst_26 [1] : vector<8x64x128xf32> to vector<8x128xf32>
    %58 = vector.shape_cast %57 : vector<8x128xf32> to vector<8x1x128xf32>
    %59 = arith.mulf %56, %56 : vector<8x64x128xf32>
    %cst_27 = arith.constant dense<0.000000e+00> : vector<8x128xf32>
    %60 = vector.multi_reduction <add>, %59, %cst_27 [1] : vector<8x64x128xf32> to vector<8x128xf32>
    %61 = vector.shape_cast %60 : vector<8x128xf32> to vector<8x1x128xf32>
    %cst_28 = arith.constant 1.562500e-02 : f32
    %62 = vector.broadcast %cst_28 : f32 to vector<8x1x128xf32>
    %63 = arith.mulf %58, %62 : vector<8x1x128xf32>
    %cst_29 = arith.constant 1.562500e-02 : f32
    %64 = vector.broadcast %cst_29 : f32 to vector<8x1x128xf32>
    %65 = arith.mulf %61, %64 : vector<8x1x128xf32>
    %66 = arith.mulf %63, %63 : vector<8x1x128xf32>
    %67 = arith.subf %65, %66 : vector<8x1x128xf32>
    %cst_30 = arith.constant 0.000000e+00 : f32
    %68 = vector.broadcast %cst_30 : f32 to vector<8x1x128xf32>
    %69 = arith.maximumf %67, %68 : vector<8x1x128xf32>
    %c0_31 = arith.constant 0 : index
    %c0_32 = arith.constant 0 : index
    %70 = vector.load %arg10[%c0_31, %c0_32] : memref<1x128xf32, #tpu.memory_space<vmem>>, vector<1x128xf32>
    %71 = vector.shape_cast %70 : vector<1x128xf32> to vector<1x1x128xf32>
    %cst_33 = arith.constant 9.99999974E-6 : f32
    %72 = vector.broadcast %cst_33 : f32 to vector<8x1x128xf32>
    %73 = arith.addf %69, %72 : vector<8x1x128xf32>
    %74 = math.rsqrt %73 : vector<8x1x128xf32>
    %75 = vector.broadcast %71 : vector<1x1x128xf32> to vector<8x1x128xf32>
    %76 = arith.mulf %75, %74 : vector<8x1x128xf32>
    %c0_34 = arith.constant 0 : index
    %c0_35 = arith.constant 0 : index
    %77 = vector.load %arg11[%c0_34, %c0_35] : memref<1x128xf32, #tpu.memory_space<vmem>>, vector<1x128xf32>
    %78 = vector.shape_cast %77 : vector<1x128xf32> to vector<1x1x128xf32>
    %79 = arith.mulf %63, %76 : vector<8x1x128xf32>
    %80 = vector.broadcast %78 : vector<1x1x128xf32> to vector<8x1x128xf32>
    %81 = arith.subf %80, %79 : vector<8x1x128xf32>
    %82 = vector.broadcast %76 : vector<8x1x128xf32> to vector<8x64x128xf32>
    %83 = arith.mulf %56, %82 : vector<8x64x128xf32>
    %84 = vector.broadcast %81 : vector<8x1x128xf32> to vector<8x64x128xf32>
    %85 = arith.addf %83, %84 : vector<8x64x128xf32>
    %cst_36 = arith.constant 0.000000e+00 : f32
    %86 = vector.broadcast %cst_36 : f32 to vector<8x64x128xf32>
    %87 = arith.maximumf %85, %86 : vector<8x64x128xf32>
    %88 = vector.shape_cast %87 : vector<8x64x128xf32> to vector<8x8x8x128xf32>
    %cst_37 = arith.constant dense<0xFF800000> : vector<8x8x128xf32>
    %89 = vector.multi_reduction <maximumf>, %88, %cst_37 [2] : vector<8x8x8x128xf32> to vector<8x8x128xf32>
    %90 = vector.shape_cast %89 : vector<8x8x128xf32> to vector<64x128xf32>
    %c0_38 = arith.constant 0 : index
    %c0_39 = arith.constant 0 : index
    %91 = vector.load %arg12[%c0_38, %c0_39] : memref<64x128xf32, #tpu.memory_space<vmem>>, vector<64x128xf32>
    tpu.vector_store %arg12[%c0_38, %c0_39], %90 {strides = array<i32>} : memref<64x128xf32, #tpu.memory_space<vmem>>, vector<64x128xf32>,
    return
  }
  func.func @transform_0(%arg0: i32) -> (i32, i32) {
    %c0_i32 = arith.constant 0 : i32
    %c0_i32_0 = arith.constant 0 : i32
    return %arg0, %c0_i32 : i32, i32
  }
  func.func @transform_1(%arg0: i32) -> (i32, i32) {
    %c0_i32 = arith.constant 0 : i32
    %c0_i32_0 = arith.constant 0 : i32
    return %arg0, %c0_i32 : i32, i32
  }
  func.func @transform_2(%arg0: i32) -> (i32, i32) {
    %c0_i32 = arith.constant 0 : i32
    %c0_i32_0 = arith.constant 0 : i32
    %c0_i32_1 = arith.constant 0 : i32
    return %c0_i32, %c0_i32_0 : i32, i32
  }
  func.func @transform_3(%arg0: i32) -> (i32, i32) {
    %c0_i32 = arith.constant 0 : i32
    %c0_i32_0 = arith.constant 0 : i32
    %c0_i32_1 = arith.constant 0 : i32
    return %c0_i32, %c0_i32_0 : i32, i32
  }
  func.func @transform_4(%arg0: i32) -> (i32, i32) {
    %c0_i32 = arith.constant 0 : i32
    %c0_i32_0 = arith.constant 0 : i32
    %c0_i32_1 = arith.constant 0 : i32
    return %c0_i32, %c0_i32_0 : i32, i32
  }
  func.func @transform_5(%arg0: i32) -> (i32, i32) {
    %c0_i32 = arith.constant 0 : i32
    %c0_i32_0 = arith.constant 0 : i32
    %c0_i32_1 = arith.constant 0 : i32
    return %c0_i32, %c0_i32_0 : i32, i32
  }
  func.func @transform_6(%arg0: i32) -> (i32, i32) {
    %c0_i32 = arith.constant 0 : i32
    %c0_i32_0 = arith.constant 0 : i32
    %c0_i32_1 = arith.constant 0 : i32
    return %c0_i32, %c0_i32_0 : i32, i32
  }
  func.func @transform_7(%arg0: i32) -> (i32, i32) {
    %c0_i32 = arith.constant 0 : i32
    %c0_i32_0 = arith.constant 0 : i32
    %c0_i32_1 = arith.constant 0 : i32
    return %c0_i32, %c0_i32_0 : i32, i32
  }
  func.func @transform_8(%arg0: i32) -> (i32, i32) {
    %c0_i32 = arith.constant 0 : i32
    %c0_i32_0 = arith.constant 0 : i32
    %c0_i32_1 = arith.constant 0 : i32
    return %c0_i32, %c0_i32_0 : i32, i32
  }
  func.func @transform_9(%arg0: i32) -> (i32, i32) {
    %c0_i32 = arith.constant 0 : i32
    %c0_i32_0 = arith.constant 0 : i32
    %c0_i32_1 = arith.constant 0 : i32
    return %c0_i32, %c0_i32_0 : i32, i32
  }
  func.func @transform_10(%arg0: i32) -> (i32, i32) {
    %c0_i32 = arith.constant 0 : i32
    %c0_i32_0 = arith.constant 0 : i32
    %c0_i32_1 = arith.constant 0 : i32
    return %c0_i32, %c0_i32_0 : i32, i32
  }
  func.func @transform_11(%arg0: i32) -> (i32, i32) {
    %c0_i32 = arith.constant 0 : i32
    %c0_i32_0 = arith.constant 0 : i32
    return %arg0, %c0_i32 : i32, i32
  }
}

</mosaic_0001>

<bundles_post_ra>
// kernel: tpu_custom_call.1
= control target key start
LH: loop header
LB: loop body
LE: loop exit
PB: predicated region body
PF: predicated region fallthrough
CT: control target
= control target key end

     0   :  { %s15981_s0 = inlined_call_operand.vmem [shape: f32[128,32], index: 0, kind: input, shape index: {}]   ;;  %s15982_s1 = inlined_call_operand.vmem [shape: f32[128,2], index: 1, kind: input, shape index: {}]   ;;  %s15983_s2 = inlined_call_operand.vmem [shape: f32[2,512], index: 2, kind: input, shape index: {}]   ;;  %s15984_s3 = inlined_call_operand.vmem [shape: f32[32,512], index: 3, kind: input, shape index: {}]   ;;  %s15985_s4 = inlined_call_operand.vmem [shape: f32[1,512], index: 4, kind: input, shape index: {}]   ;;  %s15986_s5 = inlined_call_operand.vmem [shape: f32[1,512], index: 5, kind: input, shape index: {}]   ;;  %s15987_s6 = inlined_call_operand.vmem [shape: f32[1,512], index: 6, kind: input, shape index: {}]   ;;  %s15988_s7 = inlined_call_operand.hbm [shape: f32[512,128], index: 7, kind: input, shape index: {}]   ;;  %s15989_s8 = inlined_call_operand.vmem [shape: f32[1,128], index: 8, kind: input, shape index: {}]   ;;  %s15990_s9 = inlined_call_operand.vmem [shape: f32[1,128], index: 9, kind: input, shape index: {}]   ;;  %s15991_s10 = inlined_call_operand.vmem [shape: f32[1,128], index: 10, kind: input, shape index: {}]   ;;  %s15992_s11 = inlined_call_operand.hbm [shape: f32[128,128], index: 11, kind: output, shape index: {}]  }
   0x1   :  { %16523 = sst [smem:[#allocation310_spill]] %s15981_s0 }
   0x2   :  { %16 = vsyncpa [#allocation3], 0 }
   0x3   :  { %17 = vsyncpa [#allocation4], 0 }
   0x4   :  { %19 = vsyncpa [#allocation4 + $0x1], 0  ;;  %s8816_s17 = smov 0   ;;  %s8818_s18 = smov 0  }
   0x5   :  { %s8820_s19 = smov 0   ;;  %s8822_s20 = smov 0  }
   0x6 LB: > { %s8837_s21 = sadd.s32 4294967295, %s8745_s20   ;;  %s8449_s22 = sadd.s32 4294967294, %s8745_s20   ;;  %s8745_s20 = sphi %s8822_s20, %s17769_s20   ;;  %s8741_s19 = sphi %s8820_s19, %s17768_s19   ;;  %s8737_s18 = sphi %s8818_s18, %s17767_s18   ;;  %s8733_s17 = sphi %s8816_s17, %s17766_s17  }
   0x7   : > { %s8841_s23 = sadd.s32 1, %s8745_s20   ;;  %s273_s24 = sadd.s32 1, %s8741_s19 }
   0x8   : > { %s270_s25 = ssub.s32 %s8745_s20, %s8841_s23  ;;  %p283_p0 = scmp.ne.s32.totalorder %s8741_s19, %s8737_s18 }
   0x9   : > { %p271_p1 = scmp.eq.s32.totalorder %s270_s25, 0  ;;  %p284_p2 = scmp.eq.s32.totalorder %s8837_s21, 1 }
   0xa   : > { %p289_p3 = scmp.ne.s32.totalorder %s8737_s18, %s8733_s17  ;;  %p290_p4 = scmp.eq.s32.totalorder %s8449_s22, 1 }
   0xb   : > { %s8852_s26 = scalar_select %p271_p1, %s8741_s19, %s273_s24  }
   0xc   : > { %p8854_p5 = por %p284_p2, %p283_p0  ;;  %p8858_p6 = por %p290_p4, %p289_p3 }
   0xd   : > { %p8450_p7 = scmp.ge.s32.totalorder %s8745_s20, 1  ;;  %p297_p8 = scmp.lt.s32.totalorder %s8745_s20, 3 }
   0xe   : > { %s16525_s28 = scalar_select %p8858_p6, 1, 0 }
   0xf   : > { %p8517_p9 = scmp.eq.s32.totalorder %s8837_s21, 0  ;;  %p8865_p10 = pnand %p8450_p7, %p297_p8 }
  0x10   : > { %s8747_s30 = smov [#allocation2]  }
  0x11   : > { %s324_s12 = sshll.u32 %s8747_s30, 4  ;;  %p8509_p11 = pneg %p8865_p10  ;;  %s325_s12 = int_to_ptr.vmem [resolvable:$true] %s324_s12 }
  0x12   : > { %s8666_s13 = scalar_lea.vmem %s325_s12, 8192  ;;  %p8674_p3 = scmp.lt.s32.totalorder %s325_s12, %s325_s12 }
  0x13   : > { %p8510_p12 = pnand %p8517_p9, %p8509_p11  ;;  %p8667_p0 = scmp.ne.s32.totalorder %s325_s12, %s8666_s13 }
  0x14   : > { %p8675_p4 = scmp.lt.s32.totalorder %s8666_s13, %s8666_s13 }
  0x15   : > { %p8657_p13 = pneg %p8510_p12 }
  0x16   : > { %p8676_p6 = por %p8675_p4, %p8674_p3 }
  0x17   : > { %p8669_p1 = pnand %p8667_p0, %p8657_p13 }
  0x19   : > { %p8670_p2 = pneg %p8669_p1 }
  0x1b   : > { %p8677_p7 = pnand %p8676_p6, %p8670_p2 }
  0x1d   : > { %8680 = shalt.err (!%p8677_p7)
}
  0x1e   : > { %s8748_s14 = smov 128   ;;  %s8749_s15 = smov 8  }
  0x1f   : > { %8512 = dma.hbm_to_vmem [thread:$0]  (!%p8510_p12), %s15988_s7, 8192, %s325_s12, [#allocation3], %s8748_s14, %s8748_s14, %s8749_s15  }
  0x20   : > { %367 = sbr.rel (%p8865_p10) target bundleno = 1460 (0x5b4), region = 64 }
  0x25   : > { %8724 = dma.done.wait (%p8517_p9), [#allocation3], 8192  }
  0x26   : > { %8726 = vsyncadd (%p8517_p9), [#allocation3], 4294959104  ;;  %v447_v0 = vlaneseq  ;;  %v8750_v1 = vmov 1983009808   ;;  %v15994_v3 = vmov 0.0   ;;  %s8456_s24 = sshll.u32 %s8837_s21, 3 }
  0x27   : > { %v445_v2 = vunpack.c.l.s4 %v8750_v1  ;;  %558 = vmatprep.mubr.f32.mxu0 %v15994_v3  ;;  %671 = vmatprep.mubr.f32.mxu1 %v15994_v3  ;;  %p413_p6 = scmp.lt.s32.totalorder %s8456_s24, 15  ;;  %v441_v7 = vld [vmem:[%s15983_s2] sm:$0xff]  ;;  %vm485_vm0 = vcmask 1041408   ;;  %vm460_vm1 = vcmask 15360   ;;  %v733_v14 = vld [vmem:[%s15984_s3 + $0x68] sm:$0xff]  ;;  %v735_v15 = vld [vmem:[%s15984_s3 + $0x78] sm:$0xff] }
  0x28   : > { %v8885_v4 = vshrl.u32 %v447_v0, 7  ;;  %v443_v9 = vcombine.high %v441_v7, %v441_v7  ;;  %v732_v16 = vld [vmem:[%s15984_s3 + $0x60] sm:$0xff]  ;;  %v734_v17 = vld [vmem:[%s15984_s3 + $0x70] sm:$0xff]  ;;  %v729_v19 = vld [vmem:[%s15984_s3 + $0x48] sm:$0xff]  ;;  %s16528_s0 = sld [smem:[#allocation310_spill]]  ;;  %vm736_vm2 = vcmask 261120  }
  0x29   : > { %v446_v5 = vunpack.c.0.s8 %v445_v2  ;;  %s17771_s24 = smov (!%p413_p6, %s8456_s24), 15  ;;  %v731_v20 = vld [vmem:[%s15984_s3 + $0x58] sm:$0xff]  ;;  %v730_v22 = vld [vmem:[%s15984_s3 + $0x50] sm:$0xff]  ;;  %v728_v23 = vld [vmem:[%s15984_s3 + $0x40] sm:$0xff]  ;;  %v8752_v45 = vmov 1966171168  }
  0x2a   : > { %s15993_s25 = sshll.u32 %s17771_s24, 3  ;;  %v725_v24 = vld [vmem:[%s15984_s3 + $0x28] sm:$0xff]  ;;  %v727_v25 = vld [vmem:[%s15984_s3 + $0x38] sm:$0xff]  ;;  %v726_v27 = vld [vmem:[%s15984_s3 + $0x30] sm:$0xff]  ;;  %s16527_s15 = sshll.u32 %s17771_s24, 3  ;;  %v1056_v46 = vunpack.c.l.s4 %v8752_v45  ;;  %vm8270_vm3 = vcmask 1041409  }
  0x2b   : > { %v449_v6 = vsub.s32 %v446_v5, %v8885_v4  ;;  %s8899_s14 = scalar_lea.vmem %s15982_s1, %s15993_s25  ;;  %v724_v28 = vld [vmem:[%s15984_s3 + $0x20] sm:$0xff]  ;;  %v721_v29 = vld [vmem:[%s15984_s3 + $0x8] sm:$0xff]  ;;  %v723_v30 = vld [vmem:[%s15984_s3 + $0x18] sm:$0xff]  ;;  %vm8272_vm4 = vcmask 1042434   ;;  %vm8274_vm5 = vcmask 1043459   ;;  %vm8276_vm6 = vcmask 1044484  }
  0x2c   : > { %v433_v12 = vld [vmem:[%s8899_s14] sm:$0xff]  ;;  %v434_v18 = vld [vmem:[%s8899_s14 + $0x8] sm:$0xff]  ;;  %v435_v21 = vld [vmem:[%s8899_s14 + $0x10] sm:$0xff]  ;;  %v1057_v48 = vunpack.c.0.s8 %v1056_v46  ;;  %vm8278_vm7 = vcmask 1045509   ;;  %vm8280_vm8 = vcmask 1046534   ;;  %s409_s12 = sand.u32 1, %s8737_s18  }
  0x2d   : > { %v450_v8 = vrot.slane %v441_v7, %v449_v6  ;;  %v457_v11 = vrot.slane %v443_v9, %v449_v6  ;;  %v436_v26 = vld [vmem:[%s8899_s14 + $0x18] sm:$0xff]  ;;  %v437_v31 = vld [vmem:[%s8899_s14 + $0x20] sm:$0xff]  ;;  %v722_v32 = vld [vmem:[%s15984_s3 + $0x10] sm:$0xff]  ;;  %vm8282_vm9 = vcmask 1047559   ;;  %s15098_s16 = sshll.u32 %s409_s12, 6  ;;  %s8753_s30 = smov [#allocation5]  }
  0x2e   : > { %v720_v33 = vld [vmem:[%s15984_s3] sm:$0xff]  ;;  %v438_v34 = vld [vmem:[%s8899_s14 + $0x28] sm:$0xff]  ;;  %v439_v35 = vld [vmem:[%s8899_s14 + $0x30] sm:$0xff]  ;;  %s8990_s29 = scalar_lea.vmem %s16528_s0, %s16527_s15  ;;  %v9047_v53 = vsub.s32 %v1057_v48, %v8885_v4  ;;  %s15142_s22 = scalar_lea.vmem [#allocation5], %s15098_s16 }
  0x2f   : > { %v458_v10 = vcombine.high %v450_v8, %v450_v8  ;;  %v459_v13 = vcombine.high %v457_v11, %v457_v11  ;;  %v440_v36 = vld [vmem:[%s8899_s14 + $0x38] sm:$0xff]  ;;  %v425_v37 = vld [vmem:[%s8990_s29] sm:$0xff]  ;;  %v426_v38 = vld [vmem:[%s8990_s29 + $0x8] sm:$0xff]  ;;  %s8502_s15 = sshll.u32 %s8837_s21, 10  ;;  %s8363_s16 = sshll.u32 %s15142_s22, 4  ;;  %s15934_s16 = int_to_ptr.vmem [resolvable:$true] %s8363_s16 }
  0x30   : > { %v427_v39 = vld [vmem:[%s8990_s29 + $0x10] sm:$0xff]  ;;  %v428_v40 = vld [vmem:[%s8990_s29 + $0x18] sm:$0xff]  ;;  %v429_v41 = vld [vmem:[%s8990_s29 + $0x20] sm:$0xff]  ;;  %16529 = vst [vmem:[#allocation8_spill] sm:$0xff] %v9047_v53  ;;  %s15932_s14 = scalar_lea.hbm %s15992_s11, %s8502_s15  ;;  %s15941_s21 = scalar_lea.sflag [#allocation4], %s409_s12 }
  0x31   : > { %8460 = vmatprep.subr.msk.mxu0 %vm485_vm0, %v458_v10  ;;  %8470 = vmatprep.subr.msk.mxu1 %vm485_vm0, %v459_v13  ;;  %v430_v42 = vld [vmem:[%s8990_s29 + $0x28] sm:$0xff]  ;;  %v431_v43 = vld [vmem:[%s8990_s29 + $0x30] sm:$0xff]  ;;  %v432_v44 = vld [vmem:[%s8990_s29 + $0x38] sm:$0xff]  ;;  %s8681_s25 = scalar_lea.vmem %s15934_s16, 1024  ;;  %s8685_s13 = sshll.u32 %s8753_s30, 4  ;;  %s8686_s13 = int_to_ptr.vmem [resolvable:$false] %s8685_s13 }
  0x32   : > { %8461 = vmatpush1.msk.msra.mxu0 %vm485_vm0, %v450_v8  ;;  %8471 = vmatpush1.msk.msra.mxu1 %vm485_vm0, %v457_v11  ;;  %v9079_v11 = vld [vmem:[%s15985_s4] sm:$0xf]  ;;  %p8682_p8 = scmp.ne.s32.totalorder %s15934_s16, %s8681_s25  ;;  %s8687_s15 = scalar_lea.vmem %s8686_s13, 2048 }
  0x33   : > { %8462 = vmatmul.mubr.msk.f32.vlgmr.msra.gmra.mxu0 %vm460_vm1, %v433_v12  ;;  %785 = vmatprep.subr.mxu0 %v733_v14  ;;  %p8688_p11 = scmp.lt.s32.totalorder %s15934_s16, %s8686_s13  ;;  %p8689_p12 = scmp.lt.s32.totalorder %s8687_s15, %s8681_s25 }
  0x34   : > { %8472 = vmatmul.mubr.msk.f32.vlgmr.msra.gmra.mxu1 %vm460_vm1, %v433_v12  ;;  %898 = vmatprep.subr.mxu1 %v735_v15  ;;  %v9082_v12 = vsub.s32 0, %v8885_v4  ;;  %p8683_p9 = pnand %p8682_p8, %p8854_p5 }
  0x35   : > { %564 = vmatprep.mubr.f32.mxu0 %v15994_v3  ;;  %786 = vmatpush1.msra.mxu0 %v732_v16  ;;  %v9092_v16 = vsub.s32 2, %v8885_v4  ;;  %p8690_p13 = por %p8689_p12, %p8688_p11 }
  0x36   : > { %899 = vmatpush1.msra.mxu1 %v734_v17  ;;  %677 = vmatprep.mubr.f32.mxu1 %v15994_v3  ;;  %16531 = vst [vmem:[#allocation10_spill] sm:$0xff] %v9082_v12  ;;  %p8684_p10 = pneg %p8683_p9 }
  0x37   : > { %8463 = vmatmul.mubr.msk.f32.gmra.mxu0 %vm460_vm1, %v434_v18  ;;  %787 = vmatprep.subr.mxu0 %v729_v19  ;;  %16533 = vst [vmem:[#allocation12_spill] sm:$0xff] %v9092_v16 }
  0x38   : > { %570 = vmatprep.mubr.f32.mxu0 %v15994_v3  ;;  %8473 = vmatmul.mubr.msk.f32.gmra.mxu1 %vm460_vm1, %v434_v18  ;;  %p8691_p0 = pnand %p8690_p13, %p8684_p10 }
  0x39   : > { %683 = vmatprep.mubr.f32.mxu1 %v15994_v3  ;;  %900 = vmatprep.subr.mxu1 %v731_v20  ;;  %v9103_v20 = vsub.s32 1, %v8885_v4 }
  0x3a   : > { %901 = vmatpush1.msra.mxu1 %v730_v22  ;;  %788 = vmatpush1.msra.mxu0 %v728_v23  ;;  %v9110_v22 = vrot.slane %v9079_v11, %v9082_v12 }
  0x3b   : > { %8464 = vmatmul.mubr.msk.f32.gmra.mxu0 %vm460_vm1, %v435_v21  ;;  %789 = vmatprep.subr.mxu0 %v725_v24  ;;  %16537 = vst [vmem:[#allocation16_spill] sm:$0xff] %v9103_v20 }
  0x3c   : > { %576 = vmatprep.mubr.f32.mxu0 %v15994_v3  ;;  %8474 = vmatmul.mubr.msk.f32.gmra.mxu1 %vm460_vm1, %v435_v21  ;;  %v9106_v21 = vsub.s32 3, %v8885_v4 }
  0x3d   : > { %689 = vmatprep.mubr.f32.mxu1 %v15994_v3  ;;  %902 = vmatprep.subr.mxu1 %v727_v25 }
  0x3e   : > { %903 = vmatpush1.msra.mxu1 %v726_v27  ;;  %790 = vmatpush1.msra.mxu0 %v724_v28  ;;  %16538 = vst [vmem:[#allocation17_spill] sm:$0xff] %v9106_v21 }
  0x3f   : > { %8465 = vmatmul.mubr.msk.f32.gmra.mxu0 %vm460_vm1, %v436_v26  ;;  %791 = vmatprep.subr.mxu0 %v721_v29 }
  0x40   : > { %582 = vmatprep.mubr.f32.mxu0 %v15994_v3  ;;  %8475 = vmatmul.mubr.msk.f32.gmra.mxu1 %vm460_vm1, %v436_v26  ;;  %v9120_v26 = vrot.slane %v9079_v11, %v9092_v16 }
  0x41   : > { %695 = vmatprep.mubr.f32.mxu1 %v15994_v3  ;;  %904 = vmatprep.subr.mxu1 %v723_v30 }
  0x42   : > { %905 = vmatpush1.msra.mxu1 %v722_v32  ;;  %792 = vmatpush1.msra.mxu0 %v720_v33 }
  0x43   : > { %8466 = vmatmul.mubr.msk.f32.gmra.mxu0 %vm460_vm1, %v437_v31  ;;  %6410 = vmatprep.subr.mxu0 %v15994_v3 }
  0x44   : > { %588 = vmatprep.mubr.f32.mxu0 %v15994_v3  ;;  %8476 = vmatmul.mubr.msk.f32.gmra.mxu1 %vm460_vm1, %v437_v31 }
  0x45   : > { %701 = vmatprep.mubr.f32.mxu1 %v15994_v3  ;;  %6795 = vmatprep.subr.mxu1 %v15994_v3 }
  0x47   : > { %8467 = vmatmul.mubr.msk.f32.gmra.mxu0 %vm460_vm1, %v438_v34 }
  0x48   : > { %594 = vmatprep.mubr.f32.mxu0 %v15994_v3  ;;  %8477 = vmatmul.mubr.msk.f32.gmra.mxu1 %vm460_vm1, %v438_v34 }
  0x49   : > { %707 = vmatprep.mubr.f32.mxu1 %v15994_v3 }
  0x4b   : > { %8468 = vmatmul.mubr.msk.f32.gmra.mxu0 %vm460_vm1, %v439_v35 }
  0x4c   : > { %600 = vmatprep.mubr.f32.mxu0 %v15994_v3  ;;  %8478 = vmatmul.mubr.msk.f32.gmra.mxu1 %vm460_vm1, %v439_v35 }
  0x4d   : > { %713 = vmatprep.mubr.f32.mxu1 %v15994_v3 }
  0x4f   : > { %8469 = vmatmul.mubr.msk.f32.gmra.mxu0 %vm460_vm1, %v440_v36 }
  0x50   : > { %825 = vmatprep.mubr.f32.mxu0 %v15994_v3  ;;  %8479 = vmatmul.mubr.msk.f32.gmra.mxu1 %vm460_vm1, %v440_v36 }
  0x51   : > { %938 = vmatprep.mubr.f32.mxu1 %v15994_v3 }
  0x53   : > { %8480 = vmatmul.mubr.msk.f32.vlgmr.msra.gmra.mxu0 %vm736_vm2, %v425_v37 }
  0x54   : > { %831 = vmatprep.mubr.f32.mxu0 %v15994_v3  ;;  %8488 = vmatmul.mubr.msk.f32.vlgmr.msra.gmra.mxu1 %vm736_vm2, %v425_v37 }
  0x55   : > { %944 = vmatprep.mubr.f32.mxu1 %v15994_v3 }
  0x57   : > { %8481 = vmatmul.mubr.msk.f32.gmra.mxu0 %vm736_vm2, %v426_v38 }
  0x58   : > { %837 = vmatprep.mubr.f32.mxu0 %v15994_v3  ;;  %8489 = vmatmul.mubr.msk.f32.gmra.mxu1 %vm736_vm2, %v426_v38 }
  0x59   : > { %950 = vmatprep.mubr.f32.mxu1 %v15994_v3 }
  0x5b   : > { %8482 = vmatmul.mubr.msk.f32.gmra.mxu0 %vm736_vm2, %v427_v39 }
  0x5c   : > { %843 = vmatprep.mubr.f32.mxu0 %v15994_v3  ;;  %8490 = vmatmul.mubr.msk.f32.gmra.mxu1 %vm736_vm2, %v427_v39 }
  0x5d   : > { %956 = vmatprep.mubr.f32.mxu1 %v15994_v3 }
  0x5f   : > { %8483 = vmatmul.mubr.msk.f32.gmra.mxu0 %vm736_vm2, %v428_v40 }
  0x60   : > { %849 = vmatprep.mubr.f32.mxu0 %v15994_v3  ;;  %8491 = vmatmul.mubr.msk.f32.gmra.mxu1 %vm736_vm2, %v428_v40 }
  0x61   : > { %962 = vmatprep.mubr.f32.mxu1 %v15994_v3 }
  0x63   : > { %8484 = vmatmul.mubr.msk.f32.gmra.mxu0 %vm736_vm2, %v429_v41 }
  0x64   : > { %855 = vmatprep.mubr.f32.mxu0 %v15994_v3  ;;  %8492 = vmatmul.mubr.msk.f32.gmra.mxu1 %vm736_vm2, %v429_v41 }
  0x65   : > { %968 = vmatprep.mubr.f32.mxu1 %v15994_v3 }
  0x67   : > { %8485 = vmatmul.mubr.msk.f32.gmra.mxu0 %vm736_vm2, %v430_v42 }
  0x68   : > { %861 = vmatprep.mubr.f32.mxu0 %v15994_v3  ;;  %8493 = vmatmul.mubr.msk.f32.gmra.mxu1 %vm736_vm2, %v430_v42 }
  0x69   : > { %974 = vmatprep.mubr.f32.mxu1 %v15994_v3 }
  0x6b   : > { %8486 = vmatmul.mubr.msk.f32.gmra.mxu0 %vm736_vm2, %v431_v43 }
  0x6c   : > { %867 = vmatprep.mubr.f32.mxu0 %v15994_v3  ;;  %8494 = vmatmul.mubr.msk.f32.gmra.mxu1 %vm736_vm2, %v431_v43 }
  0x6d   : > { %980 = vmatprep.mubr.f32.mxu1 %v15994_v3 }
  0x6f   : > { %8487 = vmatmul.mubr.msk.f32.gmra.mxu0 %vm736_vm2, %v432_v44 }
  0x70   : > { %8495 = vmatmul.mubr.msk.f32.gmra.mxu1 %vm736_vm2, %v432_v44 }
  0xf3   : > { %v9036_v47 = vpop.f32.mrf.mxu0 }
  0xf4   : > { %v9040_v50 = vpop.f32.mrf.mxu1 }
  0xf5   : > { %v9038_v49 = vpop.f32.mrf.mxu0 }
  0xf6   : > { %v9042_v51 = vpop.f32.mrf.mxu1  ;;  %v1051_v54 = vcombine.low %v9036_v47, %v9038_v49  ;;  %v1052_v57 = vcombine.high %v9036_v47, %v9038_v49 }
  0xf7   : > { %v1053_v52 = vcombine.low %v9040_v50, %v9042_v51  ;;  %v9051_v55 = vpop.f32.mrf.mxu0  ;;  %v1054_v56 = vcombine.high %v9040_v50, %v9042_v51 }
  0xf8   : > { %v9058_v59 = vpop.f32.mrf.mxu1  ;;  %v1061_v60 = vrot.slane %v1051_v54, %v9047_v53  ;;  %v1068_v63 = vrot.slane %v1052_v57, %v9047_v53 }
  0xf9   : > { %v1075_v58 = vrot.slane %v1053_v52, %v9047_v53  ;;  %v1082_v61 = vrot.slane %v1054_v56, %v9047_v53  ;;  %v9062_v62 = vpop.f32.mrf.mxu0 }
  0xfa   : > { %v9065_v2 = vpop.f32.mrf.mxu1  ;;  %v1119_v9 = vcombine.low %v9051_v55, %v9062_v62  ;;  %v1120_v14 = vcombine.high %v9051_v55, %v9062_v62 }
  0xfb   : > { %v1083_v0 = vcombine.low %v1061_v60, %v1075_v58  ;;  %v1084_v1 = vcombine.high %v1061_v60, %v1075_v58  ;;  %v1085_v5 = vcombine.low %v1068_v63, %v1082_v61  ;;  %v1086_v6 = vcombine.high %v1068_v63, %v1082_v61  ;;  %v9067_v7 = vpop.f32.mrf.mxu0 }
  0xfc   : > { %v1121_v10 = vcombine.low %v9058_v59, %v9065_v2  ;;  %v1122_v15 = vcombine.high %v9058_v59, %v9065_v2  ;;  %v1129_v24 = vrot.slane %v1119_v9, %v9047_v53  ;;  %v1136_v27 = vrot.slane %v1120_v14, %v9047_v53  ;;  %v9130_v30 = vpop.f32.mrf.mxu1 }
  0xfd   : > { %v9070_v8 = vrot.slane %v1083_v0, %v9047_v53  ;;  %v9085_v13 = vrot.slane %v1084_v1, %v9047_v53  ;;  %v9095_v17 = vrot.slane %v1085_v5, %v9047_v53  ;;  %v9098_v18 = vrot.slane %v1086_v6, %v9047_v53  ;;  %v9100_v19 = vpop.f32.mrf.mxu0  ;;  %16541 = vst [vmem:[#allocation20_spill] sm:$0xff] %v9130_v30 }
  0xfe   : > { %16536 = vst [vmem:[#allocation15_spill] sm:$0xff] %v9100_v19  ;;  %v1143_v25 = vrot.slane %v1121_v10, %v9047_v53  ;;  %v1150_v28 = vrot.slane %v1122_v15, %v9047_v53  ;;  %v1187_v29 = vcombine.low %v9067_v7, %v9100_v19  ;;  %v1188_v34 = vcombine.high %v9067_v7, %v9100_v19  ;;  %v9164_v48 = vpop.f32.mrf.mxu1 }
  0xff   : > { %16530 = vst [vmem:[#allocation9_spill] sm:$0xff] %v9070_v8  ;;  %16532 = vst [vmem:[#allocation11_spill] sm:$0xff] %v9085_v13  ;;  %v9114_v23 = vcombine.high %v9070_v8, %v9070_v8  ;;  %v9124_v4 = vcombine.high %v9085_v13, %v9085_v13  ;;  %v9134_v31 = vcombine.high %v9095_v17, %v9095_v17  ;;  %v9170_v58 = vpop.f32.mrf.mxu0 }
 0x100   : > { %16534 = vst [vmem:[#allocation13_spill] sm:$0xff] %v9095_v17  ;;  %16535 = vst [vmem:[#allocation14_spill] sm:$0xff] %v9098_v18  ;;  %v9138_v32 = vcombine.high %v9098_v18, %v9098_v18  ;;  %v1151_v42 = vcombine.low %v1129_v24, %v1143_v25  ;;  %v1152_v46 = vcombine.high %v1129_v24, %v1143_v25 }
 0x101   : > { %16539 = vst [vmem:[#allocation18_spill] sm:$0xff] %v9114_v23  ;;  %16540 = vst [vmem:[#allocation19_spill] sm:$0xff] %v9124_v4  ;;  %v1153_v56 = vcombine.low %v1136_v27, %v1150_v28  ;;  %v1154_v57 = vcombine.high %v1136_v27, %v1150_v28  ;;  %v1189_v9 = vcombine.low %v9130_v30, %v9164_v48  ;;  %v9208_v1 = vpop.f32.mrf.mxu0 }
 0x102   : > { %16542 = vst [vmem:[#allocation21_spill] sm:$0xff] %v9134_v31  ;;  %16543 = vst [vmem:[#allocation22_spill] sm:$0xff] %v9164_v48  ;;  %v9185_v6 = vrot.slane %v1151_v42, %v9047_v53  ;;  %v9194_v15 = vrot.slane %v1152_v46, %v9047_v53  ;;  %v1190_v24 = vcombine.high %v9130_v30, %v9164_v48 }
 0x103   : > { %16544 = vst [vmem:[#allocation23_spill] sm:$0xff] %v9170_v58  ;;  %v9203_v28 = vrot.slane %v1153_v56, %v9047_v53  ;;  %v9206_v42 = vrot.slane %v1154_v57, %v9047_v53  ;;  %16549 = vst [vmem:[#allocation28_spill] sm:$0xff] %v9208_v1  ;;  %v1197_v10 = vrot.slane %v1187_v29, %v9047_v53  ;;  %v9234_v56 = vpop.f32.mrf.mxu1  ;;  %v9274_v35 = vpop.f32.mrf.mxu0 }
 0x104   : > { %16545 = vst [vmem:[#allocation24_spill] sm:$0xff] %v9185_v6  ;;  %16546 = vst [vmem:[#allocation25_spill] sm:$0xff] %v9194_v15  ;;  %v9222_v57 = vcombine.high %v9185_v6, %v9185_v6  ;;  %v1211_v46 = vrot.slane %v1189_v9, %v9047_v53  ;;  %v9228_v63 = vcombine.high %v9194_v15, %v9194_v15 }
 0x105   : > { %16547 = vst [vmem:[#allocation26_spill] sm:$0xff] %v9203_v28  ;;  %16548 = vst [vmem:[#allocation27_spill] sm:$0xff] %v9206_v42  ;;  %v1204_v25 = vrot.slane %v1188_v34, %v9047_v53  ;;  %v1218_v52 = vrot.slane %v1190_v24, %v9047_v53  ;;  %v1255_v43 = vcombine.low %v9170_v58, %v9208_v1  ;;  %v9268_v41 = vpop.f32.mrf.mxu1  ;;  %v9312_v9 = vpop.f32.mrf.mxu0 }
 0x106   : > { %16550 = vst [vmem:[#allocation29_spill] sm:$0xff] %v9222_v57  ;;  %16551 = vst [vmem:[#allocation30_spill] sm:$0xff] %v9228_v63  ;;  %v9238_v39 = vcombine.high %v9203_v28, %v9203_v28  ;;  %v9242_v29 = vcombine.high %v9206_v42, %v9206_v42  ;;  %v1256_v34 = vcombine.high %v9170_v58, %v9208_v1 }
 0x107   : > { %16552 = vst [vmem:[#allocation31_spill] sm:$0xff] %v9234_v56  ;;  %v1219_v45 = vcombine.low %v1197_v10, %v1211_v46  ;;  %v1220_v27 = vcombine.high %v1197_v10, %v1211_v46  ;;  %16554 = vst [vmem:[#allocation33_spill] sm:$0xff] %v9268_v41  ;;  %v1221_v61 = vcombine.low %v1204_v25, %v1218_v52 }
 0x108   : > { %16553 = vst [vmem:[#allocation32_spill] sm:$0xff] %v9238_v39  ;;  %v1222_v38 = vcombine.high %v1204_v25, %v1218_v52  ;;  %16555 = vst [vmem:[#allocation34_spill] sm:$0xff] %v9274_v35  ;;  %v1257_v24 = vcombine.low %v9234_v56, %v9268_v41  ;;  %v1258_v5 = vcombine.high %v9234_v56, %v9268_v41  ;;  %v9378_v56 = vpop.f32.mrf.mxu0 }
 0x109   : > { %v9289_v25 = vrot.slane %v1219_v45, %v9047_v53  ;;  %v9298_v3 = vrot.slane %v1220_v27, %v9047_v53  ;;  %v9307_v46 = vrot.slane %v1221_v61, %v9047_v53  ;;  %16560 = vst [vmem:[#allocation39_spill] sm:$0xff] %v9312_v9  ;;  %v1265_v60 = vrot.slane %v1255_v43, %v9047_v53  ;;  %v9338_v61 = vpop.f32.mrf.mxu1 }
 0x10a   : > { %v9310_v36 = vrot.slane %v1222_v38, %v9047_v53  ;;  %v1279_v27 = vrot.slane %v1257_v24, %v9047_v53  ;;  %v1272_v52 = vrot.slane %v1256_v34, %v9047_v53  ;;  %v1286_v14 = vrot.slane %v1258_v5, %v9047_v53  ;;  %16563 = vst [vmem:[#allocation42_spill] sm:$0xff] %v9338_v61  ;;  %v9416_v24 = vpop.f32.mrf.mxu0 }
 0x10b   : > { %16556 = vst [vmem:[#allocation35_spill] sm:$0xff] %v9289_v25  ;;  %16557 = vst [vmem:[#allocation36_spill] sm:$0xff] %v9298_v3  ;;  %v9326_v38 = vcombine.high %v9289_v25, %v9289_v25  ;;  %v9332_v10 = vcombine.high %v9298_v3, %v9298_v3  ;;  %v1323_v45 = vcombine.low %v9274_v35, %v9312_v9  ;;  %v9372_v41 = vpop.f32.mrf.mxu1 }
 0x10c   : > { %16558 = vst [vmem:[#allocation37_spill] sm:$0xff] %v9307_v46  ;;  %16559 = vst [vmem:[#allocation38_spill] sm:$0xff] %v9310_v36  ;;  %v9342_v0 = vcombine.high %v9307_v46, %v9307_v46  ;;  %v9346_v43 = vcombine.high %v9310_v36, %v9310_v36  ;;  %v1324_v34 = vcombine.high %v9274_v35, %v9312_v9 }
 0x10d   : > { %16561 = vst [vmem:[#allocation40_spill] sm:$0xff] %v9326_v38  ;;  %16562 = vst [vmem:[#allocation41_spill] sm:$0xff] %v9332_v10  ;;  %v1287_v9 = vcombine.low %v1265_v60, %v1279_v27  ;;  %v1288_v40 = vcombine.high %v1265_v60, %v1279_v27  ;;  %v1289_v33 = vcombine.low %v1272_v52, %v1286_v14 }
 0x10e   : > { %16564 = vst [vmem:[#allocation43_spill] sm:$0xff] %v9342_v0  ;;  %16565 = vst [vmem:[#allocation44_spill] sm:$0xff] %v9346_v43  ;;  %v1290_v35 = vcombine.high %v1272_v52, %v1286_v14  ;;  %v1325_v5 = vcombine.low %v9338_v61, %v9372_v41  ;;  %v1326_v37 = vcombine.high %v9338_v61, %v9372_v41  ;;  %v9482_v43 = vpop.f32.mrf.mxu0 }
 0x10f   : > { %16566 = vst [vmem:[#allocation45_spill] sm:$0xff] %v9372_v41  ;;  %16567 = vst [vmem:[#allocation46_spill] sm:$0xff] %v9378_v56  ;;  %v9393_v52 = vrot.slane %v1287_v9, %v9047_v53  ;;  %v9402_v44 = vrot.slane %v1288_v40, %v9047_v53  ;;  %v9411_v27 = vrot.slane %v1289_v33, %v9047_v53  ;;  %v9442_v33 = vpop.f32.mrf.mxu1 }
 0x110   : > { %v9414_v54 = vrot.slane %v1290_v35, %v9047_v53  ;;  %16572 = vst [vmem:[#allocation51_spill] sm:$0xff] %v9416_v24  ;;  %v1333_v41 = vrot.slane %v1323_v45, %v9047_v53  ;;  %v1347_v40 = vrot.slane %v1325_v5, %v9047_v53  ;;  %v1340_v14 = vrot.slane %v1324_v34, %v9047_v53  ;;  %v9520_v5 = vpop.f32.mrf.mxu0 }
 0x111   : > { %16568 = vst [vmem:[#allocation47_spill] sm:$0xff] %v9393_v52  ;;  %16569 = vst [vmem:[#allocation48_spill] sm:$0xff] %v9402_v44  ;;  %v9430_v35 = vcombine.high %v9393_v52, %v9393_v52  ;;  %v9436_v60 = vcombine.high %v9402_v44, %v9402_v44  ;;  %v1354_v61 = vrot.slane %v1326_v37, %v9047_v53  ;;  %v9476_v52 = vpop.f32.mrf.mxu1 }
 0x112   : > { %16570 = vst [vmem:[#allocation49_spill] sm:$0xff] %v9411_v27  ;;  %16571 = vst [vmem:[#allocation50_spill] sm:$0xff] %v9414_v54  ;;  %v1391_v9 = vcombine.low %v9378_v56, %v9416_v24  ;;  %v9446_v1 = vcombine.high %v9411_v27, %v9411_v27  ;;  %v9450_v45 = vcombine.high %v9414_v54, %v9414_v54 }
 0x113   : > { %16573 = vst [vmem:[#allocation52_spill] sm:$0xff] %v9430_v35  ;;  %16574 = vst [vmem:[#allocation53_spill] sm:$0xff] %v9436_v60  ;;  %v1392_v34 = vcombine.high %v9378_v56, %v9416_v24  ;;  %v1355_v56 = vcombine.low %v1333_v41, %v1347_v40  ;;  %v1356_v58 = vcombine.high %v1333_v41, %v1347_v40  ;;  %v9586_v35 = vpop.f32.mrf.mxu0 }
 0x114   : > { %16575 = vst [vmem:[#allocation54_spill] sm:$0xff] %v9442_v33  ;;  %16576 = vst [vmem:[#allocation55_spill] sm:$0xff] %v9446_v1  ;;  %v1357_v24 = vcombine.low %v1340_v14, %v1354_v61  ;;  %v1358_v44 = vcombine.high %v1340_v14, %v1354_v61  ;;  %v1393_v37 = vcombine.low %v9442_v33, %v9476_v52 }
 0x115   : > { %16577 = vst [vmem:[#allocation56_spill] sm:$0xff] %v9450_v45  ;;  %16578 = vst [vmem:[#allocation57_spill] sm:$0xff] %v9476_v52  ;;  %v9497_v14 = vrot.slane %v1355_v56, %v9047_v53  ;;  %v9506_v19 = vrot.slane %v1356_v58, %v9047_v53  ;;  %v1394_v30 = vcombine.high %v9442_v33, %v9476_v52 }
 0x116   : > { %16579 = vst [vmem:[#allocation58_spill] sm:$0xff] %v9482_v43  ;;  %v9515_v40 = vrot.slane %v1357_v24, %v9047_v53  ;;  %v9518_v48 = vrot.slane %v1358_v44, %v9047_v53  ;;  %16584 = vst [vmem:[#allocation63_spill] sm:$0xff] %v9520_v5  ;;  %v1401_v52 = vrot.slane %v1391_v9, %v9047_v53  ;;  %v9546_v24 = vpop.f32.mrf.mxu1 }
 0x117   : > { %16580 = vst [vmem:[#allocation59_spill] sm:$0xff] %v9497_v14  ;;  %16581 = vst [vmem:[#allocation60_spill] sm:$0xff] %v9506_v19  ;;  %v9534_v44 = vcombine.high %v9497_v14, %v9497_v14  ;;  %v1415_v58 = vrot.slane %v1393_v37, %v9047_v53  ;;  %v9540_v41 = vcombine.high %v9506_v19, %v9506_v19  ;;  %v9624_v37 = vpop.f32.mrf.mxu0 }
 0x118   : > { %16582 = vst [vmem:[#allocation61_spill] sm:$0xff] %v9515_v40  ;;  %16583 = vst [vmem:[#allocation62_spill] sm:$0xff] %v9518_v48  ;;  %v1408_v61 = vrot.slane %v1392_v34, %v9047_v53  ;;  %v1422_v33 = vrot.slane %v1394_v30, %v9047_v53  ;;  %v1459_v56 = vcombine.low %v9482_v43, %v9520_v5  ;;  %v9580_v14 = vpop.f32.mrf.mxu1 }
 0x119   : > { %16585 = vst [vmem:[#allocation64_spill] sm:$0xff] %v9534_v44  ;;  %16586 = vst [vmem:[#allocation65_spill] sm:$0xff] %v9540_v41  ;;  %v9550_v45 = vcombine.high %v9515_v40, %v9515_v40  ;;  %v9554_v9 = vcombine.high %v9518_v48, %v9518_v48  ;;  %v1460_v34 = vcombine.high %v9482_v43, %v9520_v5 }
 0x11a   : > { %16587 = vst [vmem:[#allocation66_spill] sm:$0xff] %v9546_v24  ;;  %v1423_v43 = vcombine.low %v1401_v52, %v1415_v58  ;;  %v1424_v27 = vcombine.high %v1401_v52, %v1415_v58  ;;  %16590 = vst [vmem:[#allocation69_spill] sm:$0xff] %v9580_v14  ;;  %v1425_v5 = vcombine.low %v1408_v61, %v1422_v33 }
 0x11b   : > { %16588 = vst [vmem:[#allocation67_spill] sm:$0xff] %v9550_v45  ;;  %16589 = vst [vmem:[#allocation68_spill] sm:$0xff] %v9554_v9  ;;  %v1426_v19 = vcombine.high %v1408_v61, %v1422_v33  ;;  %v1461_v30 = vcombine.low %v9546_v24, %v9580_v14  ;;  %v1462_v60 = vcombine.high %v9546_v24, %v9580_v14 }
 0x11c   : > { %16591 = vst [vmem:[#allocation70_spill] sm:$0xff] %v9586_v35  ;;  %v9601_v61 = vrot.slane %v1423_v43, %v9047_v53  ;;  %v9610_v54 = vrot.slane %v1424_v27, %v9047_v53  ;;  %v9619_v58 = vrot.slane %v1425_v5, %v9047_v53  ;;  %16596 = vst [vmem:[#allocation75_spill] sm:$0xff] %v9624_v37 }
 0x11d   : > { %v9622_v1 = vrot.slane %v1426_v19, %v9047_v53  ;;  %v1469_v14 = vrot.slane %v1459_v56, %v9047_v53  ;;  %v1483_v27 = vrot.slane %v1461_v30, %v9047_v53  ;;  %v1476_v33 = vrot.slane %v1460_v34, %v9047_v53  ;;  %v9662_v34 = vpop.f32.mrf.mxu1 }
 0x11e   : > { %16592 = vst [vmem:[#allocation71_spill] sm:$0xff] %v9601_v61  ;;  %16593 = vst [vmem:[#allocation72_spill] sm:$0xff] %v9610_v54  ;;  %v9638_v19 = vcombine.high %v9601_v61, %v9601_v61  ;;  %v9644_v52 = vcombine.high %v9610_v54, %v9610_v54  ;;  %v1490_v24 = vrot.slane %v1462_v60, %v9047_v53 }
 0x11f   : > { %16594 = vst [vmem:[#allocation73_spill] sm:$0xff] %v9619_v58  ;;  %16595 = vst [vmem:[#allocation74_spill] sm:$0xff] %v9622_v1  ;;  %v1527_v43 = vcombine.low %v9586_v35, %v9624_v37  ;;  %v9652_v5 = vcombine.high %v9619_v58, %v9619_v58  ;;  %v9656_v56 = vcombine.high %v9622_v1, %v9622_v1 }
 0x120   : > { %16597 = vst [vmem:[#allocation76_spill] sm:$0xff] %v9638_v19  ;;  %16598 = vst [vmem:[#allocation77_spill] sm:$0xff] %v9644_v52  ;;  %v1528_v9 = vcombine.high %v9586_v35, %v9624_v37  ;;  %v1491_v41 = vcombine.low %v1469_v14, %v1483_v27  ;;  %v1492_v40 = vcombine.high %v1469_v14, %v1483_v27  ;;  %v9688_v35 = vpop.f32.mrf.mxu1  ;;  %v827_v27 = vpop.f32.mrf.mxu0 }
 0x121   : > { %16599 = vst [vmem:[#allocation78_spill] sm:$0xff] %v9652_v5  ;;  %16600 = vst [vmem:[#allocation79_spill] sm:$0xff] %v9656_v56  ;;  %v1493_v54 = vcombine.low %v1476_v33, %v1490_v24  ;;  %v1494_v61 = vcombine.high %v1476_v33, %v1490_v24  ;;  %v1529_v14 = vcombine.low %v9662_v34, %v9688_v35 }
 0x122   : > { %16601 = vst [vmem:[#allocation80_spill] sm:$0xff] %v9662_v34  ;;  %16602 = vst [vmem:[#allocation81_spill] sm:$0xff] %v9688_v35  ;;  %v9705_v60 = vrot.slane %v1491_v41, %v9047_v53  ;;  %v9710_v48 = vrot.slane %v1492_v40, %v9047_v53  ;;  %v1530_v30 = vcombine.high %v9662_v34, %v9688_v35  ;;  %v829_v34 = vpop.f32.mrf.mxu0 }
 0x123   : > { %v9721_v41 = vrot.slane %v1493_v54, %v9047_v53  ;;  %v9724_v45 = vrot.slane %v1494_v61, %v9047_v53  ;;  %v1537_v33 = vrot.slane %v1527_v43, %v9047_v53  ;;  %v1544_v40 = vrot.slane %v1528_v9, %v9047_v53 }
 0x124   : > { %16603 = vst [vmem:[#allocation82_spill] sm:$0xff] %v9705_v60  ;;  %16604 = vst [vmem:[#allocation83_spill] sm:$0xff] %v9710_v48  ;;  %v9738_v61 = vcombine.high %v9705_v60, %v9705_v60  ;;  %v9744_v37 = vcombine.high %v9710_v48, %v9710_v48  ;;  %v1551_v35 = vrot.slane %v1529_v14, %v9047_v53  ;;  %v940_v60 = vpop.f32.mrf.mxu1 }
 0x125   : > { %16605 = vst [vmem:[#allocation84_spill] sm:$0xff] %v9721_v41  ;;  %16606 = vst [vmem:[#allocation85_spill] sm:$0xff] %v9724_v45  ;;  %v1558_v24 = vrot.slane %v1530_v30, %v9047_v53  ;;  %v987_v5 = vadd.f32 %v827_v27, %v9036_v47  ;;  %v9751_v54 = vcombine.high %v9721_v41, %v9721_v41 }
 0x126   : > { %16607 = vst [vmem:[#allocation86_spill] sm:$0xff] %v9738_v61  ;;  %16608 = vst [vmem:[#allocation87_spill] sm:$0xff] %v9744_v37  ;;  %v9755_v56 = vcombine.high %v9724_v45, %v9724_v45  ;;  %v9760_v43 = vadd.f32 %v829_v34, %v9038_v49  ;;  %v1559_v30 = vcombine.low %v1537_v33, %v1551_v35 }
 0x127   : > { %16609 = vst [vmem:[#allocation88_spill] sm:$0xff] %v9751_v54  ;;  %v1561_v34 = vcombine.low %v1544_v40, %v1558_v24  ;;  %v1560_v37 = vcombine.high %v1537_v33, %v1551_v35  ;;  %v1562_v61 = vcombine.high %v1544_v40, %v1558_v24  ;;  %v16612_v27 = vrot.slane %v9070_v8, %v9082_v12 }
 0x128   : > { %16610 = vst [vmem:[#allocation89_spill] sm:$0xff] %v9755_v56  ;;  %16611 = vst [vmem:[#allocation90_spill] sm:$0xff] %v9760_v43  ;;  %v16613_v33 = vrot.slane %v9085_v13, %v9082_v12  ;;  %v9815_v49 = vrot.slane %v1559_v30, %v9047_v53  ;;  %v16616_v40 = vrot.slane %v9114_v23, %v9082_v12 }
 0x129   : > { %v2875_v35 = vsub.f32 %v987_v5, %v16612_v27  ;;  %v9818_v24 = vrot.slane %v1561_v34, %v9047_v53  ;;  %v9830_v9 = vrot.slane %v1560_v37, %v9047_v53  ;;  %v9835_v34 = vrot.slane %v1562_v61, %v9047_v53 }
 0x12a   : > { %v2879_v1 = vsub.f32 %v987_v5, %v16613_v33  ;;  %16614 = vst [vmem:[#allocation91_spill] sm:$0xff] %v9815_v49  ;;  %v2883_v47 = vsub.f32 %v987_v5, %v16616_v40  ;;  %v16619_v40 = vrot.slane %v9124_v4, %v9082_v12  ;;  %v16620_v27 = vrot.slane %v9095_v17, %v9082_v12 }
 0x12b   : > { %16615 = vst [vmem:[#allocation92_spill] sm:$0xff] %v9818_v24  ;;  %16617 = vst [vmem:[#allocation93_spill] sm:$0xff] %v9830_v9  ;;  %v16621_v33 = vrot.slane %v9098_v18, %v9082_v12  ;;  %v16622_v37 = vrot.slane %v9134_v31, %v9082_v12  ;;  %v9850_v30 = vadd.f32 %v9110_v22, %v2875_v35 }
 0x12c   : > { %16618 = vst [vmem:[#allocation94_spill] sm:$0xff] %v9835_v34  ;;  %v2887_v54 = vsub.f32 %v987_v5, %v16619_v40  ;;  %v2891_v14 = vsub.f32 %v987_v5, %v16620_v27  ;;  %v9853_v61 = vadd.f32 %v9110_v22, %v2879_v1  ;;  %v9857_v40 = vcombine.high %v9815_v49, %v9815_v49 }
 0x12d   : > { %v2895_v45 = vsub.f32 %v987_v5, %v16621_v33  ;;  %v2899_v41 = vsub.f32 %v987_v5, %v16622_v37  ;;  %16623 = vst [vmem:[#allocation95_spill] sm:$0xff] %v9850_v30  ;;  %v9861_v27 = vcombine.high %v9818_v24, %v9818_v24  ;;  %v16627_v33 = vrot.slane %v9138_v32, %v9082_v12 }
 0x12e   : > { %16624 = vst [vmem:[#allocation96_spill] sm:$0xff] %v9853_v61  ;;  %16625 = vst [vmem:[#allocation97_spill] sm:$0xff] %v9857_v40  ;;  %v9869_v37 = vadd.f32 %v9110_v22, %v2883_v47  ;;  %v9873_v1 = vcombine.high %v9830_v9, %v9830_v9  ;;  %v3409_v35 = vadd.f32 %v9853_v61, %v9850_v30 }
 0x12f   : > { %16626 = vst [vmem:[#allocation98_spill] sm:$0xff] %v9861_v27  ;;  %v9866_v53 = vsub.f32 %v987_v5, %v16627_v33  ;;  %v3825_v56 = vmul.f32 %v9850_v30, %v9850_v30  ;;  %v3829_v48 = vmul.f32 %v9853_v61, %v9853_v61  ;;  %v9883_v5 = vcombine.high %v9835_v34, %v9835_v34  ;;  %v16922_v34 = vld [vmem:[#allocation45_spill] sm:$0xff] }
 0x130   : > { %16628 = vst [vmem:[#allocation99_spill] sm:$0xff] %v9869_v37  ;;  %16629 = vst [vmem:[#allocation100_spill] sm:$0xff] %v9873_v1  ;;  %v9900_v47 = vadd.f32 %v9110_v22, %v2887_v54  ;;  %v3833_v33 = vmul.f32 %v9869_v37, %v9869_v37  ;;  %v989_v58 = vadd.f32 %v940_v60, %v9040_v50 }
 0x131   : > { %16630 = vst [vmem:[#allocation101_spill] sm:$0xff] %v9883_v5  ;;  %v4081_v19 = vadd.f32 %v3829_v48, %v3825_v56  ;;  %v3410_v56 = vadd.f32 %v3409_v35, %v9869_v37  ;;  %v16632_v54 = vrot.slane %v9070_v8, %v9092_v16  ;;  %v16633_v9 = vrot.slane %v9085_v13, %v9092_v16  ;;  %v833_v48 = vpop.f32.mrf.mxu0  ;;  %v16852_v5 = vld [vmem:[#allocation67_spill] sm:$0xff] }
 0x132   : > { %16631 = vst [vmem:[#allocation102_spill] sm:$0xff] %v9900_v47  ;;  %v16634_v60 = vrot.slane %v9114_v23, %v9092_v16  ;;  %v9928_v35 = vadd.f32 %v9110_v22, %v2891_v14  ;;  %v9964_v37 = vadd.f32 %v833_v48, %v9051_v55  ;;  %v16645_v55 = vrot.slane %v9134_v31, %v9092_v16 }
 0x133   : > { %v4082_v52 = vadd.f32 %v4081_v19, %v3833_v33  ;;  %v2877_v44 = vsub.f32 %v989_v58, %v16632_v54  ;;  %v2881_v50 = vsub.f32 %v989_v58, %v16633_v9  ;;  %v3837_v33 = vmul.f32 %v9900_v47, %v9900_v47 }
 0x134   : > { %v2885_v30 = vsub.f32 %v989_v58, %v16634_v60  ;;  %16635 = vst [vmem:[#allocation103_spill] sm:$0xff] %v9928_v35  ;;  %v16636_v9 = vrot.slane %v9124_v4, %v9092_v16  ;;  %v3411_v1 = vadd.f32 %v3410_v56, %v9900_v47  ;;  %v9957_v19 = vadd.f32 %v9110_v22, %v2895_v45 }
 0x135   : > { %v9936_v60 = vadd.f32 %v9120_v26, %v2877_v44  ;;  %v9939_v61 = vadd.f32 %v9120_v26, %v2881_v50  ;;  %v4083_v44 = vadd.f32 %v4082_v52, %v3837_v33  ;;  %v16639_v50 = vrot.slane %v9095_v17, %v9092_v16 }
 0x136   : > { %v2889_v54 = vsub.f32 %v989_v58, %v16636_v9  ;;  %v9954_v49 = vadd.f32 %v9120_v26, %v2885_v30  ;;  %16641 = vst [vmem:[#allocation107_spill] sm:$0xff] %v9957_v19  ;;  %v3841_v52 = vmul.f32 %v9928_v35, %v9928_v35  ;;  %v16642_v33 = vrot.slane %v9098_v18, %v9092_v16 }
 0x137   : > { %16637 = vst [vmem:[#allocation104_spill] sm:$0xff] %v9936_v60  ;;  %16638 = vst [vmem:[#allocation105_spill] sm:$0xff] %v9939_v61  ;;  %v2893_v40 = vsub.f32 %v989_v58, %v16639_v50  ;;  %v3435_v14 = vadd.f32 %v9939_v61, %v9936_v60  ;;  %v3827_v56 = vmul.f32 %v9936_v60, %v9936_v60 }
 0x138   : > { %16640 = vst [vmem:[#allocation106_spill] sm:$0xff] %v9954_v49  ;;  %v2897_v30 = vsub.f32 %v989_v58, %v16642_v33  ;;  %v9972_v50 = vadd.f32 %v9120_v26, %v2889_v54  ;;  %v3831_v45 = vmul.f32 %v9939_v61, %v9939_v61  ;;  %v9977_v9 = vadd.f32 %v9110_v22, %v2899_v41 }
 0x139   : > { %v3412_v47 = vadd.f32 %v3411_v1, %v9928_v35  ;;  %v2901_v48 = vsub.f32 %v989_v58, %v16645_v55  ;;  %v3436_v60 = vadd.f32 %v3435_v14, %v9954_v49  ;;  %v4084_v24 = vadd.f32 %v4083_v44, %v3841_v52 }
 0x13a   : > { %16643 = vst [vmem:[#allocation108_spill] sm:$0xff] %v9972_v50  ;;  %16644 = vst [vmem:[#allocation109_spill] sm:$0xff] %v9977_v9  ;;  %v9985_v33 = vadd.f32 %v9120_v26, %v2893_v40  ;;  %v3835_v54 = vmul.f32 %v9954_v49, %v9954_v49  ;;  %v4107_v0 = vadd.f32 %v3831_v45, %v3827_v56 }
 0x13b   : > { %v3845_v41 = vmul.f32 %v9957_v19, %v9957_v19  ;;  %v3437_v61 = vadd.f32 %v3436_v60, %v9972_v50  ;;  %v16647_v1 = vrot.slane %v9185_v6, %v9082_v12  ;;  %v16648_v14 = vrot.slane %v9194_v15, %v9082_v12 }
 0x13c   : > { %16646 = vst [vmem:[#allocation110_spill] sm:$0xff] %v9985_v33  ;;  %v16649_v44 = vrot.slane %v9138_v32, %v9092_v16  ;;  %v10004_v56 = vadd.f32 %v9120_v26, %v2897_v30  ;;  %v3839_v60 = vmul.f32 %v9972_v50, %v9972_v50  ;;  %v4108_v45 = vadd.f32 %v4107_v0, %v3835_v54 }
 0x13d   : > { %v2907_v55 = vsub.f32 %v9964_v37, %v16647_v1  ;;  %v2911_v40 = vsub.f32 %v9964_v37, %v16648_v14  ;;  %v10012_v1 = vadd.f32 %v9110_v22, %v9866_v53  ;;  %v3413_v14 = vadd.f32 %v3412_v47, %v9957_v19 }
 0x13e   : > { %v2905_v52 = vsub.f32 %v989_v58, %v16649_v44  ;;  %16650 = vst [vmem:[#allocation111_spill] sm:$0xff] %v10004_v56  ;;  %v3438_v49 = vadd.f32 %v3437_v61, %v9985_v33  ;;  %v4085_v36 = vadd.f32 %v4084_v24, %v3845_v41  ;;  %v10017_v58 = vadd.f32 %v9120_v26, %v2901_v48 }
 0x13f   : > { %16651 = vst [vmem:[#allocation112_spill] sm:$0xff] %v10012_v1  ;;  %v3843_v30 = vmul.f32 %v9985_v33, %v9985_v33  ;;  %v4109_v44 = vadd.f32 %v4108_v45, %v3839_v60  ;;  %v16653_v54 = vrot.slane %v9222_v57, %v9082_v12  ;;  %v10027_v35 = vadd.f32 %v9110_v22, %v2907_v55  ;;  %v942_v45 = vpop.f32.mrf.mxu1 }
 0x140   : > { %16652 = vst [vmem:[#allocation113_spill] sm:$0xff] %v10017_v58  ;;  %v3439_v0 = vadd.f32 %v3438_v49, %v10004_v56  ;;  %v10030_v61 = vadd.f32 %v9110_v22, %v2911_v40  ;;  %v3849_v24 = vmul.f32 %v9977_v9, %v9977_v9  ;;  %v10035_v47 = vadd.f32 %v9120_v26, %v2905_v52 }
 0x141   : > { %v2915_v53 = vsub.f32 %v9964_v37, %v16653_v54  ;;  %16654 = vst [vmem:[#allocation114_spill] sm:$0xff] %v10027_v35  ;;  %v3847_v49 = vmul.f32 %v10004_v56, %v10004_v56  ;;  %v4110_v48 = vadd.f32 %v4109_v44, %v3843_v30  ;;  %v3414_v60 = vadd.f32 %v3413_v14, %v9977_v9 }
 0x142   : > { %16655 = vst [vmem:[#allocation115_spill] sm:$0xff] %v10030_v61  ;;  %16656 = vst [vmem:[#allocation116_spill] sm:$0xff] %v10035_v47  ;;  %v3440_v40 = vadd.f32 %v3439_v0, %v10017_v58  ;;  %v4086_v54 = vadd.f32 %v4085_v36, %v3849_v24  ;;  %v3851_v52 = vmul.f32 %v10017_v58, %v10017_v58 }
 0x143   : > { %v4111_v19 = vadd.f32 %v4110_v48, %v3847_v49  ;;  %v16657_v56 = vrot.slane %v9228_v63, %v9082_v12  ;;  %v10053_v41 = vadd.f32 %v9110_v22, %v2915_v53  ;;  %v3857_v14 = vmul.f32 %v10027_v35, %v10027_v35 }
 0x144   : > { %v3441_v44 = vadd.f32 %v3440_v40, %v10035_v47  ;;  %v3861_v36 = vmul.f32 %v10030_v61, %v10030_v61  ;;  %v3853_v0 = vmul.f32 %v10012_v1, %v10012_v1  ;;  %v3855_v24 = vmul.f32 %v10035_v47, %v10035_v47 }
 0x145   : > { %v2919_v30 = vsub.f32 %v9964_v37, %v16657_v56  ;;  %16658 = vst [vmem:[#allocation117_spill] sm:$0xff] %v10053_v41  ;;  %v4112_v49 = vadd.f32 %v4111_v19, %v3851_v52  ;;  %v10064_v56 = vadd.f32 %v942_v45, %v9042_v51  ;;  %v10072_v55 = vrot.slane %v9079_v11, %v9106_v21 }
 0x146   : > { %v3442_v40 = vrot.slane %v3441_v44, 4  ;;  %v3415_v58 = vadd.f32 %v3414_v60, %v10012_v1  ;;  %v4087_v9 = vadd.f32 %v4086_v54, %v3853_v0  ;;  %v16659_v19 = vrot.slane %v9203_v28, %v9082_v12 }
 0x147   : > { %v4113_v33 = vadd.f32 %v4112_v49, %v3855_v24  ;;  %v10080_v45 = vadd.f32 %v9110_v22, %v2919_v30  ;;  %v3461_v52 = vadd.f32 %v10030_v61, %v10027_v35  ;;  %v3865_v48 = vmul.f32 %v10053_v41, %v10053_v41  ;;  %v946_v61 = vpop.f32.mrf.mxu1 }
 0x148   : > { %v2923_v51 = vsub.f32 %v9964_v37, %v16659_v19  ;;  %v4133_v11 = vadd.f32 %v3861_v36, %v3857_v14  ;;  %v3443_v53 = vadd.f32 %v3442_v40, %v3441_v44  ;;  %v16661_v60 = vrot.slane %v9070_v8, %v9106_v21 }
 0x149   : > { %16660 = vst [vmem:[#allocation118_spill] sm:$0xff] %v10080_v45  ;;  %v4114_v47 = vrot.slane %v4113_v33, 4  ;;  %v16662_v0 = vrot.slane %v9085_v13, %v9106_v21  ;;  %v3416_v40 = vrot.slane %v3415_v58, 4  ;;  %v4088_v19 = vrot.slane %v4087_v9, 4  ;;  %v16851_v13 = vld [vmem:[#allocation33_spill] sm:$0xff] }
 0x14a   : > { %v2878_v54 = vsub.f32 %v10064_v56, %v16661_v60  ;;  %v4134_v14 = vadd.f32 %v4133_v11, %v3865_v48  ;;  %v16663_v60 = vrot.slane %v9206_v42, %v9082_v12  ;;  %v10107_v24 = vadd.f32 %v9110_v22, %v2923_v51 }
 0x14b   : > { %v2882_v30 = vsub.f32 %v10064_v56, %v16662_v0  ;;  %v3462_v49 = vadd.f32 %v3461_v52, %v10053_v41  ;;  %v3869_v44 = vmul.f32 %v10080_v45, %v10080_v45  ;;  %v16665_v48 = vrot.slane %v9114_v23, %v9106_v21 }
 0x14c   : > { %v2927_v0 = vsub.f32 %v9964_v37, %v16663_v60  ;;  %16664 = vst [vmem:[#allocation119_spill] sm:$0xff] %v10107_v24  ;;  %v3444_v36 = vrot.slane %v3443_v53, 2  ;;  %v4115_v35 = vadd.f32 %v4114_v47, %v4113_v33  ;;  %v10117_v1 = vadd.f32 %v10072_v55, %v2878_v54 }
 0x14d   : > { %v2886_v11 = vsub.f32 %v10064_v56, %v16665_v48  ;;  %v10120_v60 = vadd.f32 %v10072_v55, %v2882_v30  ;;  %v16668_v52 = vrot.slane %v9238_v39, %v9082_v12  ;;  %v4135_v50 = vadd.f32 %v4134_v14, %v3869_v44 }
 0x14e   : > { %16666 = vst [vmem:[#allocation120_spill] sm:$0xff] %v10117_v1  ;;  %v10129_v23 = vadd.f32 %v946_v61, %v9058_v59  ;;  %v10131_v48 = vadd.f32 %v3416_v40, %v3415_v58  ;;  %v10133_v33 = vadd.f32 %v4088_v19, %v4087_v9  ;;  %v16669_v47 = vrot.slane %v9242_v29, %v9082_v12 }
 0x14f   : > { %16667 = vst [vmem:[#allocation121_spill] sm:$0xff] %v10120_v60  ;;  %v2931_v41 = vsub.f32 %v9964_v37, %v16668_v52  ;;  %v16670_v30 = vrot.slane %v9124_v4, %v9106_v21  ;;  %v10144_v52 = vadd.f32 %v9110_v22, %v2927_v0  ;;  %v3463_v59 = vadd.f32 %v3462_v49, %v10080_v45 }
 0x150   : > { %v2935_v54 = vsub.f32 %v9964_v37, %v16669_v47  ;;  %v3873_v58 = vmul.f32 %v10107_v24, %v10107_v24  ;;  %v16672_v9 = vrot.slane %v9095_v17, %v9106_v21  ;;  %v3445_v44 = vadd.f32 %v3444_v36, %v3443_v53 }
 0x151   : > { %v2890_v51 = vsub.f32 %v10064_v56, %v16670_v30  ;;  %16671 = vst [vmem:[#allocation122_spill] sm:$0xff] %v10144_v52  ;;  %v4116_v37 = vrot.slane %v4115_v35, 2  ;;  %v10154_v14 = vadd.f32 %v10072_v55, %v2886_v11  ;;  %v3448_v40 = vadd.f32 %v10120_v60, %v10117_v1 }
 0x152   : > { %v2894_v61 = vsub.f32 %v10064_v56, %v16672_v9  ;;  %v10159_v19 = vadd.f32 %v9110_v22, %v2931_v41  ;;  %v4136_v49 = vadd.f32 %v4135_v50, %v3873_v58  ;;  %v3828_v0 = vmul.f32 %v10117_v1, %v10117_v1 }
 0x153   : > { %16673 = vst [vmem:[#allocation123_spill] sm:$0xff] %v10154_v14  ;;  %v3832_v47 = vmul.f32 %v10120_v60, %v10120_v60  ;;  %v4090_v30 = vrot.slane %v10133_v33, 2  ;;  %v16675_v53 = vrot.slane %v9098_v18, %v9106_v21  ;;  %v10171_v11 = vadd.f32 %v10072_v55, %v2890_v51 }
 0x154   : > { %16674 = vst [vmem:[#allocation124_spill] sm:$0xff] %v10159_v19  ;;  %v3449_v41 = vadd.f32 %v3448_v40, %v10154_v14  ;;  %v10175_v50 = vadd.f32 %v9110_v22, %v2935_v54  ;;  %v3464_v58 = vadd.f32 %v3463_v59, %v10107_v24  ;;  %v3877_v9 = vmul.f32 %v10144_v52, %v10144_v52 }
 0x155   : > { %v2898_v36 = vsub.f32 %v10064_v56, %v16675_v53  ;;  %16676 = vst [vmem:[#allocation125_spill] sm:$0xff] %v10171_v11  ;;  %v16678_v45 = vrot.slane %v9134_v31, %v9106_v21  ;;  %v3446_v1 = vrot.slane %v3445_v44, 1  ;;  %v4117_v53 = vadd.f32 %v4116_v37, %v4115_v35 }
 0x156   : > { %16677 = vst [vmem:[#allocation126_spill] sm:$0xff] %v10175_v50  ;;  %v10185_v51 = vadd.f32 %v10072_v55, %v2894_v61  ;;  %v3450_v40 = vadd.f32 %v3449_v41, %v10171_v11  ;;  %v3881_v54 = vmul.f32 %v10159_v19, %v10159_v19  ;;  %v4137_v18 = vadd.f32 %v4136_v49, %v3877_v9 }
 0x157   : > { %v2902_v60 = vsub.f32 %v10064_v56, %v16678_v45  ;;  %v3836_v59 = vmul.f32 %v10154_v14, %v10154_v14  ;;  %v4120_v24 = vadd.f32 %v3832_v47, %v3828_v0  ;;  %v16680_v31 = vrot.slane %v9138_v32, %v9106_v21 }
 0x158   : > { %16679 = vst [vmem:[#allocation127_spill] sm:$0xff] %v10185_v51  ;;  %v10197_v35 = vadd.f32 %v10072_v55, %v2898_v36  ;;  %v3451_v61 = vadd.f32 %v3450_v40, %v10185_v51  ;;  %v16682_v37 = vrot.slane %v9185_v6, %v9092_v16  ;;  %v3465_v49 = vadd.f32 %v3464_v58, %v10144_v52 }
 0x159   : > { %v2906_v45 = vsub.f32 %v10064_v56, %v16680_v31  ;;  %v3840_v0 = vmul.f32 %v10171_v11, %v10171_v11  ;;  %v4121_v47 = vadd.f32 %v4120_v24, %v3836_v59  ;;  %v16683_v9 = vrot.slane %v9194_v15, %v9092_v16 }
 0x15a   : > { %16681 = vst [vmem:[#allocation128_spill] sm:$0xff] %v10197_v35  ;;  %v2909_v41 = vsub.f32 %v10129_v23, %v16682_v37  ;;  %v3447_v56 = vadd.f32 %v3446_v1, %v3445_v44  ;;  %v4118_v36 = vrot.slane %v4117_v53, 1  ;;  %v10212_v40 = vadd.f32 %v10072_v55, %v2902_v60 }
 0x15b   : > { %v2913_v31 = vsub.f32 %v10129_v23, %v16683_v9  ;;  %v3452_v14 = vadd.f32 %v3451_v61, %v10197_v35  ;;  %v3885_v37 = vmul.f32 %v10175_v50, %v10175_v50  ;;  %v4138_v58 = vadd.f32 %v4137_v18, %v3881_v54 }
 0x15c   : > { %16684 = vst [vmem:[#allocation129_spill] sm:$0xff] %v10212_v40  ;;  %v3844_v52 = vmul.f32 %v10185_v51, %v10185_v51  ;;  %v4122_v24 = vadd.f32 %v4121_v47, %v3840_v0  ;;  %v10220_v59 = vadd.f32 %v10072_v55, %v2906_v45  ;;  %v16686_v1 = vrot.slane %v9222_v57, %v9092_v16  ;;  %v835_v51 = vpop.f32.mrf.mxu0 }
 0x15d   : > { %v3453_v9 = vadd.f32 %v3452_v14, %v10212_v40  ;;  %v10228_v44 = vadd.f32 %v9120_v26, %v2909_v41  ;;  %v3466_v61 = vadd.f32 %v3465_v49, %v10159_v19  ;;  %v3848_v18 = vmul.f32 %v10197_v35, %v10197_v35 }
 0x15e   : > { %16685 = vst [vmem:[#allocation130_spill] sm:$0xff] %v10220_v59  ;;  %v2917_v60 = vsub.f32 %v10129_v23, %v16686_v1  ;;  %v4123_v54 = vadd.f32 %v4122_v24, %v3844_v52  ;;  %v10234_v0 = vadd.f32 %v9120_v26, %v2913_v31  ;;  %v4119_v45 = vadd.f32 %v4118_v36, %v4117_v53 }
 0x15f   : > { %16687 = vst [vmem:[#allocation131_spill] sm:$0xff] %v10228_v44  ;;  %v10236_v47 = vmul.f32 0.015625, %v3447_v56  ;;  %v3454_v14 = vadd.f32 %v3453_v9, %v10220_v59  ;;  %v16690_v1 = vrot.slane %v9228_v63, %v9092_v16  ;;  %v4139_v11 = vadd.f32 %v4138_v58, %v3885_v37 }
 0x160   : > { %16688 = vst [vmem:[#allocation132_spill] sm:$0xff] %v10234_v0  ;;  %v3852_v49 = vmul.f32 %v10212_v40, %v10212_v40  ;;  %v4124_v19 = vadd.f32 %v4123_v54, %v3848_v18  ;;  %v16691_v52 = vrot.slane %v9203_v28, %v9092_v16  ;;  %v10250_v56 = vadd.f32 %v9120_v26, %v2917_v60  ;;  %v839_v40 = vpop.f32.mrf.mxu0 }
 0x161   : > { %16689 = vst [vmem:[#allocation133_spill] sm:$0xff] %v10236_v47  ;;  %v2921_v41 = vsub.f32 %v10129_v23, %v16690_v1  ;;  %v3455_v31 = vrot.slane %v3454_v14, 4  ;;  %v3487_v36 = vadd.f32 %v10234_v0, %v10228_v44  ;;  %v3859_v24 = vmul.f32 %v10228_v44, %v10228_v44 }
 0x162   : > { %v2925_v53 = vsub.f32 %v10129_v23, %v16691_v52  ;;  %16692 = vst [vmem:[#allocation134_spill] sm:$0xff] %v10250_v56  ;;  %v3856_v37 = vmul.f32 %v10220_v59, %v10220_v59  ;;  %v4125_v58 = vadd.f32 %v4124_v19, %v3852_v49  ;;  %v16693_v9 = vrot.slane %v9206_v42, %v9092_v16 }
 0x163   : > { %v3863_v54 = vmul.f32 %v10234_v0, %v10234_v0  ;;  %v4091_v60 = vadd.f32 %v4090_v30, %v10133_v33  ;;  %v3456_v1 = vadd.f32 %v3455_v31, %v3454_v14  ;;  %v10266_v52 = vadd.f32 %v9120_v26, %v2921_v41 }
 0x164   : > { %v2929_v18 = vsub.f32 %v10129_v23, %v16693_v9  ;;  %v3488_v44 = vadd.f32 %v3487_v36, %v10250_v56  ;;  %v4531_v35 = vmul.f32 0.015625, %v4119_v45  ;;  %v4563_v19 = vmul.f32 %v10236_v47, %v10236_v47 }
 0x165   : > { %16694 = vst [vmem:[#allocation135_spill] sm:$0xff] %v10266_v52  ;;  %v3467_v49 = vadd.f32 %v3466_v61, %v10175_v50  ;;  %v4126_v59 = vadd.f32 %v4125_v58, %v3856_v37  ;;  %v10273_v9 = vadd.f32 %v9120_v26, %v2925_v53  ;;  %v3867_v33 = vmul.f32 %v10250_v56, %v10250_v56 }
 0x166   : > { %v3489_v0 = vadd.f32 %v3488_v44, %v10266_v52  ;;  %v4159_v30 = vadd.f32 %v3863_v54, %v3859_v24  ;;  %v4140_v14 = vrot.slane %v4139_v11, 4  ;;  %v16696_v41 = vrot.slane %v9238_v39, %v9092_v16 }
 0x167   : > { %16695 = vst [vmem:[#allocation136_spill] sm:$0xff] %v10273_v9  ;;  %v10283_v31 = vadd.f32 %v9120_v26, %v2929_v18  ;;  %v10286_v61 = vadd.f32 %v839_v40, %v9067_v7  ;;  %v3457_v53 = vrot.slane %v3456_v1, 2  ;;  %v3871_v44 = vmul.f32 %v10266_v52, %v10266_v52 }
 0x168   : > { %v2933_v45 = vsub.f32 %v10129_v23, %v16696_v41  ;;  %v3490_v36 = vadd.f32 %v3489_v0, %v10273_v9  ;;  %v4160_v37 = vadd.f32 %v4159_v30, %v3867_v33  ;;  %v4127_v58 = vrot.slane %v4126_v59, 4 }
 0x169   : > { %16697 = vst [vmem:[#allocation137_spill] sm:$0xff] %v10283_v31  ;;  %v16698_v54 = vrot.slane %v9289_v25, %v9082_v12  ;;  %v16699_v7 = vrot.slane %v9298_v3, %v9082_v12  ;;  %v4092_v41 = vrot.slane %v4091_v60, 1  ;;  %v16700_v0 = vrot.slane %v9138_v32, %v9103_v20 }
 0x16a   : > { %v3491_v30 = vadd.f32 %v3490_v36, %v10283_v31  ;;  %v4161_v24 = vadd.f32 %v4160_v37, %v3871_v44  ;;  %v3418_v50 = vrot.slane %v10131_v48, 2  ;;  %v4595_v52 = vsub.f32 %v4531_v35, %v4563_v19 }
 0x16b   : > { %v2939_v18 = vsub.f32 %v10286_v61, %v16698_v54  ;;  %v2943_v40 = vsub.f32 %v10286_v61, %v16699_v7  ;;  %v10305_v33 = vsub.f32 %v9760_v43, %v16700_v0  ;;  %v3468_v56 = vrot.slane %v3467_v49, 4 }
 0x16c   : > { %v4141_v54 = vadd.f32 %v4140_v14, %v4139_v11  ;;  %v3458_v47 = vadd.f32 %v3457_v53, %v3456_v1  ;;  %v16702_v17 = vrot.slane %v9242_v29, %v9092_v16  ;;  %v10314_v4 = vadd.f32 %v9120_v26, %v2933_v45 }
 0x16d   : > { %16701 = vst [vmem:[#allocation138_spill] sm:$0xff] %v10305_v33  ;;  %v3875_v32 = vmul.f32 %v10273_v9, %v10273_v9  ;;  %v4128_v0 = vadd.f32 %v4127_v58, %v4126_v59  ;;  %v16704_v36 = vrot.slane %v9326_v38, %v9082_v12  ;;  %v10323_v11 = vadd.f32 %v9110_v22, %v2939_v18 }
 0x16e   : > { %v2937_v7 = vsub.f32 %v10129_v23, %v16702_v17  ;;  %16703 = vst [vmem:[#allocation139_spill] sm:$0xff] %v10314_v4  ;;  %v10326_v1 = vadd.f32 %v9110_v22, %v2943_v40  ;;  %v4093_v19 = vadd.f32 %v4092_v41, %v4091_v60  ;;  %v10329_v17 = vadd.f32 %v835_v51, %v9062_v62  ;;  %v948_v51 = vpop.f32.mrf.mxu1 }
 0x16f   : > { %v2947_v35 = vsub.f32 %v10286_v61, %v16704_v36  ;;  %16705 = vst [vmem:[#allocation140_spill] sm:$0xff] %v10323_v11  ;;  %v3492_v23 = vadd.f32 %v3491_v30, %v10314_v4  ;;  %v4162_v14 = vadd.f32 %v4161_v24, %v3875_v32  ;;  %v10333_v59 = vadd.f32 %v3418_v50, %v10131_v48 }
 0x170   : > { %16706 = vst [vmem:[#allocation141_spill] sm:$0xff] %v10326_v1  ;;  %16707 = vst [vmem:[#allocation142_spill] sm:$0xff] %v10329_v17  ;;  %v4627_v45 = vmax.f32 %v4595_v52, 0.0  ;;  %v3469_v53 = vadd.f32 %v3468_v56, %v3467_v49  ;;  %v16709_v44 = vrot.slane %v9332_v10, %v9082_v12  ;;  %v4142_v58 = vrot.slane %v4141_v54, 2 }
 0x171   : > { %16708 = vst [vmem:[#allocation143_spill] sm:$0xff] %v10333_v59  ;;  %v3459_v18 = vrot.slane %v3458_v47, 1  ;;  %v10340_v60 = vadd.f32 %v9120_v26, %v2937_v7  ;;  %v3879_v62 = vmul.f32 %v10283_v31, %v10283_v31  ;;  %v4129_v24 = vrot.slane %v4128_v0, 2 }
 0x172   : > { %v2951_v37 = vsub.f32 %v10286_v61, %v16709_v44  ;;  %v10345_v48 = vadd.f32 %v9110_v22, %v2947_v35  ;;  %v3889_v50 = vmul.f32 %v10323_v11, %v10323_v11  ;;  %v3893_v56 = vmul.f32 %v10326_v1, %v10326_v1 }
 0x173   : > { %16710 = vst [vmem:[#allocation144_spill] sm:$0xff] %v10340_v60  ;;  %v10351_v52 = vmul.f32 0.015625, %v4093_v19  ;;  %v3493_v49 = vadd.f32 %v3492_v23, %v10340_v60  ;;  %v4163_v40 = vadd.f32 %v4162_v14, %v3879_v62  ;;  %v16713_v41 = vrot.slane %v9307_v46, %v9082_v12  ;;  %v16717_v62 = vld [vmem:[#allocation38_spill] sm:$0xff] }
 0x174   : > { %16711 = vst [vmem:[#allocation145_spill] sm:$0xff] %v10345_v48  ;;  %v3470_v7 = vrot.slane %v3469_v53, 2  ;;  %v16714_v32 = vrot.slane %v9242_v29, %v9103_v20  ;;  %v10365_v35 = vadd.f32 %v9110_v22, %v2951_v37  ;;  %v10368_v19 = vadd.f32 %v948_v51, %v9065_v2 }
 0x175   : > { %16712 = vst [vmem:[#allocation146_spill] sm:$0xff] %v10351_v52  ;;  %v2955_v30 = vsub.f32 %v10286_v61, %v16713_v41  ;;  %v4660_v23 = vadd.f32 1e-05, %v4627_v45  ;;  %v4143_v14 = vadd.f32 %v4142_v58, %v4141_v54  ;;  %v3883_v44 = vmul.f32 %v10314_v4, %v10314_v4 }
 0x176   : > { %v10362_v36 = vsub.f32 %v10329_v17, %v16714_v32  ;;  %16716 = vst [vmem:[#allocation148_spill] sm:$0xff] %v10365_v35  ;;  %v16718_v41 = vrot.slane %v16717_v62, %v9082_v12  ;;  %v3460_v9 = vadd.f32 %v3459_v18, %v3458_v47  ;;  %v4130_v52 = vadd.f32 %v4129_v24, %v4128_v0 }
 0x177   : > { %v3897_v32 = vmul.f32 %v10345_v48, %v10345_v48  ;;  %v4185_v37 = vadd.f32 %v3893_v56, %v3889_v50  ;;  %v4164_v17 = vadd.f32 %v4163_v40, %v3883_v44  ;;  %v10379_v2 = vadd.f32 %v9110_v22, %v2955_v30  ;;  %v16723_v40 = vld [vmem:[#allocation43_spill] sm:$0xff] }
 0x178   : > { %16715 = vst [vmem:[#allocation147_spill] sm:$0xff] %v10362_v36  ;;  %v2959_v31 = vsub.f32 %v10286_v61, %v16718_v41  ;;  %v3494_v36 = vrot.slane %v3493_v49, 4  ;;  %v3513_v54 = vadd.f32 %v10326_v1, %v10323_v11  ;;  %v3901_v45 = vmul.f32 %v10365_v35, %v10365_v35  ;;  %v952_v1 = vpop.f32.mrf.mxu1 }
 0x179   : > { %16719 = vst [vmem:[#allocation149_spill] sm:$0xff] %v10379_v2  ;;  %v4186_v58 = vadd.f32 %v4185_v37, %v3897_v32  ;;  %v16720_v47 = vrot.slane %v9185_v6, %v9106_v21  ;;  %v16721_v18 = vrot.slane %v9194_v15, %v9106_v21  ;;  %v10393_v24 = vadd.f32 %v3470_v7, %v3469_v53 }
 0x17a   : > { %v4144_v50 = vrot.slane %v4143_v14, 1  ;;  %v3887_v56 = vmul.f32 %v10340_v60, %v10340_v60  ;;  %v16724_v30 = vrot.slane %v16723_v40, %v9082_v12  ;;  %v4131_v41 = vrot.slane %v4130_v52, 1 }
 0x17b   : > { %v2910_v0 = vsub.f32 %v10368_v19, %v16720_v47  ;;  %v2914_v51 = vsub.f32 %v10368_v19, %v16721_v18  ;;  %16722 = vst [vmem:[#allocation150_spill] sm:$0xff] %v10393_v24  ;;  %v10401_v32 = vmul.f32 0.015625, %v3460_v9  ;;  %v10404_v37 = vadd.f32 %v9110_v22, %v2959_v31 }
 0x17c   : > { %v2963_v44 = vsub.f32 %v10286_v61, %v16724_v30  ;;  %v4187_v47 = vadd.f32 %v4186_v58, %v3901_v45  ;;  %v3495_v18 = vadd.f32 %v3494_v36, %v3493_v49  ;;  %v4165_v53 = vadd.f32 %v4164_v17, %v3887_v56  ;;  %v16730_v17 = vld [vmem:[#allocation44_spill] sm:$0xff] }
 0x17d   : > { %16725 = vst [vmem:[#allocation151_spill] sm:$0xff] %v10401_v32  ;;  %16726 = vst [vmem:[#allocation152_spill] sm:$0xff] %v10404_v37  ;;  %v3514_v7 = vadd.f32 %v3513_v54, %v10345_v48  ;;  %v3905_v11 = vmul.f32 %v10379_v2, %v10379_v2  ;;  %8561 = vrsqrt.f32 %v4660_v23  ;;  %v16727_v60 = vrot.slane %v9222_v57, %v9106_v21  ;;  %v16732_v23 = vld [vmem:[#allocation20_spill] sm:$0xff]  ;;  %v16783_v57 = vld [vmem:[#allocation50_spill] sm:$0xff] }
 0x17e   : > { %v10414_v9 = vadd.f32 %v10072_v55, %v2910_v0  ;;  %v10417_v31 = vadd.f32 %v10072_v55, %v2914_v51  ;;  %v10419_v45 = vadd.f32 %v4144_v50, %v4143_v14  ;;  %v16731_v49 = vrot.slane %v16730_v17, %v9082_v12 }
 0x17f   : > { %v2918_v30 = vsub.f32 %v10368_v19, %v16727_v60  ;;  %v4188_v54 = vadd.f32 %v4187_v47, %v3905_v11  ;;  %v10426_v58 = vadd.f32 %v952_v1, %v16732_v23  ;;  %v4132_v56 = vadd.f32 %v4131_v41, %v4130_v52 }
 0x180   : > { %16728 = vst [vmem:[#allocation153_spill] sm:$0xff] %v10414_v9  ;;  %16729 = vst [vmem:[#allocation154_spill] sm:$0xff] %v10417_v31  ;;  %v2967_v36 = vsub.f32 %v10286_v61, %v16731_v49  ;;  %v10430_v60 = vmul.f32 %v10401_v32, %v10401_v32  ;;  %v10433_v0 = vadd.f32 %v9110_v22, %v2963_v44  ;;  %v3496_v50 = vrot.slane %v3495_v18, 2 }
 0x181   : > { %v16734_v14 = vrot.slane %v9228_v63, %v9106_v21  ;;  %v4166_v48 = vrot.slane %v4165_v53, 4  ;;  %v3515_v61 = vadd.f32 %v3514_v7, %v10365_v35  ;;  %v3909_v11 = vmul.f32 %v10404_v37, %v10404_v37 }
 0x182   : > { %16733 = vst [vmem:[#allocation44_spill] sm:$0xff] %v10433_v0  ;;  %v16735_v1 = vrot.slane %v9203_v28, %v9106_v21  ;;  %v10447_v44 = vadd.f32 %v10072_v55, %v2918_v30  ;;  %v3500_v41 = vadd.f32 %v10417_v31, %v10414_v9  ;;  %v3860_v47 = vmul.f32 %v10414_v9, %v10414_v9  ;;  %v16768_v28 = vld [vmem:[#allocation52_spill] sm:$0xff] }
 0x183   : > { %v2922_v51 = vsub.f32 %v10368_v19, %v16734_v14  ;;  %v10454_v49 = vadd.f32 %v9110_v22, %v2967_v36  ;;  %v4189_v7 = vadd.f32 %v4188_v54, %v3909_v11  ;;  %v16738_v23 = vrot.slane %v9206_v42, %v9106_v21 }
 0x184   : > { %v2926_v52 = vsub.f32 %v10368_v19, %v16735_v1  ;;  %16736 = vst [vmem:[#allocation20_spill] sm:$0xff] %v10447_v44  ;;  %v3864_v1 = vmul.f32 %v10417_v31, %v10417_v31  ;;  %v10462_v30 = vmul.f32 0.015625, %v4132_v56  ;;  %v3913_v35 = vmul.f32 %v10433_v0, %v10433_v0 }
 0x185   : > { %16737 = vst [vmem:[#allocation155_spill] sm:$0xff] %v10454_v49  ;;  %v2930_v14 = vsub.f32 %v10368_v19, %v16738_v23  ;;  %v10467_v4 = vadd.f32 %v10072_v55, %v2922_v51  ;;  %v3501_v36 = vadd.f32 %v3500_v41, %v10447_v44  ;;  %v3497_v9 = vadd.f32 %v3496_v50, %v3495_v18 }
 0x186   : > { %v4167_v54 = vadd.f32 %v4166_v48, %v4165_v53  ;;  %v3516_v11 = vadd.f32 %v3515_v61, %v10379_v2  ;;  %v16740_v23 = vrot.slane %v9238_v39, %v9106_v21  ;;  %v10476_v56 = vadd.f32 %v10072_v55, %v2926_v52 }
 0x187   : > { %16739 = vst [vmem:[#allocation156_spill] sm:$0xff] %v10467_v4  ;;  %v3502_v31 = vadd.f32 %v3501_v36, %v10467_v4  ;;  %v3868_v51 = vmul.f32 %v10447_v44, %v10447_v44  ;;  %v4172_v24 = vadd.f32 %v3864_v1, %v3860_v47  ;;  %v4190_v42 = vadd.f32 %v4189_v7, %v3913_v35 }
 0x188   : > { %v2934_v32 = vsub.f32 %v10368_v19, %v16740_v23  ;;  %16741 = vst [vmem:[#allocation157_spill] sm:$0xff] %v10476_v56  ;;  %v16742_v48 = vrot.slane %v9242_v29, %v9106_v21  ;;  %v10486_v53 = vadd.f32 %v10072_v55, %v2930_v14  ;;  %v16744_v50 = vrot.slane %v9289_v25, %v9092_v16 }
 0x189   : > { %v3503_v52 = vadd.f32 %v3502_v31, %v10476_v56  ;;  %v3872_v41 = vmul.f32 %v10467_v4, %v10467_v4  ;;  %v4173_v47 = vadd.f32 %v4172_v24, %v3868_v51  ;;  %v16745_v35 = vrot.slane %v9298_v3, %v9092_v16 }
 0x18a   : > { %v2938_v18 = vsub.f32 %v10368_v19, %v16742_v48  ;;  %16743 = vst [vmem:[#allocation158_spill] sm:$0xff] %v10486_v53  ;;  %v2941_v61 = vsub.f32 %v10426_v58, %v16744_v50  ;;  %v4168_v19 = vrot.slane %v4167_v54, 2  ;;  %v3517_v7 = vadd.f32 %v3516_v11, %v10404_v37  ;;  %v10512_v48 = vpop.eup %8561  ;;  %v10523_v37 = vpop.f32.mrf.mxu0 }
 0x18b   : > { %v2945_v29 = vsub.f32 %v10426_v58, %v16745_v35  ;;  %v3917_v14 = vmul.f32 %v10454_v49, %v10454_v49  ;;  %v10503_v1 = vadd.f32 %v10072_v55, %v2934_v32  ;;  %v3504_v31 = vadd.f32 %v3503_v52, %v10486_v53  ;;  %16748 = vst [vmem:[#allocation160_spill] sm:$0xff] %v10512_v48 }
 0x18c   : > { %v3876_v36 = vmul.f32 %v10476_v56, %v10476_v56  ;;  %v4174_v24 = vadd.f32 %v4173_v47, %v3872_v41  ;;  %v16747_v23 = vrot.slane %v9326_v38, %v9092_v16  ;;  %v3498_v11 = vrot.slane %v3497_v9, 1 }
 0x18d   : > { %16746 = vst [vmem:[#allocation159_spill] sm:$0xff] %v10503_v1  ;;  %v4191_v50 = vadd.f32 %v4190_v42, %v3917_v14  ;;  %v10515_v35 = vadd.f32 %v10072_v55, %v2938_v18  ;;  %v10518_v32 = vadd.f32 %v9120_v26, %v2941_v61  ;;  %v3505_v52 = vadd.f32 %v3504_v31, %v10503_v1 }
 0x18e   : > { %v2949_v51 = vsub.f32 %v10426_v58, %v16747_v23  ;;  %v3880_v41 = vmul.f32 %v10486_v53, %v10486_v53  ;;  %v4175_v47 = vadd.f32 %v4174_v24, %v3876_v36  ;;  %v10526_v23 = vadd.f32 %v9120_v26, %v2945_v29 }
 0x18f   : > { %16749 = vst [vmem:[#allocation161_spill] sm:$0xff] %v10515_v35  ;;  %16750 = vst [vmem:[#allocation162_spill] sm:$0xff] %v10518_v32  ;;  %v4169_v2 = vadd.f32 %v4168_v19, %v4167_v54  ;;  %v3518_v42 = vadd.f32 %v3517_v7, %v10433_v0  ;;  %v3884_v18 = vmul.f32 %v10503_v1, %v10503_v1  ;;  %v845_v0 = vpop.f32.mrf.mxu0 }
 0x190   : > { %16751 = vst [vmem:[#allocation163_spill] sm:$0xff] %v10526_v23  ;;  %v16752_v61 = vrot.slane %v9332_v10, %v9092_v16  ;;  %v3506_v31 = vadd.f32 %v3505_v52, %v10515_v35  ;;  %v4176_v53 = vadd.f32 %v4175_v47, %v3880_v41  ;;  %v16753_v36 = vrot.slane %v9307_v46, %v9092_v16 }
 0x191   : > { %v10541_v54 = vadd.f32 %v9120_v26, %v2949_v51  ;;  %v3888_v19 = vmul.f32 %v10515_v35, %v10515_v35  ;;  %v3539_v7 = vadd.f32 %v10526_v23, %v10518_v32  ;;  %v3891_v24 = vmul.f32 %v10518_v32, %v10518_v32 }
 0x192   : > { %v2953_v14 = vsub.f32 %v10426_v58, %v16752_v61  ;;  %v2957_v29 = vsub.f32 %v10426_v58, %v16753_v36  ;;  %v3895_v52 = vmul.f32 %v10526_v23, %v10526_v23  ;;  %v4192_v41 = vrot.slane %v4191_v50, 4 }
 0x193   : > { %16754 = vst [vmem:[#allocation164_spill] sm:$0xff] %v10541_v54  ;;  %v3507_v47 = vrot.slane %v3506_v31, 4  ;;  %v4177_v61 = vadd.f32 %v4176_v53, %v3884_v18  ;;  %v16755_v36 = vrot.slane %v16717_v62, %v9092_v16  ;;  %v4596_v35 = vsub.f32 %v10462_v30, %v10430_v60  ;;  %v16759_v30 = vld [vmem:[#allocation23_spill] sm:$0xff] }
 0x194   : > { %v3499_v1 = vadd.f32 %v3498_v11, %v3497_v9  ;;  %v10558_v56 = vadd.f32 %v9120_v26, %v2953_v14  ;;  %v3540_v32 = vadd.f32 %v3539_v7, %v10541_v54  ;;  %v16757_v23 = vrot.slane %v16723_v40, %v9092_v16 }
 0x195   : > { %v2961_v51 = vsub.f32 %v10426_v58, %v16755_v36  ;;  %v4178_v4 = vadd.f32 %v4177_v61, %v3888_v19  ;;  %v10566_v18 = vadd.f32 %v9120_v26, %v2957_v29  ;;  %v3899_v36 = vmul.f32 %v10541_v54, %v10541_v54 }
 0x196   : > { %16756 = vst [vmem:[#allocation165_spill] sm:$0xff] %v10558_v56  ;;  %v2965_v53 = vsub.f32 %v10426_v58, %v16757_v23  ;;  %v3508_v44 = vadd.f32 %v3507_v47, %v3506_v31  ;;  %v3541_v9 = vadd.f32 %v3540_v32, %v10558_v56  ;;  %v4211_v60 = vadd.f32 %v3895_v52, %v3891_v24 }
 0x197   : > { %16758 = vst [vmem:[#allocation166_spill] sm:$0xff] %v10566_v18  ;;  %v10572_v11 = vadd.f32 %v845_v0, %v16759_v30  ;;  %v4170_v14 = vrot.slane %v4169_v2, 1  ;;  %v3519_v19 = vadd.f32 %v3518_v42, %v10454_v49  ;;  %v4193_v7 = vadd.f32 %v4192_v41, %v4191_v50  ;;  %v16763_v42 = vld [vmem:[#allocation47_spill] sm:$0xff]  ;;  %v16765_v41 = vld [vmem:[#allocation48_spill] sm:$0xff] }
 0x198   : > { %v10576_v61 = vadd.f32 %v9120_v26, %v2961_v51  ;;  %v4179_v23 = vrot.slane %v4178_v4, 4  ;;  %v3542_v29 = vadd.f32 %v3541_v9, %v10566_v18  ;;  %v3903_v54 = vmul.f32 %v10558_v56, %v10558_v56 }
 0x199   : > { %v4212_v31 = vadd.f32 %v4211_v60, %v3899_v36  ;;  %v16761_v32 = vrot.slane %v16730_v17, %v9092_v16  ;;  %v10586_v24 = vadd.f32 %v9120_v26, %v2965_v53  ;;  %v16764_v50 = vrot.slane %v16763_v42, %v9082_v12 }
 0x19a   : > { %16760 = vst [vmem:[#allocation23_spill] sm:$0xff] %v10576_v61  ;;  %v16766_v47 = vrot.slane %v16765_v41, %v9082_v12  ;;  %v3509_v9 = vrot.slane %v3508_v44, 2  ;;  %v3543_v36 = vadd.f32 %v3542_v29, %v10576_v61  ;;  %v3907_v60 = vmul.f32 %v10566_v18, %v10566_v18 }
 0x19b   : > { %v2969_v0 = vsub.f32 %v10426_v58, %v16761_v32  ;;  %16762 = vst [vmem:[#allocation167_spill] sm:$0xff] %v10586_v24  ;;  %v2971_v52 = vsub.f32 %v10572_v11, %v16764_v50  ;;  %v4213_v58 = vadd.f32 %v4212_v31, %v3903_v54  ;;  %v4628_v30 = vmax.f32 %v4596_v35, 0.0 }
 0x19c   : > { %v2975_v51 = vsub.f32 %v10572_v11, %v16766_v47  ;;  %v4171_v53 = vadd.f32 %v4170_v14, %v4169_v2  ;;  %v10599_v32 = vmul.f32 0.015625, %v3499_v1  ;;  %v3520_v49 = vrot.slane %v3519_v19, 4 }
 0x19d   : > { %v4180_v56 = vadd.f32 %v4179_v23, %v4178_v4  ;;  %v3544_v50 = vadd.f32 %v3543_v36, %v10586_v24  ;;  %v3911_v48 = vmul.f32 %v10576_v61, %v10576_v61  ;;  %v4214_v39 = vadd.f32 %v4213_v58, %v3907_v60  ;;  %v16782_v61 = vld [vmem:[#allocation22_spill] sm:$0xff] }
 0x19e   : > { %16767 = vst [vmem:[#allocation168_spill] sm:$0xff] %v10599_v32  ;;  %v4194_v47 = vrot.slane %v4193_v7, 2  ;;  %v16769_v29 = vrot.slane %v16768_v28, %v9082_v12  ;;  %v10609_v54 = vadd.f32 %v9110_v22, %v2971_v52  ;;  %v10612_v2 = vadd.f32 %v9110_v22, %v2975_v51  ;;  %v16774_v52 = vld [vmem:[#allocation53_spill] sm:$0xff] }
 0x19f   : > { %v10615_v4 = vmul.f32 0.015625, %v10419_v45  ;;  %v3510_v1 = vadd.f32 %v3509_v9, %v3508_v44  ;;  %v10618_v35 = vadd.f32 %v9120_v26, %v2969_v0  ;;  %v4215_v14 = vadd.f32 %v4214_v39, %v3911_v48  ;;  %v954_v39 = vpop.f32.mrf.mxu1 }
 0x1a0   : > { %v2979_v63 = vsub.f32 %v10572_v11, %v16769_v29  ;;  %16770 = vst [vmem:[#allocation169_spill] sm:$0xff] %v10609_v54  ;;  %16771 = vst [vmem:[#allocation170_spill] sm:$0xff] %v10612_v2  ;;  %v4661_v23 = vadd.f32 1e-05, %v4628_v30  ;;  %v10620_v31 = vmul.f32 0.015625, %v4171_v53  ;;  %v10624_v36 = vmul.f32 %v10599_v32, %v10599_v32 }
 0x1a1   : > { %16772 = vst [vmem:[#allocation171_spill] sm:$0xff] %v10615_v4  ;;  %16773 = vst [vmem:[#allocation172_spill] sm:$0xff] %v10618_v35  ;;  %v16775_v60 = vrot.slane %v16774_v52, %v9082_v12  ;;  %v3521_v58 = vadd.f32 %v3520_v49, %v3519_v19  ;;  %v4181_v45 = vrot.slane %v4180_v56, 2  ;;  %v3545_v44 = vadd.f32 %v3544_v50, %v10618_v35  ;;  %v16779_v50 = vld [vmem:[#allocation49_spill] sm:$0xff] }
 0x1a2   : > { %v3915_v0 = vmul.f32 %v10586_v24, %v10586_v24  ;;  %v4195_v48 = vadd.f32 %v4194_v47, %v4193_v7  ;;  %v10634_v9 = vadd.f32 %v9110_v22, %v2979_v63  ;;  %v3921_v30 = vmul.f32 %v10609_v54, %v10609_v54 }
 0x1a3   : > { %v2983_v51 = vsub.f32 %v10572_v11, %v16775_v60  ;;  %v3925_v53 = vmul.f32 %v10612_v2, %v10612_v2  ;;  %v3511_v29 = vrot.slane %v3510_v1, 1  ;;  %v16777_v60 = vld [vmem:[#allocation15_spill] sm:$0xff]  ;;  %v16780_v24 = vrot.slane %v16779_v50, %v9082_v12 }
 0x1a4   : > { %16776 = vst [vmem:[#allocation173_spill] sm:$0xff] %v10634_v9  ;;  %v10642_v49 = vadd.f32 %v10523_v37, %v16777_v60  ;;  %v4216_v19 = vadd.f32 %v4215_v14, %v3915_v0  ;;  %8563 = vrsqrt.f32 %v4661_v23  ;;  %v10654_v18 = vadd.f32 %v954_v39, %v16782_v61 }
 0x1a5   : > { %v2987_v7 = vsub.f32 %v10572_v11, %v16780_v24  ;;  %v10651_v47 = vadd.f32 %v9110_v22, %v2983_v51  ;;  %v4182_v32 = vadd.f32 %v4181_v45, %v4180_v56  ;;  %v3546_v4 = vrot.slane %v3545_v44, 4 }
 0x1a6   : > { %16778 = vst [vmem:[#allocation15_spill] sm:$0xff] %v10642_v49  ;;  %v3919_v37 = vmul.f32 %v10618_v35, %v10618_v35  ;;  %v3565_v14 = vadd.f32 %v10612_v2, %v10609_v54  ;;  %v3522_v0 = vrot.slane %v3521_v58, 2  ;;  %v4196_v24 = vrot.slane %v4195_v48, 1 }
 0x1a7   : > { %16781 = vst [vmem:[#allocation174_spill] sm:$0xff] %v10651_v47  ;;  %v3929_v23 = vmul.f32 %v10634_v9, %v10634_v9  ;;  %v4237_v60 = vadd.f32 %v3925_v53, %v3921_v30  ;;  %v3512_v63 = vadd.f32 %v3511_v29, %v3510_v1  ;;  %v16784_v61 = vrot.slane %v16783_v57, %v9082_v12 }
 0x1a8   : > { %v4217_v51 = vadd.f32 %v4216_v19, %v3919_v37  ;;  %v10667_v45 = vadd.f32 %v9110_v22, %v2987_v7  ;;  %v3933_v39 = vmul.f32 %v10651_v47, %v10651_v47  ;;  %v16786_v54 = vrot.slane %v9289_v25, %v9106_v21 }
 0x1a9   : > { %v2991_v56 = vsub.f32 %v10572_v11, %v16784_v61  ;;  %v4238_v2 = vadd.f32 %v4237_v60, %v3929_v23  ;;  %v16787_v1 = vrot.slane %v9298_v3, %v9106_v21  ;;  %v4183_v53 = vrot.slane %v4182_v32, 1  ;;  %v16791_v60 = vld [vmem:[#allocation55_spill] sm:$0xff]  ;;  %v16793_v3 = vld [vmem:[#allocation56_spill] sm:$0xff] }
 0x1aa   : > { %16785 = vst [vmem:[#allocation22_spill] sm:$0xff] %v10667_v45  ;;  %v2942_v35 = vsub.f32 %v10654_v18, %v16786_v54  ;;  %v16788_v29 = vrot.slane %v16730_v17, %v9103_v20  ;;  %v3547_v7 = vadd.f32 %v3546_v4, %v3545_v44  ;;  %v3566_v37 = vadd.f32 %v3565_v14, %v10634_v9  ;;  %v847_v44 = vpop.f32.mrf.mxu0 }
 0x1ab   : > { %v2946_v30 = vsub.f32 %v10654_v18, %v16787_v1  ;;  %v10686_v23 = vadd.f32 %v3522_v0, %v3521_v58  ;;  %v16792_v54 = vrot.slane %v16791_v60, %v9082_v12  ;;  %v16794_v1 = vrot.slane %v16793_v3, %v9082_v12 }
 0x1ac   : > { %v10683_v19 = vsub.f32 %v10642_v49, %v16788_v29  ;;  %v4239_v15 = vadd.f32 %v4238_v2, %v3933_v39  ;;  %v10696_v33 = vmul.f32 0.015625, %v3512_v63  ;;  %v4218_v29 = vrot.slane %v4217_v51, 4 }
 0x1ad   : > { %16790 = vst [vmem:[#allocation176_spill] sm:$0xff] %v10686_v23  ;;  %v2995_v61 = vsub.f32 %v10572_v11, %v16792_v54  ;;  %v2999_v25 = vsub.f32 %v10572_v11, %v16794_v1  ;;  %v10699_v4 = vadd.f32 %v9110_v22, %v2991_v56  ;;  %v3937_v58 = vmul.f32 %v10667_v45, %v10667_v45 }
 0x1ae   : > { %16789 = vst [vmem:[#allocation175_spill] sm:$0xff] %v10683_v19  ;;  %16795 = vst [vmem:[#allocation56_spill] sm:$0xff] %v10696_v33  ;;  %v10703_v14 = vadd.f32 %v4196_v24, %v4195_v48  ;;  %v16797_v0 = vrot.slane %v9326_v38, %v9106_v21  ;;  %v10710_v11 = vadd.f32 %v10072_v55, %v2942_v35  ;;  %v3548_v56 = vrot.slane %v3547_v7, 2  ;;  %v958_v19 = vpop.f32.mrf.mxu1 }
 0x1af   : > { %16796 = vst [vmem:[#allocation177_spill] sm:$0xff] %v10699_v4  ;;  %v10713_v2 = vadd.f32 %v10072_v55, %v2946_v30  ;;  %v4184_v63 = vadd.f32 %v4183_v53, %v4182_v32  ;;  %v3567_v39 = vadd.f32 %v3566_v37, %v10651_v47  ;;  %v4240_v1 = vadd.f32 %v4239_v15, %v3937_v58 }
 0x1b0   : > { %v2950_v54 = vsub.f32 %v10654_v18, %v16797_v0  ;;  %16798 = vst [vmem:[#allocation178_spill] sm:$0xff] %v10710_v11  ;;  %v10717_v9 = vadd.f32 %v9110_v22, %v2995_v61  ;;  %v10720_v48 = vadd.f32 %v9110_v22, %v2999_v25  ;;  %v16802_v24 = vrot.slane %v9332_v10, %v9106_v21  ;;  %v16803_v0 = vld [vmem:[#allocation28_spill] sm:$0xff] }
 0x1b1   : > { %16799 = vst [vmem:[#allocation179_spill] sm:$0xff] %v10713_v2  ;;  %v10727_v23 = vadd.f32 %v847_v44, %v16803_v0  ;;  %v10731_v32 = vmul.f32 %v10696_v33, %v10696_v33  ;;  %v4219_v30 = vadd.f32 %v4218_v29, %v4217_v51  ;;  %v3941_v15 = vmul.f32 %v10699_v4, %v10699_v4  ;;  %v10748_v29 = vpop.eup %8563 }
 0x1b2   : > { %16800 = vst [vmem:[#allocation180_spill] sm:$0xff] %v10717_v9  ;;  %16801 = vst [vmem:[#allocation181_spill] sm:$0xff] %v10720_v48  ;;  %v2954_v35 = vsub.f32 %v10654_v18, %v16802_v24  ;;  %v16805_v25 = vrot.slane %v9307_v46, %v9106_v21  ;;  %v10740_v37 = vadd.f32 %v10072_v55, %v2950_v54  ;;  %v10750_v44 = vmul.f32 0.015625, %v4184_v63  ;;  %v16813_v46 = vld [vmem:[#allocation31_spill] sm:$0xff] }
 0x1b3   : > { %16804 = vst [vmem:[#allocation28_spill] sm:$0xff] %v10727_v23  ;;  %v3552_v61 = vadd.f32 %v10713_v2, %v10710_v11  ;;  %v3892_v58 = vmul.f32 %v10710_v11, %v10710_v11  ;;  %v3896_v51 = vmul.f32 %v10713_v2, %v10713_v2  ;;  %16807 = vst [vmem:[#allocation183_spill] sm:$0xff] %v10748_v29  ;;  %v4220_v63 = vrot.slane %v4219_v30, 2 }
 0x1b4   : > { %v2958_v53 = vsub.f32 %v10654_v18, %v16805_v25  ;;  %16806 = vst [vmem:[#allocation182_spill] sm:$0xff] %v10740_v37  ;;  %v3549_v24 = vadd.f32 %v3548_v56, %v3547_v7  ;;  %v3568_v0 = vadd.f32 %v3567_v39, %v10667_v45  ;;  %v4241_v25 = vadd.f32 %v4240_v1, %v3941_v15 }
 0x1b5   : > { %v3945_v54 = vmul.f32 %v10717_v9, %v10717_v9  ;;  %v16808_v47 = vrot.slane %v16717_v62, %v9106_v21  ;;  %v10760_v11 = vadd.f32 %v10072_v55, %v2954_v35  ;;  %v3553_v2 = vadd.f32 %v3552_v61, %v10740_v37 }
 0x1b6   : > { %v3949_v7 = vmul.f32 %v10720_v48, %v10720_v48  ;;  %v16810_v56 = vrot.slane %v16723_v40, %v9106_v21  ;;  %v16811_v1 = vrot.slane %v16730_v17, %v9106_v21  ;;  %v10774_v35 = vadd.f32 %v10072_v55, %v2958_v53 }
 0x1b7   : > { %v2962_v33 = vsub.f32 %v10654_v18, %v16808_v47  ;;  %16809 = vst [vmem:[#allocation184_spill] sm:$0xff] %v10760_v11  ;;  %v3554_v15 = vadd.f32 %v3553_v2, %v10760_v11  ;;  %v3900_v61 = vmul.f32 %v10740_v37, %v10740_v37  ;;  %v4224_v45 = vadd.f32 %v3896_v51, %v3892_v58 }
 0x1b8   : > { %v2966_v39 = vsub.f32 %v10654_v18, %v16810_v56  ;;  %v2970_v47 = vsub.f32 %v10654_v18, %v16811_v1  ;;  %16812 = vst [vmem:[#allocation185_spill] sm:$0xff] %v10774_v35  ;;  %v3550_v29 = vrot.slane %v3549_v24, 1  ;;  %v3569_v62 = vadd.f32 %v3568_v0, %v10699_v4  ;;  %v16825_v4 = vld [vmem:[#allocation34_spill] sm:$0xff] }
 0x1b9   : > { %v4242_v40 = vadd.f32 %v4241_v25, %v3945_v54  ;;  %v1001_v56 = vadd.f32 %v958_v19, %v16813_v46  ;;  %v10782_v10 = vadd.f32 %v10072_v55, %v2962_v33  ;;  %v3555_v17 = vadd.f32 %v3554_v15, %v10774_v35 }
 0x1ba   : > { %v3904_v18 = vmul.f32 %v10760_v11, %v10760_v11  ;;  %v4225_v53 = vadd.f32 %v4224_v45, %v3900_v61  ;;  %v4221_v2 = vadd.f32 %v4220_v63, %v4219_v30  ;;  %v10788_v1 = vadd.f32 %v10072_v55, %v2966_v39 }
 0x1bb   : > { %16814 = vst [vmem:[#allocation31_spill] sm:$0xff] %v10782_v10  ;;  %v16816_v58 = vrot.slane %v16763_v42, %v9092_v16  ;;  %v16817_v46 = vrot.slane %v16765_v41, %v9092_v16  ;;  %v10797_v33 = vadd.f32 %v10072_v55, %v2970_v47  ;;  %v3556_v0 = vadd.f32 %v3555_v17, %v10782_v10 }
 0x1bc   : > { %16815 = vst [vmem:[#allocation186_spill] sm:$0xff] %v10788_v1  ;;  %v3908_v45 = vmul.f32 %v10774_v35, %v10774_v35  ;;  %v4226_v30 = vadd.f32 %v4225_v53, %v3904_v18  ;;  %v3551_v54 = vadd.f32 %v3550_v29, %v3549_v24  ;;  %v4243_v63 = vadd.f32 %v4242_v40, %v3949_v7  ;;  %v851_v24 = vpop.f32.mrf.mxu0 }
 0x1bd   : > { %v2973_v51 = vsub.f32 %v1001_v56, %v16816_v58  ;;  %v2977_v19 = vsub.f32 %v1001_v56, %v16817_v46  ;;  %16818 = vst [vmem:[#allocation187_spill] sm:$0xff] %v10797_v33  ;;  %v16819_v39 = vrot.slane %v16768_v28, %v9092_v16  ;;  %v3570_v61 = vadd.f32 %v3569_v62, %v10717_v9 }
 0x1be   : > { %v3557_v47 = vadd.f32 %v3556_v0, %v10788_v1  ;;  %v3912_v17 = vmul.f32 %v10782_v10, %v10782_v10  ;;  %v4227_v58 = vadd.f32 %v4226_v30, %v3908_v45  ;;  %v4222_v46 = vrot.slane %v4221_v2, 1 }
 0x1bf   : > { %v2981_v15 = vsub.f32 %v1001_v56, %v16819_v39  ;;  %v16820_v18 = vrot.slane %v16774_v52, %v9092_v16  ;;  %v10815_v29 = vadd.f32 %v9120_v26, %v2973_v51  ;;  %v10818_v40 = vadd.f32 %v9120_v26, %v2977_v19 }
 0x1c0   : > { %v3558_v62 = vadd.f32 %v3557_v47, %v10797_v33  ;;  %v3916_v7 = vmul.f32 %v10788_v1, %v10788_v1  ;;  %v3920_v0 = vmul.f32 %v10797_v33, %v10797_v33  ;;  %v4228_v45 = vadd.f32 %v4227_v58, %v3912_v17 }
 0x1c1   : > { %v2985_v53 = vsub.f32 %v1001_v56, %v16820_v18  ;;  %16821 = vst [vmem:[#allocation188_spill] sm:$0xff] %v10815_v29  ;;  %16822 = vst [vmem:[#allocation189_spill] sm:$0xff] %v10818_v40  ;;  %v4244_v30 = vrot.slane %v4243_v63, 4  ;;  %v16823_v39 = vrot.slane %v16779_v50, %v9092_v16  ;;  %v10829_v51 = vadd.f32 %v9120_v26, %v2981_v15 }
 0x1c2   : > { %v3591_v19 = vadd.f32 %v10818_v40, %v10815_v29  ;;  %v3559_v25 = vrot.slane %v3558_v62, 4  ;;  %v4229_v47 = vadd.f32 %v4228_v45, %v3916_v7  ;;  %v3923_v9 = vmul.f32 %v10815_v29, %v10815_v29 }
 0x1c3   : > { %v2989_v18 = vsub.f32 %v1001_v56, %v16823_v39  ;;  %16824 = vst [vmem:[#allocation190_spill] sm:$0xff] %v10829_v51  ;;  %v10836_v1 = vadd.f32 %v851_v24, %v16825_v4  ;;  %v16826_v17 = vrot.slane %v16783_v57, %v9092_v16  ;;  %v10842_v39 = vadd.f32 %v9120_v26, %v2985_v53 }
 0x1c4   : > { %v3592_v15 = vadd.f32 %v3591_v19, %v10829_v51  ;;  %v3927_v33 = vmul.f32 %v10818_v40, %v10818_v40  ;;  %v10847_v10 = vmul.f32 0.015625, %v3551_v54  ;;  %v3571_v7 = vadd.f32 %v3570_v61, %v10720_v48  ;;  %v16839_v48 = vld [vmem:[#allocation64_spill] sm:$0xff] }
 0x1c5   : > { %v2993_v58 = vsub.f32 %v1001_v56, %v16826_v17  ;;  %16827 = vst [vmem:[#allocation34_spill] sm:$0xff] %v10842_v39  ;;  %v4230_v45 = vadd.f32 %v4229_v47, %v3920_v0  ;;  %v16829_v4 = vrot.slane %v16791_v60, %v9092_v16  ;;  %v3560_v29 = vadd.f32 %v3559_v25, %v3558_v62  ;;  %v16832_v0 = vld [vmem:[#allocation59_spill] sm:$0xff] }
 0x1c6   : > { %16828 = vst [vmem:[#allocation191_spill] sm:$0xff] %v10847_v10  ;;  %v16830_v17 = vrot.slane %v16793_v3, %v9092_v16  ;;  %v10857_v35 = vadd.f32 %v9120_v26, %v2989_v18  ;;  %v3593_v19 = vadd.f32 %v3592_v15, %v10842_v39  ;;  %v10860_v40 = vadd.f32 %v4222_v46, %v4221_v2  ;;  %v16835_v18 = vld [vmem:[#allocation60_spill] sm:$0xff] }
 0x1c7   : > { %v2997_v24 = vsub.f32 %v1001_v56, %v16829_v4  ;;  %v3931_v54 = vmul.f32 %v10829_v51, %v10829_v51  ;;  %v4263_v61 = vadd.f32 %v3927_v33, %v3923_v9  ;;  %v16833_v47 = vrot.slane %v16832_v0, %v9082_v12 }
 0x1c8   : > { %v3001_v53 = vsub.f32 %v1001_v56, %v16830_v17  ;;  %16831 = vst [vmem:[#allocation192_spill] sm:$0xff] %v10857_v35  ;;  %v4245_v62 = vadd.f32 %v4244_v30, %v4243_v63  ;;  %v10869_v4 = vadd.f32 %v9120_v26, %v2993_v58  ;;  %v3594_v56 = vadd.f32 %v3593_v19, %v10857_v35 }
 0x1c9   : > { %v3003_v25 = vsub.f32 %v10836_v1, %v16833_v47  ;;  %v16836_v15 = vrot.slane %v16835_v18, %v9082_v12  ;;  %v10878_v46 = vmul.f32 %v10847_v10, %v10847_v10  ;;  %v4231_v9 = vrot.slane %v4230_v45, 4 }
 0x1ca   : > { %16834 = vst [vmem:[#allocation193_spill] sm:$0xff] %v10869_v4  ;;  %v3935_v33 = vmul.f32 %v10842_v39, %v10842_v39  ;;  %v4264_v17 = vadd.f32 %v4263_v61, %v3931_v54  ;;  %v3561_v63 = vrot.slane %v3560_v29, 2  ;;  %v10883_v30 = vadd.f32 %v9120_v26, %v2997_v24 }
 0x1cb   : > { %v3007_v2 = vsub.f32 %v10836_v1, %v16836_v15  ;;  %v10886_v58 = vadd.f32 %v9120_v26, %v3001_v53  ;;  %v3595_v19 = vadd.f32 %v3594_v56, %v10869_v4  ;;  %v3939_v47 = vmul.f32 %v10857_v35, %v10857_v35 }
 0x1cc   : > { %16837 = vst [vmem:[#allocation194_spill] sm:$0xff] %v10883_v30  ;;  %v4265_v15 = vadd.f32 %v4264_v17, %v3935_v33  ;;  %v16840_v51 = vrot.slane %v16839_v48, %v9082_v12  ;;  %v10896_v54 = vadd.f32 %v9110_v22, %v3003_v25  ;;  %v3572_v61 = vrot.slane %v3571_v7, 4  ;;  %v16843_v17 = vld [vmem:[#allocation65_spill] sm:$0xff] }
 0x1cd   : > { %16838 = vst [vmem:[#allocation195_spill] sm:$0xff] %v10886_v58  ;;  %v4246_v24 = vrot.slane %v4245_v62, 2  ;;  %v3596_v39 = vadd.f32 %v3595_v19, %v10883_v30  ;;  %v10900_v53 = vadd.f32 %v9110_v22, %v3007_v2  ;;  %v4232_v56 = vadd.f32 %v4231_v9, %v4230_v45  ;;  %v16845_v45 = vld [vmem:[#allocation61_spill] sm:$0xff] }
 0x1ce   : > { %v3011_v11 = vsub.f32 %v10836_v1, %v16840_v51  ;;  %16841 = vst [vmem:[#allocation196_spill] sm:$0xff] %v10896_v54  ;;  %v3943_v35 = vmul.f32 %v10869_v4, %v10869_v4  ;;  %v4266_v33 = vadd.f32 %v4265_v15, %v3939_v47  ;;  %v16844_v37 = vrot.slane %v16843_v17, %v9082_v12 }
 0x1cf   : > { %16842 = vst [vmem:[#allocation197_spill] sm:$0xff] %v10900_v53  ;;  %v3562_v10 = vadd.f32 %v3561_v63, %v3560_v29  ;;  %v3597_v25 = vadd.f32 %v3596_v39, %v10886_v58  ;;  %v3947_v38 = vmul.f32 %v10883_v30, %v10883_v30  ;;  %v3951_v2 = vmul.f32 %v10886_v58, %v10886_v58  ;;  %v960_v29 = vpop.f32.mrf.mxu1  ;;  %v16848_v63 = vld [vmem:[#allocation62_spill] sm:$0xff] }
 0x1d0   : > { %v3015_v51 = vsub.f32 %v10836_v1, %v16844_v37  ;;  %v4267_v19 = vadd.f32 %v4266_v33, %v3943_v35  ;;  %v16846_v9 = vrot.slane %v16845_v45, %v9082_v12  ;;  %v10918_v15 = vadd.f32 %v9110_v22, %v3011_v11 }
 0x1d1   : > { %v3617_v37 = vadd.f32 %v10900_v53, %v10896_v54  ;;  %v3598_v39 = vrot.slane %v3597_v25, 4  ;;  %v16849_v30 = vrot.slane %v16848_v63, %v9082_v12  ;;  %v3953_v35 = vmul.f32 %v10896_v54, %v10896_v54 }
 0x1d2   : > { %v3019_v47 = vsub.f32 %v10836_v1, %v16846_v9  ;;  %16847 = vst [vmem:[#allocation198_spill] sm:$0xff] %v10918_v15  ;;  %v3957_v33 = vmul.f32 %v10900_v53, %v10900_v53  ;;  %v4233_v9 = vrot.slane %v4232_v56, 2  ;;  %v4268_v58 = vadd.f32 %v4267_v19, %v3947_v38 }
 0x1d3   : > { %v3023_v4 = vsub.f32 %v10836_v1, %v16849_v30  ;;  %v10931_v11 = vadd.f32 %v9110_v22, %v3015_v51  ;;  %v3618_v49 = vadd.f32 %v3617_v37, %v10918_v15  ;;  %v3573_v6 = vadd.f32 %v3572_v61, %v3571_v7 }
 0x1d4   : > { %v4247_v59 = vadd.f32 %v4246_v24, %v4245_v62  ;;  %v3599_v43 = vadd.f32 %v3598_v39, %v3597_v25  ;;  %v10935_v8 = vadd.f32 %v960_v29, %v16851_v13  ;;  %v4269_v30 = vadd.f32 %v4268_v58, %v3951_v2 }
 0x1d5   : > { %16850 = vst [vmem:[#allocation199_spill] sm:$0xff] %v10931_v11  ;;  %v16853_v54 = vrot.slane %v16852_v5, %v9082_v12  ;;  %v10942_v53 = vadd.f32 %v9110_v22, %v3019_v47  ;;  %v3619_v38 = vadd.f32 %v3618_v49, %v10931_v11  ;;  %v3563_v51 = vrot.slane %v3562_v10, 1 }
 0x1d6   : > { %v3600_v19 = vrot.slane %v3599_v43, 2  ;;  %v3961_v7 = vmul.f32 %v10918_v15, %v10918_v15  ;;  %v4289_v62 = vadd.f32 %v3957_v33, %v3953_v35  ;;  %v4234_v61 = vadd.f32 %v4233_v9, %v4232_v56  ;;  %v16858_v9 = vld [vmem:[#allocation68_spill] sm:$0xff] }
 0x1d7   : > { %v3027_v27 = vsub.f32 %v10836_v1, %v16853_v54  ;;  %16854 = vst [vmem:[#allocation33_spill] sm:$0xff] %v10942_v53  ;;  %v4270_v13 = vrot.slane %v4269_v30, 4  ;;  %v10948_v58 = vadd.f32 %v9110_v22, %v3023_v4  ;;  %v3620_v24 = vadd.f32 %v3619_v38, %v10942_v53 }
 0x1d8   : > { %v3965_v54 = vmul.f32 %v10931_v11, %v10931_v11  ;;  %v4290_v25 = vadd.f32 %v4289_v62, %v3961_v7  ;;  %v16856_v49 = vrot.slane %v16763_v42, %v9106_v21  ;;  %v16857_v47 = vrot.slane %v16765_v41, %v9106_v21 }
 0x1d9   : > { %16855 = vst [vmem:[#allocation200_spill] sm:$0xff] %v10948_v58  ;;  %v10962_v37 = vmul.f32 0.015625, %v10860_v40  ;;  %v3601_v4 = vadd.f32 %v3600_v19, %v3599_v43  ;;  %v4271_v29 = vadd.f32 %v4270_v13, %v4269_v30  ;;  %v3621_v39 = vadd.f32 %v3620_v24, %v10948_v58  ;;  %v6354_v43 = vld [vmem:[#allocation2 + $0x78] sm:$0xff] }
 0x1da   : > { %v2974_v2 = vsub.f32 %v10935_v8, %v16856_v49  ;;  %v2978_v56 = vsub.f32 %v10935_v8, %v16857_v47  ;;  %v3574_v35 = vrot.slane %v3573_v6, 2  ;;  %v4248_v33 = vrot.slane %v4247_v59, 1  ;;  %v6386_v30 = vld [vmem:[#allocation2 + $0x178] sm:$0xff]  ;;  %6411 = vmatpush1.msra.mxu0 %v6354_v43 }
 0x1db   : > { %v16859_v38 = vrot.slane %v16858_v9, %v9082_v12  ;;  %v4291_v62 = vadd.f32 %v4290_v25, %v3965_v54  ;;  %v3564_v49 = vadd.f32 %v3563_v51, %v3562_v10  ;;  %v4235_v11 = vrot.slane %v4234_v61, 1  ;;  %6796 = vmatpush1.msra.mxu1 %v6386_v30 }
 0x1dc   : > { %v10970_v15 = vadd.f32 %v9110_v22, %v3027_v27  ;;  %v3969_v40 = vmul.f32 %v10942_v53, %v10942_v53  ;;  %v4272_v19 = vrot.slane %v4271_v29, 2  ;;  %v16861_v13 = vrot.slane %v16768_v28, %v9106_v21 }
 0x1dd   : > { %v3031_v7 = vsub.f32 %v10836_v1, %v16859_v38  ;;  %v10979_v47 = vadd.f32 %v10072_v55, %v2974_v2  ;;  %v10982_v10 = vadd.f32 %v10072_v55, %v2978_v56  ;;  %v16864_v1 = vrot.slane %v16793_v3, %v9103_v20 }
 0x1de   : > { %16860 = vst [vmem:[#allocation68_spill] sm:$0xff] %v10970_v15  ;;  %v2982_v24 = vsub.f32 %v10935_v8, %v16861_v13  ;;  %v3602_v54 = vrot.slane %v3601_v4, 1  ;;  %v3622_v25 = vadd.f32 %v3621_v39, %v10970_v15  ;;  %v16866_v38 = vmov 0.0  }
 0x1df   : > { %16862 = vst [vmem:[#allocation201_spill] sm:$0xff] %v10979_v47  ;;  %16863 = vst [vmem:[#allocation202_spill] sm:$0xff] %v10982_v10  ;;  %v10990_v51 = vsub.f32 %v10727_v23, %v16864_v1  ;;  %6412 = vmatprep.subr.mxu0 %v16866_v38  ;;  %v10994_v2 = vadd.f32 %v3574_v35, %v3573_v6  ;;  %v10996_v56 = vadd.f32 %v4248_v33, %v4247_v59 }
 0x1e0   : > { %v4292_v43 = vadd.f32 %v4291_v62, %v3969_v40  ;;  %v16868_v13 = vrot.slane %v16774_v52, %v9106_v21  ;;  %6797 = vmatprep.subr.mxu1 %v16866_v38  ;;  %v4236_v1 = vadd.f32 %v4235_v11, %v4234_v61  ;;  %v11003_v53 = vmul.f32 0.015625, %v3564_v49  ;;  %v6350_v52 = vld [vmem:[#allocation2 + $0x58] sm:$0xff] }
 0x1e1   : > { %16865 = vst [vmem:[#allocation203_spill] sm:$0xff] %v10990_v51  ;;  %16867 = vst [vmem:[#allocation204_spill] sm:$0xff] %v10994_v2  ;;  %v11006_v39 = vadd.f32 %v9110_v22, %v3031_v7  ;;  %v3973_v6 = vmul.f32 %v10948_v58, %v10948_v58  ;;  %v4273_v35 = vadd.f32 %v4272_v19, %v4271_v29  ;;  %v16909_v2 = vld [vmem:[#allocation76_spill] sm:$0xff] }
 0x1e2   : > { %v2986_v27 = vsub.f32 %v10935_v8, %v16868_v13  ;;  %16869 = vst [vmem:[#allocation205_spill] sm:$0xff] %v11003_v53  ;;  %v16871_v59 = vrot.slane %v16779_v50, %v9106_v21  ;;  %v11015_v62 = vadd.f32 %v10072_v55, %v2982_v24  ;;  %v3604_v11 = vadd.f32 %v10982_v10, %v10979_v47 }
 0x1e3   : > { %16870 = vst [vmem:[#allocation206_spill] sm:$0xff] %v11006_v39  ;;  %v3603_v61 = vadd.f32 %v3602_v54, %v3601_v4  ;;  %v3623_v49 = vadd.f32 %v3622_v25, %v11006_v39  ;;  %v3924_v7 = vmul.f32 %v10979_v47, %v10979_v47  ;;  %v3928_v29 = vmul.f32 %v10982_v10, %v10982_v10 }
 0x1e4   : > { %v2990_v33 = vsub.f32 %v10935_v8, %v16871_v59  ;;  %16872 = vst [vmem:[#allocation207_spill] sm:$0xff] %v11015_v62  ;;  %v4293_v40 = vadd.f32 %v4292_v43, %v3973_v6  ;;  %v16873_v30 = vrot.slane %v16783_v57, %v9106_v21  ;;  %v11029_v24 = vadd.f32 %v10072_v55, %v2986_v27  ;;  %v964_v59 = vpop.f32.mrf.mxu1 }
 0x1e5   : > { %v3605_v13 = vadd.f32 %v3604_v11, %v11015_v62  ;;  %v11032_v4 = vmul.f32 0.015625, %v4236_v1  ;;  %v11036_v54 = vmul.f32 %v11003_v53, %v11003_v53  ;;  %v3977_v25 = vmul.f32 %v10970_v15, %v10970_v15 }
 0x1e6   : > { %v2994_v19 = vsub.f32 %v10935_v8, %v16873_v30  ;;  %16874 = vst [vmem:[#allocation208_spill] sm:$0xff] %v11029_v24  ;;  %v16875_v43 = vrot.slane %v16791_v60, %v9106_v21  ;;  %v4274_v30 = vrot.slane %v4273_v35, 1  ;;  %v16876_v27 = vrot.slane %v16793_v3, %v9106_v21  ;;  %v16880_v60 = vld [vmem:[#allocation42_spill] sm:$0xff] }
 0x1e7   : > { %v11049_v11 = vadd.f32 %v10072_v55, %v2990_v33  ;;  %v3606_v58 = vadd.f32 %v3605_v13, %v11029_v24  ;;  %v11052_v10 = vmul.f32 0.015625, %v3603_v61  ;;  %v3624_v15 = vrot.slane %v3623_v49, 4 }
 0x1e8   : > { %v2998_v6 = vsub.f32 %v10935_v8, %v16875_v43  ;;  %v3002_v1 = vsub.f32 %v10935_v8, %v16876_v27  ;;  %v3932_v47 = vmul.f32 %v11015_v62, %v11015_v62  ;;  %v4276_v53 = vadd.f32 %v3928_v29, %v3924_v7  ;;  %v11068_v62 = vpop.f32.mrf.mxu0 }
 0x1e9   : > { %16877 = vst [vmem:[#allocation209_spill] sm:$0xff] %v11049_v11  ;;  %16878 = vst [vmem:[#allocation210_spill] sm:$0xff] %v11052_v10  ;;  %v4294_v43 = vadd.f32 %v4293_v40, %v3977_v25  ;;  %v11057_v51 = vadd.f32 %v10072_v55, %v2994_v19  ;;  %v3607_v3 = vadd.f32 %v3606_v58, %v11049_v11 }
 0x1ea   : > { %v1005_v8 = vadd.f32 %v964_v59, %v16880_v60  ;;  %v3981_v33 = vmul.f32 %v11006_v39, %v11006_v39  ;;  %v11064_v13 = vadd.f32 %v10072_v55, %v2998_v6  ;;  %v3936_v61 = vmul.f32 %v11029_v24, %v11029_v24  ;;  %v6353_v59 = vld [vmem:[#allocation2 + $0x70] sm:$0xff] }
 0x1eb   : > { %16879 = vst [vmem:[#allocation211_spill] sm:$0xff] %v11057_v51  ;;  %v4277_v27 = vadd.f32 %v4276_v53, %v3932_v47  ;;  %v4275_v7 = vadd.f32 %v4274_v30, %v4273_v35  ;;  %v3608_v29 = vadd.f32 %v3607_v3, %v11057_v51  ;;  %v16882_v58 = vrot.slane %v16832_v0, %v9092_v16  ;;  %v6385_v35 = vld [vmem:[#allocation2 + $0x170] sm:$0xff] }
 0x1ec   : > { %16881 = vst [vmem:[#allocation42_spill] sm:$0xff] %v11064_v13  ;;  %v16883_v60 = vrot.slane %v16835_v18, %v9092_v16  ;;  %v3625_v6 = vadd.f32 %v3624_v15, %v3623_v49  ;;  %v3940_v53 = vmul.f32 %v11049_v11, %v11049_v11  ;;  %v11083_v30 = vmul.f32 %v11052_v10, %v11052_v10 }
 0x1ed   : > { %v3005_v40 = vsub.f32 %v1005_v8, %v16882_v58  ;;  %v4278_v47 = vadd.f32 %v4277_v27, %v3936_v61  ;;  %v4295_v3 = vadd.f32 %v4294_v43, %v3981_v33  ;;  %v11086_v58 = vadd.f32 %v10072_v55, %v3002_v1  ;;  %6413 = vmatpush1.msra.mxu0 %v6353_v59  ;;  %v857_v43 = vpop.f32.mrf.mxu0 }
 0x1ee   : > { %v3009_v19 = vsub.f32 %v1005_v8, %v16883_v60  ;;  %16884 = vst [vmem:[#allocation212_spill] sm:$0xff] %v11083_v30  ;;  %v3609_v60 = vadd.f32 %v3608_v29, %v11064_v13  ;;  %v16886_v15 = vsub.f32 %v10620_v31, %v10624_v36  ;;  %v3944_v61 = vmul.f32 %v11057_v51, %v11057_v51 }
 0x1ef   : > { %16885 = vst [vmem:[#allocation213_spill] sm:$0xff] %v11086_v58  ;;  %v4279_v27 = vadd.f32 %v4278_v47, %v3940_v53  ;;  %v16887_v25 = vrot.slane %v16839_v48, %v9092_v16  ;;  %6798 = vmatpush1.msra.mxu1 %v6385_v35  ;;  %6414 = vmatprep.subr.mxu0 %v16866_v38  ;;  %v11100_v1 = vmul.f32 0.015625, %v4275_v7  ;;  %v3626_v29 = vrot.slane %v3625_v6, 2 }
 0x1f0   : > { %v11092_v49 = vmax.f32 %v16886_v15, 0.0  ;;  %v3610_v33 = vadd.f32 %v3609_v60, %v11086_v58  ;;  %v11104_v31 = vadd.f32 %v9120_v26, %v3005_v40  ;;  %v11107_v36 = vadd.f32 %v9120_v26, %v3009_v19  ;;  %6799 = vmatprep.subr.mxu1 %v16866_v38  ;;  %v16892_v60 = vld [vmem:[#allocation46_spill] sm:$0xff] }
 0x1f1   : > { %v3013_v39 = vsub.f32 %v1005_v8, %v16887_v25  ;;  %v3948_v25 = vmul.f32 %v11064_v13, %v11064_v13  ;;  %v4280_v53 = vadd.f32 %v4279_v27, %v3944_v61  ;;  %v16890_v47 = vrot.slane %v16843_v17, %v9092_v16 }
 0x1f2   : > { %16888 = vst [vmem:[#allocation214_spill] sm:$0xff] %v11104_v31  ;;  %16889 = vst [vmem:[#allocation215_spill] sm:$0xff] %v11107_v36  ;;  %v3611_v59 = vrot.slane %v3610_v33, 4  ;;  %v3952_v35 = vmul.f32 %v11086_v58, %v11086_v58  ;;  %v16891_v40 = vrot.slane %v16845_v45, %v9092_v16  ;;  %v11121_v15 = vadd.f32 %v857_v43, %v16892_v60 }
 0x1f3   : > { %v3017_v7 = vsub.f32 %v1005_v8, %v16890_v47  ;;  %v4281_v51 = vadd.f32 %v4280_v53, %v3948_v25  ;;  %v11124_v11 = vadd.f32 %v9120_v26, %v3013_v39  ;;  %v3643_v61 = vadd.f32 %v11107_v36, %v11104_v31 }
 0x1f4   : > { %v3021_v19 = vsub.f32 %v1005_v8, %v16891_v40  ;;  %v3955_v27 = vmul.f32 %v11104_v31, %v11104_v31  ;;  %v4296_v47 = vrot.slane %v4295_v3, 4  ;;  %v3612_v13 = vadd.f32 %v3611_v59, %v3610_v33 }
 0x1f5   : > { %16893 = vst [vmem:[#allocation46_spill] sm:$0xff] %v11124_v11  ;;  %v16894_v58 = vrot.slane %v16848_v63, %v9092_v16  ;;  %v3959_v43 = vmul.f32 %v11107_v36, %v11107_v36  ;;  %v4282_v40 = vadd.f32 %v4281_v51, %v3952_v35  ;;  %v16895_v39 = vrot.slane %v16852_v5, %v9092_v16  ;;  %v16900_v36 = vld [vmem:[#allocation71_spill] sm:$0xff] }
 0x1f6   : > { %v11139_v53 = vadd.f32 %v9120_v26, %v3017_v7  ;;  %v3644_v60 = vadd.f32 %v3643_v61, %v11124_v11  ;;  %v11144_v59 = vadd.f32 %v3626_v29, %v3625_v6  ;;  %v11150_v51 = vadd.f32 %v9120_v26, %v3021_v19 }
 0x1f7   : > { %v3025_v24 = vsub.f32 %v1005_v8, %v16894_v58  ;;  %v3029_v25 = vsub.f32 %v1005_v8, %v16895_v39  ;;  %v16898_v58 = vrot.slane %v16858_v9, %v9092_v16  ;;  %v3963_v7 = vmul.f32 %v11124_v11, %v11124_v11 }
 0x1f8   : > { %16896 = vst [vmem:[#allocation216_spill] sm:$0xff] %v11139_v53  ;;  %16897 = vst [vmem:[#allocation217_spill] sm:$0xff] %v11144_v59  ;;  %v3645_v35 = vadd.f32 %v3644_v60, %v11139_v53  ;;  %v4315_v39 = vadd.f32 %v3959_v43, %v3955_v27  ;;  %v16901_v61 = vrot.slane %v16900_v36, %v9082_v12  ;;  %v3613_v6 = vrot.slane %v3612_v13, 2  ;;  %v16906_v59 = vld [vmem:[#allocation39_spill] sm:$0xff] }
 0x1f9   : > { %v3033_v31 = vsub.f32 %v1005_v8, %v16898_v58  ;;  %16899 = vst [vmem:[#allocation218_spill] sm:$0xff] %v11150_v51  ;;  %v4283_v29 = vrot.slane %v4282_v40, 4  ;;  %v11160_v10 = vadd.f32 %v9120_v26, %v3025_v24  ;;  %v16903_v8 = vld [vmem:[#allocation72_spill] sm:$0xff]  ;;  %v11167_v60 = vadd.f32 %v9120_v26, %v3029_v25 }
 0x1fa   : > { %v3035_v33 = vsub.f32 %v11121_v15, %v16901_v61  ;;  %v16904_v19 = vrot.slane %v16903_v8, %v9082_v12  ;;  %v3646_v27 = vadd.f32 %v3645_v35, %v11150_v51  ;;  %v3967_v43 = vmul.f32 %v11139_v53, %v11139_v53 }
 0x1fb   : > { %16902 = vst [vmem:[#allocation219_spill] sm:$0xff] %v11160_v10  ;;  %16905 = vst [vmem:[#allocation220_spill] sm:$0xff] %v11167_v60  ;;  %v4316_v11 = vadd.f32 %v4315_v39, %v3963_v7  ;;  %v4297_v61 = vadd.f32 %v4296_v47, %v4295_v3  ;;  %v11174_v57 = vadd.f32 %v11068_v62, %v16906_v59  ;;  %v6352_v47 = vld [vmem:[#allocation2 + $0x68] sm:$0xff] }
 0x1fc   : > { %v3039_v58 = vsub.f32 %v11121_v15, %v16904_v19  ;;  %v11177_v24 = vadd.f32 %v9120_v26, %v3033_v31  ;;  %v16910_v19 = vrot.slane %v16909_v2, %v9082_v12  ;;  %v3647_v50 = vadd.f32 %v3646_v27, %v11160_v10  ;;  %v6384_v62 = vld [vmem:[#allocation2 + $0x168] sm:$0xff]  ;;  %6415 = vmatpush1.msra.mxu0 %v6352_v47 }
 0x1fd   : > { %16907 = vst [vmem:[#allocation39_spill] sm:$0xff] %v11174_v57  ;;  %v3971_v35 = vmul.f32 %v11150_v51, %v11150_v51  ;;  %v4317_v53 = vadd.f32 %v4316_v11, %v3967_v43  ;;  %v11187_v3 = vadd.f32 %v9110_v22, %v3035_v33  ;;  %v3614_v59 = vadd.f32 %v3613_v6, %v3612_v13  ;;  %v16913_v43 = vld [vmem:[#allocation77_spill] sm:$0xff]  ;;  %v6351_v13 = vld [vmem:[#allocation2 + $0x60] sm:$0xff] }
 0x1fe   : > { %16908 = vst [vmem:[#allocation221_spill] sm:$0xff] %v11177_v24  ;;  %v3043_v25 = vsub.f32 %v11121_v15, %v16910_v19  ;;  %v4284_v7 = vadd.f32 %v4283_v29, %v4282_v40  ;;  %v3975_v31 = vmul.f32 %v11160_v10, %v11160_v10  ;;  %v11192_v39 = vadd.f32 %v9110_v22, %v3039_v58  ;;  %v6383_v40 = vld [vmem:[#allocation2 + $0x160] sm:$0xff]  ;;  %v16915_v58 = vld [vmem:[#allocation73_spill] sm:$0xff]  ;;  %v966_v10 = vpop.f32.mrf.mxu1 }
 0x1ff   : > { %16911 = vst [vmem:[#allocation222_spill] sm:$0xff] %v11187_v3  ;;  %v3648_v27 = vadd.f32 %v3647_v50, %v11167_v60  ;;  %v3979_v19 = vmul.f32 %v11167_v60, %v11167_v60  ;;  %v4318_v11 = vadd.f32 %v4317_v53, %v3971_v35  ;;  %v16914_v33 = vrot.slane %v16913_v43, %v9082_v12 }
 0x200   : > { %16912 = vst [vmem:[#allocation223_spill] sm:$0xff] %v11192_v39  ;;  %6800 = vmatpush1.msra.mxu1 %v6384_v62  ;;  %v4298_v6 = vrot.slane %v4297_v61, 2  ;;  %v3983_v29 = vmul.f32 %v11177_v24, %v11177_v24  ;;  %v16916_v47 = vrot.slane %v16915_v58, %v9082_v12  ;;  %v11208_v60 = vadd.f32 %v9110_v22, %v3043_v25 }
 0x201   : > { %v3047_v51 = vsub.f32 %v11121_v15, %v16914_v33  ;;  %6416 = vmatprep.subr.mxu0 %v16866_v38  ;;  %6801 = vmatprep.subr.mxu1 %v16866_v38  ;;  %v4664_v53 = vadd.f32 1e-05, %v11092_v49  ;;  %v3649_v35 = vadd.f32 %v3648_v27, %v11177_v24  ;;  %v4319_v62 = vadd.f32 %v4318_v11, %v3975_v31  ;;  %v16919_v24 = vld [vmem:[#allocation74_spill] sm:$0xff] }
 0x202   : > { %v3051_v50 = vsub.f32 %v11121_v15, %v16916_v47  ;;  %16917 = vst [vmem:[#allocation224_spill] sm:$0xff] %v11208_v60  ;;  %v3669_v33 = vadd.f32 %v11192_v39, %v11187_v3  ;;  %6417 = vmatpush1.msra.mxu0 %v6351_v13  ;;  %6802 = vmatpush1.msra.mxu1 %v6383_v40  ;;  %v6382_v47 = vld [vmem:[#allocation2 + $0x158] sm:$0xff]  ;;  %v3615_v28 = vrot.slane %v3614_v59, 1  ;;  %v4285_v25 = vrot.slane %v4284_v7, 2  ;;  %v6349_v13 = vld [vmem:[#allocation2 + $0x50] sm:$0xff] }
 0x203   : > { %v3985_v23 = vmul.f32 %v11187_v3, %v11187_v3  ;;  %v3989_v41 = vmul.f32 %v11192_v39, %v11192_v39  ;;  %6418 = vmatprep.subr.mxu0 %v16866_v38  ;;  %v3650_v49 = vrot.slane %v3649_v35, 4  ;;  %v4320_v31 = vadd.f32 %v4319_v62, %v3979_v19  ;;  %6803 = vmatprep.subr.mxu1 %v16866_v38 }
 0x204   : > { %v11222_v27 = vadd.f32 %v9110_v22, %v3047_v51  ;;  %v3670_v11 = vadd.f32 %v3669_v33, %v11208_v60  ;;  %6419 = vmatpush1.msra.mxu0 %v6350_v52  ;;  %v4299_v40 = vadd.f32 %v4298_v6, %v4297_v61  ;;  %v16920_v3 = vrot.slane %v16919_v24, %v9082_v12  ;;  %v6381_v51 = vld [vmem:[#allocation2 + $0x150] sm:$0xff] }
 0x205   : > { %v11231_v39 = vadd.f32 %v9110_v22, %v3051_v50  ;;  %v11234_v19 = vadd.f32 %v966_v10, %v16922_v34  ;;  %6804 = vmatpush1.msra.mxu1 %v6382_v47  ;;  %8565 = vrsqrt.f32 %v4664_v53  ;;  %v3651_v62 = vadd.f32 %v3650_v49, %v3649_v35  ;;  %6420 = vmatprep.subr.mxu0 %v16866_v38  ;;  %v6348_v34 = vld [vmem:[#allocation2 + $0x48] sm:$0xff]  ;;  %v16923_v53 = vld [vmem:[#allocation78_spill] sm:$0xff] }
 0x206   : > { %16918 = vst [vmem:[#allocation225_spill] sm:$0xff] %v11222_v27  ;;  %v3055_v42 = vsub.f32 %v11121_v15, %v16920_v3  ;;  %v4321_v33 = vadd.f32 %v4320_v31, %v3983_v29  ;;  %v3671_v52 = vadd.f32 %v3670_v11, %v11222_v27  ;;  %6805 = vmatprep.subr.mxu1 %v16866_v38  ;;  %v6380_v10 = vld [vmem:[#allocation2 + $0x148] sm:$0xff]  ;;  %v6347_v31 = vld [vmem:[#allocation2 + $0x40] sm:$0xff]  ;;  %v4300_v11 = vrot.slane %v4299_v40, 1 }
 0x207   : > { %16921 = vst [vmem:[#allocation226_spill] sm:$0xff] %v11231_v39  ;;  %v3616_v61 = vadd.f32 %v3615_v28, %v3614_v59  ;;  %v4286_v6 = vadd.f32 %v4285_v25, %v4284_v7  ;;  %v3993_v3 = vmul.f32 %v11208_v60, %v11208_v60  ;;  %v4341_v50 = vadd.f32 %v3989_v41, %v3985_v23 }
 0x208   : > { %6421 = vmatpush1.msra.mxu0 %v6349_v13  ;;  %v3652_v47 = vrot.slane %v3651_v62, 2  ;;  %v4322_v30 = vrot.slane %v4321_v33, 4  ;;  %v16924_v29 = vrot.slane %v16923_v53, %v9082_v12  ;;  %v3672_v49 = vadd.f32 %v3671_v52, %v11231_v39  ;;  %6806 = vmatpush1.msra.mxu1 %v6381_v51  ;;  %v16927_v51 = vld [vmem:[#allocation79_spill] sm:$0xff] }
 0x209   : > { %6422 = vmatprep.subr.mxu0 %v16866_v38  ;;  %v3997_v28 = vmul.f32 %v11222_v27, %v11222_v27  ;;  %v4342_v59 = vadd.f32 %v4341_v50, %v3993_v3  ;;  %v16925_v41 = vrot.slane %v16832_v0, %v9106_v21  ;;  %v16926_v7 = vrot.slane %v16835_v18, %v9106_v21 }
 0x20a   : > { %v3059_v35 = vsub.f32 %v11121_v15, %v16924_v29  ;;  %6807 = vmatprep.subr.mxu1 %v16866_v38  ;;  %v4323_v13 = vadd.f32 %v4322_v30, %v4321_v33  ;;  %v16928_v52 = vrot.slane %v16927_v51, %v9082_v12  ;;  %v11263_v50 = vadd.f32 %v9110_v22, %v3055_v42  ;;  %v6379_v29 = vld [vmem:[#allocation2 + $0x140] sm:$0xff] }
 0x20b   : > { %v3006_v23 = vsub.f32 %v11234_v19, %v16925_v41  ;;  %v3010_v25 = vsub.f32 %v11234_v19, %v16926_v7  ;;  %6423 = vmatpush1.msra.mxu0 %v6348_v34  ;;  %6808 = vmatpush1.msra.mxu1 %v6380_v10  ;;  %v4287_v41 = vrot.slane %v4286_v6, 1  ;;  %v11265_v27 = vmul.f32 0.015625, %v3616_v61  ;;  %v6346_v61 = vld [vmem:[#allocation2 + $0x38] sm:$0xff] }
 0x20c   : > { %v3063_v3 = vsub.f32 %v11121_v15, %v16928_v52  ;;  %16929 = vst [vmem:[#allocation45_spill] sm:$0xff] %v11263_v50  ;;  %v3653_v7 = vadd.f32 %v3652_v47, %v3651_v62  ;;  %v4343_v60 = vadd.f32 %v4342_v59, %v3997_v28  ;;  %6424 = vmatprep.subr.mxu0 %v16866_v38  ;;  %v4324_v28 = vrot.slane %v4323_v13, 2 }
 0x20d   : > { %16930 = vst [vmem:[#allocation79_spill] sm:$0xff] %v11265_v27  ;;  %v16931_v30 = vsub.f32 %v10750_v44, %v10731_v32  ;;  %v11272_v18 = vadd.f32 %v9110_v22, %v3059_v35  ;;  %v3673_v42 = vadd.f32 %v3672_v49, %v11263_v50  ;;  %v4001_v15 = vmul.f32 %v11231_v39, %v11231_v39  ;;  %v6378_v35 = vld [vmem:[#allocation2 + $0x138] sm:$0xff] }
 0x20e   : > { %6809 = vmatprep.subr.mxu1 %v16866_v38  ;;  %6425 = vmatpush1.msra.mxu0 %v6347_v31  ;;  %v16933_v62 = vrot.slane %v16858_v9, %v9103_v20  ;;  %v16935_v32 = vrot.slane %v16839_v48, %v9106_v21  ;;  %v11289_v10 = vadd.f32 %v10072_v55, %v3006_v23 }
 0x20f   : > { %v4632_v33 = vmax.f32 %v16931_v30, 0.0  ;;  %16932 = vst [vmem:[#allocation227_spill] sm:$0xff] %v11272_v18  ;;  %v11292_v47 = vadd.f32 %v10072_v55, %v3010_v25  ;;  %6810 = vmatpush1.msra.mxu1 %v6379_v29  ;;  %v11294_v49 = vadd.f32 %v4300_v11, %v4299_v40  ;;  %v11297_v59 = vadd.f32 %v9110_v22, %v3063_v3  ;;  %v6345_v3 = vld [vmem:[#allocation2 + $0x30] sm:$0xff] }
 0x210   : > { %v11282_v34 = vsub.f32 %v11174_v57, %v16933_v62  ;;  %v3014_v44 = vsub.f32 %v11234_v19, %v16935_v32  ;;  %16936 = vst [vmem:[#allocation229_spill] sm:$0xff] %v11289_v10  ;;  %v4344_v31 = vadd.f32 %v4343_v60, %v4001_v15  ;;  %6426 = vmatprep.subr.mxu0 %v16866_v38  ;;  %v3654_v25 = vrot.slane %v3653_v7, 1  ;;  %v6377_v15 = vld [vmem:[#allocation2 + $0x130] sm:$0xff]  ;;  %v16983_v57 = vld [vmem:[#allocation51_spill] sm:$0xff] }
 0x211   : > { %16937 = vst [vmem:[#allocation230_spill] sm:$0xff] %v11292_v47  ;;  %16938 = vst [vmem:[#allocation231_spill] sm:$0xff] %v11297_v59  ;;  %6811 = vmatprep.subr.mxu1 %v16866_v38  ;;  %v11301_v52 = vadd.f32 %v4287_v41, %v4286_v6  ;;  %v11305_v23 = vmul.f32 %v11265_v27, %v11265_v27  ;;  %v16939_v40 = vrot.slane %v16843_v17, %v9106_v21 }
 0x212   : > { %16934 = vst [vmem:[#allocation228_spill] sm:$0xff] %v11282_v34  ;;  %6427 = vmatpush1.msra.mxu0 %v6346_v61  ;;  %v16940_v60 = vsub.f32 %v10962_v37, %v10878_v46  ;;  %v3674_v30 = vadd.f32 %v3673_v42, %v11272_v18  ;;  %v4005_v6 = vmul.f32 %v11263_v50, %v11263_v50  ;;  %v6376_v50 = vld [vmem:[#allocation2 + $0x128] sm:$0xff] }
 0x213   : > { %v3018_v11 = vsub.f32 %v11234_v19, %v16939_v40  ;;  %v4009_v41 = vmul.f32 %v11272_v18, %v11272_v18  ;;  %6812 = vmatpush1.msra.mxu1 %v6378_v35  ;;  %6428 = vmatprep.subr.mxu0 %v16866_v38  ;;  %v16941_v61 = vrot.slane %v16845_v45, %v9106_v21  ;;  %v6344_v18 = vld [vmem:[#allocation2 + $0x28] sm:$0xff] }
 0x214   : > { %v4635_v29 = vmax.f32 %v16940_v60, 0.0  ;;  %v16942_v46 = vrot.slane %v16848_v63, %v9106_v21  ;;  %v11329_v42 = vadd.f32 %v10072_v55, %v3014_v44  ;;  %v3656_v32 = vadd.f32 %v11292_v47, %v11289_v10  ;;  %6813 = vmatprep.subr.mxu1 %v16866_v38  ;;  %6429 = vmatpush1.msra.mxu0 %v6345_v3  ;;  %v16978_v63 = vld [vmem:[#allocation86_spill] sm:$0xff] }
 0x215   : > { %v3022_v62 = vsub.f32 %v11234_v19, %v16941_v61  ;;  %v4325_v35 = vadd.f32 %v4324_v28, %v4323_v13  ;;  %v4345_v40 = vadd.f32 %v4344_v31, %v4005_v6  ;;  %v3956_v60 = vmul.f32 %v11289_v10, %v11289_v10  ;;  %6814 = vmatpush1.msra.mxu1 %v6377_v15  ;;  %v6343_v15 = vld [vmem:[#allocation2 + $0x20] sm:$0xff] }
 0x216   : > { %v3026_v37 = vsub.f32 %v11234_v19, %v16942_v46  ;;  %16943 = vst [vmem:[#allocation232_spill] sm:$0xff] %v11329_v42  ;;  %v3960_v61 = vmul.f32 %v11292_v47, %v11292_v47  ;;  %v11338_v46 = vpop.eup %8565  ;;  %v3655_v44 = vadd.f32 %v3654_v25, %v3653_v7  ;;  %v16944_v39 = vrot.slane %v16852_v5, %v9106_v21  ;;  %v970_v47 = vpop.f32.mrf.mxu1 }
 0x217   : > { %v11345_v13 = vadd.f32 %v10072_v55, %v3018_v11  ;;  %v3657_v28 = vadd.f32 %v3656_v32, %v11329_v42  ;;  %v4665_v31 = vadd.f32 1e-05, %v4632_v33  ;;  %v3675_v6 = vadd.f32 %v3674_v30, %v11297_v59  ;;  %6430 = vmatprep.subr.mxu0 %v16866_v38  ;;  %6815 = vmatprep.subr.mxu1 %v16866_v38 }
 0x218   : > { %v3030_v27 = vsub.f32 %v11234_v19, %v16944_v39  ;;  %v4013_v3 = vmul.f32 %v11297_v59, %v11297_v59  ;;  %v16946_v7 = vrot.slane %v16858_v9, %v9106_v21  ;;  %v4668_v39 = vadd.f32 1e-05, %v4635_v29  ;;  %6431 = vmatpush1.msra.mxu0 %v6344_v18  ;;  %6816 = vmatpush1.msra.mxu1 %v6376_v50  ;;  %v6375_v9 = vld [vmem:[#allocation2 + $0x120] sm:$0xff]  ;;  %v6342_v50 = vld [vmem:[#allocation2 + $0x18] sm:$0xff] }
 0x219   : > { %16945 = vst [vmem:[#allocation233_spill] sm:$0xff] %v11345_v13  ;;  %v11358_v11 = vadd.f32 %v10072_v55, %v3022_v62  ;;  %v11361_v33 = vadd.f32 %v10072_v55, %v3026_v37  ;;  %v3658_v30 = vadd.f32 %v3657_v28, %v11345_v13  ;;  %v4326_v32 = vrot.slane %v4325_v35, 1  ;;  %6432 = vmatprep.subr.mxu0 %v16866_v38  ;;  %v16951_v28 = vld [vmem:[#allocation54_spill] sm:$0xff] }
 0x21a   : > { %v3034_v25 = vsub.f32 %v11234_v19, %v16946_v7  ;;  %v4346_v19 = vadd.f32 %v4345_v40, %v4009_v41  ;;  %v3964_v7 = vmul.f32 %v11329_v42, %v11329_v42  ;;  %v4328_v59 = vadd.f32 %v3960_v61, %v3956_v60  ;;  %6817 = vmatprep.subr.mxu1 %v16866_v38  ;;  %v6374_v41 = vld [vmem:[#allocation2 + $0x118] sm:$0xff] }
 0x21b   : > { %16947 = vst [vmem:[#allocation234_spill] sm:$0xff] %v11358_v11  ;;  %16948 = vst [vmem:[#allocation235_spill] sm:$0xff] %v11361_v33  ;;  %v11367_v29 = vmul.f32 0.015625, %v3655_v44  ;;  %v11370_v62 = vadd.f32 %v10072_v55, %v3030_v27  ;;  %v3659_v37 = vadd.f32 %v3658_v30, %v11358_v11  ;;  %v11374_v18 = vadd.f32 %v970_v47, %v16951_v28  ;;  %v11386_v44 = vpop.f32.mrf.mxu0 }
 0x21c   : > { %v3676_v40 = vrot.slane %v3675_v6, 4  ;;  %v11378_v42 = vadd.f32 %v10072_v55, %v3034_v25  ;;  %v3968_v60 = vmul.f32 %v11345_v13, %v11345_v13  ;;  %v4329_v61 = vadd.f32 %v4328_v59, %v3964_v7  ;;  %6433 = vmatpush1.msra.mxu0 %v6343_v15  ;;  %6818 = vmatpush1.msra.mxu1 %v6375_v9  ;;  %v6373_v7 = vld [vmem:[#allocation2 + $0x110] sm:$0xff] }
 0x21d   : > { %16949 = vst [vmem:[#allocation236_spill] sm:$0xff] %v11367_v29  ;;  %16950 = vst [vmem:[#allocation237_spill] sm:$0xff] %v11370_v62  ;;  %v11383_v27 = vmul.f32 0.015625, %v10703_v14  ;;  %v3660_v47 = vadd.f32 %v3659_v37, %v11361_v33  ;;  %v16953_v30 = vrot.slane %v16900_v36, %v9092_v16  ;;  %v16954_v25 = vrot.slane %v16903_v8, %v9092_v16  ;;  %v6341_v14 = vld [vmem:[#allocation2 + $0x10] sm:$0xff] }
 0x21e   : > { %16952 = vst [vmem:[#allocation54_spill] sm:$0xff] %v11378_v42  ;;  %6434 = vmatprep.subr.mxu0 %v16866_v38  ;;  %6819 = vmatprep.subr.mxu1 %v16866_v38  ;;  %8567 = vrsqrt.f32 %v4665_v31  ;;  %v4347_v59 = vadd.f32 %v4346_v19, %v4013_v3  ;;  %v3972_v15 = vmul.f32 %v11358_v11, %v11358_v11  ;;  %v6340_v19 = vld [vmem:[#allocation2 + $0x8] sm:$0xff] }
 0x21f   : > { %v3037_v28 = vsub.f32 %v11374_v18, %v16953_v30  ;;  %v3041_v13 = vsub.f32 %v11374_v18, %v16954_v25  ;;  %v4330_v9 = vadd.f32 %v4329_v61, %v3968_v60  ;;  %6435 = vmatpush1.msra.mxu0 %v6342_v50  ;;  %6820 = vmatpush1.msra.mxu1 %v6374_v41  ;;  %8569 = vrsqrt.f32 %v4668_v39  ;;  %v6372_v50 = vld [vmem:[#allocation2 + $0x108] sm:$0xff]  ;;  %v863_v39 = vpop.f32.mrf.mxu0 }
 0x220   : > { %v11400_v37 = vadd.f32 %v4326_v32, %v4325_v35  ;;  %v11404_v30 = vmul.f32 %v11367_v29, %v11367_v29  ;;  %v3661_v25 = vadd.f32 %v3660_v47, %v11370_v62  ;;  %v16955_v10 = vrot.slane %v16909_v2, %v9092_v16  ;;  %6436 = vmatprep.subr.mxu0 %v16866_v38 }
 0x221   : > { %v11412_v3 = vadd.f32 %v3676_v40, %v3675_v6  ;;  %v3976_v35 = vmul.f32 %v11361_v33, %v11361_v33  ;;  %v4331_v32 = vadd.f32 %v4330_v9, %v3972_v15  ;;  %6821 = vmatprep.subr.mxu1 %v16866_v38  ;;  %6437 = vmatpush1.msra.mxu0 %v6341_v14  ;;  %v11418_v41 = vmul.f32 0.015625, %v10996_v56  ;;  %v16962_v33 = vld [vmem:[#allocation58_spill] sm:$0xff] }
 0x222   : > { %v3045_v31 = vsub.f32 %v11374_v18, %v16955_v10  ;;  %v3662_v60 = vadd.f32 %v3661_v25, %v11378_v42  ;;  %v11422_v10 = vadd.f32 %v9120_v26, %v3037_v28  ;;  %v11425_v6 = vadd.f32 %v9120_v26, %v3041_v13  ;;  %6822 = vmatpush1.msra.mxu1 %v6373_v7  ;;  %v6339_v28 = vld [vmem:[#allocation2] sm:$0xff] }
 0x223   : > { %16956 = vst [vmem:[#allocation238_spill] sm:$0xff] %v11418_v41  ;;  %6438 = vmatprep.subr.mxu0 %v16866_v38  ;;  %v4348_v40 = vrot.slane %v4347_v59, 4  ;;  %v3980_v61 = vmul.f32 %v11370_v62, %v11370_v62  ;;  %v4332_v47 = vadd.f32 %v4331_v32, %v3976_v35  ;;  %v16959_v56 = vrot.slane %v16913_v43, %v9092_v16  ;;  %v6371_v35 = vld [vmem:[#allocation2 + $0x100] sm:$0xff] }
 0x224   : > { %16957 = vst [vmem:[#allocation239_spill] sm:$0xff] %v11422_v10  ;;  %16958 = vst [vmem:[#allocation240_spill] sm:$0xff] %v11425_v6  ;;  %6823 = vmatprep.subr.mxu1 %v16866_v38  ;;  %v3663_v15 = vrot.slane %v3662_v60, 4  ;;  %v3984_v13 = vmul.f32 %v11378_v42, %v11378_v42  ;;  %v16960_v9 = vrot.slane %v16915_v58, %v9092_v16  ;;  %6439 = vmatpush1.msra.mxu0 %v6340_v19 }
 0x225   : > { %v3049_v14 = vsub.f32 %v11374_v18, %v16959_v56  ;;  %v11442_v25 = vadd.f32 %v9120_v26, %v3045_v31  ;;  %6824 = vmatpush1.msra.mxu1 %v6372_v50  ;;  %v4333_v32 = vadd.f32 %v4332_v47, %v3980_v61  ;;  %v3695_v56 = vadd.f32 %v11425_v6, %v11422_v10 }
 0x226   : > { %v3053_v7 = vsub.f32 %v11374_v18, %v16960_v9  ;;  %v3987_v62 = vmul.f32 %v11422_v10, %v11422_v10  ;;  %v11449_v42 = vadd.f32 %v863_v39, %v16962_v33  ;;  %6440 = vmatprep.subr.mxu0 %v16866_v38  ;;  %v16963_v9 = vsub.f32 %v11032_v4, %v11036_v54  ;;  %v6370_v33 = vld [vmem:[#allocation2 + $0xf8] sm:$0xff] }
 0x227   : > { %16961 = vst [vmem:[#allocation241_spill] sm:$0xff] %v11442_v25  ;;  %v3664_v19 = vadd.f32 %v3663_v15, %v3662_v60  ;;  %v16964_v50 = vrot.slane %v16919_v24, %v9092_v16  ;;  %v3991_v47 = vmul.f32 %v11425_v6, %v11425_v6  ;;  %6825 = vmatprep.subr.mxu1 %v16866_v38  ;;  %v6402_v39 = vld [vmem:[#allocation2 + $0x1f8] sm:$0xff]  ;;  %v11469_v60 = vmul.f32 0.015625, %v11301_v52 }
 0x228   : > { %v11455_v31 = vmax.f32 %v16963_v9, 0.0  ;;  %6441 = vmatpush1.msra.mxu0 %v6339_v28  ;;  %v4349_v10 = vadd.f32 %v4348_v40, %v4347_v59  ;;  %v4334_v11 = vadd.f32 %v4333_v32, %v3984_v13  ;;  %v11465_v4 = vadd.f32 %v9120_v26, %v3049_v14  ;;  %6826 = vmatpush1.msra.mxu1 %v6371_v35  ;;  %v16968_v13 = vld [vmem:[#allocation82_spill] sm:$0xff] }
 0x229   : > { %v3057_v61 = vsub.f32 %v11374_v18, %v16964_v50  ;;  %v3696_v54 = vadd.f32 %v3695_v56, %v11442_v25  ;;  %v16966_v15 = vrot.slane %v16923_v53, %v9092_v16  ;;  %v11476_v28 = vadd.f32 %v9120_v26, %v3053_v7  ;;  %6442 = vmatprep.subr.mxu0 %v16866_v38  ;;  %v6369_v7 = vld [vmem:[#allocation2 + $0xf0] sm:$0xff] }
 0x22a   : > { %16965 = vst [vmem:[#allocation58_spill] sm:$0xff] %v11465_v4  ;;  %v3995_v59 = vmul.f32 %v11442_v25, %v11442_v25  ;;  %6827 = vmatprep.subr.mxu1 %v16866_v38  ;;  %v4335_v40 = vrot.slane %v4334_v11, 4  ;;  %v4367_v52 = vadd.f32 %v3991_v47, %v3987_v62  ;;  %v16969_v35 = vrot.slane %v16968_v13, %v9082_v12  ;;  %v6401_v56 = vld [vmem:[#allocation2 + $0x1f0] sm:$0xff] }
 0x22b   : > { %v3061_v9 = vsub.f32 %v11374_v18, %v16966_v15  ;;  %16967 = vst [vmem:[#allocation242_spill] sm:$0xff] %v11476_v28  ;;  %v3697_v14 = vadd.f32 %v3696_v54, %v11465_v4  ;;  %6443 = vmatpush2.msra.mxu0 %v6370_v33  ;;  %6828 = vmatpush2.msra.mxu1 %v6402_v39  ;;  %v3665_v50 = vrot.slane %v3664_v19, 2  ;;  %v16972_v54 = vld [vmem:[#allocation83_spill] sm:$0xff]  ;;  %v4350_v34 = vrot.slane %v4349_v10, 2 }
 0x22c   : > { %v3067_v32 = vsub.f32 %v11449_v42, %v16969_v35  ;;  %v16970_v15 = vrot.slane %v16927_v51, %v9092_v16  ;;  %v11492_v6 = vadd.f32 %v9120_v26, %v3057_v61  ;;  %v16973_v62 = vrot.slane %v16972_v54, %v9082_v12  ;;  %6444 = vmatprep.subr.mxu0 %v16866_v38 }
 0x22d   : > { %v4336_v33 = vadd.f32 %v4335_v40, %v4334_v11  ;;  %v3698_v39 = vadd.f32 %v3697_v14, %v11476_v28  ;;  %v3999_v35 = vmul.f32 %v11465_v4, %v11465_v4  ;;  %v4368_v29 = vadd.f32 %v4367_v52, %v3995_v59  ;;  %6829 = vmatprep.subr.mxu1 %v16866_v38  ;;  %v6400_v40 = vld [vmem:[#allocation2 + $0x1e8] sm:$0xff] }
 0x22e   : > { %v3065_v25 = vsub.f32 %v11374_v18, %v16970_v15  ;;  %16971 = vst [vmem:[#allocation243_spill] sm:$0xff] %v11492_v6  ;;  %v3071_v47 = vsub.f32 %v11449_v42, %v16973_v62  ;;  %v6368_v18 = vld [vmem:[#allocation2 + $0xe8] sm:$0xff]  ;;  %v11503_v15 = vpop.eup %8567  ;;  %v11506_v61 = vmul.f32 0.015625, %v11400_v37  ;;  %v11509_v62 = vadd.f32 %v9120_v26, %v3061_v9  ;;  %6445 = vmatpush2.msra.mxu0 %v6369_v7 }
 0x22f   : > { %v4003_v11 = vmul.f32 %v11476_v28, %v11476_v28  ;;  %6830 = vmatpush2.msra.mxu1 %v6401_v56  ;;  %v3678_v59 = vrot.slane %v11412_v3, 2  ;;  %v3699_v14 = vadd.f32 %v3698_v39, %v11492_v6  ;;  %v4369_v52 = vadd.f32 %v4368_v29, %v3999_v35  ;;  %6446 = vmatprep.subr.mxu0 %v16866_v38  ;;  %v11520_v37 = vpop.eup %8569  ;;  %v6367_v29 = vld [vmem:[#allocation2 + $0xe0] sm:$0xff] }
 0x230   : > { %16974 = vst [vmem:[#allocation244_spill] sm:$0xff] %v11509_v62  ;;  %v11516_v4 = vadd.f32 %v9110_v22, %v3067_v32  ;;  %6831 = vmatprep.subr.mxu1 %v16866_v38  ;;  %v3666_v9 = vadd.f32 %v3665_v50, %v3664_v19  ;;  %v11523_v28 = vadd.f32 %v9120_v26, %v3065_v25  ;;  %v6399_v32 = vld [vmem:[#allocation2 + $0x1e0] sm:$0xff]  ;;  %v4337_v39 = vrot.slane %v4336_v33, 2  ;;  %v972_v50 = vpop.f32.mrf.mxu1 }
 0x231   : > { %v4007_v7 = vmul.f32 %v11492_v6, %v11492_v6  ;;  %v11528_v56 = vadd.f32 %v9110_v22, %v3071_v47  ;;  %6447 = vmatpush2.msra.mxu0 %v6368_v18  ;;  %v3700_v35 = vadd.f32 %v3699_v14, %v11509_v62  ;;  %v4370_v5 = vadd.f32 %v4369_v52, %v4003_v11  ;;  %v6366_v11 = vld [vmem:[#allocation2 + $0xd8] sm:$0xff]  ;;  %v16980_v14 = vld [vmem:[#allocation212_spill] sm:$0xff] }
 0x232   : > { %16975 = vst [vmem:[#allocation245_spill] sm:$0xff] %v11516_v4  ;;  %16976 = vst [vmem:[#allocation246_spill] sm:$0xff] %v11523_v28  ;;  %v16979_v45 = vrot.slane %v16978_v63, %v9082_v12  ;;  %6832 = vmatpush2.msra.mxu1 %v6400_v40  ;;  %v4669_v25 = vadd.f32 1e-05, %v11455_v31  ;;  %v4351_v18 = vadd.f32 %v4350_v34, %v4349_v10  ;;  %6448 = vmatprep.subr.mxu0 %v16866_v38  ;;  %v6398_v47 = vld [vmem:[#allocation2 + $0x1d8] sm:$0xff] }
 0x233   : > { %16977 = vst [vmem:[#allocation247_spill] sm:$0xff] %v11528_v56  ;;  %6833 = vmatprep.subr.mxu1 %v16866_v38  ;;  %v16981_v52 = vsub.f32 %v11100_v1, %v16980_v14  ;;  %v4371_v40 = vadd.f32 %v4370_v5, %v4007_v7  ;;  %v3721_v31 = vadd.f32 %v11528_v56, %v11516_v4  ;;  %v3667_v10 = vrot.slane %v3666_v9, 1 }
 0x234   : > { %v3075_v19 = vsub.f32 %v11449_v42, %v16979_v45  ;;  %v3701_v45 = vadd.f32 %v3700_v35, %v11523_v28  ;;  %6449 = vmatpush2.msra.mxu0 %v6367_v29  ;;  %6834 = vmatpush2.msra.mxu1 %v6399_v32  ;;  %v11549_v34 = vadd.f32 %v3678_v59, %v11412_v3  ;;  %v16985_v35 = vld [vmem:[#allocation87_spill] sm:$0xff]  ;;  %8571 = vrsqrt.f32 %v4669_v25 }
 0x235   : > { %v4639_v6 = vmax.f32 %v16981_v52, 0.0  ;;  %v11553_v17 = vadd.f32 %v11386_v44, %v16983_v57  ;;  %v4011_v1 = vmul.f32 %v11509_v62, %v11509_v62  ;;  %6450 = vmatprep.subr.mxu0 %v16866_v38  ;;  %v4338_v5 = vadd.f32 %v4337_v39, %v4336_v33  ;;  %6835 = vmatprep.subr.mxu1 %v16866_v38  ;;  %v6365_v57 = vld [vmem:[#allocation2 + $0xd0] sm:$0xff]  ;;  %v16988_v52 = vld [vmem:[#allocation57_spill] sm:$0xff] }
 0x236   : > { %16982 = vst [vmem:[#allocation212_spill] sm:$0xff] %v11549_v34  ;;  %v3702_v7 = vrot.slane %v3701_v45, 4  ;;  %v16986_v29 = vrot.slane %v16985_v35, %v9082_v12  ;;  %v11563_v3 = vadd.f32 %v9110_v22, %v3075_v19  ;;  %6451 = vmatpush2.msra.mxu0 %v6366_v11  ;;  %v4352_v44 = vrot.slane %v4351_v18, 1  ;;  %6836 = vmatpush2.msra.mxu1 %v6398_v47  ;;  %v6397_v39 = vld [vmem:[#allocation2 + $0x1d0] sm:$0xff]  ;;  %v6396_v34 = vld [vmem:[#allocation2 + $0x1c8] sm:$0xff] }
 0x237   : > { %16984 = vst [vmem:[#allocation51_spill] sm:$0xff] %v11553_v17  ;;  %v4015_v59 = vmul.f32 %v11523_v28, %v11523_v28  ;;  %v4372_v14 = vadd.f32 %v4371_v40, %v4011_v1  ;;  %v11569_v33 = vadd.f32 %v972_v50, %v16988_v52  ;;  %v4672_v62 = vadd.f32 1e-05, %v4639_v6  ;;  %6452 = vmatprep.subr.mxu0 %v16866_v38  ;;  %v16989_v1 = vld [vmem:[#allocation84_spill] sm:$0xff]  ;;  %v16991_v6 = vld [vmem:[#allocation85_spill] sm:$0xff] }
 0x238   : > { %v3079_v32 = vsub.f32 %v11449_v42, %v16986_v29  ;;  %16987 = vst [vmem:[#allocation248_spill] sm:$0xff] %v11563_v3  ;;  %v3722_v29 = vadd.f32 %v3721_v31, %v11563_v3  ;;  %v4017_v19 = vmul.f32 %v11516_v4, %v11516_v4  ;;  %v4021_v11 = vmul.f32 %v11528_v56, %v11528_v56  ;;  %v6364_v4 = vld [vmem:[#allocation2 + $0xc8] sm:$0xff] }
 0x239   : > { %6837 = vmatprep.subr.mxu1 %v16866_v38  ;;  %v3668_v28 = vadd.f32 %v3667_v10, %v3666_v9  ;;  %v3703_v40 = vadd.f32 %v3702_v7, %v3701_v45  ;;  %v16990_v50 = vrot.slane %v16989_v1, %v9082_v12  ;;  %v16992_v31 = vrot.slane %v16991_v6, %v9082_v12  ;;  %v16995_v45 = vld [vmem:[#allocation88_spill] sm:$0xff] }
 0x23a   : > { %6453 = vmatpush2.msra.mxu0 %v6365_v57  ;;  %v4339_v56 = vrot.slane %v4338_v5, 1  ;;  %v16993_v48 = vrot.slane %v16927_v51, %v9103_v20  ;;  %v16996_v10 = vrot.slane %v16995_v45, %v9082_v12  ;;  %6838 = vmatpush2.msra.mxu1 %v6397_v39  ;;  %v11600_v57 = vadd.f32 %v4352_v44, %v4351_v18  ;;  %v17000_v39 = vld [vmem:[#allocation89_spill] sm:$0xff] }
 0x23b   : > { %v3083_v47 = vsub.f32 %v11449_v42, %v16990_v50  ;;  %v3087_v52 = vsub.f32 %v11449_v42, %v16992_v31  ;;  %v11597_v50 = vadd.f32 %v9110_v22, %v3079_v32  ;;  %6454 = vmatprep.subr.mxu0 %v16866_v38  ;;  %v4373_v31 = vadd.f32 %v4372_v14, %v4015_v59  ;;  %v6363_v32 = vld [vmem:[#allocation2 + $0xc0] sm:$0xff] }
 0x23c   : > { %v11590_v9 = vsub.f32 %v11553_v17, %v16993_v48  ;;  %v3091_v7 = vsub.f32 %v11449_v42, %v16996_v10  ;;  %v16998_v41 = vrot.slane %v16900_v36, %v9106_v21  ;;  %6839 = vmatprep.subr.mxu1 %v16866_v38  ;;  %v17001_v10 = vrot.slane %v17000_v39, %v9082_v12 }
 0x23d   : > { %16997 = vst [vmem:[#allocation249_spill] sm:$0xff] %v11597_v50  ;;  %v3723_v44 = vadd.f32 %v3722_v29, %v11597_v50  ;;  %v4393_v59 = vadd.f32 %v4021_v11, %v4017_v19  ;;  %6455 = vmatpush2.msra.mxu0 %v6364_v4  ;;  %6840 = vmatpush2.msra.mxu1 %v6396_v34  ;;  %v11616_v14 = vmul.f32 0.015625, %v3668_v28  ;;  %8573 = vrsqrt.f32 %v4672_v62  ;;  %v6362_v28 = vld [vmem:[#allocation2 + $0xb8] sm:$0xff] }
 0x23e   : > { %16994 = vst [vmem:[#allocation57_spill] sm:$0xff] %v11590_v9  ;;  %v3038_v48 = vsub.f32 %v11569_v33, %v16998_v41  ;;  %v16999_v9 = vrot.slane %v16903_v8, %v9106_v21  ;;  %v3095_v18 = vsub.f32 %v11449_v42, %v17001_v10  ;;  %v6395_v41 = vld [vmem:[#allocation2 + $0x1c0] sm:$0xff]  ;;  %v3704_v8 = vrot.slane %v3703_v40, 2  ;;  %6456 = vmatprep.subr.mxu0 %v16866_v38 }
 0x23f   : > { %17002 = vst [vmem:[#allocation89_spill] sm:$0xff] %v11616_v14  ;;  %v11622_v36 = vadd.f32 %v9110_v22, %v3087_v52  ;;  %v4340_v25 = vadd.f32 %v4339_v56, %v4338_v5  ;;  %v11626_v42 = vadd.f32 %v9110_v22, %v3091_v7  ;;  %v4025_v4 = vmul.f32 %v11563_v3, %v11563_v3  ;;  %v6394_v56 = vld [vmem:[#allocation2 + $0x1b8] sm:$0xff] }
 0x240   : > { %v3042_v17 = vsub.f32 %v11569_v33, %v16999_v9  ;;  %v11619_v9 = vadd.f32 %v9110_v22, %v3083_v47  ;;  %6841 = vmatprep.subr.mxu1 %v16866_v38  ;;  %6457 = vmatpush2.msra.mxu0 %v6363_v32  ;;  %v4374_v34 = vrot.slane %v4373_v31, 4  ;;  %v17006_v29 = vrot.slane %v16909_v2, %v9106_v21 }
 0x241   : > { %17004 = vst [vmem:[#allocation251_spill] sm:$0xff] %v11622_v36  ;;  %17005 = vst [vmem:[#allocation252_spill] sm:$0xff] %v11626_v42  ;;  %v11636_v11 = vadd.f32 %v10072_v55, %v3038_v48  ;;  %6842 = vmatpush2.msra.mxu1 %v6395_v41  ;;  %v17009_v5 = vsub.f32 %v11469_v60, %v11305_v23  ;;  %v11647_v52 = vadd.f32 %v9110_v22, %v3095_v18  ;;  %v6361_v18 = vld [vmem:[#allocation2 + $0xb0] sm:$0xff] }
 0x242   : > { %17003 = vst [vmem:[#allocation250_spill] sm:$0xff] %v11619_v9  ;;  %v3046_v19 = vsub.f32 %v11569_v33, %v17006_v29  ;;  %v11639_v62 = vadd.f32 %v10072_v55, %v3042_v17  ;;  %v3724_v7 = vadd.f32 %v3723_v44, %v11619_v9  ;;  %v4394_v32 = vadd.f32 %v4393_v59, %v4025_v4 }
 0x243   : > { %17007 = vst [vmem:[#allocation253_spill] sm:$0xff] %v11636_v11  ;;  %v11644_v47 = vmax.f32 %v17009_v5, 0.0  ;;  %17010 = vst [vmem:[#allocation255_spill] sm:$0xff] %v11647_v52  ;;  %6458 = vmatprep.subr.mxu0 %v16866_v38  ;;  %6843 = vmatprep.subr.mxu1 %v16866_v38  ;;  %v11654_v17 = vmul.f32 %v11616_v14, %v11616_v14  ;;  %v3705_v48 = vadd.f32 %v3704_v8, %v3703_v40  ;;  %v6393_v40 = vld [vmem:[#allocation2 + $0x1b0] sm:$0xff] }
 0x244   : > { %17008 = vst [vmem:[#allocation254_spill] sm:$0xff] %v11639_v62  ;;  %v4029_v23 = vmul.f32 %v11597_v50, %v11597_v50  ;;  %v17011_v60 = vrot.slane %v16913_v43, %v9106_v21  ;;  %6459 = vmatpush2.msra.mxu0 %v6362_v28  ;;  %v11662_v44 = vmul.f32 0.015625, %v4340_v25  ;;  %v4033_v59 = vmul.f32 %v11619_v9, %v11619_v9  ;;  %v6360_v9 = vld [vmem:[#allocation2 + $0xa8] sm:$0xff] }
 0x245   : > { %v11668_v41 = vmul.f32 %v11622_v36, %v11622_v36  ;;  %v11672_v8 = vmul.f32 %v11626_v42, %v11626_v42  ;;  %6844 = vmatpush2.msra.mxu1 %v6394_v56  ;;  %6460 = vmatprep.subr.mxu0 %v16866_v38  ;;  %v11675_v4 = vadd.f32 %v4374_v34, %v4373_v31  ;;  %v3706_v50 = vrot.slane %v3705_v48, 1 }
 0x246   : > { %v3050_v10 = vsub.f32 %v11569_v33, %v17011_v60  ;;  %v17012_v25 = vrot.slane %v16915_v58, %v9106_v21  ;;  %v11682_v29 = vadd.f32 %v10072_v55, %v3046_v19  ;;  %v3708_v5 = vadd.f32 %v11639_v62, %v11636_v11  ;;  %6845 = vmatprep.subr.mxu1 %v16866_v38 }
 0x247   : > { %v3725_v56 = vadd.f32 %v3724_v7, %v11622_v36  ;;  %v4395_v60 = vadd.f32 %v4394_v32, %v4029_v23  ;;  %v3988_v31 = vmul.f32 %v11636_v11, %v11636_v11  ;;  %v3992_v34 = vmul.f32 %v11639_v62, %v11639_v62  ;;  %6461 = vmatpush2.msra.mxu0 %v6361_v18  ;;  %v976_v62 = vpop.f32.mrf.mxu1  ;;  %v6391_v18 = vld [vmem:[#allocation2 + $0x1a0] sm:$0xff] }
 0x248   : > { %v3054_v28 = vsub.f32 %v11569_v33, %v17012_v25  ;;  %17013 = vst [vmem:[#allocation256_spill] sm:$0xff] %v11682_v29  ;;  %v6392_v25 = vld [vmem:[#allocation2 + $0x1a8] sm:$0xff]  ;;  %v17014_v19 = vrot.slane %v16919_v24, %v9106_v21  ;;  %v11697_v14 = vadd.f32 %v10072_v55, %v3050_v10  ;;  %v3709_v7 = vadd.f32 %v3708_v5, %v11682_v29 }
 0x249   : > { %6846 = vmatpush2.msra.mxu1 %v6393_v40  ;;  %v17016_v32 = vsub.f32 %v11506_v61, %v11404_v30  ;;  %v11707_v36 = vmul.f32 %v11647_v52, %v11647_v52  ;;  %6462 = vmatprep.subr.mxu0 %v16866_v38  ;;  %v4376_v30 = vrot.slane %v11675_v4, 2  ;;  %v17018_v61 = vrot.slane %v16927_v51, %v9106_v21  ;;  %v11728_v51 = vpop.eup %8571 }
 0x24a   : > { %v3058_v3 = vsub.f32 %v11569_v33, %v17014_v19  ;;  %17015 = vst [vmem:[#allocation257_spill] sm:$0xff] %v11697_v14  ;;  %v17017_v19 = vrot.slane %v16923_v53, %v9106_v21  ;;  %6847 = vmatprep.subr.mxu1 %v16866_v38  ;;  %v11721_v5 = vadd.f32 %v10072_v55, %v3054_v28 }
 0x24b   : > { %v4643_v23 = vmax.f32 %v17016_v32, 0.0  ;;  %v3066_v40 = vsub.f32 %v11569_v33, %v17018_v61  ;;  %v3710_v32 = vadd.f32 %v3709_v7, %v11697_v14  ;;  %6463 = vmatpush2.msra.mxu0 %v6360_v9  ;;  %6848 = vmatpush2.msra.mxu1 %v6392_v25  ;;  %v3726_v11 = vadd.f32 %v3725_v56, %v11626_v42  ;;  %v17021_v25 = vld [vmem:[#allocation66_spill] sm:$0xff]  ;;  %v6390_v56 = vld [vmem:[#allocation2 + $0x198] sm:$0xff] }
 0x24c   : > { %v3062_v10 = vsub.f32 %v11569_v33, %v17017_v19  ;;  %17019 = vst [vmem:[#allocation258_spill] sm:$0xff] %v11721_v5  ;;  %v6359_v19 = vld [vmem:[#allocation2 + $0xa0] sm:$0xff]  ;;  %v4396_v53 = vadd.f32 %v4395_v60, %v4033_v59  ;;  %v3996_v24 = vmul.f32 %v11682_v29, %v11682_v29  ;;  %v4380_v58 = vadd.f32 %v3992_v34, %v3988_v31  ;;  %v6358_v59 = vld [vmem:[#allocation2 + $0x98] sm:$0xff] }
 0x24d   : > { %6464 = vmatprep.subr.mxu0 %v16866_v38  ;;  %v11730_v33 = vadd.f32 %v3706_v50, %v3705_v48  ;;  %v11733_v28 = vadd.f32 %v10072_v55, %v3058_v3  ;;  %v3711_v9 = vadd.f32 %v3710_v32, %v11721_v5  ;;  %v11737_v7 = vadd.f32 %v976_v62, %v17021_v25  ;;  %v11746_v3 = vpop.eup %8573  ;;  %v6389_v25 = vld [vmem:[#allocation2 + $0x190] sm:$0xff]  ;;  %v17055_v29 = vld [vmem:[#allocation100_spill] sm:$0xff] }
 0x24e   : > { %6849 = vmatprep.subr.mxu1 %v16866_v38  ;;  %v4673_v60 = vadd.f32 1e-05, %v11644_v47  ;;  %v11742_v31 = vadd.f32 %v10072_v55, %v3062_v10  ;;  %v4000_v50 = vmul.f32 %v11697_v14, %v11697_v14  ;;  %v4381_v48 = vadd.f32 %v4380_v58, %v3996_v24  ;;  %6465 = vmatpush2.msra.mxu0 %v6359_v19  ;;  %v6357_v24 = vld [vmem:[#allocation2 + $0x90] sm:$0xff] }
 0x24f   : > { %17020 = vst [vmem:[#allocation259_spill] sm:$0xff] %v11733_v28  ;;  %6850 = vmatpush2.msra.mxu1 %v6391_v18  ;;  %17023 = vst [vmem:[#allocation260_spill] sm:$0xff] %v11746_v3  ;;  %v4676_v34 = vadd.f32 1e-05, %v4643_v23  ;;  %v3712_v62 = vadd.f32 %v3711_v9, %v11733_v28  ;;  %v17024_v61 = vrot.slane %v16968_v13, %v9092_v16  ;;  %6466 = vmatprep.subr.mxu0 %v16866_v38  ;;  %v11765_v9 = vpop.f32.mrf.mxu0  ;;  %v17252_v3 = vld [vmem:[#allocation110_spill] sm:$0xff] }
 0x250   : > { %17022 = vst [vmem:[#allocation66_spill] sm:$0xff] %v11742_v31  ;;  %v17025_v47 = vrot.slane %v16972_v54, %v9092_v16  ;;  %6851 = vmatprep.subr.mxu1 %v16866_v38  ;;  %v11760_v58 = vmul.f32 0.015625, %v11294_v49  ;;  %v4397_v23 = vadd.f32 %v4396_v53, %v11668_v41  ;;  %v4004_v18 = vmul.f32 %v11721_v5, %v11721_v5 }
 0x251   : > { %v3069_v32 = vsub.f32 %v11737_v7, %v17024_v61  ;;  %v4382_v19 = vadd.f32 %v4381_v48, %v4000_v50  ;;  %6467 = vmatpush2.msra.mxu0 %v6358_v59  ;;  %6852 = vmatpush2.msra.mxu1 %v6390_v56  ;;  %v11768_v61 = vadd.f32 %v4376_v30, %v11675_v4  ;;  %8575 = vrsqrt.f32 %v4673_v60  ;;  %v6356_v30 = vld [vmem:[#allocation2 + $0x88] sm:$0xff] }
 0x252   : > { %v3073_v10 = vsub.f32 %v11737_v7, %v17025_v47  ;;  %17026 = vst [vmem:[#allocation261_spill] sm:$0xff] %v11760_v58  ;;  %v11771_v47 = vadd.f32 %v10072_v55, %v3066_v40  ;;  %v3713_v49 = vadd.f32 %v3712_v62, %v11742_v31  ;;  %v17028_v53 = vrot.slane %v16978_v63, %v9092_v16  ;;  %v6388_v40 = vld [vmem:[#allocation2 + $0x188] sm:$0xff] }
 0x253   : > { %6468 = vmatprep.subr.mxu0 %v16866_v38  ;;  %v3727_v59 = vadd.f32 %v3726_v11, %v11647_v52  ;;  %v4008_v56 = vmul.f32 %v11733_v28, %v11733_v28  ;;  %v4383_v4 = vadd.f32 %v4382_v19, %v4004_v18  ;;  %6853 = vmatprep.subr.mxu1 %v16866_v38  ;;  %8577 = vrsqrt.f32 %v4676_v34  ;;  %v869_v19 = vpop.f32.mrf.mxu0 }
 0x254   : > { %17027 = vst [vmem:[#allocation262_spill] sm:$0xff] %v11771_v47  ;;  %v3077_v41 = vsub.f32 %v11737_v7, %v17028_v53  ;;  %6469 = vmatpush2.msra.mxu0 %v6357_v24  ;;  %v3714_v50 = vadd.f32 %v3713_v49, %v11771_v47  ;;  %v11785_v48 = vadd.f32 %v9120_v26, %v3069_v32  ;;  %v6355_v32 = vld [vmem:[#allocation2 + $0x80] sm:$0xff] }
 0x255   : > { %v11788_v62 = vadd.f32 %v9120_v26, %v3073_v10  ;;  %6854 = vmatpush2.msra.mxu1 %v6389_v25  ;;  %6470 = vmatprep.subr.mxu0 %v16866_v38  ;;  %v4398_v11 = vadd.f32 %v4397_v23, %v11672_v8  ;;  %v4012_v60 = vmul.f32 %v11742_v31, %v11742_v31 }
 0x256   : > { %17029 = vst [vmem:[#allocation263_spill] sm:$0xff] %v11785_v48  ;;  %v4384_v24 = vadd.f32 %v4383_v4, %v4008_v56  ;;  %v17031_v34 = vrot.slane %v16985_v35, %v9092_v16  ;;  %6855 = vmatprep.subr.mxu1 %v16866_v38  ;;  %v17032_v10 = vsub.f32 %v11662_v44, %v11654_v17  ;;  %v3715_v56 = vrot.slane %v3714_v50, 4 }
 0x257   : > { %17030 = vst [vmem:[#allocation264_spill] sm:$0xff] %v11788_v62  ;;  %v4016_v8 = vmul.f32 %v11771_v47, %v11771_v47  ;;  %v17033_v23 = vrot.slane %v16989_v1, %v9092_v16  ;;  %v11811_v53 = vadd.f32 %v9120_v26, %v3077_v41  ;;  %6471 = vmatpush2.msra.mxu0 %v6356_v30 }
 0x258   : > { %v3081_v18 = vsub.f32 %v11737_v7, %v17031_v34  ;;  %v11802_v25 = vmax.f32 %v17032_v10, 0.0  ;;  %6856 = vmatpush2.msra.mxu1 %v6388_v40  ;;  %v4385_v4 = vadd.f32 %v4384_v24, %v4012_v60  ;;  %v3747_v17 = vadd.f32 %v11788_v62, %v11785_v48  ;;  %6472 = vmatprep.subr.mxu0 %v16866_v38  ;;  %v17036_v40 = vld [vmem:[#allocation70_spill] sm:$0xff] }
 0x259   : > { %v3085_v49 = vsub.f32 %v11737_v7, %v17033_v23  ;;  %17034 = vst [vmem:[#allocation265_spill] sm:$0xff] %v11811_v53  ;;  %v4019_v44 = vmul.f32 %v11785_v48, %v11785_v48  ;;  %v4378_v34 = vrot.slane %v11768_v61, 1  ;;  %v17035_v10 = vrot.slane %v16991_v6, %v9092_v16  ;;  %6857 = vmatprep.subr.mxu1 %v16866_v38 }
 0x25a   : > { %v4023_v30 = vmul.f32 %v11788_v62, %v11788_v62  ;;  %v11826_v60 = vadd.f32 %v869_v19, %v17036_v40  ;;  %6473 = vmatpush2.msra.mxu0 %v6355_v32  ;;  %v11830_v24 = vmul.f32 0.015625, %v11730_v33  ;;  %v4386_v23 = vadd.f32 %v4385_v4, %v4016_v8 }
 0x25b   : > { %v3089_v41 = vsub.f32 %v11737_v7, %v17035_v10  ;;  %v11833_v52 = vadd.f32 %v9120_v26, %v3081_v18  ;;  %v3748_v42 = vadd.f32 %v3747_v17, %v11811_v53  ;;  %v3728_v48 = vrot.slane %v3727_v59, 4  ;;  %v17043_v17 = vld [vmem:[#allocation91_spill] sm:$0xff] }
 0x25c   : > { %17037 = vst [vmem:[#allocation70_spill] sm:$0xff] %v11830_v24  ;;  %v4399_v10 = vadd.f32 %v4398_v11, %v11707_v36  ;;  %v17039_v62 = vrot.slane %v16995_v45, %v9092_v16  ;;  %v11842_v38 = vadd.f32 %v9120_v26, %v3085_v49  ;;  %v3716_v32 = vadd.f32 %v3715_v56, %v3714_v50  ;;  %v17045_v50 = vld [vmem:[#allocation93_spill] sm:$0xff] }
 0x25d   : > { %17038 = vst [vmem:[#allocation266_spill] sm:$0xff] %v11833_v52  ;;  %v3749_v33 = vadd.f32 %v3748_v42, %v11833_v52  ;;  %v4027_v18 = vmul.f32 %v11811_v53, %v11811_v53  ;;  %v4419_v8 = vadd.f32 %v4023_v30, %v4019_v44  ;;  %v17041_v4 = vrot.slane %v17000_v39, %v9092_v16 }
 0x25e   : > { %v3093_v19 = vsub.f32 %v11737_v7, %v17039_v62  ;;  %17040 = vst [vmem:[#allocation267_spill] sm:$0xff] %v11842_v38  ;;  %v11852_v11 = vadd.f32 %v9120_v26, %v3089_v41  ;;  %v17044_v62 = vrot.slane %v17043_v17, %v9082_v12  ;;  %v17046_v42 = vrot.slane %v17045_v50, %v9082_v12  ;;  %v11872_v5 = vpop.eup %8575 }
 0x25f   : > { %v3097_v36 = vsub.f32 %v11737_v7, %v17041_v4  ;;  %v4387_v40 = vrot.slane %v4386_v23, 4  ;;  %v3750_v44 = vadd.f32 %v3749_v33, %v11842_v38  ;;  %v4031_v30 = vmul.f32 %v11833_v52, %v11833_v52  ;;  %17048 = vst [vmem:[#allocation270_spill] sm:$0xff] %v11872_v5 }
 0x260   : > { %17042 = vst [vmem:[#allocation268_spill] sm:$0xff] %v11852_v11  ;;  %v3099_v49 = vsub.f32 %v11826_v60, %v17044_v62  ;;  %v3103_v56 = vsub.f32 %v11826_v60, %v17046_v42  ;;  %v4420_v7 = vadd.f32 %v4419_v8, %v4027_v18  ;;  %v4379_v41 = vadd.f32 %v4378_v34, %v11768_v61  ;;  %v17050_v18 = vld [vmem:[#allocation97_spill] sm:$0xff] }
 0x261   : > { %v3729_v4 = vadd.f32 %v3728_v48, %v3727_v59  ;;  %v4400_v53 = vrot.slane %v4399_v10, 4  ;;  %v11867_v47 = vadd.f32 %v9120_v26, %v3093_v19  ;;  %v3717_v62 = vrot.slane %v3716_v32, 2  ;;  %v11887_v19 = vpop.eup %8577 }
 0x262   : > { %v3751_v31 = vadd.f32 %v3750_v44, %v11852_v11  ;;  %v4035_v42 = vmul.f32 %v11842_v38, %v11842_v38  ;;  %v4421_v28 = vadd.f32 %v4420_v7, %v4031_v30  ;;  %v11875_v33 = vadd.f32 %v9120_v26, %v3097_v36  ;;  %17054 = vst [vmem:[#allocation274_spill] sm:$0xff] %v11887_v19  ;;  %v17060_v19 = vld [vmem:[#allocation92_spill] sm:$0xff] }
 0x263   : > { %17047 = vst [vmem:[#allocation269_spill] sm:$0xff] %v11867_v47  ;;  %v17051_v61 = vrot.slane %v17050_v18, %v9082_v12  ;;  %v11882_v48 = vadd.f32 %v9110_v22, %v3099_v49  ;;  %v11885_v34 = vadd.f32 %v9110_v22, %v3103_v56  ;;  %v4388_v8 = vadd.f32 %v4387_v40, %v4386_v23  ;;  %v978_v40 = vpop.f32.mrf.mxu1 }
 0x264   : > { %17049 = vst [vmem:[#allocation271_spill] sm:$0xff] %v11875_v33  ;;  %v3752_v44 = vadd.f32 %v3751_v31, %v11867_v47  ;;  %v4039_v36 = vmul.f32 %v11852_v11, %v11852_v11  ;;  %v4422_v30 = vadd.f32 %v4421_v28, %v4035_v42  ;;  %v4551_v7 = vmul.f32 0.015625, %v4379_v41 }
 0x265   : > { %v3107_v59 = vsub.f32 %v11826_v60, %v17051_v61  ;;  %17052 = vst [vmem:[#allocation272_spill] sm:$0xff] %v11882_v48  ;;  %17053 = vst [vmem:[#allocation273_spill] sm:$0xff] %v11885_v34  ;;  %v4583_v38 = vmul.f32 %v11830_v24, %v11830_v24  ;;  %v4401_v61 = vadd.f32 %v4400_v53, %v4399_v10  ;;  %v4389_v42 = vrot.slane %v4388_v8, 2 }
 0x266   : > { %v4043_v49 = vmul.f32 %v11867_v47, %v11867_v47  ;;  %v3718_v52 = vadd.f32 %v3717_v62, %v3716_v32  ;;  %v3753_v56 = vadd.f32 %v3752_v44, %v11875_v33  ;;  %v4423_v14 = vadd.f32 %v4422_v30, %v4039_v36 }
 0x267   : > { %v17056_v23 = vrot.slane %v17055_v29, %v9082_v12  ;;  %v11902_v28 = vadd.f32 %v9110_v22, %v3107_v59  ;;  %v3773_v41 = vadd.f32 %v11885_v34, %v11882_v48  ;;  %v4049_v53 = vmul.f32 %v11882_v48, %v11882_v48 }
 0x268   : > { %v4053_v10 = vmul.f32 %v11885_v34, %v11885_v34  ;;  %v4677_v32 = vadd.f32 1e-05, %v11802_v25  ;;  %v3730_v62 = vrot.slane %v3729_v4, 2  ;;  %v4424_v44 = vadd.f32 %v4423_v14, %v4043_v49 }
 0x269   : > { %v3111_v31 = vsub.f32 %v11826_v60, %v17056_v23  ;;  %17057 = vst [vmem:[#allocation275_spill] sm:$0xff] %v11902_v28  ;;  %v11912_v36 = vmul.f32 0.015625, %v11600_v57  ;;  %v4615_v30 = vsub.f32 %v4551_v7, %v4583_v38  ;;  %v4402_v59 = vrot.slane %v4401_v61, 2  ;;  %v17059_v23 = vld [vmem:[#allocation69_spill] sm:$0xff] }
 0x26a   : > { %v11915_v47 = vadd.f32 %v978_v40, %v17059_v23  ;;  %v3719_v11 = vrot.slane %v3718_v52, 1  ;;  %v3754_v24 = vrot.slane %v3753_v56, 4  ;;  %v4047_v48 = vmul.f32 %v11875_v33, %v11875_v33  ;;  %v17064_v33 = vld [vmem:[#allocation63_spill] sm:$0xff] }
 0x26b   : > { %17058 = vst [vmem:[#allocation276_spill] sm:$0xff] %v11912_v36  ;;  %v17061_v34 = vrot.slane %v17060_v19, %v9082_v12  ;;  %v11924_v14 = vadd.f32 %v9110_v22, %v3111_v31  ;;  %v3774_v57 = vadd.f32 %v3773_v41, %v11902_v28  ;;  %v4057_v38 = vmul.f32 %v11902_v28, %v11902_v28 }
 0x26c   : > { %v4445_v7 = vadd.f32 %v4053_v10, %v4049_v53  ;;  %8579 = vrsqrt.f32 %v4677_v32  ;;  %v11929_v49 = vadd.f32 %v3730_v62, %v3729_v4  ;;  %v4390_v40 = vadd.f32 %v4389_v42, %v4388_v8 }
 0x26d   : > { %v3115_v25 = vsub.f32 %v11826_v60, %v17061_v34  ;;  %17062 = vst [vmem:[#allocation69_spill] sm:$0xff] %v11924_v14  ;;  %v4425_v23 = vadd.f32 %v4424_v44, %v4047_v48  ;;  %v11933_v36 = vadd.f32 %v11765_v9, %v17064_v33  ;;  %v17066_v34 = vrot.slane %v16968_v13, %v9106_v21  ;;  %v17068_v48 = vld [vmem:[#allocation94_spill] sm:$0xff] }
 0x26e   : > { %17063 = vst [vmem:[#allocation277_spill] sm:$0xff] %v11929_v49  ;;  %v4446_v43 = vadd.f32 %v4445_v7, %v4057_v38  ;;  %v17067_v41 = vrot.slane %v16972_v54, %v9106_v21  ;;  %v4647_v10 = vmax.f32 %v4615_v30, 0.0  ;;  %v11943_v4 = vadd.f32 %v4402_v59, %v4401_v61  ;;  %v17071_v30 = vld [vmem:[#allocation98_spill] sm:$0xff] }
 0x26f   : > { %17065 = vst [vmem:[#allocation63_spill] sm:$0xff] %v11933_v36  ;;  %v3070_v31 = vsub.f32 %v11915_v47, %v17066_v34  ;;  %v3755_v8 = vadd.f32 %v3754_v24, %v3753_v56  ;;  %v17069_v32 = vrot.slane %v17068_v48, %v9082_v12  ;;  %v3720_v33 = vadd.f32 %v3719_v11, %v3718_v52  ;;  %v17073_v56 = vld [vmem:[#allocation101_spill] sm:$0xff] }
 0x270   : > { %v3074_v53 = vsub.f32 %v11915_v47, %v17067_v41  ;;  %v11950_v62 = vadd.f32 %v9110_v22, %v3115_v25  ;;  %v3775_v42 = vadd.f32 %v3774_v57, %v11924_v14  ;;  %v4061_v44 = vmul.f32 %v11924_v14, %v11924_v14 }
 0x271   : > { %v3119_v9 = vsub.f32 %v11826_v60, %v17069_v32  ;;  %v4391_v38 = vrot.slane %v4390_v40, 1  ;;  %v4426_v7 = vrot.slane %v4425_v23, 4  ;;  %v17072_v61 = vrot.slane %v17071_v30, %v9082_v12 }
 0x272   : > { %17070 = vst [vmem:[#allocation278_spill] sm:$0xff] %v11950_v62  ;;  %v17074_v59 = vrot.slane %v17073_v56, %v9082_v12  ;;  %v4447_v11 = vadd.f32 %v4446_v43, %v4061_v44  ;;  %v17075_v25 = vrot.slane %v16978_v63, %v9106_v21  ;;  %v11968_v34 = vadd.f32 %v10072_v55, %v3070_v31 }
 0x273   : > { %v3123_v24 = vsub.f32 %v11826_v60, %v17072_v61  ;;  %v11971_v41 = vadd.f32 %v10072_v55, %v3074_v53  ;;  %v11973_v32 = vadd.f32 1e-05, %v4647_v10  ;;  %v3756_v14 = vrot.slane %v3755_v8, 2 }
 0x274   : > { %v3127_v52 = vsub.f32 %v11826_v60, %v17074_v59  ;;  %v3078_v57 = vsub.f32 %v11915_v47, %v17075_v25  ;;  %17076 = vst [vmem:[#allocation101_spill] sm:$0xff] %v11968_v34  ;;  %v11977_v28 = vadd.f32 %v9110_v22, %v3119_v9  ;;  %v11979_v43 = vmul.f32 0.015625, %v3720_v33  ;;  %v6387_v33 = vld [vmem:[#allocation2 + $0x180] sm:$0xff] }
 0x275   : > { %17077 = vst [vmem:[#allocation279_spill] sm:$0xff] %v11971_v41  ;;  %v3776_v60 = vadd.f32 %v3775_v42, %v11950_v62  ;;  %v4065_v44 = vmul.f32 %v11950_v62, %v11950_v62  ;;  %v17080_v31 = vrot.slane %v16985_v35, %v9106_v21  ;;  %v4392_v10 = vadd.f32 %v4391_v38, %v4390_v40 }
 0x276   : > { %17078 = vst [vmem:[#allocation280_spill] sm:$0xff] %v11977_v28  ;;  %17079 = vst [vmem:[#allocation281_spill] sm:$0xff] %v11979_v43  ;;  %v4427_v59 = vadd.f32 %v4426_v7, %v4425_v23  ;;  %v11989_v25 = vadd.f32 %v9110_v22, %v3123_v24  ;;  %v11992_v9 = vadd.f32 %v9110_v22, %v3127_v52  ;;  %6858 = vmatpush2.msra.mxu1 %v6387_v33 }
 0x277   : > { %v3082_v53 = vsub.f32 %v11915_v47, %v17080_v31  ;;  %v4448_v61 = vadd.f32 %v4447_v11, %v4065_v44  ;;  %v17083_v42 = vrot.slane %v16989_v1, %v9106_v21  ;;  %v11999_v63 = vadd.f32 %v10072_v55, %v3078_v57 }
 0x278   : > { %17081 = vst [vmem:[#allocation282_spill] sm:$0xff] %v11989_v25  ;;  %17082 = vst [vmem:[#allocation283_spill] sm:$0xff] %v11992_v9  ;;  %v3760_v40 = vadd.f32 %v11971_v41, %v11968_v34  ;;  %v3757_v23 = vadd.f32 %v3756_v14, %v3755_v8  ;;  %v4069_v38 = vmul.f32 %v11977_v28, %v11977_v28  ;;  %v4428_v44 = vrot.slane %v4427_v59, 2 }
 0x279   : > { %v3086_v62 = vsub.f32 %v11915_v47, %v17083_v42  ;;  %17084 = vst [vmem:[#allocation284_spill] sm:$0xff] %v11999_v63  ;;  %v4020_v22 = vmul.f32 %v11968_v34, %v11968_v34  ;;  %v4024_v7 = vmul.f32 %v11971_v41, %v11971_v41  ;;  %v3777_v24 = vadd.f32 %v3776_v60, %v11977_v28  ;;  %v982_v42 = vpop.f32.mrf.mxu1  ;;  %v12026_v28 = vpop.eup %8579 }
 0x27a   : > { %v17085_v52 = vrot.slane %v16991_v6, %v9106_v21  ;;  %v12015_v57 = vadd.f32 %v10072_v55, %v3082_v53  ;;  %v3761_v14 = vadd.f32 %v3760_v40, %v11999_v63  ;;  %v4584_v8 = vmul.f32 %v11979_v43, %v11979_v43  ;;  %17088 = vst [vmem:[#allocation286_spill] sm:$0xff] %v12026_v28 }
 0x27b   : > { %v4073_v31 = vmul.f32 %v11989_v25, %v11989_v25  ;;  %v17087_v60 = vrot.slane %v16995_v45, %v9106_v21  ;;  %v4449_v53 = vadd.f32 %v4448_v61, %v4069_v38  ;;  %v12029_v41 = vadd.f32 %v10072_v55, %v3086_v62  ;;  %v17092_v61 = vld [vmem:[#allocation80_spill] sm:$0xff] }
 0x27c   : > { %v3090_v11 = vsub.f32 %v11915_v47, %v17085_v52  ;;  %17086 = vst [vmem:[#allocation285_spill] sm:$0xff] %v12015_v57  ;;  %v4552_v52 = vmul.f32 0.015625, %v4392_v10  ;;  %v3762_v40 = vadd.f32 %v3761_v14, %v12015_v57  ;;  %v3758_v34 = vrot.slane %v3757_v23, 1 }
 0x27d   : > { %v3094_v33 = vsub.f32 %v11915_v47, %v17087_v60  ;;  %17089 = vst [vmem:[#allocation287_spill] sm:$0xff] %v12029_v41  ;;  %v17090_v43 = vrot.slane %v17000_v39, %v9106_v21  ;;  %v4028_v45 = vmul.f32 %v11999_v63, %v11999_v63  ;;  %v4432_v60 = vadd.f32 %v4024_v7, %v4020_v22  ;;  %v17119_v63 = vld [vmem:[#allocation75_spill] sm:$0xff] }
 0x27e   : > { %v3778_v1 = vadd.f32 %v3777_v24, %v11989_v25  ;;  %v12040_v10 = vadd.f32 %v10072_v55, %v3090_v11  ;;  %v3763_v62 = vadd.f32 %v3762_v40, %v12029_v41  ;;  %v1017_v38 = vadd.f32 %v982_v42, %v17092_v61 }
 0x27f   : > { %v3098_v6 = vsub.f32 %v11915_v47, %v17090_v43  ;;  %v4429_v14 = vadd.f32 %v4428_v44, %v4427_v59  ;;  %v12045_v28 = vadd.f32 %v10072_v55, %v3094_v33  ;;  %v4032_v47 = vmul.f32 %v12015_v57, %v12015_v57 }
 0x280   : > { %17091 = vst [vmem:[#allocation288_spill] sm:$0xff] %v12040_v10  ;;  %v4433_v43 = vadd.f32 %v4432_v60, %v4028_v45  ;;  %v4450_v35 = vadd.f32 %v4449_v53, %v4073_v31  ;;  %v3764_v22 = vadd.f32 %v3763_v62, %v12040_v10  ;;  %v17094_v7 = vrot.slane %v17043_v17, %v9092_v16 }
 0x281   : > { %17093 = vst [vmem:[#allocation80_spill] sm:$0xff] %v12045_v28  ;;  %v17095_v11 = vrot.slane %v17045_v50, %v9092_v16  ;;  %v4616_v42 = vsub.f32 %v4552_v52, %v4584_v8  ;;  %v4077_v59 = vmul.f32 %v11992_v9, %v11992_v9  ;;  %v4036_v44 = vmul.f32 %v12029_v41, %v12029_v41 }
 0x282   : > { %v3101_v24 = vsub.f32 %v1017_v38, %v17094_v7  ;;  %v4434_v33 = vadd.f32 %v4433_v43, %v4032_v47  ;;  %v3759_v45 = vadd.f32 %v3758_v34, %v3757_v23  ;;  %v12061_v31 = vadd.f32 %v10072_v55, %v3098_v6  ;;  %v984_v23 = vpop.f32.mrf.mxu1 }
 0x283   : > { %v3105_v40 = vsub.f32 %v1017_v38, %v17095_v11  ;;  %v3765_v53 = vadd.f32 %v3764_v22, %v12045_v28  ;;  %v17097_v60 = vrot.slane %v17050_v18, %v9092_v16  ;;  %v4430_v61 = vrot.slane %v4429_v14, 1 }
 0x284   : > { %17096 = vst [vmem:[#allocation289_spill] sm:$0xff] %v12061_v31  ;;  %v3779_v8 = vadd.f32 %v3778_v1, %v11992_v9  ;;  %v4040_v52 = vmul.f32 %v12040_v10, %v12040_v10  ;;  %v4435_v7 = vadd.f32 %v4434_v33, %v4036_v44  ;;  %v4451_v11 = vadd.f32 %v4450_v35, %v4077_v59 }
 0x285   : > { %v3109_v62 = vsub.f32 %v1017_v38, %v17097_v60  ;;  %v3766_v47 = vadd.f32 %v3765_v53, %v12061_v31  ;;  %v12072_v34 = vadd.f32 %v9120_v26, %v3101_v24  ;;  %v12075_v6 = vadd.f32 %v9120_v26, %v3105_v40 }
 0x286   : > { %v4648_v43 = vmax.f32 %v4616_v42, 0.0  ;;  %v4044_v22 = vmul.f32 %v12045_v28, %v12045_v28  ;;  %v4436_v60 = vadd.f32 %v4435_v7, %v4040_v52  ;;  %v17100_v1 = vrot.slane %v17055_v29, %v9092_v16  ;;  %v17104_v52 = vld [vmem:[#allocation81_spill] sm:$0xff] }
 0x287   : > { %17098 = vst [vmem:[#allocation290_spill] sm:$0xff] %v12072_v34  ;;  %17099 = vst [vmem:[#allocation291_spill] sm:$0xff] %v12075_v6  ;;  %v12082_v44 = vmul.f32 0.015625, %v3759_v45  ;;  %v3767_v35 = vrot.slane %v3766_v47, 4  ;;  %v17102_v24 = vrot.slane %v17060_v19, %v9092_v16  ;;  %v12088_v40 = vadd.f32 %v9120_v26, %v3109_v62 }
 0x288   : > { %v3113_v9 = vsub.f32 %v1017_v38, %v17100_v1  ;;  %v4437_v33 = vadd.f32 %v4436_v60, %v4044_v22  ;;  %v3799_v42 = vadd.f32 %v12075_v6, %v12072_v34  ;;  %v4051_v53 = vmul.f32 %v12072_v34, %v12072_v34 }
 0x289   : > { %17101 = vst [vmem:[#allocation292_spill] sm:$0xff] %v12082_v44  ;;  %v3117_v59 = vsub.f32 %v1017_v38, %v17102_v24  ;;  %17103 = vst [vmem:[#allocation293_spill] sm:$0xff] %v12088_v40  ;;  %v12095_v7 = vadd.f32 %v984_v23, %v17104_v52  ;;  %v4431_v45 = vadd.f32 %v4430_v61, %v4429_v14  ;;  %v3780_v1 = vrot.slane %v3779_v8, 4 }
 0x28a   : > { %v4452_v25 = vrot.slane %v4451_v11, 4  ;;  %v4055_v28 = vmul.f32 %v12075_v6, %v12075_v6  ;;  %v4048_v62 = vmul.f32 %v12061_v31, %v12061_v31  ;;  %v17105_v22 = vrot.slane %v17068_v48, %v9092_v16 }
 0x28b   : > { %v12105_v24 = vadd.f32 %v9120_v26, %v3113_v9  ;;  %v3800_v34 = vadd.f32 %v3799_v42, %v12088_v40  ;;  %v3768_v23 = vadd.f32 %v3767_v35, %v3766_v47  ;;  %v17107_v14 = vrot.slane %v17071_v30, %v9092_v16 }
 0x28c   : > { %v3121_v60 = vsub.f32 %v1017_v38, %v17105_v22  ;;  %v12112_v52 = vadd.f32 %v9120_v26, %v3117_v59  ;;  %v4059_v6 = vmul.f32 %v12088_v40, %v12088_v40  ;;  %v4438_v31 = vadd.f32 %v4437_v33, %v4048_v62 }
 0x28d   : > { %17106 = vst [vmem:[#allocation81_spill] sm:$0xff] %v12105_v24  ;;  %v3125_v61 = vsub.f32 %v1017_v38, %v17107_v14  ;;  %v3801_v10 = vadd.f32 %v3800_v34, %v12105_v24  ;;  %v4471_v22 = vadd.f32 %v4055_v28, %v4051_v53  ;;  %v17109_v9 = vrot.slane %v17043_v17, %v9106_v21 }
 0x28e   : > { %17108 = vst [vmem:[#allocation294_spill] sm:$0xff] %v12112_v52  ;;  %v4587_v47 = vmul.f32 %v12082_v44, %v12082_v44  ;;  %v4453_v35 = vadd.f32 %v4452_v25, %v4451_v11  ;;  %v17110_v59 = vrot.slane %v17073_v56, %v9092_v16  ;;  %v17111_v40 = vrot.slane %v17045_v50, %v9106_v21 }
 0x28f   : > { %v3102_v42 = vsub.f32 %v12095_v7, %v17109_v9  ;;  %v12131_v28 = vadd.f32 %v9120_v26, %v3121_v60  ;;  %v3802_v34 = vadd.f32 %v3801_v10, %v12112_v52  ;;  %v4063_v53 = vmul.f32 %v12105_v24, %v12105_v24 }
 0x290   : > { %v3129_v14 = vsub.f32 %v1017_v38, %v17110_v59  ;;  %v3106_v33 = vsub.f32 %v12095_v7, %v17111_v40  ;;  %v4472_v62 = vadd.f32 %v4471_v22, %v4059_v6  ;;  %v4555_v9 = vmul.f32 0.015625, %v4431_v45  ;;  %v871_v45 = vpop.f32.mrf.mxu0 }
 0x291   : > { %17112 = vst [vmem:[#allocation295_spill] sm:$0xff] %v12131_v28  ;;  %v3769_v25 = vrot.slane %v3768_v23, 2  ;;  %v12137_v11 = vadd.f32 %v9120_v26, %v3125_v61  ;;  %v4067_v38 = vmul.f32 %v12112_v52, %v12112_v52  ;;  %v4439_v59 = vrot.slane %v4438_v31, 4 }
 0x292   : > { %v3803_v40 = vadd.f32 %v3802_v34, %v12131_v28  ;;  %v4473_v41 = vadd.f32 %v4472_v62, %v4063_v53  ;;  %v12143_v60 = vadd.f32 %v10072_v55, %v3102_v42  ;;  %v3781_v10 = vadd.f32 %v3780_v1, %v3779_v8 }
 0x293   : > { %17113 = vst [vmem:[#allocation296_spill] sm:$0xff] %v12137_v11  ;;  %v4454_v57 = vrot.slane %v4453_v35, 2  ;;  %v12146_v24 = vadd.f32 %v9120_v26, %v3129_v14  ;;  %v12149_v6 = vadd.f32 %v10072_v55, %v3106_v33  ;;  %v4071_v22 = vmul.f32 %v12131_v28, %v12131_v28 }
 0x294   : > { %17114 = vst [vmem:[#allocation297_spill] sm:$0xff] %v12143_v60  ;;  %v3804_v61 = vadd.f32 %v3803_v40, %v12137_v11  ;;  %v4474_v52 = vadd.f32 %v4473_v41, %v4067_v38  ;;  %v17117_v34 = vrot.slane %v17050_v18, %v9106_v21  ;;  %v17118_v8 = vrot.slane %v11943_v4, 1 }
 0x295   : > { %17115 = vst [vmem:[#allocation298_spill] sm:$0xff] %v12146_v24  ;;  %17116 = vst [vmem:[#allocation299_spill] sm:$0xff] %v12149_v6  ;;  %v4681_v1 = vadd.f32 1e-05, %v4648_v43  ;;  %v4619_v14 = vsub.f32 %v4555_v9, %v4587_v47  ;;  %v3770_v33 = vadd.f32 %v3769_v25, %v3768_v23  ;;  %v4440_v53 = vadd.f32 %v4439_v59, %v4438_v31 }
 0x296   : > { %v3110_v42 = vsub.f32 %v12095_v7, %v17117_v34  ;;  %v4405_v26 = vadd.f32 %v17118_v8, %v11943_v4  ;;  %v3805_v62 = vadd.f32 %v3804_v61, %v12146_v24  ;;  %v4475_v40 = vadd.f32 %v4474_v52, %v4071_v22 }
 0x297   : > { %v3812_v28 = vadd.f32 %v12149_v6, %v12143_v60  ;;  %v3782_v41 = vrot.slane %v3781_v10, 2  ;;  %v4455_v38 = vadd.f32 %v4454_v57, %v4453_v35  ;;  %v12165_v44 = vadd.f32 %v871_v45, %v17119_v63 }
 0x298   : > { %v4075_v34 = vmul.f32 %v12137_v11, %v12137_v11  ;;  %8581 = vrsqrt.f32 %v11973_v32  ;;  %v17121_v4 = vrot.slane %v17000_v39, %v9103_v20  ;;  %v17123_v43 = vrot.slane %v17055_v29, %v9106_v21 }
 0x299   : > { %17120 = vst [vmem:[#allocation75_spill] sm:$0xff] %v12165_v44  ;;  %v12181_v57 = vadd.f32 %v10072_v55, %v3110_v42  ;;  %v12183_v63 = vmul.f32 0.015625, %v4405_v26  ;;  %8583 = vrsqrt.f32 %v4681_v1  ;;  %v3771_v52 = vrot.slane %v3770_v33, 1 }
 0x29a   : > { %v12174_v31 = vsub.f32 %v11933_v36, %v17121_v4  ;;  %v3114_v23 = vsub.f32 %v12095_v7, %v17123_v43  ;;  %v4476_v47 = vadd.f32 %v4475_v40, %v4075_v34  ;;  %v4651_v32 = vmax.f32 %v4619_v14, 0.0  ;;  %v17131_v40 = vld [vmem:[#allocation9_spill] sm:$0xff]  ;;  %v17132_v34 = vld [vmem:[#allocation11_spill] sm:$0xff] }
 0x29b   : > { %17124 = vst [vmem:[#allocation301_spill] sm:$0xff] %v12181_v57  ;;  %17125 = vst [vmem:[#allocation302_spill] sm:$0xff] %v12183_v63  ;;  %v4441_v35 = vrot.slane %v4440_v53, 2  ;;  %v3806_v9 = vrot.slane %v3805_v62, 4  ;;  %v3813_v39 = vadd.f32 %v3812_v28, %v12181_v57  ;;  %v12186_v25 = vadd.f32 %v3782_v41, %v3781_v10 }
 0x29c   : > { %17122 = vst [vmem:[#allocation300_spill] sm:$0xff] %v12174_v31  ;;  %v4456_v59 = vrot.slane %v4455_v38, 1  ;;  %v17127_v45 = vrot.slane %v17073_v56, %v9103_v20  ;;  %v4079_v22 = vmul.f32 %v12146_v24, %v12146_v24  ;;  %v17129_v42 = vrot.slane %v17060_v19, %v9106_v21  ;;  %v17183_v31 = vld [vmem:[#allocation40_spill] sm:$0xff] }
 0x29d   : > { %17126 = vst [vmem:[#allocation303_spill] sm:$0xff] %v12186_v25  ;;  %v12201_v26 = vadd.f32 %v10072_v55, %v3114_v23  ;;  %v4052_v28 = vmul.f32 %v12143_v60, %v12143_v60  ;;  %v4056_v10 = vmul.f32 %v12149_v6, %v12149_v6  ;;  %v3772_v1 = vadd.f32 %v3771_v52, %v3770_v33  ;;  %v17134_v6 = vld [vmem:[#allocation90_spill] sm:$0xff] }
 0x29e   : > { %v12192_v61 = vsub.f32 %v12165_v44, %v17127_v45  ;;  %v3118_v8 = vsub.f32 %v12095_v7, %v17129_v42  ;;  %v4477_v14 = vadd.f32 %v4476_v47, %v4079_v22  ;;  %v1602_v41 = vrot.slane %v17131_v40, %v9103_v20  ;;  %v17172_v44 = vld [vmem:[#allocation32_spill] sm:$0xff] }
 0x29f   : > { %17130 = vst [vmem:[#allocation305_spill] sm:$0xff] %v12201_v26  ;;  %v1618_v4 = vrot.slane %v17132_v34, %v9103_v20  ;;  %v4684_v43 = vadd.f32 1e-05, %v4651_v32  ;;  %v4442_v45 = vadd.f32 %v4441_v35, %v4440_v53  ;;  %v3807_v42 = vadd.f32 %v3806_v9, %v3805_v62  ;;  %v17139_v9 = vld [vmem:[#allocation18_spill] sm:$0xff] }
 0x2a0   : > { %17128 = vst [vmem:[#allocation304_spill] sm:$0xff] %v12192_v61  ;;  %v3814_v23 = vadd.f32 %v3813_v39, %v12201_v26  ;;  %v4457_v24 = vadd.f32 %v4456_v59, %v4455_v38  ;;  %v17133_v11 = vrot.slane %v17068_v48, %v9106_v21  ;;  %v2876_v33 = vsub.f32 %v17134_v6, %v1602_v41  ;;  %v8641_v59 = vld [vmem:[%s15985_s4] sm:$0xf] }
 0x2a1   : > { %v2880_v52 = vsub.f32 %v17134_v6, %v1618_v4  ;;  %v17135_v47 = vrot.slane %v17071_v30, %v9106_v21  ;;  %v17136_v53 = vrot.slane %v17073_v56, %v9106_v21  ;;  %v12227_v38 = vadd.f32 %v10072_v55, %v3118_v8 }
 0x2a2   : > { %v3122_v60 = vsub.f32 %v12095_v7, %v17133_v11  ;;  %v4484_v32 = vadd.f32 %v4056_v10, %v4052_v28  ;;  %v12229_v35 = vmul.f32 0.015625, %v3772_v1  ;;  %v4478_v11 = vrot.slane %v4477_v14, 4  ;;  %v17141_v28 = vld [vmem:[#allocation19_spill] sm:$0xff] }
 0x2a3   : > { %v3126_v22 = vsub.f32 %v12095_v7, %v17135_v47  ;;  %v3130_v62 = vsub.f32 %v12095_v7, %v17136_v53  ;;  %17137 = vst [vmem:[#allocation9_spill] sm:$0xff] %v12227_v38  ;;  %v1634_v39 = vrot.slane %v17139_v9, %v9103_v20  ;;  %v12237_v40 = vrot.slane %v8641_v59, %v9103_v20 }
 0x2a4   : > { %17138 = vst [vmem:[#allocation11_spill] sm:$0xff] %v12229_v35  ;;  %v4443_v56 = vrot.slane %v4442_v45, 1  ;;  %v3808_v41 = vrot.slane %v3807_v42, 2  ;;  %v3815_v7 = vadd.f32 %v3814_v23, %v12227_v38  ;;  %v4060_v8 = vmul.f32 %v12181_v57, %v12181_v57 }
 0x2a5   : > { %17140 = vst [vmem:[#allocation90_spill] sm:$0xff] %v12237_v40  ;;  %v1650_v10 = vrot.slane %v17141_v28, %v9103_v20  ;;  %v2884_v1 = vsub.f32 %v17134_v6, %v1634_v39  ;;  %v12246_v34 = vadd.f32 %v12237_v40, %v2876_v33  ;;  %v12249_v4 = vadd.f32 %v12237_v40, %v2880_v52  ;;  %v12256_v9 = vpop.eup %8581 }
 0x2a6   : > { %8585 = vrsqrt.f32 %v4684_v43  ;;  %v12251_v47 = vmul.f32 0.015625, %v4457_v24  ;;  %v12254_v53 = vadd.f32 %v10072_v55, %v3122_v60  ;;  %v4485_v23 = vadd.f32 %v4484_v32, %v4060_v8  ;;  %17144 = vst [vmem:[#allocation306_spill] sm:$0xff] %v12256_v9  ;;  %v12265_v52 = vpop.eup %8583  ;;  %v17150_v8 = vld [vmem:[#allocation14_spill] sm:$0xff] }
 0x2a7   : > { %v4479_v59 = vadd.f32 %v4478_v11, %v4477_v14  ;;  %v12259_v28 = vadd.f32 %v10072_v55, %v3126_v22  ;;  %v12262_v39 = vadd.f32 %v10072_v55, %v3130_v62  ;;  %v2888_v33 = vsub.f32 %v17134_v6, %v1650_v10  ;;  %17147 = vst [vmem:[#allocation309_spill] sm:$0xff] %v12265_v52  ;;  %v17148_v22 = vld [vmem:[#allocation13_spill] sm:$0xff] }
 0x2a8   : > { %17142 = vst [vmem:[#allocation18_spill] sm:$0xff] %v12251_v47  ;;  %17143 = vst [vmem:[#allocation19_spill] sm:$0xff] %v12254_v53  ;;  %v4444_v43 = vadd.f32 %v4443_v56, %v4442_v45  ;;  %v3809_v24 = vadd.f32 %v3808_v41, %v3807_v42  ;;  %v3816_v57 = vadd.f32 %v3815_v7, %v12254_v53  ;;  %v17152_v47 = vld [vmem:[#allocation21_spill] sm:$0xff] }
 0x2a9   : > { %17145 = vst [vmem:[#allocation307_spill] sm:$0xff] %v12259_v28  ;;  %17146 = vst [vmem:[#allocation308_spill] sm:$0xff] %v12262_v39  ;;  %v4064_v60 = vmul.f32 %v12201_v26, %v12201_v26  ;;  %v12272_v14 = vmul.f32 %v12229_v35, %v12229_v35  ;;  %v17149_v32 = vrot.slane %v17148_v22, %v9103_v20  ;;  %v4480_v7 = vrot.slane %v4479_v59, 2 }
 0x2aa   : > { %v12279_v62 = vadd.f32 %v12237_v40, %v2884_v1  ;;  %v3422_v45 = vadd.f32 %v12249_v4, %v12246_v34  ;;  %v4068_v42 = vmul.f32 %v12227_v38, %v12227_v38  ;;  %v3826_v56 = vmul.f32 %v12246_v34, %v12246_v34 }
 0x2ab   : > { %v2892_v55 = vsub.f32 %v17134_v6, %v17149_v32  ;;  %v4486_v11 = vadd.f32 %v4485_v23, %v4064_v60  ;;  %v3830_v41 = vmul.f32 %v12249_v4, %v12249_v4  ;;  %v17151_v10 = vrot.slane %v17150_v8, %v9103_v20 }
 0x2ac   : > { %v12294_v22 = vadd.f32 %v12237_v40, %v2888_v33  ;;  %v3423_v32 = vadd.f32 %v3422_v45, %v12279_v62  ;;  %v4556_v26 = vmul.f32 0.015625, %v4444_v43  ;;  %v3810_v38 = vrot.slane %v3809_v24, 1 }
 0x2ad   : > { %v2896_v1 = vsub.f32 %v17134_v6, %v17151_v10  ;;  %v3817_v23 = vadd.f32 %v3816_v57, %v12259_v28  ;;  %v4072_v60 = vmul.f32 %v12254_v53, %v12254_v53  ;;  %v17153_v35 = vrot.slane %v17152_v47, %v9103_v20  ;;  %v17154_v10 = vld [vmem:[#allocation143_spill] sm:$0xff] }
 0x2ae   : > { %v12305_v8 = vadd.f32 %v12237_v40, %v2892_v55  ;;  %v3420_v33 = vrot.slane %v17154_v10, 1  ;;  %v3424_v30 = vadd.f32 %v3423_v32, %v12294_v22  ;;  %v4076_v43 = vmul.f32 %v12259_v28, %v12259_v28 }
 0x2af   : > { %v2900_v61 = vsub.f32 %v17134_v6, %v17153_v35  ;;  %v4487_v45 = vadd.f32 %v4486_v11, %v4068_v42  ;;  %v3834_v57 = vmul.f32 %v12279_v62, %v12279_v62  ;;  %v4094_v53 = vadd.f32 %v3830_v41, %v3826_v56 }
 0x2b0   : > { %v4481_v48 = vadd.f32 %v4480_v7, %v4479_v59  ;;  %v4080_v47 = vmul.f32 %v12262_v39, %v12262_v39  ;;  %v12316_v6 = vadd.f32 %v12237_v40, %v2896_v1  ;;  %v3425_v35 = vadd.f32 %v3424_v30, %v12305_v8 }
 0x2b1   : > { %v4620_v55 = vsub.f32 %v4556_v26, %v12272_v14  ;;  %v3818_v32 = vadd.f32 %v3817_v23, %v12262_v39  ;;  %v3838_v42 = vmul.f32 %v12294_v22, %v12294_v22  ;;  %v4095_v11 = vadd.f32 %v4094_v53, %v3834_v57  ;;  %v17155_v26 = vld [vmem:[#allocation24_spill] sm:$0xff]  ;;  %v17157_v53 = vld [vmem:[#allocation138_spill] sm:$0xff] }
 0x2b2   : > { %v3811_v28 = vadd.f32 %v3810_v38, %v3809_v24  ;;  %v12324_v56 = vadd.f32 %v12237_v40, %v2900_v61  ;;  %v3421_v59 = vadd.f32 %v3420_v33, %v17154_v10  ;;  %v3426_v41 = vadd.f32 %v3425_v35, %v12316_v6  ;;  %v17158_v24 = vld [vmem:[#allocation25_spill] sm:$0xff]  ;;  %v17159_v57 = vld [vmem:[#allocation142_spill] sm:$0xff] }
 0x2b3   : > { %v4488_v7 = vadd.f32 %v4487_v45, %v4072_v60  ;;  %v3842_v30 = vmul.f32 %v12305_v8, %v12305_v8  ;;  %v4096_v1 = vadd.f32 %v4095_v11, %v3838_v42  ;;  %v1730_v14 = vrot.slane %v17155_v26, %v9103_v20  ;;  %v12332_v23 = vpop.eup %8585  ;;  %v17160_v26 = vld [vmem:[#allocation29_spill] sm:$0xff] }
 0x2b4   : > { %17156 = vst [vmem:[#allocation13_spill] sm:$0xff] %v12332_v23  ;;  %v4482_v39 = vrot.slane %v4481_v48, 1  ;;  %v12336_v38 = vadd.f32 %v12237_v40, %v17157_v53  ;;  %v3427_v61 = vadd.f32 %v3426_v41, %v12324_v56  ;;  %v1746_v10 = vrot.slane %v17158_v24, %v9103_v20 }
 0x2b5   : > { %v3819_v60 = vrot.slane %v3818_v32, 4  ;;  %v3846_v33 = vmul.f32 %v12316_v6, %v12316_v6  ;;  %v4097_v45 = vadd.f32 %v4096_v1, %v3842_v30  ;;  %v2908_v35 = vsub.f32 %v17159_v57, %v1730_v14 }
 0x2b6   : > { %v3428_v42 = vadd.f32 %v3427_v61, %v12336_v38  ;;  %v12345_v11 = vmul.f32 0.015625, %v3421_v59  ;;  %v1762_v53 = vrot.slane %v17160_v26, %v9103_v20  ;;  %v2912_v19 = vsub.f32 %v17159_v57, %v1746_v10  ;;  %v17162_v61 = vld [vmem:[#allocation30_spill] sm:$0xff] }
 0x2b7   : > { %v12350_v41 = vmul.f32 0.015625, %v3811_v28  ;;  %v4489_v25 = vadd.f32 %v4488_v7, %v4076_v43  ;;  %v3850_v24 = vmul.f32 %v12324_v56, %v12324_v56  ;;  %v4098_v29 = vadd.f32 %v4097_v45, %v3846_v33 }
 0x2b8   : > { %v4483_v23 = vadd.f32 %v4482_v39, %v4481_v48  ;;  %v3429_v30 = vrot.slane %v3428_v42, 4  ;;  %v3854_v1 = vmul.f32 %v12336_v38, %v12336_v38  ;;  %v2916_v59 = vsub.f32 %v17159_v57, %v1762_v53 }
 0x2b9   : > { %17161 = vst [vmem:[#allocation14_spill] sm:$0xff] %v12350_v41  ;;  %v4099_v14 = vadd.f32 %v4098_v29, %v3850_v24  ;;  %v1778_v26 = vrot.slane %v17162_v61, %v9103_v20  ;;  %v12360_v10 = vadd.f32 %v12237_v40, %v2908_v35  ;;  %v12363_v28 = vadd.f32 %v12237_v40, %v2912_v19  ;;  %v17165_v19 = vld [vmem:[#allocation26_spill] sm:$0xff] }
 0x2ba   : > { %v12365_v43 = vmax.f32 %v4620_v55, 0.0  ;;  %v3820_v7 = vadd.f32 %v3819_v60, %v3818_v32  ;;  %v3430_v48 = vadd.f32 %v3429_v30, %v3428_v42  ;;  %v4561_v39 = vmul.f32 %v12345_v11, %v12345_v11 }
 0x2bb   : > { %17163 = vst [vmem:[#allocation21_spill] sm:$0xff] %v12360_v10  ;;  %17164 = vst [vmem:[#allocation143_spill] sm:$0xff] %v12363_v28  ;;  %v12371_v33 = vmul.f32 %v12350_v41, %v12350_v41  ;;  %v4490_v29 = vadd.f32 %v4489_v25, %v4080_v47  ;;  %v4100_v45 = vadd.f32 %v4099_v14, %v3854_v1  ;;  %v12374_v35 = vmul.f32 0.015625, %v4483_v23  ;;  %v17168_v14 = vld [vmem:[#allocation146_spill] sm:$0xff] }
 0x2bc   : > { %v2920_v53 = vsub.f32 %v17159_v57, %v1778_v26  ;;  %v3431_v24 = vrot.slane %v3430_v48, 2  ;;  %v17166_v55 = vrot.slane %v17165_v19, %v9103_v20  ;;  %v12381_v60 = vadd.f32 %v12237_v40, %v2916_v59  ;;  %v17169_v26 = vld [vmem:[#allocation27_spill] sm:$0xff] }
 0x2bd   : > { %v4101_v42 = vrot.slane %v4100_v45, 4  ;;  %v3474_v30 = vadd.f32 %v12363_v28, %v12360_v10  ;;  %v3858_v25 = vmul.f32 %v12360_v10, %v12360_v10  ;;  %v3862_v47 = vmul.f32 %v12363_v28, %v12363_v28 }
 0x2be   : > { %v2924_v32 = vsub.f32 %v17159_v57, %v17166_v55  ;;  %17167 = vst [vmem:[#allocation24_spill] sm:$0xff] %v12381_v60  ;;  %v3821_v23 = vrot.slane %v3820_v7, 2  ;;  %v3432_v1 = vadd.f32 %v3431_v24, %v3430_v48  ;;  %v4593_v61 = vsub.f32 %v17168_v14, %v4561_v39 }
 0x2bf   : > { %v17170_v19 = vrot.slane %v17169_v26, %v9103_v20  ;;  %v4491_v55 = vrot.slane %v4490_v29, 4  ;;  %v4102_v41 = vadd.f32 %v4101_v42, %v4100_v45  ;;  %v12395_v18 = vadd.f32 %v12237_v40, %v2920_v53 }
 0x2c0   : > { %v3475_v63 = vadd.f32 %v3474_v30, %v12381_v60  ;;  %v3433_v52 = vrot.slane %v3432_v1, 1  ;;  %v17173_v48 = vrot.slane %v17172_v44, %v9103_v20  ;;  %v12405_v24 = vadd.f32 %v12237_v40, %v2924_v32 }
 0x2c1   : > { %v2928_v59 = vsub.f32 %v17159_v57, %v17170_v19  ;;  %17171 = vst [vmem:[#allocation138_spill] sm:$0xff] %v12395_v18  ;;  %v4103_v14 = vrot.slane %v4102_v41, 2  ;;  %v3866_v53 = vmul.f32 %v12381_v60, %v12381_v60  ;;  %v4146_v42 = vadd.f32 %v3862_v47, %v3858_v25  ;;  %v17251_v60 = vld [vmem:[#allocation103_spill] sm:$0xff] }
 0x2c2   : > { %v2932_v39 = vsub.f32 %v17159_v57, %v17173_v48  ;;  %17174 = vst [vmem:[#allocation25_spill] sm:$0xff] %v12405_v24  ;;  %v3476_v45 = vadd.f32 %v3475_v63, %v12395_v18  ;;  %v12410_v30 = vadd.f32 %v3821_v23, %v3820_v7  ;;  %v3434_v26 = vadd.f32 %v3433_v52, %v3432_v1  ;;  %v17177_v7 = vld [vmem:[#allocation35_spill] sm:$0xff]  ;;  %v17178_v52 = vld [vmem:[#allocation36_spill] sm:$0xff] }
 0x2c3   : > { %v4625_v19 = vmax.f32 %v4593_v61, 0.0  ;;  %v12413_v9 = vadd.f32 %v12237_v40, %v2928_v59  ;;  %v4104_v44 = vadd.f32 %v4103_v14, %v4102_v41  ;;  %v3870_v32 = vmul.f32 %v12395_v18, %v12395_v18  ;;  %v17179_v59 = vld [vmem:[#allocation147_spill] sm:$0xff] }
 0x2c4   : > { %v3477_v57 = vadd.f32 %v3476_v45, %v12405_v24  ;;  %v4147_v48 = vadd.f32 %v4146_v42, %v3866_v53  ;;  %v12418_v50 = vmul.f32 0.015625, %v3434_v26  ;;  %v12421_v63 = vadd.f32 %v12237_v40, %v2932_v39  ;;  %v17181_v45 = vld [vmem:[#allocation15_spill] sm:$0xff] }
 0x2c5   : > { %17175 = vst [vmem:[#allocation142_spill] sm:$0xff] %v12413_v9  ;;  %v1858_v25 = vrot.slane %v17177_v7, %v9103_v20  ;;  %v1874_v47 = vrot.slane %v17178_v52, %v9103_v20  ;;  %v4105_v23 = vrot.slane %v4104_v44, 1  ;;  %v3874_v1 = vmul.f32 %v12405_v24, %v12405_v24 }
 0x2c6   : > { %17176 = vst [vmem:[#allocation29_spill] sm:$0xff] %v12421_v63  ;;  %v3478_v41 = vadd.f32 %v3477_v57, %v12413_v9  ;;  %v4148_v61 = vadd.f32 %v4147_v48, %v3870_v32  ;;  %v12432_v14 = vadd.f32 %v12237_v40, %v17179_v59  ;;  %v3878_v39 = vmul.f32 %v12413_v9, %v12413_v9  ;;  %v17182_v48 = vld [vmem:[#allocation150_spill] sm:$0xff] }
 0x2c7   : > { %v2940_v53 = vsub.f32 %v17181_v45, %v1858_v25  ;;  %v2944_v42 = vsub.f32 %v17181_v45, %v1874_v47  ;;  %v4106_v26 = vadd.f32 %v4105_v23, %v4104_v44  ;;  %v4562_v7 = vmul.f32 %v12418_v50, %v12418_v50  ;;  %v17184_v23 = vld [vmem:[#allocation41_spill] sm:$0xff] }
 0x2c8   : > { %17180 = vst [vmem:[#allocation30_spill] sm:$0xff] %v12432_v14  ;;  %v3479_v57 = vadd.f32 %v3478_v41, %v12421_v63  ;;  %v4149_v52 = vadd.f32 %v4148_v61, %v3874_v1  ;;  %v12441_v17 = vadd.f32 %v4491_v55, %v4490_v29  ;;  %v4658_v32 = vadd.f32 1e-05, %v4625_v19 }
 0x2c9   : > { %v3472_v59 = vrot.slane %v17182_v48, 1  ;;  %v1890_v36 = vrot.slane %v17183_v31, %v9103_v20  ;;  %v4530_v54 = vmul.f32 0.015625, %v4106_v26  ;;  %v3882_v44 = vmul.f32 %v12421_v63, %v12421_v63 }
 0x2ca   : > { %v3480_v25 = vadd.f32 %v3479_v57, %v12432_v14  ;;  %v4150_v47 = vadd.f32 %v4149_v52, %v3878_v39  ;;  %v1906_v13 = vrot.slane %v17184_v23, %v9103_v20  ;;  %v12453_v29 = vadd.f32 %v12237_v40, %v2940_v53  ;;  %v17187_v23 = vld [vmem:[#allocation37_spill] sm:$0xff] }
 0x2cb   : > { %v2948_v41 = vsub.f32 %v17181_v45, %v1890_v36  ;;  %v12456_v55 = vadd.f32 %v12237_v40, %v2944_v42  ;;  %v4594_v19 = vsub.f32 %v4530_v54, %v4562_v7  ;;  %v3886_v1 = vmul.f32 %v12432_v14, %v12432_v14 }
 0x2cc   : > { %17185 = vst [vmem:[#allocation26_spill] sm:$0xff] %v12453_v29  ;;  %v3481_v31 = vrot.slane %v3480_v25, 4  ;;  %v4151_v61 = vadd.f32 %v4150_v47, %v3882_v44  ;;  %v3823_v26 = vrot.slane %v12410_v30, 1  ;;  %8587 = vrsqrt.f32 %v4658_v32  ;;  %v17190_v47 = vld [vmem:[#allocation38_spill] sm:$0xff] }
 0x2cd   : > { %17186 = vst [vmem:[#allocation146_spill] sm:$0xff] %v12456_v55  ;;  %v3473_v39 = vadd.f32 %v3472_v59, %v17182_v48  ;;  %v2952_v57 = vsub.f32 %v17181_v45, %v1906_v13  ;;  %v4626_v36 = vmax.f32 %v4594_v19, 0.0  ;;  %v17188_v42 = vrot.slane %v17187_v23, %v9103_v20 }
 0x2ce   : > { %v3482_v52 = vadd.f32 %v3481_v31, %v3480_v25  ;;  %v4152_v53 = vadd.f32 %v4151_v61, %v3886_v1  ;;  %v12468_v7 = vadd.f32 %v12237_v40, %v2948_v41  ;;  %v3526_v44 = vadd.f32 %v12456_v55, %v12453_v29  ;;  %v17193_v41 = vld [vmem:[#allocation43_spill] sm:$0xff] }
 0x2cf   : > { %v2956_v54 = vsub.f32 %v17181_v45, %v17188_v42  ;;  %v3890_v32 = vmul.f32 %v12453_v29, %v12453_v29  ;;  %v3894_v13 = vmul.f32 %v12456_v55, %v12456_v55  ;;  %v4659_v48 = vadd.f32 1e-05, %v4626_v36 }
 0x2d0   : > { %17189 = vst [vmem:[#allocation27_spill] sm:$0xff] %v12468_v7  ;;  %v3483_v59 = vrot.slane %v3482_v52, 2  ;;  %v4153_v25 = vrot.slane %v4152_v53, 4  ;;  %v17191_v19 = vrot.slane %v17190_v47, %v9103_v20  ;;  %v12480_v1 = vmul.f32 0.015625, %v3473_v39 }
 0x2d1   : > { %v17194_v61 = vrot.slane %v17193_v41, %v9103_v20  ;;  %v12487_v42 = vadd.f32 %v12237_v40, %v2952_v57  ;;  %v3527_v49 = vadd.f32 %v3526_v44, %v12468_v7  ;;  %8589 = vrsqrt.f32 %v4659_v48 }
 0x2d2   : > { %v2960_v31 = vsub.f32 %v17181_v45, %v17191_v19  ;;  %17192 = vst [vmem:[#allocation32_spill] sm:$0xff] %v12480_v1  ;;  %v3484_v36 = vadd.f32 %v3483_v59, %v3482_v52  ;;  %v4154_v2 = vadd.f32 %v4153_v25, %v4152_v53  ;;  %v12491_v58 = vadd.f32 %v12237_v40, %v2956_v54 }
 0x2d3   : > { %v2964_v23 = vsub.f32 %v17181_v45, %v17194_v61  ;;  %17195 = vst [vmem:[#allocation35_spill] sm:$0xff] %v12487_v42  ;;  %v4493_v47 = vrot.slane %v12441_v17, 2  ;;  %v3528_v39 = vadd.f32 %v3527_v49, %v12487_v42  ;;  %v3898_v19 = vmul.f32 %v12468_v7, %v12468_v7  ;;  %v17197_v45 = vld [vmem:[#allocation183_spill] sm:$0xff]  ;;  %v17198_v61 = vld [vmem:[#allocation160_spill] sm:$0xff] }
 0x2d4   : > { %17196 = vst [vmem:[#allocation36_spill] sm:$0xff] %v12491_v58  ;;  %v4198_v41 = vadd.f32 %v3894_v13, %v3890_v32  ;;  %v4755_v57 = vcombine.low %v17198_v61, %v17197_v45  ;;  %v3485_v55 = vrot.slane %v3484_v36, 1  ;;  %v4155_v29 = vrot.slane %v4154_v2, 2  ;;  %v17201_v45 = vld [vmem:[#allocation47_spill] sm:$0xff] }
 0x2d5   : > { %v12500_v44 = vadd.f32 %v12237_v40, %v2960_v31  ;;  %v4565_v52 = vmul.f32 %v12480_v1, %v12480_v1  ;;  %v3529_v53 = vadd.f32 %v3528_v39, %v12491_v58  ;;  %v3902_v49 = vmul.f32 %v12487_v42, %v12487_v42  ;;  %v17202_v39 = vld [vmem:[#allocation48_spill] sm:$0xff]  ;;  %v17203_v42 = vld [vmem:[#allocation175_spill] sm:$0xff] }
 0x2d6   : > { %v4199_v54 = vadd.f32 %v4198_v41, %v3898_v19  ;;  %v3486_v48 = vadd.f32 %v3485_v55, %v3484_v36  ;;  %v4156_v59 = vadd.f32 %v4155_v29, %v4154_v2  ;;  %v12508_v32 = vadd.f32 %v12237_v40, %v2964_v23  ;;  %v17205_v2 = vld [vmem:[#allocation176_spill] sm:$0xff] }
 0x2d7   : > { %17199 = vst [vmem:[#allocation147_spill] sm:$0xff] %v12500_v44  ;;  %v3906_v13 = vmul.f32 %v12491_v58, %v12491_v58  ;;  %v3530_v25 = vadd.f32 %v3529_v53, %v12500_v44  ;;  %v1986_v61 = vrot.slane %v17201_v45, %v9103_v20  ;;  %v2002_v7 = vrot.slane %v17202_v39, %v9103_v20  ;;  %v17206_v41 = vld [vmem:[#allocation28_spill] sm:$0xff]  ;;  %v17208_v58 = vld [vmem:[#allocation171_spill] sm:$0xff] }
 0x2d8   : > { %17200 = vst [vmem:[#allocation15_spill] sm:$0xff] %v12508_v32  ;;  %v4200_v31 = vadd.f32 %v4199_v54, %v3902_v49  ;;  %v4157_v14 = vrot.slane %v4156_v59, 1  ;;  %v12519_v55 = vadd.f32 %v12237_v40, %v17203_v42  ;;  %v3524_v29 = vrot.slane %v17205_v2, 1  ;;  %v17209_v42 = vld [vmem:[#allocation52_spill] sm:$0xff] }
 0x2d9   : > { %v3910_v23 = vmul.f32 %v12500_v44, %v12500_v44  ;;  %v3531_v36 = vadd.f32 %v3530_v25, %v12508_v32  ;;  %v2972_v53 = vsub.f32 %v17206_v41, %v1986_v61  ;;  %v2976_v49 = vsub.f32 %v17206_v41, %v2002_v7  ;;  %v8588_v54 = vpop.eup %8587 }
 0x2da   : > { %17204 = vst [vmem:[#allocation150_spill] sm:$0xff] %v12519_v55  ;;  %v4201_v19 = vadd.f32 %v4200_v31, %v3906_v13  ;;  %v4158_v45 = vadd.f32 %v4157_v14, %v4156_v59  ;;  %v12527_v39 = vmul.f32 0.015625, %v3486_v48  ;;  %v4597_v63 = vsub.f32 %v17208_v58, %v4565_v52 }
 0x2db   : > { %v2018_v9 = vrot.slane %v17209_v42, %v9103_v20  ;;  %v3824_v24 = vadd.f32 %v3823_v26, %v12410_v30  ;;  %v3532_v44 = vadd.f32 %v3531_v36, %v12519_v55  ;;  %v3914_v13 = vmul.f32 %v12508_v32, %v12508_v32 }
 0x2dc   : > { %17207 = vst [vmem:[#allocation40_spill] sm:$0xff] %v12527_v39  ;;  %v4202_v25 = vadd.f32 %v4201_v19, %v3910_v23  ;;  %v4494_v31 = vadd.f32 %v4493_v47, %v12441_v17  ;;  %v3525_v7 = vadd.f32 %v3524_v29, %v17205_v2  ;;  %v3918_v14 = vmul.f32 %v12519_v55, %v12519_v55  ;;  %v17212_v47 = vld [vmem:[#allocation53_spill] sm:$0xff] }
 0x2dd   : > { %v2980_v58 = vsub.f32 %v17206_v41, %v2018_v9  ;;  %v3533_v52 = vrot.slane %v3532_v44, 4  ;;  %v12542_v59 = vadd.f32 %v12237_v40, %v2972_v53  ;;  %v12545_v30 = vadd.f32 %v12237_v40, %v2976_v49  ;;  %v17214_v9 = vld [vmem:[#allocation8_spill] sm:$0xff] }
 0x2de   : > { %v4203_v48 = vadd.f32 %v4202_v25, %v3914_v13  ;;  %v4534_v26 = vmul.f32 0.015625, %v4158_v45  ;;  %v4566_v61 = vmul.f32 %v12527_v39, %v12527_v39  ;;  %v4629_v17 = vmax.f32 %v4597_v63, 0.0  ;;  %v8590_v29 = vpop.eup %8589 }
 0x2df   : > { %17210 = vst [vmem:[#allocation41_spill] sm:$0xff] %v12542_v59  ;;  %17211 = vst [vmem:[#allocation37_spill] sm:$0xff] %v12545_v30  ;;  %v2034_v2 = vrot.slane %v17212_v47, %v9103_v20  ;;  %v12551_v23 = vmul.f32 0.015625, %v3824_v24  ;;  %v4769_v36 = vrot.slane %v4755_v57, %v17214_v9  ;;  %v3534_v19 = vadd.f32 %v3533_v52, %v3532_v44 }
 0x2e0   : > { %v4204_v42 = vadd.f32 %v4203_v48, %v3918_v14  ;;  %v4495_v53 = vrot.slane %v4494_v31, 1  ;;  %v4754_v13 = vcombine.low %v8588_v54, %v8590_v29  ;;  %v12554_v25 = vmul.f32 0.015625, %v3525_v7  ;;  %v17222_v29 = vld [vmem:[#allocation204_spill] sm:$0xff] }
 0x2e1   : > { %17213 = vst [vmem:[#allocation38_spill] sm:$0xff] %v12551_v23  ;;  %v2984_v49 = vsub.f32 %v17206_v41, %v2034_v2  ;;  %v3535_v45 = vrot.slane %v3534_v19, 2  ;;  %v12558_v63 = vadd.f32 %v12237_v40, %v2980_v58  ;;  %v3578_v47 = vadd.f32 %v12545_v30, %v12542_v59 }
 0x2e2   : > { %17215 = vst [vmem:[#allocation43_spill] sm:$0xff] %v12554_v25  ;;  %v4205_v55 = vrot.slane %v4204_v42, 4  ;;  %v4762_v24 = vrot.slane %v4754_v13, %v17214_v9  ;;  %v4598_v32 = vsub.f32 %v4534_v26, %v4566_v61  ;;  %v4662_v57 = vadd.f32 1e-05, %v4629_v17  ;;  %v17219_v61 = vld [vmem:[#allocation49_spill] sm:$0xff] }
 0x2e3   : > { %17216 = vst [vmem:[#allocation183_spill] sm:$0xff] %v12558_v63  ;;  %v4779_v44 = vcombine.low %v11338_v46, %v11503_v15  ;;  %v12567_v54 = vmul.f32 %v12551_v23, %v12551_v23  ;;  %v3536_v7 = vadd.f32 %v3535_v45, %v3534_v19  ;;  %v3579_v52 = vadd.f32 %v3578_v47, %v12558_v63  ;;  %v12581_v46 = vld [vmem:[%s15986_s5] sm:$0xf] }
 0x2e4   : > { %v4206_v14 = vadd.f32 %v4205_v55, %v4204_v42  ;;  %v12570_v58 = vadd.f32 %v4495_v53, %v4494_v31  ;;  %v4770_v48 = vcombine.low %v4762_v24, %v4769_v36  ;;  %v12574_v2 = vmul.f32 %v12554_v25, %v12554_v25  ;;  %v17224_v24 = vld [vmem:[#allocation50_spill] sm:$0xff] }
 0x2e5   : > { %17217 = vst [vmem:[#allocation160_spill] sm:$0xff] %v12567_v54  ;;  %v4803_v26 = vcombine.low %v11520_v37, %v11728_v51  ;;  %v17220_v55 = vrot.slane %v17219_v61, %v9103_v20  ;;  %v12588_v17 = vadd.f32 %v12237_v40, %v2984_v49  ;;  %v3576_v36 = vrot.slane %v17222_v29, 1  ;;  %v17230_v54 = vld [vmem:[#allocation151_spill] sm:$0xff]  ;;  %v17246_v25 = vld [vmem:[#allocation106_spill] sm:$0xff] }
 0x2e6   : > { %17218 = vst [vmem:[#allocation47_spill] sm:$0xff] %v12570_v58  ;;  %v4207_v15 = vrot.slane %v4206_v14, 2  ;;  %v4777_v19 = vrot.slane %v4770_v48, %v17214_v9  ;;  %v4630_v42 = vmax.f32 %v4598_v32, 0.0  ;;  %8591 = vrsqrt.f32 %v4662_v57  ;;  %v17226_v48 = vld [vmem:[#allocation55_spill] sm:$0xff] }
 0x2e7   : > { %v2988_v31 = vsub.f32 %v17206_v41, %v17220_v55  ;;  %17221 = vst [vmem:[#allocation48_spill] sm:$0xff] %v12588_v17  ;;  %v12593_v37 = vrot.slane %v4779_v44, %v17214_v9  ;;  %v3537_v51 = vrot.slane %v3536_v7, 1  ;;  %v3580_v53 = vadd.f32 %v3579_v52, %v12588_v17  ;;  %v17244_v58 = vld [vmem:[#allocation123_spill] sm:$0xff] }
 0x2e8   : > { %v3922_v13 = vmul.f32 %v12542_v59, %v12542_v59  ;;  %v3926_v45 = vmul.f32 %v12545_v30, %v12545_v30  ;;  %v4954_v49 = vmul.f32 %v4777_v19, %v12581_v46  ;;  %v12604_v32 = vrot.slane %v4803_v26, %v17214_v9 }
 0x2e9   : > { %v17225_v57 = vrot.slane %v17224_v24, %v9103_v20  ;;  %v4208_v52 = vadd.f32 %v4207_v15, %v4206_v14  ;;  %v17227_v61 = vrot.slane %v17226_v48, %v9103_v20  ;;  %v12615_v23 = vadd.f32 %v12237_v40, %v2988_v31  ;;  %v17229_v48 = vld [vmem:[#allocation133_spill] sm:$0xff] }
 0x2ea   : > { %17223 = vst [vmem:[#allocation175_spill] sm:$0xff] %v12604_v32  ;;  %v3577_v19 = vadd.f32 %v3576_v36, %v17222_v29  ;;  %v12619_v47 = vrot.slane %v4954_v49, %v9082_v12  ;;  %v12622_v26 = vrot.slane %v4954_v49, %v9103_v20  ;;  %v12625_v24 = vrot.slane %v4954_v49, %v9092_v16  ;;  %v17247_v32 = vld [vmem:[#allocation125_spill] sm:$0xff] }
 0x2eb   : > { %v2992_v44 = vsub.f32 %v17206_v41, %v17225_v57  ;;  %v2996_v55 = vsub.f32 %v17206_v41, %v17227_v61  ;;  %17228 = vst [vmem:[#allocation176_spill] sm:$0xff] %v12615_v23  ;;  %v12628_v14 = vrot.slane %v4954_v49, %v9106_v21  ;;  %v4663_v15 = vadd.f32 1e-05, %v4630_v42  ;;  %v17233_v42 = vld [vmem:[#allocation203_spill] sm:$0xff] }
 0x2ec   : > { %v3538_v57 = vadd.f32 %v3537_v51, %v3536_v7  ;;  %v3581_v41 = vadd.f32 %v3580_v53, %v12615_v23  ;;  %v4250_v31 = vadd.f32 %v3926_v45, %v3922_v13  ;;  %v5131_v29 = vmul.f32 %v12619_v47, %v12345_v11 }
 0x2ed   : > { %v5132_v36 = vmul.f32 %v12622_v26, %v12418_v50  ;;  %v5133_v61 = vmul.f32 %v12625_v24, %v17229_v48  ;;  %v5134_v30 = vmul.f32 %v12628_v14, %v17230_v54  ;;  %v12640_v49 = vadd.f32 %v12237_v40, %v2992_v44 }
 0x2ee   : > { %v12643_v7 = vadd.f32 %v12237_v40, %v2996_v55  ;;  %v12647_v51 = vadd.f32 %v12237_v40, %v17233_v42  ;;  %v3930_v11 = vmul.f32 %v12558_v63, %v12558_v63  ;;  %v4209_v13 = vrot.slane %v4208_v52, 1  ;;  %v17248_v40 = vld [vmem:[#allocation102_spill] sm:$0xff] }
 0x2ef   : > { %17231 = vst [vmem:[#allocation28_spill] sm:$0xff] %v12640_v49  ;;  %v5195_v50 = vcombine.low %v5131_v29, %v5132_v36  ;;  %v5196_v53 = vcombine.low %v5133_v61, %v5134_v30  ;;  %v12651_v45 = vmul.f32 0.015625, %v3577_v19  ;;  %8593 = vrsqrt.f32 %v4663_v15  ;;  %v17238_v61 = vld [vmem:[#allocation120_spill] sm:$0xff] }
 0x2f0   : > { %17232 = vst [vmem:[#allocation171_spill] sm:$0xff] %v12643_v7  ;;  %17234 = vst [vmem:[#allocation52_spill] sm:$0xff] %v12647_v51  ;;  %v12653_v54 = vmul.f32 0.015625, %v3538_v57  ;;  %v3582_v44 = vadd.f32 %v3581_v41, %v12640_v49  ;;  %v4251_v48 = vadd.f32 %v4250_v31, %v3930_v11  ;;  %v3934_v42 = vmul.f32 %v12588_v17, %v12588_v17  ;;  %v17240_v17 = vld [vmem:[#allocation104_spill] sm:$0xff] }
 0x2f1   : > { %17235 = vst [vmem:[#allocation53_spill] sm:$0xff] %v12651_v45  ;;  %v5203_v55 = vrot.slane %v5195_v50, %v17214_v9  ;;  %v5210_v59 = vrot.slane %v5196_v53, %v17214_v9  ;;  %v12662_v29 = vmul.f32 %v12615_v23, %v12615_v23  ;;  %v12666_v30 = vmul.f32 %v12640_v49, %v12640_v49  ;;  %v12691_v50 = vld [vmem:[%s15987_s6] sm:$0xf]  ;;  %v17239_v49 = vld [vmem:[#allocation95_spill] sm:$0xff] }
 0x2f2   : > { %17236 = vst [vmem:[#allocation49_spill] sm:$0xff] %v12653_v54  ;;  %v12670_v19 = vmul.f32 %v12643_v7, %v12643_v7  ;;  %v12674_v15 = vmul.f32 %v12647_v51, %v12647_v51  ;;  %v12678_v31 = vadd.f32 %v4209_v13, %v4208_v52  ;;  %v12682_v36 = vmul.f32 %v12651_v45, %v12651_v45  ;;  %v17241_v45 = vld [vmem:[#allocation121_spill] sm:$0xff] }
 0x2f3   : > { %v5211_v41 = vcombine.low %v5203_v55, %v5210_v59  ;;  %v12686_v11 = vpop.eup %8591  ;;  %17237 = vst [vmem:[#allocation204_spill] sm:$0xff] %v12691_v50  ;;  %v5404_v53 = vmul.f32 %v12622_v26, %v12246_v34  ;;  %v12697_v59 = vmul.f32 %v12653_v54, %v12653_v54  ;;  %v12700_v52 = vadd.f32 %v3582_v44, %v12643_v7  ;;  %v17242_v7 = vld [vmem:[#allocation96_spill] sm:$0xff]  ;;  %v17245_v54 = vld [vmem:[#allocation99_spill] sm:$0xff] }
 0x2f4   : > { %v12702_v13 = vadd.f32 %v4251_v48, %v3934_v42  ;;  %v5406_v57 = vmul.f32 %v12628_v14, %v17238_v61  ;;  %v5403_v23 = vmul.f32 %v12619_v47, %v17239_v49  ;;  %v5405_v34 = vmul.f32 %v12625_v24, %v17240_v17  ;;  %v17243_v42 = vld [vmem:[#allocation105_spill] sm:$0xff] }
 0x2f5   : > { %v5218_v55 = vrot.slane %v5211_v41, %v17214_v9  ;;  %v5408_v63 = vmul.f32 %v12622_v26, %v12249_v4  ;;  %v5410_v44 = vmul.f32 %v12628_v14, %v17241_v45  ;;  %v5407_v48 = vmul.f32 %v12619_v47, %v17242_v7 }
 0x2f6   : > { %v5409_v41 = vmul.f32 %v12625_v24, %v17243_v42  ;;  %v5412_v49 = vmul.f32 %v12622_v26, %v12279_v62  ;;  %v5414_v17 = vmul.f32 %v12628_v14, %v17244_v58  ;;  %v5411_v4 = vmul.f32 %v12619_v47, %v17245_v54 }
 0x2f7   : > { %v5395_v61 = vsub.f32 %v12691_v50, %v5218_v55  ;;  %v5413_v45 = vmul.f32 %v12625_v24, %v17246_v25  ;;  %v5416_v7 = vmul.f32 %v12622_v26, %v12294_v22  ;;  %v5418_v42 = vmul.f32 %v12628_v14, %v17247_v32  ;;  %v17249_v22 = vld [vmem:[#allocation108_spill] sm:$0xff] }
 0x2f8   : > { %v12734_v55 = vmul.f32 %v12619_v47, %v17248_v40  ;;  %v5417_v18 = vmul.f32 %v12625_v24, %v17249_v22  ;;  %v12752_v32 = vmul.f32 %v12622_v26, %v12305_v8  ;;  %v17250_v40 = vld [vmem:[#allocation127_spill] sm:$0xff]  ;;  %v12760_v28 = vmul.f32 %v12619_v47, %v17251_v60 }
 0x2f9   : > { %v12737_v62 = vrot.slane %v5395_v61, %v9103_v20  ;;  %v12740_v58 = vrot.slane %v5395_v61, %v9106_v21  ;;  %v12743_v54 = vrot.slane %v5395_v61, %v9082_v12  ;;  %v12746_v25 = vrot.slane %v5395_v61, %v9092_v16  ;;  %v17253_v21 = vld [vmem:[#allocation128_spill] sm:$0xff] }
 0x2fa   : > { %v12756_v50 = vmul.f32 %v12628_v14, %v17250_v40  ;;  %v12770_v40 = vmul.f32 %v12625_v24, %v17252_v3  ;;  %v12774_v60 = vmul.f32 %v12622_v26, %v12316_v6  ;;  %v17254_v3 = vld [vmem:[#allocation107_spill] sm:$0xff] }
 0x2fb   : > { %v5828_v10 = vadd.f32 %v12737_v62, %v5404_v53  ;;  %v5830_v61 = vadd.f32 %v12740_v58, %v5406_v57  ;;  %v5827_v0 = vadd.f32 %v12743_v54, %v5403_v23  ;;  %v5829_v22 = vadd.f32 %v12746_v25, %v5405_v34 }
 0x2fc   : > { %v5832_v5 = vadd.f32 %v12737_v62, %v5408_v63  ;;  %v5834_v8 = vadd.f32 %v12740_v58, %v5410_v44  ;;  %v12776_v39 = vpop.eup %8593  ;;  %v5831_v34 = vadd.f32 %v12743_v54, %v5407_v48  ;;  %v5833_v63 = vadd.f32 %v12746_v25, %v5409_v41  ;;  %v17256_v41 = vld [vmem:[#allocation111_spill] sm:$0xff] }
 0x2fd   : > { %v6084_v53 = vmax.f32 %v5828_v10, 0.0  ;;  %v6086_v57 = vmax.f32 %v5830_v61, 0.0  ;;  %v6083_v1 = vmax.f32 %v5827_v0, 0.0  ;;  %v6085_v23 = vmax.f32 %v5829_v22, 0.0  ;;  %v17257_v22 = vld [vmem:[#allocation129_spill] sm:$0xff] }
 0x2fe   : > { %v12782_v44 = vmul.f32 %v12628_v14, %v17253_v21  ;;  %v12786_v16 = vmul.f32 %v12619_v47, %v17254_v3  ;;  %v6088_v6 = vmax.f32 %v5832_v5, 0.0  ;;  %v6090_v20 = vmax.f32 %v5834_v8, 0.0 }
 0x2ff   : > { %6474 = vmatprep.mubr.f32.mxu0 %v6084_v53  ;;  %6859 = vmatprep.mubr.f32.mxu1 %v6086_v57  ;;  %v5836_v10 = vadd.f32 %v12737_v62, %v5412_v49  ;;  %v5838_v0 = vadd.f32 %v12740_v58, %v5414_v17  ;;  %v12791_v48 = vadd.f32 1e-05, %v12365_v43  ;;  %v12795_v21 = vmul.f32 %v12625_v24, %v17256_v41  ;;  %v17258_v49 = vld [vmem:[#allocation109_spill] sm:$0xff] }
 0x300   : > { %6475 = vmatmul.mubr.f32.vlgmr.msra.gmra.mxu0 %v6083_v1  ;;  %6860 = vmatmul.mubr.f32.vlgmr.msra.gmra.mxu1 %v6085_v23  ;;  %v12799_v61 = vmul.f32 %v12622_v26, %v12324_v56  ;;  %v12803_v5 = vmul.f32 %v12628_v14, %v17257_v22  ;;  %v12807_v43 = vmul.f32 %v12619_v47, %v17258_v49  ;;  %v17259_v1 = vld [vmem:[#allocation113_spill] sm:$0xff]  ;;  %v6087_v57 = vmax.f32 %v5831_v34, 0.0 }
 0x301   : > { %17255 = vst [vmem:[#allocation50_spill] sm:$0xff] %v12791_v48  ;;  %6479 = vmatprep.mubr.f32.mxu0 %v6088_v6  ;;  %6864 = vmatprep.mubr.f32.mxu1 %v6090_v20  ;;  %v12811_v17 = vmul.f32 %v12625_v24, %v17259_v1  ;;  %v12815_v8 = vmul.f32 %v12622_v26, %v12336_v38  ;;  %v6089_v23 = vmax.f32 %v5833_v63, 0.0  ;;  %v6092_v6 = vmax.f32 %v5836_v10, 0.0  ;;  %v17261_v38 = vld [vmem:[#allocation130_spill] sm:$0xff]  ;;  %v17262_v1 = vld [vmem:[#allocation112_spill] sm:$0xff] }
 0x302   : > { %v17260_v56 = vsub.f32 %v11383_v27, %v12574_v2  ;;  %v5835_v20 = vadd.f32 %v12743_v54, %v5411_v4  ;;  %v5837_v3 = vadd.f32 %v12746_v25, %v5413_v45  ;;  %v6094_v41 = vmax.f32 %v5838_v0, 0.0  ;;  %v17263_v45 = vld [vmem:[#allocation116_spill] sm:$0xff] }
 0x303   : > { %v5840_v22 = vadd.f32 %v12737_v62, %v5416_v7  ;;  %v5842_v49 = vadd.f32 %v12740_v58, %v5418_v42  ;;  %v5434_v26 = vmul.f32 %v12628_v14, %v17261_v38  ;;  %v12828_v27 = vmul.f32 %v12619_v47, %v17262_v1 }
 0x304   : > { %v4633_v53 = vmax.f32 %v17260_v56, 0.0  ;;  %6480 = vmatmul.mubr.f32.gmra.mxu0 %v6087_v57  ;;  %6865 = vmatmul.mubr.f32.gmra.mxu1 %v6089_v23  ;;  %v4538_v2 = vmul.f32 0.015625, %v12678_v31  ;;  %v4253_v4 = vadd.f32 %v12702_v13, %v12662_v29  ;;  %v12835_v7 = vmul.f32 %v12625_v24, %v17263_v45 }
 0x305   : > { %6484 = vmatprep.mubr.f32.mxu0 %v6092_v6  ;;  %6869 = vmatprep.mubr.f32.mxu1 %v6094_v41  ;;  %v4778_v42 = vcombine.low %v12686_v11, %v12776_v39  ;;  %v3584_v14 = vadd.f32 %v12700_v52, %v12647_v51  ;;  %v6091_v47 = vmax.f32 %v5835_v20, 0.0  ;;  %v6093_v63 = vmax.f32 %v5837_v3, 0.0 }
 0x306   : > { %v4666_v34 = vadd.f32 1e-05, %v4633_v53  ;;  %v5839_v31 = vadd.f32 %v12743_v54, %v12734_v55  ;;  %v5841_v29 = vadd.f32 %v12746_v25, %v5417_v18  ;;  %v6096_v13 = vmax.f32 %v5840_v22, 0.0  ;;  %v17265_v18 = vld [vmem:[#allocation238_spill] sm:$0xff] }
 0x307   : > { %v6098_v10 = vmax.f32 %v5842_v49, 0.0  ;;  %v5844_v24 = vadd.f32 %v12737_v62, %v12752_v32  ;;  %v5846_v0 = vadd.f32 %v12740_v58, %v12756_v50  ;;  %v17264_v39 = vsub.f32 %v12374_v35, %v12371_v33 }
 0x308   : > { %6485 = vmatmul.mubr.f32.gmra.mxu0 %v6091_v47  ;;  %6870 = vmatmul.mubr.f32.gmra.mxu1 %v6093_v63  ;;  %v4602_v52 = vsub.f32 %v4538_v2, %v12697_v59  ;;  %v4254_v55 = vadd.f32 %v4253_v4, %v12666_v30  ;;  %v4605_v56 = vsub.f32 %v17265_v18, %v12682_v36  ;;  %8595 = vrsqrt.f32 %v4666_v34 }
 0x309   : > { %v12851_v11 = vmax.f32 %v17264_v39, 0.0  ;;  %6489 = vmatprep.mubr.f32.mxu0 %v6096_v13  ;;  %6874 = vmatprep.mubr.f32.mxu1 %v6098_v10  ;;  %v5843_v32 = vadd.f32 %v12743_v54, %v12760_v28  ;;  %v5845_v50 = vadd.f32 %v12746_v25, %v12770_v40  ;;  %v4786_v33 = vrot.slane %v4778_v42, %v17214_v9  ;;  %v17270_v13 = vld [vmem:[#allocation40_spill] sm:$0xff] }
 0x30a   : > { %v6095_v35 = vmax.f32 %v5839_v31, 0.0  ;;  %v6097_v53 = vmax.f32 %v5841_v29, 0.0  ;;  %v5848_v59 = vadd.f32 %v12737_v62, %v12774_v60  ;;  %v5850_v30 = vadd.f32 %v12740_v58, %v12782_v44  ;;  %v17269_v31 = vld [vmem:[#allocation32_spill] sm:$0xff] }
 0x30b   : > { %v6100_v36 = vmax.f32 %v5844_v24, 0.0  ;;  %v6102_v57 = vmax.f32 %v5846_v0, 0.0  ;;  %v4794_v23 = vcombine.low %v4786_v33, %v12593_v37  ;;  %v3585_v20 = vrot.slane %v3584_v14, 4  ;;  %v17271_v24 = vld [vmem:[#allocation168_spill] sm:$0xff] }
 0x30c   : > { %6490 = vmatmul.mubr.f32.gmra.mxu0 %v6095_v35  ;;  %6875 = vmatmul.mubr.f32.gmra.mxu1 %v6097_v53  ;;  %v5847_v28 = vadd.f32 %v12743_v54, %v12786_v16  ;;  %v4634_v40 = vmax.f32 %v4602_v52, 0.0  ;;  %v4255_v3 = vadd.f32 %v4254_v55, %v12670_v19  ;;  %v12870_v6 = vmax.f32 %v4605_v56, 0.0  ;;  %v17272_v52 = vld [vmem:[#allocation56_spill] sm:$0xff] }
 0x30d   : > { %6494 = vmatprep.mubr.f32.mxu0 %v6100_v36  ;;  %6879 = vmatprep.mubr.f32.mxu1 %v6102_v57  ;;  %v6099_v60 = vmax.f32 %v5843_v32, 0.0  ;;  %v6101_v41 = vmax.f32 %v5845_v50, 0.0  ;;  %v5849_v44 = vadd.f32 %v12746_v25, %v12795_v21  ;;  %v4801_v37 = vrot.slane %v4794_v23, %v17214_v9  ;;  %v17274_v36 = vld [vmem:[#allocation270_spill] sm:$0xff]  ;;  %v17277_v23 = vld [vmem:[#allocation60_spill] sm:$0xff] }
 0x30e   : > { %v6104_v22 = vmax.f32 %v5848_v59, 0.0  ;;  %v6106_v49 = vmax.f32 %v5850_v30, 0.0  ;;  %v5852_v38 = vadd.f32 %v12737_v62, %v12799_v61  ;;  %v5854_v16 = vadd.f32 %v12740_v58, %v12803_v5  ;;  %v17273_v30 = vld [vmem:[#allocation260_spill] sm:$0xff] }
 0x30f   : > { %v5851_v19 = vadd.f32 %v12743_v54, %v12807_v43  ;;  %v5853_v1 = vadd.f32 %v12746_v25, %v12811_v17  ;;  %v5856_v2 = vadd.f32 %v12737_v62, %v12815_v8  ;;  %v4955_v21 = vmul.f32 %v4801_v37, %v12581_v46  ;;  %v17266_v17 = vld [vmem:[#allocation16_spill] sm:$0xff] }
 0x310   : > { %6495 = vmatmul.mubr.f32.gmra.mxu0 %v6099_v60  ;;  %6880 = vmatmul.mubr.f32.gmra.mxu1 %v6101_v41  ;;  %v6103_v4 = vmax.f32 %v5847_v28, 0.0  ;;  %v5858_v45 = vadd.f32 %v12740_v58, %v5434_v26  ;;  %v3586_v61 = vadd.f32 %v3585_v20, %v3584_v14  ;;  %v4256_v42 = vadd.f32 %v4255_v3, %v12674_v15  ;;  %v17267_v62 = vld [vmem:[#allocation12_spill] sm:$0xff]  ;;  %v17268_v26 = vld [vmem:[#allocation17_spill] sm:$0xff] }
 0x311   : > { %6499 = vmatprep.mubr.f32.mxu0 %v6104_v22  ;;  %6884 = vmatprep.mubr.f32.mxu1 %v6106_v49  ;;  %v6105_v5 = vmax.f32 %v5849_v44, 0.0  ;;  %v12889_v43 = vrot.slane %v4955_v21, %v9082_v12  ;;  %v12892_v34 = vrot.slane %v4955_v21, %v17266_v17  ;;  %v12895_v8 = vrot.slane %v4955_v21, %v17267_v62  ;;  %v17278_v28 = vld [vmem:[#allocation64_spill] sm:$0xff]  ;;  %v17280_v49 = vld [vmem:[#allocation59_spill] sm:$0xff] }
 0x312   : > { %v6108_v47 = vmax.f32 %v5852_v38, 0.0  ;;  %v6110_v63 = vmax.f32 %v5854_v16, 0.0  ;;  %v5855_v58 = vadd.f32 %v12743_v54, %v12828_v27  ;;  %v12900_v14 = vrot.slane %v4955_v21, %v17268_v26  ;;  %v17282_v16 = vld [vmem:[#allocation39_spill] sm:$0xff] }
 0x313   : > { %v6107_v15 = vmax.f32 %v5851_v19, 0.0  ;;  %v5135_v29 = vmul.f32 %v12889_v43, %v17269_v31  ;;  %v5136_v10 = vmul.f32 %v12892_v34, %v17270_v13  ;;  %v5137_v0 = vmul.f32 %v12895_v8, %v17271_v24  ;;  %v17288_v31 = vld [vmem:[#allocation153_spill] sm:$0xff]  ;;  %v17289_v13 = vld [vmem:[#allocation114_spill] sm:$0xff]  ;;  %v17290_v24 = vld [vmem:[#allocation67_spill] sm:$0xff] }
 0x314   : > { %6500 = vmatmul.mubr.f32.gmra.mxu0 %v6103_v4  ;;  %6885 = vmatmul.mubr.f32.gmra.mxu1 %v6105_v5  ;;  %v5857_v39 = vadd.f32 %v12746_v25, %v12835_v7  ;;  %v5138_v54 = vmul.f32 %v12900_v14, %v17272_v52  ;;  %v3587_v27 = vrot.slane %v3586_v61, 2  ;;  %v4257_v55 = vrot.slane %v4256_v42, 4  ;;  %v17285_v5 = vld [vmem:[#allocation62_spill] sm:$0xff] }
 0x315   : > { %6504 = vmatprep.mubr.f32.mxu0 %v6108_v47  ;;  %6889 = vmatprep.mubr.f32.mxu1 %v6110_v63  ;;  %v6109_v18 = vmax.f32 %v5853_v1, 0.0  ;;  %v6112_v56 = vmax.f32 %v5856_v2, 0.0  ;;  %v5219_v32 = vcombine.low %v5135_v29, %v5136_v10  ;;  %v4667_v50 = vadd.f32 1e-05, %v4634_v40  ;;  %v12912_v33 = vpop.eup %8595  ;;  %v17279_v40 = vld [vmem:[#allocation65_spill] sm:$0xff] }
 0x316   : > { %v6114_v35 = vmax.f32 %v5858_v45, 0.0  ;;  %v6111_v53 = vmax.f32 %v5855_v58, 0.0  ;;  %v5220_v59 = vcombine.low %v5137_v0, %v5138_v54  ;;  %v17275_v25 = vcombine.low %v17273_v30, %v17274_v36  ;;  %v17283_v45 = vld [vmem:[#allocation61_spill] sm:$0xff]  ;;  %v17292_v54 = vld [vmem:[#allocation131_spill] sm:$0xff]  ;;  %v17296_v30 = vld [vmem:[#allocation132_spill] sm:$0xff] }
 0x317   : > { %v5227_v57 = vrot.slane %v5219_v32, %v17214_v9  ;;  %v2130_v20 = vrot.slane %v17277_v23, %v17266_v17  ;;  %v2146_v3 = vrot.slane %v17278_v28, %v17266_v17  ;;  %v2162_v60 = vrot.slane %v17279_v40, %v17266_v17  ;;  %v17287_v58 = vld [vmem:[#allocation21_spill] sm:$0xff]  ;;  %v17294_v32 = vld [vmem:[#allocation154_spill] sm:$0xff]  ;;  %v17297_v36 = vld [vmem:[#allocation24_spill] sm:$0xff] }
 0x318   : > { %v12918_v7 = vrot.slane %v17275_v25, %v17214_v9  ;;  %6505 = vmatmul.mubr.f32.gmra.mxu0 %v6107_v15  ;;  %6890 = vmatmul.mubr.f32.gmra.mxu1 %v6109_v18  ;;  %v6113_v41 = vmax.f32 %v5857_v39, 0.0  ;;  %v5234_v44 = vrot.slane %v5220_v59, %v17214_v9  ;;  %v12928_v37 = vadd.f32 %v3587_v27, %v3586_v61 }
 0x319   : > { %v12930_v22 = vadd.f32 %v4257_v55, %v4256_v42  ;;  %6509 = vmatprep.mubr.f32.mxu0 %v6112_v56  ;;  %6894 = vmatprep.mubr.f32.mxu1 %v6114_v35  ;;  %8597 = vrsqrt.f32 %v4667_v50  ;;  %v17281_v38 = vrot.slane %v17280_v49, %v17266_v17  ;;  %v12939_v1 = vsub.f32 %v17282_v16, %v2130_v20  ;;  %v17293_v55 = vld [vmem:[#allocation143_spill] sm:$0xff]  ;;  %v17299_v20 = vld [vmem:[#allocation20_spill] sm:$0xff] }
 0x31a   : > { %17276 = vst [vmem:[#allocation55_spill] sm:$0xff] %v12918_v7  ;;  %v12942_v2 = vsub.f32 %v17282_v16, %v2146_v3  ;;  %v5235_v21 = vcombine.low %v5227_v57, %v5234_v44  ;;  %v12945_v4 = vsub.f32 %v17282_v16, %v2162_v60  ;;  %v17284_v61 = vrot.slane %v17283_v45, %v17266_v17  ;;  %v17295_v35 = vld [vmem:[#allocation115_spill] sm:$0xff]  ;;  %v17298_v57 = vld [vmem:[#allocation204_spill] sm:$0xff]  ;;  %v17300_v3 = vld [vmem:[#allocation117_spill] sm:$0xff] }
 0x31b   : > { %v12936_v19 = vsub.f32 %v17282_v16, %v17281_v38  ;;  %v17286_v47 = vrot.slane %v17285_v5, %v17266_v17  ;;  %v5436_v15 = vmul.f32 %v12892_v34, %v17287_v58  ;;  %v5438_v29 = vmul.f32 %v12900_v14, %v17288_v31  ;;  %v17301_v60 = vld [vmem:[#allocation134_spill] sm:$0xff]  ;;  %v17303_v38 = vld [vmem:[#allocation156_spill] sm:$0xff]  ;;  %v17314_v7 = vld [vmem:[#allocation29_spill] sm:$0xff] }
 0x31c   : > { %v12951_v42 = vsub.f32 %v17282_v16, %v17284_v61  ;;  %v5435_v10 = vmul.f32 %v12889_v43, %v17289_v13  ;;  %v17291_v0 = vrot.slane %v17290_v24, %v17266_v17  ;;  %6510 = vmatmul.mubr.f32.gmra.mxu0 %v6111_v53  ;;  %6895 = vmatmul.mubr.f32.gmra.mxu1 %v6113_v41  ;;  %v4259_v56 = vrot.slane %v12930_v22, 2  ;;  %v17302_v44 = vld [vmem:[#allocation138_spill] sm:$0xff]  ;;  %v17305_v61 = vld [vmem:[#allocation135_spill] sm:$0xff]  ;;  %v17306_v24 = vld [vmem:[#allocation25_spill] sm:$0xff] }
 0x31d   : > { %v12957_v63 = vsub.f32 %v17282_v16, %v17286_v47  ;;  %v5242_v52 = vrot.slane %v5235_v21, %v17214_v9  ;;  %v5437_v27 = vmul.f32 %v12895_v8, %v17292_v54  ;;  %v5440_v18 = vmul.f32 %v12892_v34, %v17293_v55  ;;  %v17304_v21 = vld [vmem:[#allocation118_spill] sm:$0xff]  ;;  %v17308_v55 = vld [vmem:[#allocation119_spill] sm:$0xff] }
 0x31e   : > { %v12969_v39 = vsub.f32 %v17282_v16, %v17291_v0  ;;  %v5442_v50 = vmul.f32 %v12900_v14, %v17294_v32  ;;  %v5439_v59 = vmul.f32 %v12889_v43, %v17295_v35  ;;  %v5441_v53 = vmul.f32 %v12895_v8, %v17296_v30  ;;  %v17309_v35 = vld [vmem:[#allocation136_spill] sm:$0xff] }
 0x31f   : > { %v5444_v25 = vmul.f32 %v12892_v34, %v17297_v36  ;;  %v5396_v23 = vsub.f32 %v17298_v57, %v5242_v52  ;;  %v5446_v28 = vmul.f32 %v12900_v14, %v17299_v20  ;;  %v5443_v40 = vmul.f32 %v12889_v43, %v17300_v3  ;;  %v17307_v52 = vld [vmem:[#allocation157_spill] sm:$0xff] }
 0x320   : > { %v5445_v41 = vmul.f32 %v12895_v8, %v17301_v60  ;;  %v5448_v49 = vmul.f32 %v12892_v34, %v17302_v44  ;;  %v5450_v16 = vmul.f32 %v12900_v14, %v17303_v38  ;;  %v12998_v45 = vmul.f32 %v12889_v43, %v17304_v21  ;;  %v17310_v38 = vld [vmem:[#allocation142_spill] sm:$0xff] }
 0x321   : > { %v13002_v5 = vmul.f32 %v12895_v8, %v17305_v61  ;;  %v13005_v47 = vrot.slane %v5396_v23, %v17266_v17  ;;  %v13008_v58 = vrot.slane %v5396_v23, %v17268_v26  ;;  %v13011_v31 = vrot.slane %v5396_v23, %v9082_v12  ;;  %v17311_v61 = vld [vmem:[#allocation158_spill] sm:$0xff] }
 0x322   : > { %v13014_v13 = vrot.slane %v5396_v23, %v17267_v62  ;;  %v5452_v0 = vmul.f32 %v12892_v34, %v17306_v24  ;;  %v13020_v54 = vmul.f32 %v12900_v14, %v17307_v52  ;;  %v13024_v32 = vmul.f32 %v12889_v43, %v17308_v55  ;;  %v17312_v55 = vld [vmem:[#allocation122_spill] sm:$0xff] }
 0x323   : > { %v13028_v30 = vmul.f32 %v12895_v8, %v17309_v35  ;;  %v5860_v36 = vadd.f32 %v13005_v47, %v5436_v15  ;;  %v5862_v23 = vadd.f32 %v13008_v58, %v5438_v29  ;;  %v5859_v20 = vadd.f32 %v13011_v31, %v5435_v10  ;;  %v17313_v10 = vld [vmem:[#allocation137_spill] sm:$0xff] }
 0x324   : > { %v5861_v3 = vadd.f32 %v13014_v13, %v5437_v27  ;;  %v5864_v60 = vadd.f32 %v13005_v47, %v5440_v18  ;;  %v5866_v44 = vadd.f32 %v13008_v58, %v5442_v50  ;;  %v13038_v21 = vmul.f32 %v12892_v34, %v17310_v38 }
 0x325   : > { %v13042_v24 = vmul.f32 %v12900_v14, %v17311_v61  ;;  %v6116_v52 = vmax.f32 %v5860_v36, 0.0  ;;  %v6118_v15 = vmax.f32 %v5862_v23, 0.0  ;;  %v13046_v29 = vmul.f32 %v12889_v43, %v17312_v55 }
 0x326   : > { %v13050_v27 = vmul.f32 %v12895_v8, %v17313_v10  ;;  %v6115_v18 = vmax.f32 %v5859_v20, 0.0  ;;  %v6117_v50 = vmax.f32 %v5861_v3, 0.0  ;;  %v5863_v35 = vadd.f32 %v13011_v31, %v5439_v59  ;;  %v8598_v51 = vpop.eup %8597  ;;  %v17315_v20 = vld [vmem:[#allocation159_spill] sm:$0xff]  ;;  %v17316_v59 = vld [vmem:[#allocation124_spill] sm:$0xff] }
 0x327   : > { %v5865_v38 = vadd.f32 %v13014_v13, %v5441_v53  ;;  %6514 = vmatprep.mubr.f32.mxu0 %v6116_v52  ;;  %6899 = vmatprep.mubr.f32.mxu1 %v6118_v15  ;;  %v6120_v61 = vmax.f32 %v5864_v60, 0.0  ;;  %v6122_v36 = vmax.f32 %v5866_v44, 0.0  ;;  %v5868_v23 = vadd.f32 %v13005_v47, %v5444_v25  ;;  %v17317_v60 = vld [vmem:[#allocation139_spill] sm:$0xff]  ;;  %v17318_v44 = vld [vmem:[#allocation30_spill] sm:$0xff] }
 0x328   : > { %v5870_v55 = vadd.f32 %v13008_v58, %v5446_v28  ;;  %6515 = vmatmul.mubr.f32.gmra.mxu0 %v6115_v18  ;;  %6900 = vmatmul.mubr.f32.gmra.mxu1 %v6117_v50  ;;  %v5460_v10 = vmul.f32 %v12892_v34, %v17314_v7  ;;  %v5462_v3 = vmul.f32 %v12900_v14, %v17315_v20  ;;  %v4670_v52 = vadd.f32 1e-05, %v12870_v6 }
 0x329   : > { %v13062_v53 = vmul.f32 %v12889_v43, %v17316_v59  ;;  %6519 = vmatprep.mubr.f32.mxu0 %v6120_v61  ;;  %6904 = vmatprep.mubr.f32.mxu1 %v6122_v36  ;;  %v5867_v25 = vadd.f32 %v13011_v31, %v5443_v40  ;;  %v13068_v28 = vmul.f32 %v12895_v8, %v17317_v60  ;;  %v3589_v15 = vrot.slane %v12928_v37, 1  ;;  %v17319_v60 = vld [vmem:[#allocation161_spill] sm:$0xff] }
 0x32a   : > { %v13072_v7 = vmul.f32 %v12892_v34, %v17318_v44  ;;  %v6119_v18 = vmax.f32 %v5863_v35, 0.0  ;;  %v6121_v50 = vmax.f32 %v5865_v38, 0.0  ;;  %v5869_v20 = vadd.f32 %v13014_v13, %v5445_v41  ;;  %v17320_v44 = vld [vmem:[#allocation126_spill] sm:$0xff] }
 0x32b   : > { %v4260_v6 = vadd.f32 %v4259_v56, %v12930_v22  ;;  %v6124_v61 = vmax.f32 %v5868_v23, 0.0  ;;  %v6126_v36 = vmax.f32 %v5870_v55, 0.0  ;;  %v5872_v40 = vadd.f32 %v13005_v47, %v5448_v49  ;;  %v17321_v56 = vld [vmem:[#allocation144_spill] sm:$0xff] }
 0x32c   : > { %v5874_v59 = vadd.f32 %v13008_v58, %v5450_v16  ;;  %6520 = vmatmul.mubr.f32.gmra.mxu0 %v6119_v18  ;;  %6905 = vmatmul.mubr.f32.gmra.mxu1 %v6121_v50  ;;  %v5466_v34 = vmul.f32 %v12900_v14, %v17319_v60  ;;  %v5463_v48 = vmul.f32 %v12889_v43, %v17320_v44  ;;  %8599 = vrsqrt.f32 %v4670_v52  ;;  %v17322_v16 = vld [vmem:[#allocation90_spill] sm:$0xff] }
 0x32d   : > { %v4802_v35 = vcombine.low %v12912_v33, %v8598_v51  ;;  %6524 = vmatprep.mubr.f32.mxu0 %v6124_v61  ;;  %6909 = vmatprep.mubr.f32.mxu1 %v6126_v36  ;;  %v6123_v22 = vmax.f32 %v5867_v25, 0.0  ;;  %v13086_v41 = vmul.f32 %v12895_v8, %v17321_v56  ;;  %v3590_v49 = vadd.f32 %v3589_v15, %v12928_v37  ;;  %v17324_v25 = vld [vmem:[#allocation217_spill] sm:$0xff] }
 0x32e   : > { %v13091_v38 = vadd.f32 %v17322_v16, %v12936_v19  ;;  %v6125_v14 = vmax.f32 %v5869_v20, 0.0  ;;  %v5871_v43 = vadd.f32 %v13011_v31, %v12998_v45  ;;  %v5873_v51 = vadd.f32 %v13014_v13, %v13002_v5 }
 0x32f   : > { %v5876_v33 = vadd.f32 %v13005_v47, %v5452_v0  ;;  %v6128_v23 = vmax.f32 %v5872_v40, 0.0  ;;  %v6130_v55 = vmax.f32 %v5874_v59, 0.0  ;;  %v5878_v8 = vadd.f32 %v13008_v58, %v13020_v54 }
 0x330   : > { %17323 = vst [vmem:[#allocation133_spill] sm:$0xff] %v13091_v38  ;;  %v4261_v52 = vrot.slane %v4260_v6, 1  ;;  %6525 = vmatmul.mubr.f32.gmra.mxu0 %v6123_v22  ;;  %6910 = vmatmul.mubr.f32.gmra.mxu1 %v6125_v14  ;;  %v5875_v37 = vadd.f32 %v13011_v31, %v13024_v32  ;;  %v5877_v19 = vadd.f32 %v13014_v13, %v13028_v30  ;;  %v3628_v5 = vrot.slane %v17324_v25, 1 }
 0x331   : > { %v4810_v45 = vrot.slane %v4802_v35, %v17214_v9  ;;  %6529 = vmatprep.mubr.f32.mxu0 %v6128_v23  ;;  %6914 = vmatprep.mubr.f32.mxu1 %v6130_v55  ;;  %v5880_v0 = vadd.f32 %v13005_v47, %v13038_v21  ;;  %v5882_v54 = vadd.f32 %v13008_v58, %v13042_v24  ;;  %v13110_v15 = vmul.f32 0.015625, %v3590_v49  ;;  %v17326_v21 = vld [vmem:[#allocation175_spill] sm:$0xff] }
 0x332   : > { %v13114_v32 = vadd.f32 %v17322_v16, %v12939_v1  ;;  %v6127_v18 = vmax.f32 %v5871_v43, 0.0  ;;  %v6129_v30 = vmax.f32 %v5873_v51, 0.0  ;;  %v6132_v50 = vmax.f32 %v5876_v33, 0.0 }
 0x333   : > { %v5879_v20 = vadd.f32 %v13011_v31, %v13046_v29  ;;  %v6134_v61 = vmax.f32 %v5878_v8, 0.0  ;;  %v5881_v36 = vadd.f32 %v13014_v13, %v13050_v27  ;;  %v4818_v40 = vcombine.low %v4810_v45, %v17326_v21 }
 0x334   : > { %17325 = vst [vmem:[#allocation151_spill] sm:$0xff] %v13114_v32  ;;  %v4262_v59 = vadd.f32 %v4261_v52, %v4260_v6  ;;  %6530 = vmatmul.mubr.f32.gmra.mxu0 %v6127_v18  ;;  %6915 = vmatmul.mubr.f32.gmra.mxu1 %v6129_v30  ;;  %v6131_v24 = vmax.f32 %v5875_v37, 0.0  ;;  %v6133_v60 = vmax.f32 %v5877_v19, 0.0  ;;  %v5884_v1 = vadd.f32 %v13005_v47, %v5460_v10  ;;  %v17327_v52 = vld [vmem:[#allocation43_spill] sm:$0xff]  ;;  %v17328_v19 = vld [vmem:[#allocation49_spill] sm:$0xff] }
 0x335   : > { %v5886_v44 = vadd.f32 %v13008_v58, %v5462_v3  ;;  %6534 = vmatprep.mubr.f32.mxu0 %v6132_v50  ;;  %6919 = vmatprep.mubr.f32.mxu1 %v6134_v61  ;;  %v6136_v35 = vmax.f32 %v5880_v0, 0.0  ;;  %v6138_v22 = vmax.f32 %v5882_v54, 0.0  ;;  %v5883_v29 = vadd.f32 %v13011_v31, %v13062_v53  ;;  %v17329_v0 = vld [vmem:[#allocation191_spill] sm:$0xff] }
 0x336   : > { %v4825_v27 = vrot.slane %v4818_v40, %v17214_v9  ;;  %v6135_v56 = vmax.f32 %v5879_v20, 0.0  ;;  %v5885_v6 = vadd.f32 %v13014_v13, %v13068_v28  ;;  %v4542_v49 = vmul.f32 0.015625, %v4262_v59 }
 0x337   : > { %v4574_v14 = vmul.f32 %v13110_v15, %v13110_v15  ;;  %v6137_v10 = vmax.f32 %v5881_v36, 0.0  ;;  %v5888_v3 = vadd.f32 %v13005_v47, %v13072_v7  ;;  %v5890_v43 = vadd.f32 %v13008_v58, %v5466_v34 }
 0x338   : > { %v4956_v51 = vmul.f32 %v4825_v27, %v12581_v46  ;;  %6535 = vmatmul.mubr.f32.gmra.mxu0 %v6131_v24  ;;  %6920 = vmatmul.mubr.f32.gmra.mxu1 %v6133_v60  ;;  %v6140_v53 = vmax.f32 %v5884_v1, 0.0  ;;  %v6142_v33 = vmax.f32 %v5886_v44, 0.0  ;;  %v5887_v23 = vadd.f32 %v13011_v31, %v5463_v48  ;;  %v17336_v24 = vld [vmem:[#allocation228_spill] sm:$0xff] }
 0x339   : > { %v3630_v28 = vadd.f32 %v13114_v32, %v13091_v38  ;;  %v13137_v55 = vpop.eup %8599  ;;  %6539 = vmatprep.mubr.f32.mxu0 %v6136_v35  ;;  %6924 = vmatprep.mubr.f32.mxu1 %v6138_v22  ;;  %v6139_v8 = vmax.f32 %v5883_v29, 0.0  ;;  %v6141_v7 = vmax.f32 %v5885_v6, 0.0  ;;  %v5889_v48 = vadd.f32 %v13014_v13, %v13086_v41  ;;  %v17331_v41 = vld [vmem:[#allocation205_spill] sm:$0xff] }
 0x33a   : > { %v13140_v47 = vrot.slane %v4956_v51, %v9082_v12  ;;  %v13143_v58 = vrot.slane %v4956_v51, %v17266_v17  ;;  %v13146_v46 = vrot.slane %v4956_v51, %v17267_v62  ;;  %v13151_v31 = vrot.slane %v4956_v51, %v17268_v26 }
 0x33b   : > { %v4606_v34 = vsub.f32 %v4542_v49, %v4574_v14  ;;  %v13161_v18 = vadd.f32 %v17322_v16, %v12942_v2  ;;  %v6144_v13 = vmax.f32 %v5888_v3, 0.0  ;;  %v13167_v50 = vadd.f32 %v17322_v16, %v12945_v4  ;;  %v17338_v49 = vld [vmem:[#allocation26_spill] sm:$0xff] }
 0x33c   : > { %v5139_v37 = vmul.f32 %v13140_v47, %v17327_v52  ;;  %v5140_v45 = vmul.f32 %v13143_v58, %v17328_v19  ;;  %v5141_v54 = vmul.f32 %v13146_v46, %v17329_v0  ;;  %6540 = vmatmul.mubr.f32.gmra.mxu0 %v6135_v56  ;;  %6925 = vmatmul.mubr.f32.gmra.mxu1 %v6137_v10  ;;  %v6146_v61 = vmax.f32 %v5890_v43, 0.0  ;;  %v17339_v43 = vld [vmem:[#allocation178_spill] sm:$0xff]  ;;  %v17346_v0 = vld [vmem:[#allocation163_spill] sm:$0xff] }
 0x33d   : > { %17330 = vst [vmem:[#allocation203_spill] sm:$0xff] %v13161_v18  ;;  %v5142_v30 = vmul.f32 %v13151_v31, %v17331_v41  ;;  %17332 = vst [vmem:[#allocation120_spill] sm:$0xff] %v13167_v50  ;;  %v13171_v20 = vadd.f32 %v17322_v16, %v12951_v42  ;;  %6544 = vmatprep.mubr.f32.mxu0 %v6140_v53  ;;  %6929 = vmatprep.mubr.f32.mxu1 %v6142_v33  ;;  %v4638_v59 = vmax.f32 %v4606_v34, 0.0  ;;  %v17340_v53 = vld [vmem:[#allocation140_spill] sm:$0xff]  ;;  %v17343_v34 = vld [vmem:[#allocation179_spill] sm:$0xff] }
 0x33e   : > { %v5243_v36 = vcombine.low %v5139_v37, %v5140_v45  ;;  %v13175_v2 = vadd.f32 %v17322_v16, %v12957_v63  ;;  %v3631_v21 = vadd.f32 %v3630_v28, %v13161_v18  ;;  %v13180_v4 = vadd.f32 %v17322_v16, %v12969_v39  ;;  %v17344_v37 = vld [vmem:[#allocation141_spill] sm:$0xff] }
 0x33f   : > { %17333 = vst [vmem:[#allocation95_spill] sm:$0xff] %v13171_v20  ;;  %v5244_v40 = vcombine.low %v5141_v54, %v5142_v30  ;;  %v13184_v42 = vadd.f32 %v17322_v16, %v17336_v24  ;;  %v3629_v1 = vadd.f32 %v3628_v5, %v17324_v25  ;;  %v13192_v63 = vmul.f32 %v13091_v38, %v13091_v38  ;;  %v17348_v30 = vld [vmem:[#allocation182_spill] sm:$0xff] }
 0x340   : > { %17334 = vst [vmem:[#allocation104_spill] sm:$0xff] %v13175_v2  ;;  %17335 = vst [vmem:[#allocation121_spill] sm:$0xff] %v13180_v4  ;;  %v5251_v60 = vrot.slane %v5243_v36, %v17214_v9  ;;  %v13196_v44 = vmul.f32 %v13114_v32, %v13114_v32  ;;  %6545 = vmatmul.mubr.f32.gmra.mxu0 %v6139_v8  ;;  %6930 = vmatmul.mubr.f32.gmra.mxu1 %v6141_v7  ;;  %v6143_v39 = vmax.f32 %v5887_v23, 0.0  ;;  %v17341_v23 = vld [vmem:[#allocation162_spill] sm:$0xff]  ;;  %v17349_v36 = vld [vmem:[#allocation145_spill] sm:$0xff] }
 0x341   : > { %17337 = vst [vmem:[#allocation96_spill] sm:$0xff] %v13184_v42  ;;  %v5258_v35 = vrot.slane %v5244_v40, %v17214_v9  ;;  %v13201_v22 = vmul.f32 %v13161_v18, %v13161_v18  ;;  %v13205_v25 = vmul.f32 %v13167_v50, %v13167_v50  ;;  %6549 = vmatprep.mubr.f32.mxu0 %v6144_v13  ;;  %v6145_v5 = vmax.f32 %v5889_v48, 0.0  ;;  %v17342_v8 = vld [vmem:[#allocation146_spill] sm:$0xff]  ;;  %v17347_v13 = vld [vmem:[#allocation27_spill] sm:$0xff] }
 0x342   : > { %6934 = vmatprep.mubr.f32.mxu1 %v6146_v61  ;;  %v13208_v29 = vadd.f32 %v3631_v21, %v13167_v50  ;;  %v13212_v27 = vmul.f32 %v13171_v20, %v13171_v20  ;;  %v13216_v56 = vmul.f32 %v13175_v2, %v13175_v2  ;;  %v5468_v14 = vmul.f32 %v13143_v58, %v17338_v49  ;;  %v17354_v49 = vld [vmem:[#allocation165_spill] sm:$0xff]  ;;  %v17361_v50 = vld [vmem:[#allocation152_spill] sm:$0xff]  ;;  %v17362_v32 = vld [vmem:[#allocation23_spill] sm:$0xff] }
 0x343   : > { %v5259_v6 = vcombine.low %v5251_v60, %v5258_v35  ;;  %v4671_v10 = vadd.f32 1e-05, %v4638_v59  ;;  %v13222_v3 = vmul.f32 %v13180_v4, %v13180_v4  ;;  %v5470_v51 = vmul.f32 %v13151_v31, %v17339_v43  ;;  %v17350_v59 = vld [vmem:[#allocation164_spill] sm:$0xff]  ;;  %v17351_v60 = vld [vmem:[#allocation35_spill] sm:$0xff] }
 0x344   : > { %v5467_v33 = vmul.f32 %v13140_v47, %v17340_v53  ;;  %v5469_v28 = vmul.f32 %v13146_v46, %v17341_v23  ;;  %v5472_v7 = vmul.f32 %v13143_v58, %v17342_v8  ;;  %6550 = vmatmul.mubr.f32.gmra.mxu0 %v6143_v39  ;;  %6935 = vmatmul.mubr.f32.gmra.mxu1 %v6145_v5  ;;  %v13237_v45 = vmul.f32 0.015625, %v3629_v1  ;;  %v17352_v39 = vld [vmem:[#allocation184_spill] sm:$0xff] }
 0x345   : > { %v5266_v48 = vrot.slane %v5259_v6, %v17214_v9  ;;  %v5474_v52 = vmul.f32 %v13151_v31, %v17343_v34  ;;  %v5471_v19 = vmul.f32 %v13140_v47, %v17344_v37  ;;  %v5473_v54 = vmul.f32 %v13146_v46, %v17346_v0  ;;  %v17353_v5 = vld [vmem:[#allocation148_spill] sm:$0xff]  ;;  %v17356_v34 = vld [vmem:[#allocation185_spill] sm:$0xff] }
 0x346   : > { %17345 = vst [vmem:[#allocation105_spill] sm:$0xff] %v13237_v45  ;;  %v5476_v41 = vmul.f32 %v13143_v58, %v17347_v13  ;;  %v5478_v61 = vmul.f32 %v13151_v31, %v17348_v30  ;;  %v5475_v21 = vmul.f32 %v13140_v47, %v17349_v36  ;;  %v5477_v24 = vmul.f32 %v13146_v46, %v17350_v59  ;;  %v17355_v53 = vld [vmem:[#allocation36_spill] sm:$0xff]  ;;  %v17357_v0 = vld [vmem:[#allocation149_spill] sm:$0xff]  ;;  %v17358_v30 = vld [vmem:[#allocation166_spill] sm:$0xff] }
 0x347   : > { %v5397_v40 = vsub.f32 %v17298_v57, %v5266_v48  ;;  %v5480_v1 = vmul.f32 %v13143_v58, %v17351_v60  ;;  %8601 = vrsqrt.f32 %v4671_v10  ;;  %v5482_v35 = vmul.f32 %v13151_v31, %v17352_v39  ;;  %v17359_v59 = vld [vmem:[#allocation147_spill] sm:$0xff] }
 0x348   : > { %v13256_v6 = vmul.f32 %v13140_v47, %v17353_v5  ;;  %v13260_v43 = vmul.f32 %v13146_v46, %v17354_v49  ;;  %v13264_v57 = vmul.f32 %v13143_v58, %v17355_v53  ;;  %v5486_v37 = vmul.f32 %v13151_v31, %v17356_v34 }
 0x349   : > { %v13267_v23 = vrot.slane %v5397_v40, %v17266_v17  ;;  %v13270_v10 = vrot.slane %v5397_v40, %v17268_v26  ;;  %v13273_v8 = vrot.slane %v5397_v40, %v9082_v12  ;;  %v13276_v48 = vrot.slane %v5397_v40, %v17267_v62 }
 0x34a   : > { %v13282_v13 = vmul.f32 %v13140_v47, %v17357_v0  ;;  %v13286_v36 = vmul.f32 %v13146_v46, %v17358_v30  ;;  %v13290_v60 = vmul.f32 %v13143_v58, %v17359_v59  ;;  %v17360_v0 = vld [vmem:[#allocation31_spill] sm:$0xff]  ;;  %v13304_v59 = vmul.f32 %v13140_v47, %v17361_v50 }
 0x34b   : > { %v5892_v39 = vadd.f32 %v13267_v23, %v5468_v14  ;;  %v5894_v40 = vadd.f32 %v13270_v10, %v5470_v51  ;;  %v5891_v5 = vadd.f32 %v13273_v8, %v5467_v33  ;;  %v5893_v49 = vadd.f32 %v13276_v48, %v5469_v28  ;;  %v17363_v33 = vld [vmem:[#allocation15_spill] sm:$0xff] }
 0x34c   : > { %v5896_v53 = vadd.f32 %v13267_v23, %v5472_v7  ;;  %v5898_v34 = vadd.f32 %v13270_v10, %v5474_v52  ;;  %v13300_v30 = vmul.f32 %v13151_v31, %v17360_v0  ;;  %v13308_v51 = vmul.f32 %v13146_v46, %v17362_v32 }
 0x34d   : > { %v6148_v18 = vmax.f32 %v5892_v39, 0.0  ;;  %v6150_v14 = vmax.f32 %v5894_v40, 0.0  ;;  %v13312_v28 = vmul.f32 %v13143_v58, %v17363_v33  ;;  %v6147_v7 = vmax.f32 %v5891_v5, 0.0  ;;  %v17364_v33 = vld [vmem:[#allocation186_spill] sm:$0xff] }
 0x34e   : > { %v6149_v52 = vmax.f32 %v5893_v49, 0.0  ;;  %v5895_v38 = vadd.f32 %v13273_v8, %v5471_v19  ;;  %v5897_v0 = vadd.f32 %v13276_v48, %v5473_v54  ;;  %v6152_v50 = vmax.f32 %v5896_v53, 0.0  ;;  %v17365_v49 = vld [vmem:[#allocation44_spill] sm:$0xff]  ;;  %v17366_v54 = vld [vmem:[#allocation50_spill] sm:$0xff] }
 0x34f   : > { %6554 = vmatprep.mubr.f32.mxu0 %v6148_v18  ;;  %6939 = vmatprep.mubr.f32.mxu1 %v6150_v14  ;;  %v6154_v16 = vmax.f32 %v5898_v34, 0.0  ;;  %v5900_v39 = vadd.f32 %v13267_v23, %v5476_v41  ;;  %v5902_v40 = vadd.f32 %v13270_v10, %v5478_v61  ;;  %v4688_v32 = vadd.f32 1e-05, %v12851_v11  ;;  %v17367_v41 = vld [vmem:[#allocation167_spill] sm:$0xff] }
 0x350   : > { %6555 = vmatmul.mubr.f32.gmra.mxu0 %v6147_v7  ;;  %6940 = vmatmul.mubr.f32.gmra.mxu1 %v6149_v52  ;;  %v5494_v5 = vmul.f32 %v13151_v31, %v17364_v33  ;;  %v5491_v19 = vmul.f32 %v13140_v47, %v17365_v49  ;;  %v4577_v18 = vmul.f32 %v13237_v45, %v13237_v45  ;;  %8603 = vrsqrt.f32 %v17366_v54 }
 0x351   : > { %6559 = vmatprep.mubr.f32.mxu0 %v6152_v50  ;;  %6944 = vmatprep.mubr.f32.mxu1 %v6154_v16  ;;  %v13328_v61 = vmul.f32 %v13146_v46, %v17367_v41  ;;  %v3633_v11 = vadd.f32 %v13208_v29, %v13171_v20  ;;  %v4302_v53 = vadd.f32 %v13196_v44, %v13192_v63  ;;  %v6151_v34 = vmax.f32 %v5895_v38, 0.0  ;;  %v17368_v29 = vld [vmem:[#allocation150_spill] sm:$0xff]  ;;  %v17369_v63 = vld [vmem:[#allocation187_spill] sm:$0xff]  ;;  %v17370_v44 = vld [vmem:[#allocation261_spill] sm:$0xff] }
 0x352   : > { %v6153_v14 = vmax.f32 %v5897_v0, 0.0  ;;  %v5899_v7 = vadd.f32 %v13273_v8, %v5475_v21  ;;  %v5901_v52 = vadd.f32 %v13276_v48, %v5477_v24  ;;  %v6156_v33 = vmax.f32 %v5900_v39, 0.0  ;;  %v17371_v0 = vld [vmem:[#allocation47_spill] sm:$0xff] }
 0x353   : > { %v6158_v49 = vmax.f32 %v5902_v40, 0.0  ;;  %v5904_v16 = vadd.f32 %v13267_v23, %v5480_v1  ;;  %v5906_v50 = vadd.f32 %v13270_v10, %v5482_v35  ;;  %8605 = vrsqrt.f32 %v4688_v32  ;;  %v17372_v39 = vld [vmem:[#allocation155_spill] sm:$0xff] }
 0x354   : > { %v8602_v54 = vpop.eup %8601  ;;  %6560 = vmatmul.mubr.f32.gmra.mxu0 %v6151_v34  ;;  %6945 = vmatmul.mubr.f32.gmra.mxu1 %v6153_v14  ;;  %v5496_v41 = vmul.f32 %v13143_v58, %v17368_v29  ;;  %v5498_v38 = vmul.f32 %v13151_v31, %v17369_v63  ;;  %v4609_v21 = vsub.f32 %v17370_v44, %v4577_v18  ;;  %v13344_v24 = vmul.f32 0.015625, %v17371_v0 }
 0x355   : > { %6564 = vmatprep.mubr.f32.mxu0 %v6156_v33  ;;  %6949 = vmatprep.mubr.f32.mxu1 %v6158_v49  ;;  %v5903_v1 = vadd.f32 %v13273_v8, %v13256_v6  ;;  %v5905_v35 = vadd.f32 %v13276_v48, %v13260_v43  ;;  %v5495_v40 = vmul.f32 %v13140_v47, %v17372_v39  ;;  %v6155_v58 = vmax.f32 %v5899_v7, 0.0  ;;  %v17373_v43 = vld [vmem:[#allocation172_spill] sm:$0xff]  ;;  %v17375_v39 = vld [vmem:[#allocation55_spill] sm:$0xff] }
 0x356   : > { %v6157_v32 = vmax.f32 %v5901_v52, 0.0  ;;  %v5908_v31 = vadd.f32 %v13267_v23, %v13264_v57  ;;  %v5910_v18 = vadd.f32 %v13270_v10, %v5486_v37  ;;  %v6160_v34 = vmax.f32 %v5904_v16, 0.0 }
 0x357   : > { %v6162_v14 = vmax.f32 %v5906_v50, 0.0  ;;  %v3634_v33 = vadd.f32 %v3633_v11, %v13175_v2  ;;  %v4303_v49 = vadd.f32 %v4302_v53, %v13201_v22  ;;  %v5907_v6 = vadd.f32 %v13273_v8, %v13282_v13  ;;  %v17429_v2 = vld [vmem:[#allocation194_spill] sm:$0xff] }
 0x358   : > { %6565 = vmatmul.mubr.f32.gmra.mxu0 %v6155_v58  ;;  %6950 = vmatmul.mubr.f32.gmra.mxu1 %v6157_v32  ;;  %v5497_v47 = vmul.f32 %v13146_v46, %v17373_v43  ;;  %v13363_v7 = vmul.f32 %v13184_v42, %v13184_v42  ;;  %v13365_v57 = vmax.f32 %v4609_v21, 0.0  ;;  %v6159_v37 = vmax.f32 %v5903_v1, 0.0  ;;  %v17377_v43 = vld [vmem:[#allocation71_spill] sm:$0xff] }
 0x359   : > { %6569 = vmatprep.mubr.f32.mxu0 %v6160_v34  ;;  %6954 = vmatprep.mubr.f32.mxu1 %v6162_v14  ;;  %v6161_v11 = vmax.f32 %v5905_v35, 0.0  ;;  %v5909_v22 = vadd.f32 %v13276_v48, %v13286_v36  ;;  %v5912_v53 = vadd.f32 %v13267_v23, %v13290_v60  ;;  %v6164_v13 = vmax.f32 %v5908_v31, 0.0 }
 0x35a   : > { %v6166_v52 = vmax.f32 %v5910_v18, 0.0  ;;  %v5914_v46 = vadd.f32 %v13270_v10, %v13300_v30  ;;  %v5911_v16 = vadd.f32 %v13273_v8, %v13304_v59  ;;  %v5913_v50 = vadd.f32 %v13276_v48, %v13308_v51 }
 0x35b   : > { %v4826_v29 = vcombine.low %v13137_v55, %v8602_v54  ;;  %v3635_v63 = vadd.f32 %v3634_v33, %v13180_v4  ;;  %v4304_v36 = vadd.f32 %v4303_v49, %v13205_v25  ;;  %v6163_v60 = vmax.f32 %v5907_v6, 0.0 }
 0x35c   : > { %6570 = vmatmul.mubr.f32.gmra.mxu0 %v6159_v37  ;;  %6955 = vmatmul.mubr.f32.gmra.mxu1 %v6161_v11  ;;  %v5916_v44 = vadd.f32 %v13267_v23, %v13312_v28  ;;  %v5918_v30 = vadd.f32 %v13270_v10, %v5494_v5  ;;  %v5915_v21 = vadd.f32 %v13273_v8, %v5491_v19  ;;  %v6165_v59 = vmax.f32 %v5909_v22, 0.0  ;;  %v17378_v11 = vld [vmem:[#allocation72_spill] sm:$0xff] }
 0x35d   : > { %6574 = vmatprep.mubr.f32.mxu0 %v6164_v13  ;;  %6959 = vmatprep.mubr.f32.mxu1 %v6166_v52  ;;  %v4834_v51 = vrot.slane %v4826_v29, %v17214_v9  ;;  %v3636_v55 = vadd.f32 %v3635_v63, %v13184_v42  ;;  %v4305_v54 = vadd.f32 %v4304_v36, %v13212_v27  ;;  %v13387_v25 = vpop.eup %8603  ;;  %v6168_v0 = vmax.f32 %v5912_v53, 0.0  ;;  %v17381_v53 = vld [vmem:[#allocation77_spill] sm:$0xff]  ;;  %v17428_v42 = vld [vmem:[#allocation180_spill] sm:$0xff] }
 0x35e   : > { %17374 = vst [vmem:[#allocation123_spill] sm:$0xff] %v13387_v25  ;;  %v6170_v1 = vmax.f32 %v5914_v46, 0.0  ;;  %v5917_v28 = vadd.f32 %v13276_v48, %v13328_v61  ;;  %v5920_v5 = vadd.f32 %v13267_v23, %v5496_v41  ;;  %v6167_v35 = vmax.f32 %v5911_v16, 0.0  ;;  %v17382_v16 = vld [vmem:[#allocation51_spill] sm:$0xff]  ;;  %v17432_v25 = vld [vmem:[#allocation181_spill] sm:$0xff] }
 0x35f   : > { %v6169_v19 = vmax.f32 %v5913_v50, 0.0  ;;  %v4842_v58 = vcombine.low %v4834_v51, %v17375_v39  ;;  %v3637_v32 = vrot.slane %v3636_v55, 4  ;;  %v6172_v31 = vmax.f32 %v5916_v44, 0.0  ;;  %v17385_v51 = vld [vmem:[#allocation53_spill] sm:$0xff] }
 0x360   : > { %6575 = vmatmul.mubr.f32.gmra.mxu0 %v6163_v60  ;;  %6960 = vmatmul.mubr.f32.gmra.mxu1 %v6165_v59  ;;  %v6174_v18 = vmax.f32 %v5918_v30, 0.0  ;;  %v5922_v27 = vadd.f32 %v13270_v10, %v5498_v38  ;;  %v4306_v34 = vadd.f32 %v4305_v54, %v13216_v56  ;;  %v13395_v14 = vpop.eup %8605  ;;  %v6171_v61 = vmax.f32 %v5915_v21, 0.0  ;;  %v13407_v38 = vld [vmem:[%s15986_s5] sm:$0xf]  ;;  %v17383_v30 = vld [vmem:[#allocation73_spill] sm:$0xff] }
 0x361   : > { %17376 = vst [vmem:[#allocation99_spill] sm:$0xff] %v13395_v14  ;;  %6579 = vmatprep.mubr.f32.mxu0 %v6168_v0  ;;  %6964 = vmatprep.mubr.f32.mxu1 %v6170_v1  ;;  %v5919_v23 = vadd.f32 %v13273_v8, %v5495_v40  ;;  %v4849_v41 = vrot.slane %v4842_v58, %v17214_v9  ;;  %v6173_v49 = vmax.f32 %v5917_v28, 0.0  ;;  %v6176_v6 = vmax.f32 %v5920_v5, 0.0  ;;  %v17380_v40 = vld [vmem:[#allocation76_spill] sm:$0xff]  ;;  %v17386_v0 = vld [vmem:[#allocation210_spill] sm:$0xff] }
 0x362   : > { %v3638_v33 = vadd.f32 %v3637_v32, %v3636_v55  ;;  %v2242_v37 = vrot.slane %v17377_v43, %v17266_v17  ;;  %v2258_v10 = vrot.slane %v17378_v11, %v17266_v17  ;;  %v5921_v56 = vadd.f32 %v13276_v48, %v5497_v47  ;;  %17379 = vst [vmem:[#allocation106_spill] sm:$0xff] %v13407_v38  ;;  %v17387_v28 = vld [vmem:[#allocation74_spill] sm:$0xff] }
 0x363   : > { %v4957_v8 = vmul.f32 %v13407_v38, %v4849_v41  ;;  %v2274_v22 = vrot.slane %v17380_v40, %v17266_v17  ;;  %v2290_v13 = vrot.slane %v17381_v53, %v17266_v17  ;;  %v6178_v52 = vmax.f32 %v5922_v27, 0.0  ;;  %v17390_v32 = vld [vmem:[#allocation78_spill] sm:$0xff]  ;;  %v17401_v53 = vld [vmem:[#allocation41_spill] sm:$0xff] }
 0x364   : > { %6580 = vmatmul.mubr.f32.gmra.mxu0 %v6167_v35  ;;  %6965 = vmatmul.mubr.f32.gmra.mxu1 %v6169_v19  ;;  %v4307_v46 = vadd.f32 %v4306_v34, %v13222_v3  ;;  %v3036_v48 = vsub.f32 %v17382_v16, %v2242_v37  ;;  %v3040_v47 = vsub.f32 %v17382_v16, %v2258_v10  ;;  %v3639_v36 = vrot.slane %v3638_v33, 2  ;;  %v17389_v19 = vld [vmem:[#allocation79_spill] sm:$0xff]  ;;  %v17427_v14 = vld [vmem:[#allocation42_spill] sm:$0xff] }
 0x365   : > { %6584 = vmatprep.mubr.f32.mxu0 %v6172_v31  ;;  %6969 = vmatprep.mubr.f32.mxu1 %v6174_v18  ;;  %v13418_v50 = vrot.slane %v4957_v8, %v9082_v12  ;;  %v13421_v29 = vrot.slane %v4957_v8, %v17266_v17  ;;  %v13424_v63 = vrot.slane %v4957_v8, %v17267_v62  ;;  %v17392_v18 = vld [vmem:[#allocation212_spill] sm:$0xff]  ;;  %v6175_v34 = vmax.f32 %v5919_v23, 0.0 }
 0x366   : > { %v13427_v60 = vrot.slane %v4957_v8, %v17268_v26  ;;  %v3044_v3 = vsub.f32 %v17382_v16, %v2274_v22  ;;  %v3048_v44 = vsub.f32 %v17382_v16, %v2290_v13  ;;  %v17384_v21 = vrot.slane %v17383_v30, %v17266_v17  ;;  %v17405_v30 = vld [vmem:[#allocation37_spill] sm:$0xff] }
 0x367   : > { %v5143_v55 = vmul.f32 %v13418_v50, %v17385_v51  ;;  %v5144_v54 = vmul.f32 %v13421_v29, %v13110_v15  ;;  %v5145_v1 = vmul.f32 %v13424_v63, %v17386_v0  ;;  %v17388_v5 = vrot.slane %v17387_v28, %v17266_v17  ;;  %v17408_v0 = vld [vmem:[#allocation189_spill] sm:$0xff]  ;;  %v17409_v28 = vld [vmem:[#allocation183_spill] sm:$0xff] }
 0x368   : > { %v3052_v59 = vsub.f32 %v17382_v16, %v17384_v21  ;;  %6585 = vmatmul.mubr.f32.gmra.mxu0 %v6171_v61  ;;  %6970 = vmatmul.mubr.f32.gmra.mxu1 %v6173_v49  ;;  %v5146_v39 = vmul.f32 %v13427_v60, %v17389_v19  ;;  %v13448_v58 = vadd.f32 %v4307_v46, %v13363_v7  ;;  %v6177_v41 = vmax.f32 %v5921_v56, 0.0  ;;  %v17393_v7 = vld [vmem:[#allocation90_spill] sm:$0xff]  ;;  %v17426_v56 = vld [vmem:[#allocation171_spill] sm:$0xff] }
 0x369   : > { %v3056_v35 = vsub.f32 %v17382_v16, %v17388_v5  ;;  %v17391_v31 = vrot.slane %v17390_v32, %v17266_v17  ;;  %6589 = vmatprep.mubr.f32.mxu0 %v6176_v6  ;;  %6974 = vmatprep.mubr.f32.mxu1 %v6178_v52  ;;  %v5267_v43 = vcombine.low %v5143_v55, %v5144_v54  ;;  %v13458_v37 = vadd.f32 1e-05, %v13365_v57  ;;  %v17402_v52 = vld [vmem:[#allocation201_spill] sm:$0xff]  ;;  %v17407_v55 = vld [vmem:[#allocation170_spill] sm:$0xff] }
 0x36a   : > { %v13455_v61 = vadd.f32 %v3639_v36, %v3638_v33  ;;  %v5268_v49 = vcombine.low %v5145_v1, %v5146_v39  ;;  %v13461_v11 = vadd.f32 %v17393_v7, %v3036_v48  ;;  %v13464_v10 = vadd.f32 %v17393_v7, %v3040_v47  ;;  %v17411_v32 = vld [vmem:[#allocation173_spill] sm:$0xff] }
 0x36b   : > { %v3060_v15 = vsub.f32 %v17382_v16, %v17391_v31  ;;  %v5275_v8 = vrot.slane %v5267_v43, %v17214_v9  ;;  %v13468_v6 = vadd.f32 %v17393_v7, %v3044_v3  ;;  %v13471_v23 = vadd.f32 %v17393_v7, %v3048_v44  ;;  %v17403_v16 = vld [vmem:[#allocation169_spill] sm:$0xff]  ;;  %v17404_v3 = vld [vmem:[#allocation188_spill] sm:$0xff] }
 0x36c   : > { %17394 = vst [vmem:[#allocation125_spill] sm:$0xff] %v13461_v11  ;;  %17395 = vst [vmem:[#allocation102_spill] sm:$0xff] %v13464_v10  ;;  %v13474_v33 = vadd.f32 %v17393_v7, %v3052_v59  ;;  %6590 = vmatmul.mubr.f32.gmra.mxu0 %v6175_v34  ;;  %6975 = vmatmul.mubr.f32.gmra.mxu1 %v6177_v41  ;;  %v5282_v57 = vrot.slane %v5268_v49, %v17214_v9  ;;  %v3641_v47 = vrot.slane %v13455_v61, 1  ;;  %v17406_v59 = vld [vmem:[#allocation202_spill] sm:$0xff]  ;;  %v17413_v41 = vld [vmem:[#allocation48_spill] sm:$0xff] }
 0x36d   : > { %17396 = vst [vmem:[#allocation108_spill] sm:$0xff] %v13468_v6  ;;  %17397 = vst [vmem:[#allocation127_spill] sm:$0xff] %v13471_v23  ;;  %v13479_v40 = vadd.f32 %v17393_v7, %v3056_v35  ;;  %v13482_v22 = vadd.f32 %v17393_v7, %v3060_v15  ;;  %v5500_v13 = vmul.f32 %v13421_v29, %v17401_v53  ;;  %v17410_v35 = vld [vmem:[#allocation207_spill] sm:$0xff]  ;;  %v17412_v15 = vld [vmem:[#allocation190_spill] sm:$0xff]  ;;  %8607 = vrsqrt.f32 %v13458_v37 }
 0x36e   : > { %17398 = vst [vmem:[#allocation103_spill] sm:$0xff] %v13474_v33  ;;  %v5502_v46 = vmul.f32 %v13427_v60, %v17402_v52  ;;  %v5499_v48 = vmul.f32 %v13418_v50, %v17403_v16  ;;  %v5283_v36 = vcombine.low %v5275_v8, %v5282_v57  ;;  %v5501_v44 = vmul.f32 %v13424_v63, %v17404_v3  ;;  %v17414_v49 = vld [vmem:[#allocation208_spill] sm:$0xff]  ;;  %v17415_v57 = vld [vmem:[#allocation174_spill] sm:$0xff] }
 0x36f   : > { %17399 = vst [vmem:[#allocation110_spill] sm:$0xff] %v13479_v40  ;;  %17400 = vst [vmem:[#allocation128_spill] sm:$0xff] %v13482_v22  ;;  %v5504_v21 = vmul.f32 %v13421_v29, %v17405_v30  ;;  %v5506_v51 = vmul.f32 %v13427_v60, %v17406_v59  ;;  %v5503_v54 = vmul.f32 %v13418_v50, %v17407_v55  ;;  %v17416_v52 = vld [vmem:[#allocation34_spill] sm:$0xff]  ;;  %v13529_v30 = vld [vmem:[%s15987_s6] sm:$0xf] }
 0x370   : > { %v5505_v1 = vmul.f32 %v13424_v63, %v17408_v0  ;;  %v5508_v5 = vmul.f32 %v13421_v29, %v17409_v28  ;;  %v5510_v19 = vmul.f32 %v13427_v60, %v17410_v35  ;;  %v5290_v39 = vrot.slane %v5283_v36, %v17214_v9  ;;  %v17417_v36 = vld [vmem:[#allocation176_spill] sm:$0xff]  ;;  %17418 = vst [vmem:[#allocation107_spill] sm:$0xff] %v13529_v30  ;;  %v17419_v55 = vld [vmem:[#allocation209_spill] sm:$0xff]  ;;  %v17420_v28 = vld [vmem:[#allocation22_spill] sm:$0xff] }
 0x371   : > { %v5507_v31 = vmul.f32 %v13418_v50, %v17411_v32  ;;  %v5509_v34 = vmul.f32 %v13424_v63, %v17412_v15  ;;  %v5512_v43 = vmul.f32 %v13421_v29, %v17413_v41  ;;  %v5514_v8 = vmul.f32 %v13427_v60, %v17414_v49  ;;  %v17421_v32 = vld [vmem:[#allocation192_spill] sm:$0xff] }
 0x372   : > { %v13516_v53 = vmul.f32 %v13418_v50, %v17415_v57  ;;  %v13520_v16 = vmul.f32 %v13424_v63, %v17416_v52  ;;  %v13524_v3 = vmul.f32 %v13421_v29, %v17417_v36  ;;  %v5398_v59 = vsub.f32 %v13529_v30, %v5290_v39  ;;  %v17422_v41 = vld [vmem:[#allocation28_spill] sm:$0xff]  ;;  %v17423_v57 = vld [vmem:[#allocation211_spill] sm:$0xff]  ;;  %v17424_v39 = vld [vmem:[#allocation177_spill] sm:$0xff] }
 0x373   : > { %v13534_v0 = vmul.f32 %v13427_v60, %v17419_v55  ;;  %v13538_v35 = vmul.f32 %v13418_v50, %v17420_v28  ;;  %v13542_v15 = vmul.f32 %v13424_v63, %v17421_v32  ;;  %v13546_v49 = vmul.f32 %v13421_v29, %v17422_v41  ;;  %v17425_v55 = vld [vmem:[#allocation193_spill] sm:$0xff] }
 0x374   : > { %v13550_v52 = vmul.f32 %v13427_v60, %v17423_v57  ;;  %v13554_v36 = vmul.f32 %v13418_v50, %v17424_v39  ;;  %v13558_v28 = vmul.f32 %v13424_v63, %v17425_v55  ;;  %v13561_v27 = vrot.slane %v5398_v59, %v17266_v17 }
 0x375   : > { %v13564_v32 = vrot.slane %v5398_v59, %v17268_v26  ;;  %v13567_v41 = vrot.slane %v5398_v59, %v9082_v12  ;;  %v13570_v57 = vrot.slane %v5398_v59, %v17267_v62  ;;  %v13574_v39 = vmul.f32 %v13421_v29, %v17426_v56  ;;  %v17430_v62 = vld [vmem:[#allocation52_spill] sm:$0xff]  ;;  %v17431_v12 = vld [vmem:[#allocation213_spill] sm:$0xff] }
 0x376   : > { %v13578_v55 = vmul.f32 %v13427_v60, %v17427_v14  ;;  %v13582_v4 = vmul.f32 %v13418_v50, %v17428_v42  ;;  %v13586_v20 = vmul.f32 %v13424_v63, %v17429_v2  ;;  %v5924_v30 = vadd.f32 %v13561_v27, %v5500_v13 }
 0x377   : > { %v5926_v59 = vadd.f32 %v13564_v32, %v5502_v46  ;;  %v5923_v45 = vadd.f32 %v13567_v41, %v5499_v48  ;;  %v5925_v56 = vadd.f32 %v13570_v57, %v5501_v44  ;;  %v5928_v26 = vadd.f32 %v13561_v27, %v5504_v21  ;;  %v17433_v48 = vld [vmem:[#allocation195_spill] sm:$0xff] }
 0x378   : > { %v5930_v14 = vadd.f32 %v13564_v32, %v5506_v51  ;;  %v13596_v42 = vmul.f32 %v13421_v29, %v17430_v62  ;;  %v13600_v2 = vmul.f32 %v13427_v60, %v17431_v12  ;;  %v6180_v38 = vmax.f32 %v5924_v30, 0.0 }
 0x379   : > { %v6182_v13 = vmax.f32 %v5926_v59, 0.0  ;;  %v13604_v46 = vmul.f32 %v13418_v50, %v17432_v25  ;;  %v13608_v44 = vmul.f32 %v13424_v63, %v17433_v48  ;;  %v6179_v21 = vmax.f32 %v5923_v45, 0.0 }
 0x37a   : > { %v6181_v51 = vmax.f32 %v5925_v56, 0.0  ;;  %v5927_v9 = vadd.f32 %v13567_v41, %v5503_v54  ;;  %v5929_v62 = vadd.f32 %v13570_v57, %v5505_v1  ;;  %6594 = vmatprep.mubr.f32.mxu0 %v6180_v38  ;;  %v6184_v12 = vmax.f32 %v5928_v26, 0.0  ;;  %v17435_v54 = vld [vmem:[#allocation277_spill] sm:$0xff] }
 0x37b   : > { %6979 = vmatprep.mubr.f32.mxu1 %v6182_v13  ;;  %v6186_v29 = vmax.f32 %v5930_v14, 0.0  ;;  %v5932_v60 = vadd.f32 %v13561_v27, %v5508_v5  ;;  %v5934_v30 = vadd.f32 %v13564_v32, %v5510_v19  ;;  %6595 = vmatmul.mubr.f32.gmra.mxu0 %v6179_v21  ;;  %v3642_v25 = vadd.f32 %v3641_v47, %v13455_v61  ;;  %v17436_v1 = vld [vmem:[#allocation57_spill] sm:$0xff] }
 0x37c   : > { %6980 = vmatmul.mubr.f32.gmra.mxu1 %v6181_v51  ;;  %v17434_v45 = vrot.slane %v13448_v58, 4  ;;  %v3682_v63 = vadd.f32 %v13464_v10, %v13461_v11  ;;  %v3732_v38 = vrot.slane %v17435_v54, 1  ;;  %6599 = vmatprep.mubr.f32.mxu0 %v6184_v12  ;;  %v5931_v26 = vadd.f32 %v13567_v41, %v5507_v31 }
 0x37d   : > { %6984 = vmatprep.mubr.f32.mxu1 %v6186_v29  ;;  %v13625_v5 = vadd.f32 %v17393_v7, %v17436_v1  ;;  %v17438_v61 = vrot.slane %v17392_v18, 1  ;;  %v6185_v19 = vmax.f32 %v5929_v62, 0.0  ;;  %v5933_v59 = vadd.f32 %v13570_v57, %v5509_v34 }
 0x37e   : > { %v4310_v50 = vadd.f32 %v17434_v45, %v13448_v58  ;;  %v6183_v58 = vmax.f32 %v5927_v9, 0.0  ;;  %v3986_v56 = vmul.f32 %v13461_v11, %v13461_v11  ;;  %v6188_v14 = vmax.f32 %v5932_v60, 0.0 }
 0x37f   : > { %17437 = vst [vmem:[#allocation111_spill] sm:$0xff] %v13625_v5  ;;  %v3681_v47 = vadd.f32 %v17438_v61, %v17392_v18  ;;  %v6190_v13 = vmax.f32 %v5934_v30, 0.0  ;;  %v5936_v31 = vadd.f32 %v13561_v27, %v5512_v43  ;;  %v5938_v37 = vadd.f32 %v13564_v32, %v5514_v8 }
 0x380   : > { %6600 = vmatmul.mubr.f32.gmra.mxu0 %v6183_v58  ;;  %6985 = vmatmul.mubr.f32.gmra.mxu1 %v6185_v19  ;;  %v5935_v48 = vadd.f32 %v13567_v41, %v13516_v53  ;;  %v4311_v21 = vrot.slane %v4310_v50, 2  ;;  %v13637_v18 = vmul.f32 0.015625, %v3642_v25  ;;  %v3683_v9 = vadd.f32 %v3682_v63, %v13468_v6 }
 0x381   : > { %6604 = vmatprep.mubr.f32.mxu0 %v6188_v14  ;;  %6989 = vmatprep.mubr.f32.mxu1 %v6190_v13  ;;  %v6187_v34 = vmax.f32 %v5931_v26, 0.0  ;;  %v5937_v51 = vadd.f32 %v13570_v57, %v13520_v16  ;;  %v5940_v43 = vadd.f32 %v13561_v27, %v13524_v3  ;;  %v5942_v8 = vadd.f32 %v13564_v32, %v13534_v0 }
 0x382   : > { %v6189_v62 = vmax.f32 %v5933_v59, 0.0  ;;  %v5939_v53 = vadd.f32 %v13567_v41, %v13538_v35  ;;  %v5941_v12 = vadd.f32 %v13570_v57, %v13542_v15  ;;  %v5944_v29 = vadd.f32 %v13561_v27, %v13546_v49 }
 0x383   : > { %v6192_v60 = vmax.f32 %v5936_v31, 0.0  ;;  %v6194_v30 = vmax.f32 %v5938_v37, 0.0  ;;  %v5946_v16 = vadd.f32 %v13564_v32, %v13550_v52  ;;  %v5943_v3 = vadd.f32 %v13567_v41, %v13554_v36 }
 0x384   : > { %6605 = vmatmul.mubr.f32.gmra.mxu0 %v6187_v34  ;;  %6990 = vmatmul.mubr.f32.gmra.mxu1 %v6189_v62  ;;  %v6191_v0 = vmax.f32 %v5935_v48, 0.0  ;;  %v5945_v35 = vadd.f32 %v13570_v57, %v13558_v28  ;;  %v3990_v15 = vmul.f32 %v13464_v10, %v13464_v10  ;;  %v13660_v25 = vmul.f32 0.015625, %v3681_v47  ;;  %v13676_v48 = vpop.eup %8607 }
 0x385   : > { %6609 = vmatprep.mubr.f32.mxu0 %v6192_v60  ;;  %6994 = vmatprep.mubr.f32.mxu1 %v6194_v30  ;;  %v6193_v49 = vmax.f32 %v5937_v51, 0.0  ;;  %v6196_v45 = vmax.f32 %v5940_v43, 0.0  ;;  %v6198_v63 = vmax.f32 %v5942_v8, 0.0  ;;  %v5948_v52 = vadd.f32 %v13561_v27, %v13574_v39  ;;  %v17441_v43 = vld [vmem:[#allocation83_spill] sm:$0xff] }
 0x386   : > { %17439 = vst [vmem:[#allocation129_spill] sm:$0xff] %v13660_v25  ;;  %v6195_v36 = vmax.f32 %v5939_v53, 0.0  ;;  %v6197_v26 = vmax.f32 %v5941_v12, 0.0  ;;  %v6200_v1 = vmax.f32 %v5944_v29, 0.0  ;;  %v5950_v61 = vadd.f32 %v13564_v32, %v13578_v55  ;;  %v17442_v30 = vld [vmem:[#allocation63_spill] sm:$0xff] }
 0x387   : > { %v6202_v28 = vmax.f32 %v5946_v16, 0.0  ;;  %v6199_v58 = vmax.f32 %v5943_v3, 0.0  ;;  %v4312_v19 = vadd.f32 %v4311_v21, %v4310_v50  ;;  %v3684_v47 = vadd.f32 %v3683_v9, %v13471_v23 }
 0x388   : > { %6610 = vmatmul.mubr.f32.gmra.mxu0 %v6191_v0  ;;  %6995 = vmatmul.mubr.f32.gmra.mxu1 %v6193_v49  ;;  %v6201_v59 = vmax.f32 %v5945_v35, 0.0  ;;  %v5947_v14 = vadd.f32 %v13567_v41, %v13582_v4  ;;  %v5949_v39 = vadd.f32 %v13570_v57, %v13586_v20  ;;  %v5952_v13 = vadd.f32 %v13561_v27, %v13596_v42  ;;  %v17443_v49 = vld [vmem:[#allocation86_spill] sm:$0xff] }
 0x389   : > { %6614 = vmatprep.mubr.f32.mxu0 %v6196_v45  ;;  %6999 = vmatprep.mubr.f32.mxu1 %v6198_v63  ;;  %v6204_v55 = vmax.f32 %v5948_v52, 0.0  ;;  %v5954_v50 = vadd.f32 %v13564_v32, %v13600_v2  ;;  %v4313_v31 = vrot.slane %v4312_v19, 1  ;;  %v3685_v37 = vadd.f32 %v3684_v47, %v13474_v33 }
 0x38a   : > { %v6206_v21 = vmax.f32 %v5950_v61, 0.0  ;;  %v13680_v4 = vadd.f32 %v13567_v41, %v13604_v46  ;;  %v3994_v20 = vmul.f32 %v13468_v6, %v13468_v6  ;;  %v4354_v27 = vadd.f32 %v3990_v15, %v3986_v56  ;;  %v17440_v41 = vld [vmem:[#allocation82_spill] sm:$0xff] }
 0x38b   : > { %v4314_v42 = vadd.f32 %v4313_v31, %v4312_v19  ;;  %v4578_v9 = vmul.f32 %v13637_v18, %v13637_v18  ;;  %v3686_v32 = vadd.f32 %v3685_v37, %v13479_v40  ;;  %v3998_v2 = vmul.f32 %v13471_v23, %v13471_v23 }
 0x38c   : > { %6615 = vmatmul.mubr.f32.gmra.mxu0 %v6195_v36  ;;  %7000 = vmatmul.mubr.f32.gmra.mxu1 %v6197_v26  ;;  %v6203_v34 = vmax.f32 %v5947_v14, 0.0  ;;  %v4355_v51 = vadd.f32 %v4354_v27, %v3994_v20  ;;  %v2370_v46 = vrot.slane %v17440_v41, %v17266_v17  ;;  %v2386_v8 = vrot.slane %v17441_v43, %v17266_v17  ;;  %v17452_v43 = vld [vmem:[#allocation160_spill] sm:$0xff] }
 0x38d   : > { %6619 = vmatprep.mubr.f32.mxu0 %v6200_v1  ;;  %7004 = vmatprep.mubr.f32.mxu1 %v6202_v28  ;;  %v6205_v56 = vmax.f32 %v5949_v39, 0.0  ;;  %v6208_v62 = vmax.f32 %v5952_v13, 0.0  ;;  %v4546_v53 = vmul.f32 0.015625, %v4314_v42  ;;  %v3687_v12 = vadd.f32 %v3686_v32, %v13482_v22  ;;  %v17444_v28 = vld [vmem:[#allocation87_spill] sm:$0xff]  ;;  %v17449_v42 = vld [vmem:[#allocation85_spill] sm:$0xff] }
 0x38e   : > { %v4002_v29 = vmul.f32 %v13474_v33, %v13474_v33  ;;  %v4356_v60 = vadd.f32 %v4355_v51, %v3998_v2  ;;  %v3068_v16 = vsub.f32 %v17442_v30, %v2370_v46  ;;  %v3072_v3 = vsub.f32 %v17442_v30, %v2386_v8  ;;  %v17530_v33 = vld [vmem:[#allocation237_spill] sm:$0xff] }
 0x38f   : > { %v6210_v0 = vmax.f32 %v5954_v50, 0.0  ;;  %v4610_v35 = vsub.f32 %v4546_v53, %v4578_v9  ;;  %v3688_v15 = vadd.f32 %v3687_v12, %v13625_v5  ;;  %v2402_v45 = vrot.slane %v17443_v49, %v17266_v17 }
 0x390   : > { %6620 = vmatmul.mubr.f32.gmra.mxu0 %v6199_v58  ;;  %7005 = vmatmul.mubr.f32.gmra.mxu1 %v6201_v59  ;;  %v6207_v63 = vmax.f32 %v13680_v4, 0.0  ;;  %v5953_v52 = vadd.f32 %v13570_v57, %v13608_v44  ;;  %v4006_v36 = vmul.f32 %v13479_v40, %v13479_v40  ;;  %v4357_v26 = vadd.f32 %v4356_v60, %v4002_v29  ;;  %v17454_v29 = vld [vmem:[#allocation276_spill] sm:$0xff] }
 0x391   : > { %6624 = vmatprep.mubr.f32.mxu0 %v6204_v55  ;;  %7009 = vmatprep.mubr.f32.mxu1 %v6206_v21  ;;  %v4642_v1 = vmax.f32 %v4610_v35, 0.0  ;;  %v3689_v61 = vrot.slane %v3688_v15, 4  ;;  %v2418_v19 = vrot.slane %v17444_v28, %v17266_v17  ;;  %v3076_v47 = vsub.f32 %v17442_v30, %v2402_v45  ;;  %v17447_v21 = vld [vmem:[#allocation84_spill] sm:$0xff] }
 0x392   : > { %v4010_v58 = vmul.f32 %v13482_v22, %v13482_v22  ;;  %v4358_v59 = vadd.f32 %v4357_v26, %v4006_v36  ;;  %v13712_v14 = vadd.f32 %v17393_v7, %v3068_v16  ;;  %v13715_v57 = vadd.f32 %v17393_v7, %v3072_v3  ;;  %v17455_v16 = vld [vmem:[#allocation88_spill] sm:$0xff]  ;;  %v17529_v22 = vld [vmem:[#allocation121_spill] sm:$0xff] }
 0x393   : > { %v4675_v44 = vadd.f32 1e-05, %v4642_v1  ;;  %v3690_v39 = vadd.f32 %v3689_v61, %v3688_v15  ;;  %v4014_v13 = vmul.f32 %v13625_v5, %v13625_v5  ;;  %v3080_v55 = vsub.f32 %v17442_v30, %v2418_v19  ;;  %v17528_v5 = vld [vmem:[#allocation219_spill] sm:$0xff] }
 0x394   : > { %17445 = vst [vmem:[#allocation109_spill] sm:$0xff] %v13712_v14  ;;  %17446 = vst [vmem:[#allocation113_spill] sm:$0xff] %v13715_v57  ;;  %6625 = vmatmul.mubr.f32.gmra.mxu0 %v6203_v34  ;;  %7010 = vmatmul.mubr.f32.gmra.mxu1 %v6205_v56  ;;  %v6209_v50 = vmax.f32 %v5953_v52, 0.0  ;;  %v4359_v31 = vadd.f32 %v4358_v59, %v4010_v58  ;;  %v4581_v37 = vmul.f32 %v13660_v25, %v13660_v25  ;;  %v17533_v25 = vld [vmem:[#allocation96_spill] sm:$0xff] }
 0x395   : > { %v17448_v4 = vrot.slane %v17447_v21, %v17266_v17  ;;  %6629 = vmatprep.mubr.f32.mxu0 %v6208_v62  ;;  %7014 = vmatprep.mubr.f32.mxu1 %v6210_v0  ;;  %8609 = vrsqrt.f32 %v4675_v44  ;;  %v3691_v27 = vrot.slane %v3690_v39, 2  ;;  %v17450_v9 = vrot.slane %v17449_v42, %v17266_v17 }
 0x396   : > { %v13731_v2 = vadd.f32 %v17393_v7, %v3076_v47  ;;  %v4360_v34 = vadd.f32 %v4359_v31, %v4014_v13  ;;  %v3734_v51 = vadd.f32 %v13715_v57, %v13712_v14  ;;  %v4018_v41 = vmul.f32 %v13712_v14, %v13712_v14  ;;  %v17465_v31 = vld [vmem:[#allocation91_spill] sm:$0xff] }
 0x397   : > { %v3084_v20 = vsub.f32 %v17442_v30, %v17448_v4  ;;  %v3088_v32 = vsub.f32 %v17442_v30, %v17450_v9  ;;  %v4022_v46 = vmul.f32 %v13715_v57, %v13715_v57  ;;  %v3692_v56 = vadd.f32 %v3691_v27, %v3690_v39  ;;  %v17463_v39 = vld [vmem:[#allocation300_spill] sm:$0xff]  ;;  %v17467_v27 = vld [vmem:[#allocation93_spill] sm:$0xff] }
 0x398   : > { %17451 = vst [vmem:[#allocation130_spill] sm:$0xff] %v13731_v2  ;;  %v13742_v62 = vadd.f32 %v17393_v7, %v3080_v55  ;;  %v3733_v53 = vadd.f32 %v3732_v38, %v17435_v54  ;;  %6630 = vmatmul.mubr.f32.gmra.mxu0 %v6207_v63  ;;  %7015 = vmatmul.mubr.f32.gmra.mxu1 %v6209_v50  ;;  %v4361_v12 = vrot.slane %v4360_v34, 4  ;;  %v17458_v38 = vld [vmem:[#allocation286_spill] sm:$0xff]  ;;  %v17468_v9 = vld [vmem:[#allocation8_spill] sm:$0xff] }
 0x399   : > { %v4613_v60 = vsub.f32 %v17454_v29, %v4581_v37  ;;  %v17456_v3 = vrot.slane %v17455_v16, %v17266_v17  ;;  %v3735_v35 = vadd.f32 %v3734_v51, %v13731_v2  ;;  %v3693_v15 = vrot.slane %v3692_v56, 1  ;;  %v17459_v63 = vld [vmem:[#allocation274_spill] sm:$0xff]  ;;  %v17470_v16 = vld [vmem:[#allocation309_spill] sm:$0xff]  ;;  %v17520_v57 = vld [vmem:[#allocation216_spill] sm:$0xff] }
 0x39a   : > { %17453 = vst [vmem:[#allocation112_spill] sm:$0xff] %v13742_v62  ;;  %v13754_v49 = vadd.f32 %v17393_v7, %v3084_v20  ;;  %v4026_v45 = vmul.f32 %v13731_v2, %v13731_v2  ;;  %v4406_v54 = vadd.f32 %v4022_v46, %v4018_v41  ;;  %v4851_v52 = vcombine.low %v17459_v63, %v17458_v38 }
 0x39b   : > { %v3092_v0 = vsub.f32 %v17442_v30, %v17456_v3  ;;  %v4362_v36 = vadd.f32 %v4361_v12, %v4360_v34  ;;  %v13761_v26 = vadd.f32 %v17393_v7, %v3088_v32  ;;  %v3736_v1 = vadd.f32 %v3735_v35, %v13742_v62  ;;  %v17471_v3 = vld [vmem:[#allocation306_spill] sm:$0xff] }
 0x39c   : > { %17457 = vst [vmem:[#allocation116_spill] sm:$0xff] %v13754_v49  ;;  %v3694_v30 = vadd.f32 %v3693_v15, %v3692_v56  ;;  %v4030_v61 = vmul.f32 %v13742_v62, %v13742_v62  ;;  %v4407_v28 = vadd.f32 %v4406_v54, %v4026_v45  ;;  %v13766_v19 = vmul.f32 0.015625, %v3733_v53  ;;  %v17469_v53 = vld [vmem:[#allocation75_spill] sm:$0xff] }
 0x39d   : > { %17460 = vst [vmem:[#allocation238_spill] sm:$0xff] %v13761_v26  ;;  %v4363_v47 = vrot.slane %v4362_v36, 2  ;;  %v4645_v58 = vmax.f32 %v4613_v60, 0.0  ;;  %v13769_v59 = vadd.f32 %v17393_v7, %v3092_v0  ;;  %v3737_v44 = vadd.f32 %v3736_v1, %v13754_v49  ;;  %v17518_v62 = vld [vmem:[#allocation199_spill] sm:$0xff] }
 0x39e   : > { %17461 = vst [vmem:[#allocation32_spill] sm:$0xff] %v13766_v19  ;;  %v13774_v13 = vadd.f32 %v17393_v7, %v17463_v39  ;;  %v4034_v55 = vmul.f32 %v13754_v49, %v13754_v49  ;;  %v4408_v50 = vadd.f32 %v4407_v28, %v4030_v61  ;;  %v2498_v37 = vrot.slane %v17465_v31, %v17266_v17  ;;  %v17473_v28 = vld [vmem:[#allocation97_spill] sm:$0xff] }
 0x39f   : > { %17462 = vst [vmem:[#allocation40_spill] sm:$0xff] %v13769_v59  ;;  %v4364_v21 = vadd.f32 %v4363_v47, %v4362_v36  ;;  %v13780_v4 = vmul.f32 0.015625, %v3694_v30  ;;  %v3738_v20 = vadd.f32 %v3737_v44, %v13761_v26  ;;  %v2514_v42 = vrot.slane %v17467_v27, %v17266_v17  ;;  %v17472_v30 = vld [vmem:[#allocation302_spill] sm:$0xff]  ;;  %v17517_v49 = vld [vmem:[#allocation233_spill] sm:$0xff] }
 0x3a0   : > { %17464 = vst [vmem:[#allocation168_spill] sm:$0xff] %v13774_v13  ;;  %v4865_v32 = vrot.slane %v4851_v52, %v17468_v9  ;;  %v4038_v34 = vmul.f32 %v13761_v26, %v13761_v26  ;;  %v4409_v51 = vadd.f32 %v4408_v50, %v4034_v55  ;;  %v4585_v41 = vmul.f32 %v13766_v19, %v13766_v19  ;;  %v17516_v26 = vld [vmem:[#allocation120_spill] sm:$0xff]  ;;  %v17523_v19 = vld [vmem:[#allocation33_spill] sm:$0xff] }
 0x3a1   : > { %17466 = vst [vmem:[#allocation56_spill] sm:$0xff] %v13780_v4  ;;  %v4365_v46 = vrot.slane %v4364_v21, 1  ;;  %v3739_v56 = vadd.f32 %v3738_v20, %v13769_v59  ;;  %v3100_v12 = vsub.f32 %v17469_v53, %v2498_v37  ;;  %v3104_v29 = vsub.f32 %v17469_v53, %v2514_v42  ;;  %v17476_v37 = vld [vmem:[#allocation123_spill] sm:$0xff]  ;;  %v17478_v20 = vld [vmem:[#allocation100_spill] sm:$0xff] }
 0x3a2   : > { %v4678_v60 = vadd.f32 1e-05, %v4645_v58  ;;  %v4875_v0 = vcombine.low %v17471_v3, %v17470_v16  ;;  %v4042_v35 = vmul.f32 %v13769_v59, %v13769_v59  ;;  %v4410_v15 = vadd.f32 %v4409_v51, %v4038_v34  ;;  %v8610_v45 = vpop.eup %8609  ;;  %v17480_v16 = vld [vmem:[#allocation92_spill] sm:$0xff]  ;;  %v17515_v59 = vld [vmem:[#allocation46_spill] sm:$0xff] }
 0x3a3   : > { %v4366_v54 = vadd.f32 %v4365_v46, %v4364_v21  ;;  %v4582_v38 = vmul.f32 %v13780_v4, %v13780_v4  ;;  %v3740_v63 = vadd.f32 %v3739_v56, %v13774_v13  ;;  %v4046_v52 = vmul.f32 %v13774_v13, %v13774_v13  ;;  %v17477_v21 = vld [vmem:[#allocation13_spill] sm:$0xff]  ;;  %v17514_v13 = vld [vmem:[#allocation198_spill] sm:$0xff] }
 0x3a4   : > { %v4850_v36 = vcombine.low %v13676_v48, %v8610_v45  ;;  %v4411_v1 = vadd.f32 %v4410_v15, %v4042_v35  ;;  %v4617_v61 = vsub.f32 %v17472_v30, %v4585_v41  ;;  %v2530_v47 = vrot.slane %v17473_v28, %v17266_v17  ;;  %v17479_v41 = vld [vmem:[#allocation303_spill] sm:$0xff] }
 0x3a5   : > { %v4550_v58 = vmul.f32 0.015625, %v4366_v54  ;;  %v3741_v44 = vrot.slane %v3740_v63, 4  ;;  %v13807_v39 = vadd.f32 %v17393_v7, %v3100_v12  ;;  %v13810_v55 = vadd.f32 %v17393_v7, %v3104_v29 }
 0x3a6   : > { %v4858_v50 = vrot.slane %v4850_v36, %v17468_v9  ;;  %v4412_v31 = vadd.f32 %v4411_v1, %v4046_v52  ;;  %v4899_v48 = vcombine.low %v17477_v21, %v17476_v37  ;;  %v2546_v27 = vrot.slane %v17478_v20, %v17266_v17  ;;  %v17483_v52 = vld [vmem:[#allocation94_spill] sm:$0xff] }
 0x3a7   : > { %17474 = vst [vmem:[#allocation260_spill] sm:$0xff] %v13807_v39  ;;  %17475 = vst [vmem:[#allocation270_spill] sm:$0xff] %v13810_v55  ;;  %v4614_v42 = vsub.f32 %v4550_v58, %v4582_v38  ;;  %v3742_v34 = vadd.f32 %v3741_v44, %v3740_v63  ;;  %v3108_v51 = vsub.f32 %v17469_v53, %v2530_v47  ;;  %v3784_v46 = vrot.slane %v17479_v41, 1  ;;  %v17488_v44 = vld [vmem:[#allocation106_spill] sm:$0xff] }
 0x3a8   : > { %v4866_v56 = vcombine.low %v4858_v50, %v4865_v32  ;;  %v4649_v12 = vmax.f32 %v4617_v61, 0.0  ;;  %v3112_v29 = vsub.f32 %v17469_v53, %v2546_v27  ;;  %v17481_v3 = vrot.slane %v17480_v16, %v17266_v17 }
 0x3a9   : > { %v13825_v15 = vrot.slane %v4875_v0, %v17468_v9  ;;  %v3743_v45 = vrot.slane %v3742_v34, 2  ;;  %v4413_v54 = vrot.slane %v4412_v31, 4  ;;  %v3786_v38 = vadd.f32 %v13810_v55, %v13807_v39  ;;  %v17485_v0 = vld [vmem:[#allocation98_spill] sm:$0xff] }
 0x3aa   : > { %v3116_v35 = vsub.f32 %v17469_v53, %v17481_v3  ;;  %v4873_v63 = vrot.slane %v4866_v56, %v17468_v9  ;;  %8611 = vrsqrt.f32 %v4678_v60  ;;  %v13831_v32 = vrot.slane %v4899_v48, %v17468_v9  ;;  %v17492_v56 = vld [vmem:[#allocation12_spill] sm:$0xff] }
 0x3ab   : > { %v17484_v36 = vrot.slane %v17483_v52, %v17266_v17  ;;  %v4646_v30 = vmax.f32 %v4614_v42, 0.0  ;;  %v3744_v61 = vadd.f32 %v3743_v45, %v3742_v34  ;;  %v17486_v28 = vrot.slane %v17485_v0, %v17266_v17  ;;  %v17491_v42 = vld [vmem:[#allocation10_spill] sm:$0xff]  ;;  %v17497_v52 = vld [vmem:[#allocation236_spill] sm:$0xff]  ;;  %v17498_v0 = vld [vmem:[#allocation89_spill] sm:$0xff] }
 0x3ac   : > { %17482 = vst [vmem:[#allocation60_spill] sm:$0xff] %v13831_v32  ;;  %v13842_v58 = vadd.f32 %v17393_v7, %v3108_v51  ;;  %v4958_v60 = vmul.f32 %v17488_v44, %v4873_v63  ;;  %v13845_v50 = vadd.f32 1e-05, %v4649_v12  ;;  %v13848_v37 = vadd.f32 %v17393_v7, %v3112_v29  ;;  %v17493_v29 = vld [vmem:[#allocation17_spill] sm:$0xff]  ;;  %v17499_v44 = vld [vmem:[#allocation304_spill] sm:$0xff] }
 0x3ad   : > { %v3120_v1 = vsub.f32 %v17469_v53, %v17484_v36  ;;  %v3124_v47 = vsub.f32 %v17469_v53, %v17486_v28  ;;  %v13851_v21 = vadd.f32 %v17393_v7, %v3116_v35  ;;  %v4414_v48 = vadd.f32 %v4413_v54, %v4412_v31  ;;  %v17496_v54 = vld [vmem:[#allocation105_spill] sm:$0xff] }
 0x3ae   : > { %17487 = vst [vmem:[#allocation64_spill] sm:$0xff] %v13842_v58  ;;  %17489 = vst [vmem:[#allocation65_spill] sm:$0xff] %v13848_v37  ;;  %v3787_v20 = vadd.f32 %v3786_v38, %v13842_v58  ;;  %v4050_v27 = vmul.f32 %v13807_v39, %v13807_v39  ;;  %v4054_v53 = vmul.f32 %v13810_v55, %v13810_v55  ;;  %v4679_v31 = vadd.f32 1e-05, %v4646_v30 }
 0x3af   : > { %17490 = vst [vmem:[#allocation59_spill] sm:$0xff] %v13851_v21  ;;  %v13859_v34 = vrot.slane %v4958_v60, %v17491_v42  ;;  %v13862_v51 = vrot.slane %v4958_v60, %v17266_v17  ;;  %v13865_v12 = vrot.slane %v4958_v60, %v17492_v56  ;;  %v13868_v16 = vrot.slane %v4958_v60, %v17493_v29 }
 0x3b0   : > { %v3745_v3 = vrot.slane %v3744_v61, 1  ;;  %v13871_v35 = vadd.f32 %v17393_v7, %v3120_v1  ;;  %v13874_v45 = vadd.f32 %v17393_v7, %v3124_v47  ;;  %v4415_v30 = vrot.slane %v4414_v48, 2 }
 0x3b1   : > { %v5147_v38 = vmul.f32 %v13859_v34, %v17496_v54  ;;  %v5148_v63 = vmul.f32 %v13862_v51, %v13637_v18  ;;  %v5149_v36 = vmul.f32 %v13865_v12, %v17497_v52  ;;  %v5150_v28 = vmul.f32 %v13868_v16, %v17498_v0 }
 0x3b2   : > { %17494 = vst [vmem:[#allocation39_spill] sm:$0xff] %v13871_v35  ;;  %17495 = vst [vmem:[#allocation61_spill] sm:$0xff] %v13874_v45  ;;  %v13886_v1 = vadd.f32 %v17393_v7, %v17499_v44  ;;  %v3788_v47 = vadd.f32 %v3787_v20, %v13848_v37  ;;  %v4458_v60 = vadd.f32 %v4054_v53, %v4050_v27  ;;  %8613 = vrsqrt.f32 %v4679_v31  ;;  %v17504_v53 = vld [vmem:[#allocation133_spill] sm:$0xff]  ;;  %v17507_v31 = vld [vmem:[#allocation214_spill] sm:$0xff] }
 0x3b3   : > { %v5291_v8 = vcombine.low %v5147_v38, %v5148_v63  ;;  %v5292_v55 = vcombine.low %v5149_v36, %v5150_v28  ;;  %v13890_v54 = vadd.f32 %v3784_v46, %v17479_v41  ;;  %v4058_v18 = vmul.f32 %v13842_v58, %v13842_v58 }
 0x3b4   : > { %17500 = vst [vmem:[#allocation62_spill] sm:$0xff] %v13886_v1  ;;  %v13896_v52 = vmul.f32 %v13848_v37, %v13848_v37  ;;  %v13900_v0 = vmul.f32 %v13851_v21, %v13851_v21  ;;  %v13904_v7 = vmul.f32 %v13871_v35, %v13871_v35  ;;  %v13908_v20 = vmul.f32 %v13874_v45, %v13874_v45  ;;  %v17505_v37 = vld [vmem:[#allocation229_spill] sm:$0xff]  ;;  %v17532_v1 = vld [vmem:[#allocation220_spill] sm:$0xff] }
 0x3b5   : > { %17501 = vst [vmem:[#allocation21_spill] sm:$0xff] %v13890_v54  ;;  %v5299_v41 = vrot.slane %v5291_v8, %v17468_v9  ;;  %v5306_v46 = vrot.slane %v5292_v55, %v17468_v9  ;;  %v13912_v27 = vadd.f32 %v3745_v3, %v3744_v61  ;;  %v5532_v38 = vmul.f32 %v13862_v51, %v17504_v53  ;;  %v17506_v8 = vld [vmem:[#allocation196_spill] sm:$0xff]  ;;  %v17508_v53 = vld [vmem:[#allocation151_spill] sm:$0xff] }
 0x3b6   : > { %17502 = vst [vmem:[#allocation153_spill] sm:$0xff] %v13904_v7  ;;  %17503 = vst [vmem:[#allocation114_spill] sm:$0xff] %v13908_v20  ;;  %v13916_v63 = vadd.f32 %v4415_v30, %v4414_v48  ;;  %v13919_v36 = vadd.f32 %v3788_v47, %v13851_v21  ;;  %v13921_v28 = vadd.f32 %v4458_v60, %v4058_v18  ;;  %v17509_v30 = vld [vmem:[#allocation230_spill] sm:$0xff]  ;;  %v17510_v60 = vld [vmem:[#allocation197_spill] sm:$0xff]  ;;  %8615 = vrsqrt.f32 %v13845_v50 }
 0x3b7   : > { %v5307_v44 = vcombine.low %v5299_v41, %v5306_v46  ;;  %v5534_v58 = vmul.f32 %v13868_v16, %v17505_v37  ;;  %v5531_v55 = vmul.f32 %v13859_v34, %v17506_v8  ;;  %v5533_v61 = vmul.f32 %v13865_v12, %v17507_v31  ;;  %v13929_v3 = vpop.eup %8611  ;;  %v17511_v41 = vld [vmem:[#allocation215_spill] sm:$0xff]  ;;  %v17513_v31 = vld [vmem:[#allocation232_spill] sm:$0xff] }
 0x3b8   : > { %v5536_v48 = vmul.f32 %v13862_v51, %v17508_v53  ;;  %v5538_v47 = vmul.f32 %v13868_v16, %v17509_v30  ;;  %v5535_v18 = vmul.f32 %v13859_v34, %v17510_v60  ;;  %v5537_v37 = vmul.f32 %v13865_v12, %v17511_v41  ;;  %v17512_v8 = vld [vmem:[#allocation203_spill] sm:$0xff]  ;;  %v17527_v54 = vld [vmem:[#allocation200_spill] sm:$0xff] }
 0x3b9   : > { %v5314_v46 = vrot.slane %v5307_v44, %v17468_v9  ;;  %v5540_v21 = vmul.f32 %v13862_v51, %v17512_v8  ;;  %v5542_v39 = vmul.f32 %v13868_v16, %v17513_v31  ;;  %v5539_v53 = vmul.f32 %v13859_v34, %v17514_v13  ;;  %v17519_v8 = vld [vmem:[#allocation107_spill] sm:$0xff]  ;;  %v17531_v7 = vld [vmem:[#allocation68_spill] sm:$0xff] }
 0x3ba   : > { %v5541_v30 = vmul.f32 %v13865_v12, %v17515_v59  ;;  %v5544_v60 = vmul.f32 %v13862_v51, %v17516_v26  ;;  %v5546_v41 = vmul.f32 %v13868_v16, %v17517_v49  ;;  %v13954_v44 = vmul.f32 %v13859_v34, %v17518_v62  ;;  %v17521_v13 = vld [vmem:[#allocation95_spill] sm:$0xff]  ;;  %v17522_v59 = vld [vmem:[#allocation234_spill] sm:$0xff] }
 0x3bb   : > { %v5399_v2 = vsub.f32 %v17519_v8, %v5314_v46  ;;  %v13959_v31 = vmul.f32 %v13865_v12, %v17520_v57  ;;  %v13963_v14 = vmul.f32 %v13862_v51, %v17521_v13  ;;  %v13967_v26 = vmul.f32 %v13868_v16, %v17522_v59  ;;  %v17524_v62 = vld [vmem:[#allocation218_spill] sm:$0xff]  ;;  %v17525_v46 = vld [vmem:[#allocation104_spill] sm:$0xff]  ;;  %v17526_v8 = vld [vmem:[#allocation235_spill] sm:$0xff] }
 0x3bc   : > { %v13971_v49 = vmul.f32 %v13859_v34, %v17523_v19  ;;  %v13975_v20 = vmul.f32 %v13865_v12, %v17524_v62  ;;  %v13979_v57 = vmul.f32 %v13862_v51, %v17525_v46  ;;  %v13983_v13 = vmul.f32 %v13868_v16, %v17526_v8 }
 0x3bd   : > { %v13986_v32 = vrot.slane %v5399_v2, %v17266_v17  ;;  %v13989_v59 = vrot.slane %v5399_v2, %v17493_v29  ;;  %v13992_v19 = vrot.slane %v5399_v2, %v17491_v42  ;;  %v13995_v62 = vrot.slane %v5399_v2, %v17492_v56 }
 0x3be   : > { %v13999_v46 = vmul.f32 %v13859_v34, %v17527_v54  ;;  %v14003_v8 = vmul.f32 %v13865_v12, %v17528_v5  ;;  %v14007_v40 = vmul.f32 %v13862_v51, %v17529_v22  ;;  %v14011_v23 = vmul.f32 %v13868_v16, %v17530_v33 }
 0x3bf   : > { %v5956_v6 = vadd.f32 %v13986_v32, %v5532_v38  ;;  %v5958_v2 = vadd.f32 %v13989_v59, %v5534_v58  ;;  %v5955_v10 = vadd.f32 %v13992_v19, %v5531_v55  ;;  %v5957_v54 = vadd.f32 %v13995_v62, %v5533_v61  ;;  %v14032_v61 = vpop.eup %8613 }
 0x3c0   : > { %v5960_v11 = vadd.f32 %v13986_v32, %v5536_v48  ;;  %v5962_v5 = vadd.f32 %v13989_v59, %v5538_v47  ;;  %v14021_v22 = vmul.f32 %v13859_v34, %v17531_v7  ;;  %v14025_v33 = vmul.f32 %v13865_v12, %v17532_v1 }
 0x3c1   : > { %v6212_v4 = vmax.f32 %v5956_v6, 0.0  ;;  %v6214_v38 = vmax.f32 %v5958_v2, 0.0  ;;  %v14029_v58 = vmul.f32 %v13862_v51, %v17533_v25  ;;  %v4417_v55 = vrot.slane %v13916_v63, 1 }
 0x3c2   : > { %v6211_v48 = vmax.f32 %v5955_v10, 0.0  ;;  %v6213_v47 = vmax.f32 %v5957_v54, 0.0  ;;  %v5959_v29 = vadd.f32 %v13992_v19, %v5535_v18  ;;  %v5961_v7 = vadd.f32 %v13995_v62, %v5537_v37  ;;  %v17535_v18 = vld [vmem:[#allocation54_spill] sm:$0xff] }
 0x3c3   : > { %6634 = vmatprep.mubr.f32.mxu0 %v6212_v4  ;;  %7019 = vmatprep.mubr.f32.mxu1 %v6214_v38  ;;  %v6216_v1 = vmax.f32 %v5960_v11, 0.0  ;;  %v6218_v56 = vmax.f32 %v5962_v5, 0.0  ;;  %v5964_v6 = vadd.f32 %v13986_v32, %v5540_v21  ;;  %v5966_v2 = vadd.f32 %v13989_v59, %v5542_v39  ;;  %v17536_v4 = vld [vmem:[#allocation206_spill] sm:$0xff]  ;;  %v17537_v21 = vld [vmem:[#allocation221_spill] sm:$0xff] }
 0x3c4   : > { %v17534_v25 = vsub.f32 %v13344_v24, %v17452_v43  ;;  %6635 = vmatmul.mubr.f32.gmra.mxu0 %v6211_v48  ;;  %7020 = vmatmul.mubr.f32.gmra.mxu1 %v6213_v47  ;;  %v5963_v10 = vadd.f32 %v13992_v19, %v5539_v53  ;;  %v14046_v37 = vmul.f32 %v13868_v16, %v17535_v18  ;;  %v6476_v53 = vpop.f32.mrf.mxu0  ;;  %v14060_v16 = vpop.f32.mrf.mxu1  ;;  %v6215_v54 = vmax.f32 %v5959_v29, 0.0 }
 0x3c5   : > { %v14050_v11 = vmul.f32 %v13859_v34, %v17536_v4  ;;  %6639 = vmatprep.mubr.f32.mxu0 %v6216_v1  ;;  %7024 = vmatprep.mubr.f32.mxu1 %v6218_v56  ;;  %v5965_v39 = vadd.f32 %v13995_v62, %v5541_v30  ;;  %v14055_v24 = vmul.f32 %v13865_v12, %v17537_v21  ;;  %v6217_v5 = vmax.f32 %v5961_v7, 0.0 }
 0x3c6   : > { %v14041_v51 = vmax.f32 %v17534_v25, 0.0  ;;  %v4874_v43 = vcombine.low %v13929_v3, %v14032_v61  ;;  %v4418_v34 = vadd.f32 %v4417_v55, %v13916_v63  ;;  %v14064_v56 = vmul.f32 0.015625, %v13912_v27  ;;  %v6478_v47 = vpop.f32.mrf.mxu0  ;;  %v6863_v3 = vpop.f32.mrf.mxu1 }
 0x3c7   : > { %v6220_v30 = vmax.f32 %v5964_v6, 0.0  ;;  %v6222_v38 = vmax.f32 %v5966_v2, 0.0  ;;  %v5968_v12 = vadd.f32 %v13986_v32, %v5544_v60  ;;  %v5970_v48 = vadd.f32 %v13989_v59, %v5546_v41 }
 0x3c8   : > { %17538 = vst [vmem:[#allocation67_spill] sm:$0xff] %v14064_v56  ;;  %6640 = vmatmul.mubr.f32.gmra.mxu0 %v6215_v54  ;;  %7025 = vmatmul.mubr.f32.gmra.mxu1 %v6217_v5  ;;  %v6219_v50 = vmax.f32 %v5963_v10, 0.0  ;;  %v5967_v29 = vadd.f32 %v13992_v19, %v13954_v44  ;;  %v3790_v63 = vadd.f32 %v13919_v36, %v13871_v35  ;;  %v6221_v60 = vmax.f32 %v5965_v39, 0.0  ;;  %v6481_v44 = vpop.f32.mrf.mxu0  ;;  %v6866_v7 = vpop.f32.mrf.mxu1  ;;  %v17581_v35 = vld [vmem:[#allocation128_spill] sm:$0xff] }
 0x3c9   : > { %v14074_v27 = vadd.f32 %v13921_v28, %v13896_v52  ;;  %6644 = vmatprep.mubr.f32.mxu0 %v6220_v30  ;;  %7029 = vmatprep.mubr.f32.mxu1 %v6222_v38  ;;  %v5969_v41 = vadd.f32 %v13995_v62, %v13959_v31  ;;  %v5972_v55 = vadd.f32 %v13986_v32, %v13963_v14  ;;  %v6224_v14 = vmax.f32 %v5968_v12, 0.0 }
 0x3ca   : > { %v5974_v61 = vadd.f32 %v13989_v59, %v13967_v26  ;;  %v5971_v36 = vadd.f32 %v13992_v19, %v13971_v49  ;;  %v5973_v52 = vadd.f32 %v13995_v62, %v13975_v20  ;;  %v14088_v28 = vadd.f32 %v13986_v32, %v13979_v57  ;;  %v6483_v2 = vpop.f32.mrf.mxu0  ;;  %v6868_v25 = vpop.f32.mrf.mxu1 }
 0x3cb   : > { %v14092_v31 = vadd.f32 %v13989_v59, %v13983_v13  ;;  %v6226_v1 = vmax.f32 %v5970_v48, 0.0  ;;  %v4554_v6 = vmul.f32 0.015625, %v4418_v34  ;;  %v4586_v26 = vmul.f32 %v14064_v56, %v14064_v56  ;;  %v14104_v13 = vld [vmem:[%s15989_s8] ss:$0 sm:$0xff] }
 0x3cc   : > { %6645 = vmatmul.mubr.f32.gmra.mxu0 %v6219_v50  ;;  %7030 = vmatmul.mubr.f32.gmra.mxu1 %v6221_v60  ;;  %v6223_v49 = vmax.f32 %v5967_v29, 0.0  ;;  %v14098_v20 = vadd.f32 %v13992_v19, %v13999_v46  ;;  %v4882_v57 = vrot.slane %v4874_v43, %v17468_v9  ;;  %v14107_v10 = vadd.f32 %v3790_v63, %v13874_v45  ;;  %v6486_v46 = vpop.f32.mrf.mxu0  ;;  %v6871_v54 = vpop.f32.mrf.mxu1 }
 0x3cd   : > { %6649 = vmatprep.mubr.f32.mxu0 %v6224_v14  ;;  %7034 = vmatprep.mubr.f32.mxu1 %v6226_v1  ;;  %v6225_v18 = vmax.f32 %v5969_v41, 0.0  ;;  %v6228_v4 = vmax.f32 %v5972_v55, 0.0  ;;  %v6230_v39 = vmax.f32 %v5974_v61, 0.0  ;;  %v14111_v21 = vadd.f32 %v13995_v62, %v14003_v8 }
 0x3ce   : > { %v6227_v43 = vmax.f32 %v5971_v36, 0.0  ;;  %v6229_v5 = vmax.f32 %v5973_v52, 0.0  ;;  %v6232_v34 = vmax.f32 %v14088_v28, 0.0  ;;  %v6234_v30 = vmax.f32 %v14092_v31, 0.0  ;;  %v6488_v3 = vpop.f32.mrf.mxu0  ;;  %v6873_v50 = vpop.f32.mrf.mxu1 }
 0x3cf   : > { %v5980_v38 = vadd.f32 %v13986_v32, %v14007_v40  ;;  %v4890_v12 = vcombine.low %v4882_v57, %v13825_v15  ;;  %v4618_v48 = vsub.f32 %v4554_v6, %v4586_v26  ;;  %v6477_v47 = vadd.f32 %v14104_v13, %v6476_v53  ;;  %v14132_v36 = vpop.eup %8615  ;;  %v17549_v50 = vld [vmem:[#allocation62_spill] sm:$0xff] }
 0x3d0   : > { %6650 = vmatmul.mubr.f32.gmra.mxu0 %v6223_v49  ;;  %7035 = vmatmul.mubr.f32.gmra.mxu1 %v6225_v18  ;;  %v6231_v8 = vmax.f32 %v14098_v20, 0.0  ;;  %v5982_v29 = vadd.f32 %v13989_v59, %v14011_v23  ;;  %v14124_v63 = vadd.f32 %v13992_v19, %v14021_v22  ;;  %v6482_v40 = vadd.f32 %v14104_v13, %v6481_v44  ;;  %v6491_v55 = vpop.f32.mrf.mxu0  ;;  %v6876_v61 = vpop.f32.mrf.mxu1  ;;  %v17543_v20 = vld [vmem:[#allocation17_spill] sm:$0xff] }
 0x3d1   : > { %6654 = vmatprep.mubr.f32.mxu0 %v6228_v4  ;;  %7039 = vmatprep.mubr.f32.mxu1 %v6230_v39  ;;  %v6233_v15 = vmax.f32 %v14111_v21, 0.0  ;;  %v4897_v53 = vrot.slane %v4890_v12, %v17468_v9  ;;  %v4650_v60 = vmax.f32 %v4618_v48, 0.0  ;;  %v14130_v41 = vadd.f32 %v14060_v16, %v6477_v47  ;;  %v14148_v16 = vld [vmem:[%s15986_s5] sm:$0xf]  ;;  %v17545_v21 = vld [vmem:[#allocation129_spill] sm:$0xff] }
 0x3d2   : > { %v5981_v23 = vadd.f32 %v13995_v62, %v14025_v33  ;;  %v14138_v22 = vadd.f32 %v13986_v32, %v14029_v58  ;;  %v14140_v44 = vadd.f32 %v6866_v7, %v6482_v40  ;;  %v6487_v52 = vadd.f32 %v14104_v13, %v6486_v46  ;;  %17541 = vst [vmem:[#allocation154_spill] sm:$0xff] %v14148_v16  ;;  %v6493_v33 = vpop.f32.mrf.mxu0  ;;  %v6878_v1 = vpop.f32.mrf.mxu1  ;;  %v17548_v47 = vld [vmem:[#allocation281_spill] sm:$0xff] }
 0x3d3   : > { %17539 = vst [vmem:[#allocation131_spill] sm:$0xff] %v14130_v41  ;;  %v5986_v28 = vadd.f32 %v13989_v59, %v14046_v37  ;;  %v4959_v31 = vmul.f32 %v14148_v16, %v4897_v53  ;;  %v4683_v14 = vadd.f32 1e-05, %v4650_v60  ;;  %v4461_v32 = vadd.f32 %v14074_v27, %v13900_v0  ;;  %v17542_v27 = vld [vmem:[#allocation12_spill] sm:$0xff]  ;;  %v17554_v1 = vld [vmem:[#allocation125_spill] sm:$0xff] }
 0x3d4   : > { %17540 = vst [vmem:[#allocation143_spill] sm:$0xff] %v14140_v44  ;;  %6655 = vmatmul.mubr.f32.gmra.mxu0 %v6227_v43  ;;  %7040 = vmatmul.mubr.f32.gmra.mxu1 %v6229_v5  ;;  %v6236_v58 = vmax.f32 %v5980_v38, 0.0  ;;  %v7284_v7 = vmul.f32 %v14130_v41, %v14130_v41  ;;  %v7180_v59 = vadd.f32 %v14140_v44, %v14130_v41  ;;  %v6238_v6 = vmax.f32 %v5982_v29, 0.0  ;;  %v14168_v25 = vpop.f32.mrf.mxu0  ;;  %v14170_v49 = vpop.f32.mrf.mxu1  ;;  %v17546_v43 = vld [vmem:[#allocation56_spill] sm:$0xff] }
 0x3d5   : > { %v7285_v37 = vmul.f32 %v14140_v44, %v14140_v44  ;;  %6659 = vmatprep.mubr.f32.mxu0 %v6232_v34  ;;  %7044 = vmatprep.mubr.f32.mxu1 %v6234_v30  ;;  %v14160_v26 = vrot.slane %v4959_v31, %v17491_v42  ;;  %v14163_v0 = vrot.slane %v4959_v31, %v17266_v17  ;;  %v17547_v34 = vld [vmem:[#allocation70_spill] sm:$0xff]  ;;  %8617 = vrsqrt.f32 %v4683_v14 }
 0x3d6   : > { %v14166_v2 = vrot.slane %v4959_v31, %v17542_v27  ;;  %v14173_v57 = vrot.slane %v4959_v31, %v17543_v20  ;;  %v14177_v4 = vadd.f32 %v6871_v54, %v6487_v52  ;;  %v6492_v39 = vadd.f32 %v14104_v13, %v6491_v55  ;;  %v6498_v38 = vpop.f32.mrf.mxu0  ;;  %v6883_v12 = vpop.f32.mrf.mxu1  ;;  %v17551_v52 = vld [vmem:[#allocation153_spill] sm:$0xff] }
 0x3d7   : > { %v14175_v18 = vadd.f32 %v7285_v37, %v7284_v7  ;;  %v5151_v46 = vmul.f32 %v14160_v26, %v17545_v21  ;;  %v5152_v5 = vmul.f32 %v14163_v0, %v17546_v43  ;;  %v6235_v48 = vmax.f32 %v14124_v63, 0.0  ;;  %v17556_v37 = vld [vmem:[#allocation222_spill] sm:$0xff]  ;;  %v17561_v12 = vld [vmem:[#allocation223_spill] sm:$0xff] }
 0x3d8   : > { %17544 = vst [vmem:[#allocation115_spill] sm:$0xff] %v14177_v4  ;;  %v5153_v30 = vmul.f32 %v14166_v2, %v17547_v34  ;;  %6660 = vmatmul.mubr.f32.gmra.mxu0 %v6231_v8  ;;  %7045 = vmatmul.mubr.f32.gmra.mxu1 %v6233_v15  ;;  %v5983_v54 = vadd.f32 %v13992_v19, %v14050_v11  ;;  %v6237_v40 = vmax.f32 %v5981_v23, 0.0  ;;  %v6240_v53 = vmax.f32 %v14138_v22, 0.0  ;;  %v14198_v63 = vpop.f32.mrf.mxu0  ;;  %v14200_v60 = vpop.f32.mrf.mxu1  ;;  %v17558_v21 = vld [vmem:[#allocation102_spill] sm:$0xff] }
 0x3d9   : > { %v5154_v3 = vmul.f32 %v14173_v57, %v17548_v47  ;;  %v14193_v29 = vmul.f32 %v17549_v50, %v17549_v50  ;;  %6664 = vmatprep.mubr.f32.mxu0 %v6236_v58  ;;  %7049 = vmatprep.mubr.f32.mxu1 %v6238_v6  ;;  %v5985_v8 = vadd.f32 %v13995_v62, %v14055_v24  ;;  %v6242_v19 = vmax.f32 %v5986_v28, 0.0  ;;  %v17555_v58 = vld [vmem:[#allocation253_spill] sm:$0xff]  ;;  %v17557_v6 = vld [vmem:[#allocation239_spill] sm:$0xff] }
 0x3da   : > { %v5315_v15 = vcombine.low %v5151_v46, %v5152_v5  ;;  %v14204_v55 = vadd.f32 %v14107_v10, %v17549_v50  ;;  %v14207_v31 = vadd.f32 %v4461_v32, %v17551_v52  ;;  %v14211_v22 = vadd.f32 %v7180_v59, %v14177_v4  ;;  %v6503_v28 = vpop.f32.mrf.mxu0  ;;  %v6888_v14 = vpop.f32.mrf.mxu1  ;;  %v17579_v50 = vld [vmem:[#allocation45_spill] sm:$0xff] }
 0x3db   : > { %17550 = vst [vmem:[#allocation132_spill] sm:$0xff] %v14193_v29  ;;  %v5316_v11 = vcombine.low %v5153_v30, %v5154_v3  ;;  %v14215_v62 = vmul.f32 %v14177_v4, %v14177_v4  ;;  %v14217_v24 = vadd.f32 %v6876_v61, %v6492_v39  ;;  %v6239_v10 = vmax.f32 %v5983_v54, 0.0  ;;  %v17560_v30 = vld [vmem:[#allocation254_spill] sm:$0xff]  ;;  %v17562_v54 = vld [vmem:[#allocation240_spill] sm:$0xff] }
 0x3dc   : > { %17552 = vst [vmem:[#allocation24_spill] sm:$0xff] %v14207_v31  ;;  %v5323_v23 = vrot.slane %v5315_v15, %v17468_v9  ;;  %6665 = vmatmul.mubr.f32.gmra.mxu0 %v6235_v48  ;;  %7050 = vmatmul.mubr.f32.gmra.mxu1 %v6237_v40  ;;  %v5564_v32 = vmul.f32 %v14163_v0, %v17554_v1  ;;  %v6241_v59 = vmax.f32 %v5985_v8, 0.0  ;;  %v14230_v43 = vpop.f32.mrf.mxu0  ;;  %v14232_v5 = vpop.f32.mrf.mxu1  ;;  %v17563_v3 = vld [vmem:[#allocation108_spill] sm:$0xff]  ;;  %v4689_v14 = vadd.f32 1e-05, %v14041_v51  ;;  %v17567_v1 = vld [vmem:[#allocation127_spill] sm:$0xff] }
 0x3dd   : > { %17553 = vst [vmem:[#allocation204_spill] sm:$0xff] %v14217_v24  ;;  %v5330_v33 = vrot.slane %v5316_v11, %v17468_v9  ;;  %v5566_v7 = vmul.f32 %v14173_v57, %v17555_v58  ;;  %6669 = vmatprep.mubr.f32.mxu0 %v6240_v53  ;;  %7054 = vmatprep.mubr.f32.mxu1 %v6242_v19  ;;  %17559 = vst [vmem:[#allocation20_spill] sm:$0xff] %v14232_v5  ;;  %v17564_v53 = vld [vmem:[#allocation256_spill] sm:$0xff]  ;;  %v17566_v11 = vld [vmem:[#allocation241_spill] sm:$0xff] }
 0x3de   : > { %v5563_v61 = vmul.f32 %v14160_v26, %v17556_v37  ;;  %v5565_v39 = vmul.f32 %v14166_v2, %v17557_v6  ;;  %v5568_v46 = vmul.f32 %v14163_v0, %v17558_v21  ;;  %v5570_v38 = vmul.f32 %v14173_v57, %v17560_v30  ;;  %v17565_v15 = vld [vmem:[#allocation224_spill] sm:$0xff]  ;;  %v6893_v28 = vpop.f32.mrf.mxu1  ;;  %v17568_v37 = vld [vmem:[#allocation257_spill] sm:$0xff]  ;;  %v17571_v51 = vld [vmem:[#allocation103_spill] sm:$0xff] }
 0x3df   : > { %v5331_v34 = vcombine.low %v5323_v23, %v5330_v33  ;;  %v5567_v48 = vmul.f32 %v14160_v26, %v17561_v12  ;;  %v5569_v47 = vmul.f32 %v14166_v2, %v17562_v54  ;;  %v5572_v40 = vmul.f32 %v14163_v0, %v17563_v3  ;;  %v6508_v23 = vpop.f32.mrf.mxu0  ;;  %v17569_v21 = vld [vmem:[#allocation225_spill] sm:$0xff]  ;;  %v17570_v12 = vld [vmem:[#allocation58_spill] sm:$0xff]  ;;  %v17585_v31 = vld [vmem:[#allocation111_spill] sm:$0xff] }
 0x3e0   : > { %v5574_v8 = vmul.f32 %v14173_v57, %v17564_v53  ;;  %v14246_v19 = vmul.f32 %v14160_v26, %v17565_v15  ;;  %v14250_v52 = vmul.f32 %v14166_v2, %v17566_v11  ;;  %6670 = vmatmul.mubr.f32.gmra.mxu0 %v6239_v10  ;;  %7055 = vmatmul.mubr.f32.gmra.mxu1 %v6241_v59  ;;  %v17572_v59 = vld [vmem:[#allocation258_spill] sm:$0xff]  ;;  %v14280_v53 = vpop.f32.mrf.mxu1  ;;  %v14285_v15 = vld [vmem:[%s15987_s6] sm:$0xf]  ;;  %8619 = vrsqrt.f32 %v4689_v14 }
 0x3e1   : > { %v5338_v33 = vrot.slane %v5331_v34, %v17468_v9  ;;  %v14256_v58 = vmul.f32 %v14163_v0, %v17567_v1  ;;  %v14260_v6 = vmul.f32 %v14173_v57, %v17568_v37  ;;  %v14264_v30 = vmul.f32 %v14160_v26, %v17569_v21  ;;  %v14278_v3 = vpop.f32.mrf.mxu0  ;;  %17573 = vst [vmem:[#allocation117_spill] sm:$0xff] %v14280_v53  ;;  %v17575_v23 = vld [vmem:[#allocation226_spill] sm:$0xff] }
 0x3e2   : > { %v14268_v54 = vmul.f32 %v14166_v2, %v17570_v12  ;;  %v14272_v10 = vmul.f32 %v14163_v0, %v17571_v51  ;;  %v14276_v34 = vmul.f32 %v14173_v57, %v17572_v59  ;;  %17574 = vst [vmem:[#allocation134_spill] sm:$0xff] %v14285_v15  ;;  %v14290_v28 = vmul.f32 %v14160_v26, %v17575_v23  ;;  %v17576_v1 = vld [vmem:[#allocation242_spill] sm:$0xff]  ;;  %v17578_v51 = vld [vmem:[#allocation259_spill] sm:$0xff]  ;;  %v6898_v44 = vpop.f32.mrf.mxu1 }
 0x3e3   : > { %v5400_v11 = vsub.f32 %v14285_v15, %v5338_v33  ;;  %v14294_v37 = vmul.f32 %v14166_v2, %v17576_v1  ;;  %v17577_v21 = vld [vmem:[#allocation110_spill] sm:$0xff]  ;;  %v14302_v59 = vmul.f32 %v14173_v57, %v17578_v51  ;;  %v14306_v45 = vmul.f32 %v14160_v26, %v17579_v50  ;;  %v17580_v33 = vld [vmem:[#allocation243_spill] sm:$0xff]  ;;  %v6513_v4 = vpop.f32.mrf.mxu0 }
 0x3e4   : > { %v14298_v12 = vmul.f32 %v14163_v0, %v17577_v21  ;;  %v14310_v23 = vmul.f32 %v14166_v2, %v17580_v33  ;;  %v14314_v1 = vmul.f32 %v14163_v0, %v17581_v35  ;;  %v8618_v21 = vpop.eup %8617  ;;  %v17582_v33 = vld [vmem:[#allocation66_spill] sm:$0xff]  ;;  %v17583_v35 = vld [vmem:[#allocation227_spill] sm:$0xff]  ;;  %v17584_v4 = vld [vmem:[#allocation244_spill] sm:$0xff] }
 0x3e5   : > { %v14317_v41 = vrot.slane %v5400_v11, %v17266_v17  ;;  %v14320_v51 = vrot.slane %v5400_v11, %v17543_v20  ;;  %v14323_v50 = vrot.slane %v5400_v11, %v17491_v42  ;;  %v14326_v29 = vrot.slane %v5400_v11, %v17542_v27 }
 0x3e6   : > { %v14330_v15 = vmul.f32 %v14173_v57, %v17582_v33  ;;  %v14334_v44 = vmul.f32 %v14160_v26, %v17583_v35  ;;  %v14338_v56 = vmul.f32 %v14166_v2, %v17584_v4  ;;  %v14342_v20 = vmul.f32 %v14163_v0, %v17585_v31 }
 0x3e7   : > { %v5988_v17 = vadd.f32 %v14317_v41, %v5564_v32  ;;  %v5990_v11 = vadd.f32 %v14320_v51, %v5566_v7  ;;  %v5987_v27 = vadd.f32 %v14323_v50, %v5563_v61  ;;  %v5989_v33 = vadd.f32 %v14326_v29, %v5565_v39  ;;  %v17586_v61 = vld [vmem:[#allocation262_spill] sm:$0xff] }
 0x3e8   : > { %v5992_v42 = vadd.f32 %v14317_v41, %v5568_v46  ;;  %v5994_v35 = vadd.f32 %v14320_v51, %v5570_v38  ;;  %v4898_v53 = vcombine.low %v14132_v36, %v8618_v21  ;;  %v7287_v4 = vmul.f32 %v14217_v24, %v14217_v24 }
 0x3e9   : > { %v6244_v16 = vmax.f32 %v5988_v17, 0.0  ;;  %v6246_v0 = vmax.f32 %v5990_v11, 0.0  ;;  %v5991_v31 = vadd.f32 %v14323_v50, %v5567_v48  ;;  %v5993_v32 = vadd.f32 %v14326_v29, %v5569_v47 }
 0x3ea   : > { %v6243_v7 = vmax.f32 %v5987_v27, 0.0  ;;  %v6245_v5 = vmax.f32 %v5989_v33, 0.0  ;;  %v14357_v39 = vmul.f32 %v14173_v57, %v17586_v61  ;;  %v7349_v46 = vadd.f32 %v14175_v18, %v14215_v62  ;;  %v17587_v27 = vld [vmem:[#allocation231_spill] sm:$0xff]  ;;  %v17588_v57 = vld [vmem:[#allocation246_spill] sm:$0xff] }
 0x3eb   : > { %6674 = vmatprep.mubr.f32.mxu0 %v6244_v16  ;;  %7059 = vmatprep.mubr.f32.mxu1 %v6246_v0  ;;  %v6248_v36 = vmax.f32 %v5992_v42, 0.0  ;;  %v6250_v38 = vmax.f32 %v5994_v35, 0.0  ;;  %v5996_v17 = vadd.f32 %v14317_v41, %v5572_v40  ;;  %v5998_v21 = vadd.f32 %v14320_v51, %v5574_v8  ;;  %v14388_v8 = vpop.f32.mrf.mxu0  ;;  %v17589_v35 = vld [vmem:[#allocation21_spill] sm:$0xff] }
 0x3ec   : > { %6675 = vmatmul.mubr.f32.gmra.mxu0 %v6243_v7  ;;  %7060 = vmatmul.mubr.f32.gmra.mxu1 %v6245_v5  ;;  %v14365_v48 = vmul.f32 %v14160_v26, %v17587_v27  ;;  %v14369_v47 = vmul.f32 %v14166_v2, %v17588_v57  ;;  %v14373_v16 = vadd.f32 %v14211_v22, %v14217_v24  ;;  %v6247_v42 = vmax.f32 %v5991_v31, 0.0  ;;  %v17636_v24 = vld [vmem:[#allocation288_spill] sm:$0xff] }
 0x3ed   : > { %6679 = vmatprep.mubr.f32.mxu0 %v6248_v36  ;;  %7064 = vmatprep.mubr.f32.mxu1 %v6250_v38  ;;  %v6249_v18 = vmax.f32 %v5993_v32, 0.0  ;;  %v14376_v62 = vrot.slane %v4898_v53, %v17468_v9  ;;  %v14378_v5 = vadd.f32 %v7349_v46, %v7287_v4  ;;  %v5995_v26 = vadd.f32 %v14323_v50, %v14246_v19  ;;  %v14394_v19 = vpop.f32.mrf.mxu1 }
 0x3ee   : > { %v5997_v2 = vadd.f32 %v14326_v29, %v14250_v52  ;;  %v6000_v40 = vadd.f32 %v14317_v41, %v14256_v58  ;;  %v6002_v22 = vadd.f32 %v14320_v51, %v14260_v6  ;;  %v6252_v14 = vmax.f32 %v5996_v17, 0.0 }
 0x3ef   : > { %v6254_v11 = vmax.f32 %v5998_v21, 0.0  ;;  %v5999_v53 = vadd.f32 %v14323_v50, %v14264_v30  ;;  %v6001_v33 = vadd.f32 %v14326_v29, %v14268_v54  ;;  %v6004_v52 = vadd.f32 %v14317_v41, %v14272_v10  ;;  %v6518_v30 = vpop.f32.mrf.mxu0  ;;  %v6903_v0 = vpop.f32.mrf.mxu1 }
 0x3f0   : > { %6680 = vmatmul.mubr.f32.gmra.mxu0 %v6247_v42  ;;  %7065 = vmatmul.mubr.f32.gmra.mxu1 %v6249_v18  ;;  %v6006_v58 = vadd.f32 %v14320_v51, %v14276_v34  ;;  %v14402_v6 = vadd.f32 %v14323_v50, %v14290_v28  ;;  %v14405_v4 = vmul.f32 0.015625, %v17589_v35  ;;  %v14409_v54 = vadd.f32 %v14326_v29, %v14294_v37 }
 0x3f1   : > { %6684 = vmatprep.mubr.f32.mxu0 %v6252_v14  ;;  %7069 = vmatprep.mubr.f32.mxu1 %v6254_v11  ;;  %v14413_v10 = vadd.f32 %v14317_v41, %v14298_v12  ;;  %v14417_v34 = vadd.f32 %v14320_v51, %v14302_v59  ;;  %v3793_v28 = vrot.slane %v14204_v55, 4  ;;  %v6251_v31 = vmax.f32 %v5995_v26, 0.0  ;;  %v14424_v61 = vpop.f32.mrf.mxu0  ;;  %v14426_v17 = vpop.f32.mrf.mxu1 }
 0x3f2   : > { %v6253_v32 = vmax.f32 %v5997_v2, 0.0  ;;  %v6497_v7 = vadd.f32 %v14104_v13, %v14168_v25  ;;  %v6502_v37 = vadd.f32 %v14104_v13, %v14198_v63  ;;  %v6256_v46 = vmax.f32 %v6000_v40, 0.0 }
 0x3f3   : > { %v6258_v12 = vmax.f32 %v6002_v22, 0.0  ;;  %v6255_v36 = vmax.f32 %v5999_v53, 0.0  ;;  %v6257_v38 = vmax.f32 %v6001_v33, 0.0  ;;  %v6260_v59 = vmax.f32 %v6004_v52, 0.0  ;;  %v6523_v57 = vpop.f32.mrf.mxu0  ;;  %v6908_v2 = vpop.f32.mrf.mxu1 }
 0x3f4   : > { %6685 = vmatmul.mubr.f32.gmra.mxu0 %v6251_v31  ;;  %7070 = vmatmul.mubr.f32.gmra.mxu1 %v6253_v32  ;;  %v6262_v21 = vmax.f32 %v6006_v58, 0.0  ;;  %v6259_v27 = vmax.f32 %v14402_v6, 0.0  ;;  %v14431_v25 = vadd.f32 %v14323_v50, %v14306_v45  ;;  %v6261_v63 = vmax.f32 %v14409_v54, 0.0  ;;  %v17594_v54 = vld [vmem:[#allocation20_spill] sm:$0xff]  ;;  %v17597_v31 = vld [vmem:[#allocation117_spill] sm:$0xff] }
 0x3f5   : > { %6689 = vmatprep.mubr.f32.mxu0 %v6256_v46  ;;  %7074 = vmatprep.mubr.f32.mxu1 %v6258_v12  ;;  %v6264_v42 = vmax.f32 %v14413_v10, 0.0  ;;  %v6266_v18 = vmax.f32 %v14417_v34, 0.0  ;;  %v6009_v26 = vadd.f32 %v14326_v29, %v14310_v23  ;;  %v14440_v40 = vadd.f32 %v14317_v41, %v14314_v1  ;;  %v14454_v11 = vpop.f32.mrf.mxu0  ;;  %v17590_v1 = vld [vmem:[#allocation60_spill] sm:$0xff]  ;;  %v17599_v12 = vld [vmem:[#allocation10_spill] sm:$0xff] }
 0x3f6   : > { %v14444_v45 = vadd.f32 %v14320_v51, %v14330_v15  ;;  %v14448_v22 = vadd.f32 %v14323_v50, %v14334_v44  ;;  %v14452_v14 = vadd.f32 %v14326_v29, %v14338_v56  ;;  %v14458_v23 = vadd.f32 %v14317_v41, %v14342_v20  ;;  %v14468_v44 = vpop.f32.mrf.mxu1 }
 0x3f7   : > { %v4914_v53 = vcombine.low %v14376_v62, %v17590_v1  ;;  %v14463_v15 = vadd.f32 %v14170_v49, %v6497_v7  ;;  %v14466_v33 = vadd.f32 %v14200_v60, %v6502_v37  ;;  %v6263_v56 = vmax.f32 %v14431_v25, 0.0  ;;  %v6528_v62 = vpop.f32.mrf.mxu0  ;;  %v14476_v49 = vpop.eup %8619  ;;  %v17608_v1 = vld [vmem:[#allocation292_spill] sm:$0xff] }
 0x3f8   : > { %6690 = vmatmul.mubr.f32.gmra.mxu0 %v6255_v36  ;;  %7075 = vmatmul.mubr.f32.gmra.mxu1 %v6257_v38  ;;  %v6507_v52 = vadd.f32 %v14104_v13, %v14230_v43  ;;  %v6512_v41 = vadd.f32 %v14104_v13, %v14278_v3  ;;  %v3794_v20 = vadd.f32 %v3793_v28, %v14204_v55  ;;  %v6265_v60 = vmax.f32 %v6009_v26, 0.0  ;;  %v6913_v35 = vpop.f32.mrf.mxu1  ;;  %v17596_v28 = vld [vmem:[#allocation154_spill] sm:$0xff]  ;;  %v17600_v38 = vld [vmem:[#allocation16_spill] sm:$0xff] }
 0x3f9   : > { %17591 = vst [vmem:[#allocation138_spill] sm:$0xff] %v14463_v15  ;;  %17592 = vst [vmem:[#allocation156_spill] sm:$0xff] %v14466_v33  ;;  %6694 = vmatprep.mubr.f32.mxu0 %v6260_v59  ;;  %7079 = vmatprep.mubr.f32.mxu1 %v6262_v21  ;;  %v14480_v58 = vadd.f32 %v14320_v51, %v14357_v39  ;;  %v4921_v6 = vrot.slane %v4914_v53, %v17468_v9  ;;  %v6268_v3 = vmax.f32 %v14440_v40, 0.0  ;;  %v14491_v34 = vpop.f32.mrf.mxu0  ;;  %v17601_v21 = vld [vmem:[#allocation12_spill] sm:$0xff] }
 0x3fa   : > { %17593 = vst [vmem:[#allocation118_spill] sm:$0xff] %v14476_v49  ;;  %v7288_v43 = vmul.f32 %v14463_v15, %v14463_v15  ;;  %v6270_v55 = vmax.f32 %v14444_v45, 0.0  ;;  %v6267_v30 = vmax.f32 %v14448_v22, 0.0  ;;  %v14489_v10 = vadd.f32 %v17594_v54, %v6507_v52  ;;  %v14505_v7 = vpop.f32.mrf.mxu1  ;;  %v17606_v40 = vld [vmem:[#allocation32_spill] sm:$0xff]  ;;  %v17607_v22 = vld [vmem:[#allocation67_spill] sm:$0xff] }
 0x3fb   : > { %v14495_v51 = vadd.f32 %v14323_v50, %v14365_v48  ;;  %v14499_v39 = vadd.f32 %v14326_v29, %v14369_v47  ;;  %v4960_v0 = vmul.f32 %v17596_v28, %v4921_v6  ;;  %v14503_v32 = vadd.f32 %v17597_v31, %v6512_v41  ;;  %v6533_v29 = vpop.f32.mrf.mxu0  ;;  %v17610_v6 = vld [vmem:[#allocation11_spill] sm:$0xff] }
 0x3fc   : > { %17595 = vst [vmem:[#allocation135_spill] sm:$0xff] %v14489_v10  ;;  %6695 = vmatmul.mubr.f32.gmra.mxu0 %v6259_v27  ;;  %7080 = vmatmul.mubr.f32.gmra.mxu1 %v6261_v63  ;;  %v7183_v37 = vadd.f32 %v14373_v16, %v14463_v15  ;;  %v7351_v46 = vadd.f32 %v14378_v5, %v7288_v43  ;;  %v3795_v48 = vrot.slane %v3794_v20, 2  ;;  %v6269_v47 = vmax.f32 %v14452_v14, 0.0  ;;  %v6918_v16 = vpop.f32.mrf.mxu1  ;;  %v17602_v5 = vld [vmem:[#allocation17_spill] sm:$0xff]  ;;  %v17637_v49 = vld [vmem:[#allocation251_spill] sm:$0xff] }
 0x3fd   : > { %17598 = vst [vmem:[#allocation25_spill] sm:$0xff] %v14503_v32  ;;  %v7289_v50 = vmul.f32 %v14466_v33, %v14466_v33  ;;  %6699 = vmatprep.mubr.f32.mxu0 %v6264_v42  ;;  %7084 = vmatprep.mubr.f32.mxu1 %v6266_v18  ;;  %v14514_v36 = vrot.slane %v4960_v0, %v17599_v12  ;;  %v17603_v42 = vld [vmem:[#allocation114_spill] sm:$0xff]  ;;  %v17604_v18 = vld [vmem:[#allocation24_spill] sm:$0xff]  ;;  %v14534_v2 = vpop.f32.mrf.mxu0  ;;  %v6272_v62 = vmax.f32 %v14458_v23, 0.0  ;;  %v17612_v16 = vld [vmem:[#allocation101_spill] sm:$0xff] }
 0x3fe   : > { %v14517_v59 = vrot.slane %v4960_v0, %v17600_v38  ;;  %v14520_v27 = vrot.slane %v4960_v0, %v17601_v21  ;;  %v14523_v25 = vrot.slane %v4960_v0, %v17602_v5  ;;  %v7184_v57 = vadd.f32 %v7183_v37, %v14466_v33  ;;  %17605 = vst [vmem:[#allocation157_spill] sm:$0xff] %v14534_v2  ;;  %v14546_v41 = vpop.f32.mrf.mxu1  ;;  %v17611_v37 = vld [vmem:[#allocation109_spill] sm:$0xff] }
 0x3ff   : > { %v14528_v63 = vmul.f32 %v14489_v10, %v14489_v10  ;;  %v14532_v26 = vadd.f32 %v17604_v18, %v17603_v42  ;;  %v5155_v45 = vmul.f32 %v14514_v36, %v17606_v40  ;;  %v14544_v52 = vmul.f32 %v14503_v32, %v14503_v32  ;;  %17609 = vst [vmem:[#allocation119_spill] sm:$0xff] %v14546_v41  ;;  %v6538_v28 = vpop.f32.mrf.mxu0  ;;  %v17617_v18 = vld [vmem:[#allocation279_spill] sm:$0xff] }
 0x400   : > { %v5156_v14 = vmul.f32 %v14517_v59, %v17607_v22  ;;  %v5157_v53 = vmul.f32 %v14520_v27, %v17608_v1  ;;  %6700 = vmatmul.mubr.f32.gmra.mxu0 %v6263_v56  ;;  %7085 = vmatmul.mubr.f32.gmra.mxu1 %v6265_v60  ;;  %v5158_v43 = vmul.f32 %v14523_v25, %v17610_v6  ;;  %v6274_v0 = vmax.f32 %v14480_v58, 0.0  ;;  %v6923_v60 = vpop.f32.mrf.mxu1  ;;  %v17620_v6 = vld [vmem:[#allocation264_spill] sm:$0xff]  ;;  %v17621_v28 = vld [vmem:[#allocation130_spill] sm:$0xff] }
 0x401   : > { %v7352_v35 = vadd.f32 %v7351_v46, %v7289_v50  ;;  %v14551_v54 = vadd.f32 %v3795_v48, %v3794_v20  ;;  %6704 = vmatprep.mubr.f32.mxu0 %v6268_v3  ;;  %7089 = vmatprep.mubr.f32.mxu1 %v6270_v55  ;;  %v14556_v29 = vmul.f32 %v14517_v59, %v17611_v37  ;;  %v17613_v20 = vld [vmem:[#allocation245_spill] sm:$0xff]  ;;  %v17614_v3 = vld [vmem:[#allocation263_spill] sm:$0xff]  ;;  %v14571_v55 = vpop.f32.mrf.mxu0  ;;  %v6271_v1 = vmax.f32 %v14495_v51, 0.0  ;;  %v17623_v51 = vld [vmem:[#allocation248_spill] sm:$0xff] }
 0x402   : > { %v5339_v31 = vcombine.low %v5155_v45, %v5156_v14  ;;  %v7185_v56 = vadd.f32 %v7184_v57, %v14489_v10  ;;  %v5340_v23 = vcombine.low %v5157_v53, %v5158_v43  ;;  %v14561_v42 = vmul.f32 %v14523_v25, %v17612_v16  ;;  %17615 = vst [vmem:[#allocation136_spill] sm:$0xff] %v14571_v55  ;;  %v17616_v48 = vld [vmem:[#allocation113_spill] sm:$0xff]  ;;  %v17618_v45 = vld [vmem:[#allocation247_spill] sm:$0xff]  ;;  %v14586_v14 = vpop.f32.mrf.mxu1  ;;  %v17622_v16 = vld [vmem:[#allocation284_spill] sm:$0xff] }
 0x403   : > { %v14565_v46 = vmul.f32 %v14514_v36, %v17613_v20  ;;  %v14569_v58 = vmul.f32 %v14520_v27, %v17614_v3  ;;  %v14576_v57 = vmul.f32 %v14517_v59, %v17616_v48  ;;  %v14580_v40 = vmul.f32 %v14523_v25, %v17617_v18  ;;  %17619 = vst [vmem:[#allocation142_spill] sm:$0xff] %v14586_v14  ;;  %v6543_v37 = vpop.f32.mrf.mxu0  ;;  %v17625_v18 = vld [vmem:[#allocation112_spill] sm:$0xff] }
 0x404   : > { %v5347_v50 = vrot.slane %v5339_v31, %v17468_v9  ;;  %v14584_v22 = vmul.f32 %v14514_v36, %v17618_v45  ;;  %6705 = vmatmul.mubr.f32.gmra.mxu0 %v6267_v30  ;;  %7090 = vmatmul.mubr.f32.gmra.mxu1 %v6269_v47  ;;  %v5354_v53 = vrot.slane %v5340_v23, %v17468_v9  ;;  %v6273_v60 = vmax.f32 %v14499_v39, 0.0  ;;  %v17624_v23 = vld [vmem:[#allocation265_spill] sm:$0xff]  ;;  %v6928_v3 = vpop.f32.mrf.mxu1  ;;  %v17629_v37 = vld [vmem:[#allocation266_spill] sm:$0xff] }
 0x405   : > { %v14592_v43 = vmul.f32 %v14520_v27, %v17620_v6  ;;  %v14596_v31 = vmul.f32 %v14517_v59, %v17621_v28  ;;  %6709 = vmatprep.mubr.f32.mxu0 %v6272_v62  ;;  %7094 = vmatprep.mubr.f32.mxu1 %v6274_v0  ;;  %v14601_v30 = vmul.f32 %v14523_v25, %v17622_v16  ;;  %v17626_v0 = vld [vmem:[#allocation285_spill] sm:$0xff]  ;;  %v14623_v28 = vpop.f32.mrf.mxu0  ;;  %v17632_v3 = vld [vmem:[#allocation250_spill] sm:$0xff] }
 0x406   : > { %v14605_v47 = vmul.f32 %v14514_v36, %v17623_v51  ;;  %v14609_v20 = vmul.f32 %v14520_v27, %v17624_v23  ;;  %v5355_v48 = vcombine.low %v5347_v50, %v5354_v53  ;;  %v14613_v62 = vmul.f32 %v14517_v59, %v17625_v18  ;;  %v17627_v45 = vld [vmem:[#allocation249_spill] sm:$0xff]  ;;  %17628 = vst [vmem:[#allocation158_spill] sm:$0xff] %v14623_v28  ;;  %v17630_v51 = vld [vmem:[#allocation116_spill] sm:$0xff]  ;;  %v17631_v53 = vld [vmem:[#allocation287_spill] sm:$0xff] }
 0x407   : > { %v14617_v39 = vmul.f32 %v14523_v25, %v17626_v0  ;;  %v14621_v6 = vmul.f32 %v14514_v36, %v17627_v45  ;;  %v14627_v16 = vmul.f32 %v14520_v27, %v17629_v37  ;;  %v14631_v50 = vmul.f32 %v14517_v59, %v17630_v51  ;;  %v14641_v0 = vpop.f32.mrf.mxu1  ;;  %v17634_v37 = vld [vmem:[#allocation267_spill] sm:$0xff]  ;;  %v17635_v51 = vld [vmem:[#allocation238_spill] sm:$0xff]  ;;  %v6548_v15 = vpop.f32.mrf.mxu0 }
 0x408   : > { %v14635_v23 = vmul.f32 %v14523_v25, %v17631_v53  ;;  %v14639_v18 = vmul.f32 %v14514_v36, %v17632_v3  ;;  %17633 = vst [vmem:[#allocation122_spill] sm:$0xff] %v14641_v0  ;;  %6710 = vmatmul.mubr.f32.gmra.mxu0 %v6271_v1  ;;  %7095 = vmatmul.mubr.f32.gmra.mxu1 %v6273_v60  ;;  %v3797_v53 = vrot.slane %v14551_v54, 1  ;;  %v17638_v60 = vld [vmem:[#allocation268_spill] sm:$0xff]  ;;  %v17640_v0 = vld [vmem:[#allocation134_spill] sm:$0xff] }
 0x409   : > { %v5362_v45 = vrot.slane %v5355_v48, %v17468_v9  ;;  %v14646_v10 = vmul.f32 %v14520_v27, %v17634_v37  ;;  %v14650_v33 = vmul.f32 %v14517_v59, %v17635_v51  ;;  %v14655_v3 = vmul.f32 %v14523_v25, %v17636_v24  ;;  %v17639_v37 = vld [vmem:[#allocation40_spill] sm:$0xff]  ;;  %v6933_v51 = vpop.f32.mrf.mxu1  ;;  %v14679_v55 = vpop.f32.mrf.mxu0 }
 0x40a   : > { %v14659_v1 = vmul.f32 %v14514_v36, %v17637_v49  ;;  %v14663_v48 = vmul.f32 %v14520_v27, %v17638_v60  ;;  %v14667_v9 = vmul.f32 %v14517_v59, %v17639_v37  ;;  %v17641_v15 = vld [vmem:[#allocation80_spill] sm:$0xff]  ;;  %v7353_v49 = vadd.f32 %v7352_v35, %v14528_v63  ;;  %v17643_v60 = vld [vmem:[#allocation269_spill] sm:$0xff] }
 0x40b   : > { %v5401_v14 = vsub.f32 %v17640_v0, %v5362_v45  ;;  %v14672_v28 = vmul.f32 %v14523_v25, %v17641_v15  ;;  %v17642_v24 = vld [vmem:[#allocation252_spill] sm:$0xff]  ;;  %v14683_v2 = vmul.f32 %v14520_v27, %v17643_v60  ;;  %v17645_v0 = vld [vmem:[#allocation289_spill] sm:$0xff]  ;;  %v14694_v15 = vadd.f32 %v7185_v56, %v14503_v32  ;;  %v17648_v32 = vld [vmem:[#allocation271_spill] sm:$0xff] }
 0x40c   : > { %v14676_v41 = vmul.f32 %v14514_v36, %v17642_v24  ;;  %v17644_v37 = vld [vmem:[#allocation168_spill] sm:$0xff]  ;;  %v14691_v45 = vmul.f32 %v14523_v25, %v17645_v0  ;;  %v14696_v24 = vpop.f32.mrf.mxu1  ;;  %v17647_v25 = vld [vmem:[#allocation255_spill] sm:$0xff]  ;;  %v14715_v56 = vadd.f32 %v7353_v49, %v14544_v52 }
 0x40d   : > { %v14687_v51 = vmul.f32 %v14517_v59, %v17644_v37  ;;  %17646 = vst [vmem:[#allocation137_spill] sm:$0xff] %v14696_v24  ;;  %v14699_v63 = vrot.slane %v5401_v14, %v17600_v38  ;;  %v14702_v35 = vrot.slane %v5401_v14, %v17602_v5  ;;  %v14705_v60 = vrot.slane %v5401_v14, %v17599_v12  ;;  %v6553_v37 = vpop.f32.mrf.mxu0 }
 0x40e   : > { %v14708_v59 = vrot.slane %v5401_v14, %v17601_v21  ;;  %v14712_v0 = vmul.f32 %v14514_v36, %v17647_v25  ;;  %v14719_v38 = vmul.f32 %v14520_v27, %v17648_v32  ;;  %v3798_v5 = vadd.f32 %v3797_v53, %v14551_v54  ;;  %v6938_v24 = vpop.f32.mrf.mxu1  ;;  %v17649_v54 = vld [vmem:[#allocation132_spill] sm:$0xff] }
 0x40f   : > { %v6020_v12 = vadd.f32 %v14699_v63, %v14556_v29  ;;  %v6022_v14 = vadd.f32 %v14702_v35, %v14561_v42  ;;  %v6019_v36 = vadd.f32 %v14705_v60, %v14565_v46  ;;  %v6024_v49 = vadd.f32 %v14699_v63, %v14576_v57 }
 0x410   : > { %v6021_v52 = vadd.f32 %v14708_v59, %v14569_v58  ;;  %v6026_v32 = vadd.f32 %v14702_v35, %v14580_v40  ;;  %v7187_v27 = vrot.slane %v14694_v15, 4  ;;  %v14737_v29 = vadd.f32 %v14532_v26, %v17649_v54 }
 0x411   : > { %v6276_v53 = vmax.f32 %v6020_v12, 0.0  ;;  %v6278_v42 = vmax.f32 %v6022_v14, 0.0  ;;  %v6023_v46 = vadd.f32 %v14705_v60, %v14584_v22  ;;  %v6025_v58 = vadd.f32 %v14708_v59, %v14592_v43 }
 0x412   : > { %v6275_v24 = vmax.f32 %v6019_v36, 0.0  ;;  %v6277_v37 = vmax.f32 %v6021_v52, 0.0  ;;  %v6280_v57 = vmax.f32 %v6024_v49, 0.0  ;;  %v7355_v25 = vrot.slane %v14715_v56, 4 }
 0x413   : > { %6714 = vmatprep.mubr.f32.mxu0 %v6276_v53  ;;  %7099 = vmatprep.mubr.f32.mxu1 %v6278_v42  ;;  %v6282_v40 = vmax.f32 %v6026_v32, 0.0  ;;  %v6028_v26 = vadd.f32 %v14699_v63, %v14596_v31  ;;  %v6030_v12 = vadd.f32 %v14702_v35, %v14601_v30  ;;  %v6027_v22 = vadd.f32 %v14705_v60, %v14605_v47 }
 0x414   : > { %6715 = vmatmul.mubr.f32.gmra.mxu0 %v6275_v24  ;;  %7100 = vmatmul.mubr.f32.gmra.mxu1 %v6277_v37  ;;  %v6029_v43 = vadd.f32 %v14708_v59, %v14609_v20  ;;  %v6032_v14 = vadd.f32 %v14699_v63, %v14613_v62  ;;  %v6034_v36 = vadd.f32 %v14702_v35, %v14617_v39  ;;  %v14756_v52 = vmul.f32 0.015625, %v3798_v5  ;;  %v14787_v37 = vpop.f32.mrf.mxu0 }
 0x415   : > { %6719 = vmatprep.mubr.f32.mxu0 %v6280_v57  ;;  %7104 = vmatprep.mubr.f32.mxu1 %v6282_v40  ;;  %v6279_v31 = vmax.f32 %v6023_v46, 0.0  ;;  %v6281_v30 = vmax.f32 %v6025_v58, 0.0  ;;  %v6031_v47 = vadd.f32 %v14705_v60, %v14621_v6  ;;  %v4465_v49 = vrot.slane %v14737_v29, 4 }
 0x416   : > { %v6284_v32 = vmax.f32 %v6028_v26, 0.0  ;;  %v6286_v54 = vmax.f32 %v6030_v12, 0.0  ;;  %v6283_v20 = vmax.f32 %v6027_v22, 0.0  ;;  %v6033_v62 = vadd.f32 %v14708_v59, %v14627_v16 }
 0x417   : > { %v6285_v53 = vmax.f32 %v6029_v43, 0.0  ;;  %v6036_v5 = vadd.f32 %v14699_v63, %v14631_v50  ;;  %v6038_v39 = vadd.f32 %v14702_v35, %v14635_v23  ;;  %v14769_v42 = vadd.f32 %v14705_v60, %v14639_v18  ;;  %v6558_v43 = vpop.f32.mrf.mxu0 }
 0x418   : > { %6720 = vmatmul.mubr.f32.gmra.mxu0 %v6279_v31  ;;  %7105 = vmatmul.mubr.f32.gmra.mxu1 %v6281_v30  ;;  %v6288_v6 = vmax.f32 %v6032_v14, 0.0  ;;  %v6290_v46 = vmax.f32 %v6034_v36, 0.0  ;;  %v14773_v58 = vadd.f32 %v14708_v59, %v14646_v10  ;;  %v14777_v16 = vadd.f32 %v14699_v63, %v14650_v33  ;;  %v14789_v10 = vpop.f32.mrf.mxu1 }
 0x419   : > { %6724 = vmatprep.mubr.f32.mxu0 %v6284_v32  ;;  %7109 = vmatprep.mubr.f32.mxu1 %v6286_v54  ;;  %v6287_v50 = vmax.f32 %v6031_v47, 0.0  ;;  %v6289_v23 = vmax.f32 %v6033_v62, 0.0  ;;  %v14781_v18 = vadd.f32 %v14702_v35, %v14655_v3  ;;  %v14785_v24 = vadd.f32 %v14705_v60, %v14659_v1  ;;  %v14829_v47 = vpop.f32.mrf.mxu0 }
 0x41a   : > { %v6292_v57 = vmax.f32 %v6036_v5, 0.0  ;;  %v6294_v40 = vmax.f32 %v6038_v39, 0.0  ;;  %v6291_v33 = vmax.f32 %v14769_v42, 0.0  ;;  %v14794_v26 = vadd.f32 %v14708_v59, %v14663_v48  ;;  %v6943_v14 = vpop.f32.mrf.mxu1 }
 0x41b   : > { %v6293_v12 = vmax.f32 %v14773_v58, 0.0  ;;  %v14799_v3 = vadd.f32 %v14699_v63, %v14667_v9  ;;  %v14803_v1 = vadd.f32 %v14702_v35, %v14672_v28  ;;  %v14807_v22 = vadd.f32 %v14705_v60, %v14676_v41  ;;  %v6563_v62 = vpop.f32.mrf.mxu0 }
 0x41c   : > { %6725 = vmatmul.mubr.f32.gmra.mxu0 %v6283_v20  ;;  %7110 = vmatmul.mubr.f32.gmra.mxu1 %v6285_v53  ;;  %v6296_v48 = vmax.f32 %v14777_v16, 0.0  ;;  %v14812_v36 = vadd.f32 %v14708_v59, %v14683_v2  ;;  %v14816_v9 = vadd.f32 %v14699_v63, %v14687_v51  ;;  %v14820_v28 = vadd.f32 %v14702_v35, %v14691_v45  ;;  %v14831_v51 = vpop.f32.mrf.mxu1  ;;  %v17650_v16 = vld [vmem:[#allocation18_spill] sm:$0xff] }
 0x41d   : > { %6729 = vmatprep.mubr.f32.mxu0 %v6288_v6  ;;  %7114 = vmatprep.mubr.f32.mxu1 %v6290_v46  ;;  %v6298_v41 = vmax.f32 %v14781_v18, 0.0  ;;  %v6295_v31 = vmax.f32 %v14785_v24, 0.0  ;;  %v6297_v30 = vmax.f32 %v14794_v26, 0.0  ;;  %v14827_v2 = vadd.f32 %v14705_v60, %v14712_v0 }
 0x41e   : > { %v6300_v63 = vmax.f32 %v14799_v3, 0.0  ;;  %v6302_v45 = vmax.f32 %v14803_v1, 0.0  ;;  %v6299_v35 = vmax.f32 %v14807_v22, 0.0  ;;  %v7188_v32 = vadd.f32 %v7187_v27, %v14694_v15  ;;  %v6948_v53 = vpop.f32.mrf.mxu1 }
 0x41f   : > { %v6301_v54 = vmax.f32 %v14812_v36, 0.0  ;;  %v6304_v20 = vmax.f32 %v14816_v9, 0.0  ;;  %v7356_v60 = vadd.f32 %v7355_v25, %v14715_v56  ;;  %v4466_v0 = vadd.f32 %v4465_v49, %v14737_v29  ;;  %v14855_v49 = vpop.f32.mrf.mxu0  ;;  %v17659_v36 = vld [vmem:[#allocation122_spill] sm:$0xff]  ;;  %v17661_v9 = vld [vmem:[#allocation137_spill] sm:$0xff] }
 0x420   : > { %6730 = vmatmul.mubr.f32.gmra.mxu0 %v6287_v50  ;;  %7115 = vmatmul.mubr.f32.gmra.mxu1 %v6289_v23  ;;  %v6306_v5 = vmax.f32 %v14820_v28, 0.0  ;;  %v6303_v39 = vmax.f32 %v14827_v2, 0.0  ;;  %v7189_v42 = vrot.slane %v7188_v32, 2  ;;  %v4589_v15 = vmul.f32 %v14405_v4, %v14405_v4  ;;  %v14857_v6 = vpop.f32.mrf.mxu1 }
 0x421   : > { %6734 = vmatprep.mubr.f32.mxu0 %v6292_v57  ;;  %7119 = vmatprep.mubr.f32.mxu1 %v6294_v40  ;;  %v7357_v27 = vrot.slane %v7356_v60, 2  ;;  %v14851_v56 = vadd.f32 %v14708_v59, %v14719_v38  ;;  %v4467_v29 = vrot.slane %v4466_v0, 2  ;;  %v6517_v25 = vadd.f32 %v14104_v13, %v14388_v8  ;;  %v6568_v24 = vpop.f32.mrf.mxu0 }
 0x422   : > { %v7190_v46 = vadd.f32 %v7189_v42, %v7188_v32  ;;  %v14861_v58 = vmul.f32 %v14756_v52, %v14756_v52  ;;  %v4621_v50 = vsub.f32 %v17650_v16, %v4589_v15  ;;  %v6522_v23 = vadd.f32 %v14104_v13, %v14424_v61  ;;  %v6953_v57 = vpop.f32.mrf.mxu1 }
 0x423   : > { %v7358_v38 = vadd.f32 %v7357_v27, %v7356_v60  ;;  %v4468_v59 = vadd.f32 %v4467_v29, %v4466_v0  ;;  %v14867_v18 = vadd.f32 %v14394_v19, %v6517_v25  ;;  %v6527_v8 = vadd.f32 %v14104_v13, %v14454_v11  ;;  %v14880_v60 = vpop.f32.mrf.mxu0  ;;  %v17656_v57 = vld [vmem:[#allocation158_spill] sm:$0xff] }
 0x424   : > { %6735 = vmatmul.mubr.f32.gmra.mxu0 %v6291_v33  ;;  %7120 = vmatmul.mubr.f32.gmra.mxu1 %v6293_v12  ;;  %v7191_v40 = vrot.slane %v7190_v46, 1  ;;  %v4653_v26 = vmax.f32 %v4621_v50, 0.0  ;;  %v14872_v43 = vadd.f32 %v14426_v17, %v6522_v23  ;;  %v6532_v61 = vadd.f32 %v14104_v13, %v14491_v34  ;;  %v14882_v33 = vpop.f32.mrf.mxu1 }
 0x425   : > { %6739 = vmatprep.mubr.f32.mxu0 %v6296_v48  ;;  %7124 = vmatprep.mubr.f32.mxu1 %v6298_v41  ;;  %v7359_v14 = vrot.slane %v7358_v38, 1  ;;  %v6305_v19 = vmax.f32 %v14851_v56, 0.0  ;;  %v4469_v32 = vrot.slane %v4468_v59, 1  ;;  %v14878_v11 = vadd.f32 %v14468_v44, %v6527_v8  ;;  %v6573_v62 = vpop.f32.mrf.mxu0  ;;  %v17654_v8 = vld [vmem:[#allocation119_spill] sm:$0xff] }
 0x426   : > { %v7192_v12 = vadd.f32 %v7191_v40, %v7190_v46  ;;  %v7292_v17 = vmul.f32 %v14867_v18, %v14867_v18  ;;  %v7193_v13 = vadd.f32 %v14872_v43, %v14867_v18  ;;  %v7293_v34 = vmul.f32 %v14872_v43, %v14872_v43  ;;  %v6958_v53 = vpop.f32.mrf.mxu1 }
 0x427   : > { %v7360_v48 = vadd.f32 %v7359_v14, %v7358_v38  ;;  %v4470_v41 = vadd.f32 %v4469_v32, %v4468_v59  ;;  %v7294_v44 = vmul.f32 %v14878_v11, %v14878_v11  ;;  %v14893_v0 = vadd.f32 %v14505_v7, %v6532_v61  ;;  %v6576_v50 = vpop.f32.mrf.mxu0 }
 0x428   : > { %6740 = vmatmul.mubr.f32.gmra.mxu0 %v6295_v31  ;;  %7125 = vmatmul.mubr.f32.gmra.mxu1 %v6297_v30  ;;  %v14895_v42 = vmul.f32 0.015625, %v7192_v12  ;;  %v4686_v15 = vadd.f32 1e-05, %v4653_v26  ;;  %v7361_v27 = vadd.f32 %v7293_v34, %v7292_v17  ;;  %v7194_v29 = vadd.f32 %v7193_v13, %v14878_v11  ;;  %v14907_v31 = vld [vmem:[%s15989_s8] ss:$0 sm:$0xff]  ;;  %v17652_v30 = vld [vmem:[#allocation157_spill] sm:$0xff]  ;;  %v14911_v23 = vpop.f32.mrf.mxu1 }
 0x429   : > { %17651 = vst [vmem:[#allocation29_spill] sm:$0xff] %v14893_v0  ;;  %6744 = vmatprep.mubr.f32.mxu0 %v6300_v63  ;;  %7129 = vmatprep.mubr.f32.mxu1 %v6302_v45  ;;  %v7460_v25 = vmul.f32 0.015625, %v7360_v48  ;;  %v4558_v46 = vmul.f32 0.015625, %v4470_v41  ;;  %v7295_v7 = vmul.f32 %v14893_v0, %v14893_v0  ;;  %v6537_v16 = vadd.f32 %v14907_v31, %v17652_v30  ;;  %v17653_v45 = vld [vmem:[#allocation136_spill] sm:$0xff]  ;;  %v6578_v61 = vpop.f32.mrf.mxu0  ;;  %v17657_v12 = vld [vmem:[#allocation142_spill] sm:$0xff] }
 0x42a   : > { %v7468_v3 = vmul.f32 %v14895_v42, %v14895_v42  ;;  %v7362_v1 = vadd.f32 %v7361_v27, %v7294_v44  ;;  %v7195_v63 = vadd.f32 %v7194_v29, %v14893_v0  ;;  %v6542_v38 = vadd.f32 %v14907_v31, %v17653_v45  ;;  %v6963_v14 = vpop.f32.mrf.mxu1 }
 0x42b   : > { %v4622_v59 = vsub.f32 %v4558_v46, %v14861_v58  ;;  %v14920_v24 = vadd.f32 %v17654_v8, %v6537_v16  ;;  %v6547_v40 = vadd.f32 %v14907_v31, %v17656_v57  ;;  %v6552_v26 = vadd.f32 %v14907_v31, %v14679_v55 }
 0x42c   : > { %6745 = vmatmul.mubr.f32.gmra.mxu0 %v6299_v35  ;;  %7130 = vmatmul.mubr.f32.gmra.mxu1 %v6301_v54  ;;  %v7476_v32 = vsub.f32 %v7460_v25, %v7468_v3  ;;  %8621 = vrsqrt.f32 %v4686_v15  ;;  %v7363_v58 = vadd.f32 %v7362_v1, %v7295_v7  ;;  %v14931_v17 = vadd.f32 %v17657_v12, %v6542_v38  ;;  %v6581_v54 = vpop.f32.mrf.mxu0  ;;  %v6966_v34 = vpop.f32.mrf.mxu1 }
 0x42d   : > { %17655 = vst [vmem:[#allocation159_spill] sm:$0xff] %v14920_v24  ;;  %6749 = vmatprep.mubr.f32.mxu0 %v6304_v20  ;;  %7134 = vmatprep.mubr.f32.mxu1 %v6306_v5  ;;  %v4654_v55 = vmax.f32 %v4622_v59, 0.0  ;;  %v7196_v13 = vadd.f32 %v7195_v63, %v14920_v24  ;;  %v7296_v22 = vmul.f32 %v14920_v24, %v14920_v24 }
 0x42e   : > { %17658 = vst [vmem:[#allocation124_spill] sm:$0xff] %v14931_v17  ;;  %v14941_v35 = vadd.f32 %v17659_v36, %v6547_v40  ;;  %v7484_v48 = vmax.f32 %v7476_v32, 0.0  ;;  %v7297_v41 = vmul.f32 %v14931_v17, %v14931_v17  ;;  %v14946_v20 = vadd.f32 %v17661_v9, %v6552_v26  ;;  %v6583_v15 = vpop.f32.mrf.mxu0  ;;  %v6968_v27 = vpop.f32.mrf.mxu1 }
 0x42f   : > { %v6557_v28 = vadd.f32 %v14907_v31, %v14787_v37  ;;  %v4687_v5 = vadd.f32 1e-05, %v4654_v55  ;;  %v7364_v44 = vadd.f32 %v7363_v58, %v7296_v22  ;;  %v7197_v62 = vadd.f32 %v7196_v13, %v14931_v17  ;;  %v17671_v15 = vld [vmem:[#allocation118_spill] sm:$0xff]  ;;  %v17672_v27 = vld [vmem:[#allocation99_spill] sm:$0xff] }
 0x430   : > { %17660 = vst [vmem:[#allocation139_spill] sm:$0xff] %v14941_v35  ;;  %17662 = vst [vmem:[#allocation30_spill] sm:$0xff] %v14946_v20  ;;  %v7298_v53 = vmul.f32 %v14941_v35, %v14941_v35  ;;  %6750 = vmatmul.mubr.f32.gmra.mxu0 %v6303_v39  ;;  %v7493_v29 = vadd.f32 1e-05, %v7484_v48  ;;  %7135 = vmatmul.mubr.f32.gmra.mxu1 %v6305_v19  ;;  %v7299_v25 = vmul.f32 %v14946_v20, %v14946_v20  ;;  %v6586_v39 = vpop.f32.mrf.mxu0  ;;  %v6971_v16 = vpop.f32.mrf.mxu1 }
 0x431   : > { %v14960_v37 = vadd.f32 %v14789_v10, %v6557_v28  ;;  %v6562_v46 = vadd.f32 %v14907_v31, %v14829_v47  ;;  %8623 = vrsqrt.f32 %v4687_v5  ;;  %v7365_v7 = vadd.f32 %v7364_v44, %v7297_v41 }
 0x432   : > { %v7198_v30 = vadd.f32 %v7197_v62, %v14941_v35  ;;  %v6567_v2 = vadd.f32 %v14907_v31, %v14855_v49  ;;  %8625 = vrsqrt.f32 %v7493_v29  ;;  %v6572_v10 = vadd.f32 %v14907_v31, %v14880_v60  ;;  %v6588_v63 = vpop.f32.mrf.mxu0  ;;  %v6973_v45 = vpop.f32.mrf.mxu1 }
 0x433   : > { %17663 = vst [vmem:[#allocation161_spill] sm:$0xff] %v14960_v37  ;;  %v7300_v56 = vmul.f32 %v14960_v37, %v14960_v37  ;;  %v14970_v19 = vadd.f32 %v14831_v51, %v6562_v46  ;;  %v7366_v47 = vadd.f32 %v7365_v7, %v7298_v53  ;;  %v6577_v49 = vadd.f32 %v14907_v31, %v6576_v50 }
 0x434   : > { %v7199_v3 = vadd.f32 %v7198_v30, %v14946_v20  ;;  %v14976_v1 = vadd.f32 %v14857_v6, %v6567_v2  ;;  %v14984_v59 = vadd.f32 %v14882_v33, %v6572_v10  ;;  %v6582_v60 = vadd.f32 %v14907_v31, %v6581_v54  ;;  %v6591_v40 = vpop.f32.mrf.mxu0  ;;  %v6976_v26 = vpop.f32.mrf.mxu1 }
 0x435   : > { %17664 = vst [vmem:[#allocation126_spill] sm:$0xff] %v14970_v19  ;;  %v7206_v38 = vadd.f32 %v14970_v19, %v14960_v37  ;;  %v7301_v51 = vmul.f32 %v14970_v19, %v14970_v19  ;;  %v7367_v57 = vadd.f32 %v7366_v47, %v7299_v25  ;;  %v14990_v50 = vadd.f32 %v14911_v23, %v6577_v49 }
 0x436   : > { %17665 = vst [vmem:[#allocation144_spill] sm:$0xff] %v14976_v1  ;;  %17666 = vst [vmem:[#allocation217_spill] sm:$0xff] %v14984_v59  ;;  %v7200_v8 = vrot.slane %v7199_v3, 4  ;;  %v7302_v6 = vmul.f32 %v14976_v1, %v14976_v1  ;;  %v7303_v32 = vmul.f32 %v14984_v59, %v14984_v59  ;;  %v14995_v33 = vadd.f32 %v6966_v34, %v6582_v60  ;;  %v6593_v13 = vpop.f32.mrf.mxu0  ;;  %v6978_v22 = vpop.f32.mrf.mxu1 }
 0x437   : > { %17667 = vst [vmem:[#allocation175_spill] sm:$0xff] %v14990_v50  ;;  %v7374_v61 = vadd.f32 %v7301_v51, %v7300_v56  ;;  %v7207_v14 = vadd.f32 %v7206_v38, %v14976_v1  ;;  %v7368_v12 = vrot.slane %v7367_v57, 4  ;;  %v6587_v55 = vadd.f32 %v14907_v31, %v6586_v39  ;;  %v15017_v39 = vld [vmem:[%s15990_s9] sm:$0x1]  ;;  %v17674_v13 = vld [vmem:[#allocation10_spill] sm:$0xff] }
 0x438   : > { %17668 = vst [vmem:[#allocation43_spill] sm:$0xff] %v14995_v33  ;;  %v7201_v58 = vadd.f32 %v7200_v8, %v7199_v3  ;;  %v7304_v54 = vmul.f32 %v14990_v50, %v14990_v50  ;;  %v6592_v48 = vadd.f32 %v14907_v31, %v6591_v40  ;;  %v7305_v62 = vmul.f32 %v14995_v33, %v14995_v33  ;;  %v17673_v38 = vld [vmem:[#allocation8_spill] sm:$0xff] }
 0x439   : > { %v7375_v36 = vadd.f32 %v7374_v61, %v7302_v6  ;;  %v7208_v23 = vadd.f32 %v7207_v14, %v14984_v59  ;;  %v8622_v41 = vpop.eup %8621  ;;  %v7369_v28 = vadd.f32 %v7368_v12, %v7367_v57  ;;  %v15002_v5 = vadd.f32 %v6971_v16, %v6587_v55 }
 0x43a   : > { %v7202_v9 = vrot.slane %v7201_v58, 2  ;;  %v15007_v53 = vadd.f32 %v6976_v26, %v6592_v48  ;;  %v4923_v29 = vcombine.low %v17672_v27, %v17671_v15  ;;  %v15030_v26 = vld [vmem:[%s15991_s10] sm:$0x1]  ;;  %v17677_v27 = vld [vmem:[#allocation115_spill] sm:$0xff] }
 0x43b   : > { %17669 = vst [vmem:[#allocation49_spill] sm:$0xff] %v15002_v5  ;;  %v7376_v34 = vadd.f32 %v7375_v36, %v7303_v32  ;;  %v7209_v44 = vadd.f32 %v7208_v23, %v14990_v50  ;;  %v7370_v46 = vrot.slane %v7369_v28, 2  ;;  %v7306_v2 = vmul.f32 %v15002_v5, %v15002_v5 }
 0x43c   : > { %17670 = vst [vmem:[#allocation191_spill] sm:$0xff] %v15007_v53  ;;  %v7203_v25 = vadd.f32 %v7202_v9, %v7201_v58  ;;  %v7307_v49 = vmul.f32 %v15007_v53, %v15007_v53  ;;  %v4937_v51 = vrot.slane %v4923_v29, %v17673_v38  ;;  %v6596_v58 = vpop.f32.mrf.mxu0  ;;  %v6981_v12 = vpop.f32.mrf.mxu1 }
 0x43d   : > { %v7377_v7 = vadd.f32 %v7376_v34, %v7304_v54  ;;  %v7210_v30 = vadd.f32 %v7209_v44, %v14995_v33  ;;  %v7371_v56 = vadd.f32 %v7370_v46, %v7369_v28  ;;  %v17675_v44 = vld [vmem:[#allocation131_spill] sm:$0xff] }
 0x43e   : > { %v7204_v16 = vrot.slane %v7203_v25, 1  ;;  %v8624_v10 = vpop.eup %8623  ;;  %v6598_v9 = vpop.f32.mrf.mxu0 }
 0x43f   : > { %v7378_v47 = vadd.f32 %v7377_v7, %v7305_v62  ;;  %v7211_v3 = vadd.f32 %v7210_v30, %v15002_v5  ;;  %v8626_v63 = vpop.eup %8625  ;;  %v4922_v45 = vcombine.low %v8622_v41, %v8624_v10  ;;  %v7372_v8 = vrot.slane %v7371_v56, 1  ;;  %v6983_v28 = vpop.f32.mrf.mxu1  ;;  %v17680_v10 = vld [vmem:[#allocation156_spill] sm:$0xff] }
 0x440   : > { %v7205_v60 = vadd.f32 %v7204_v16, %v7203_v25  ;;  %v7509_v57 = vmul.f32 %v8626_v63, %v15017_v39  ;;  %v6597_v41 = vadd.f32 %v14907_v31, %v6596_v58  ;;  %v17678_v25 = vld [vmem:[#allocation204_spill] sm:$0xff]  ;;  %v15052_v30 = vpop.f32.mrf.mxu0  ;;  %v17679_v16 = vld [vmem:[#allocation138_spill] sm:$0xff]  ;;  %v17681_v63 = vld [vmem:[#allocation135_spill] sm:$0xff] }
 0x441   : > { %v7379_v6 = vadd.f32 %v7378_v47, %v7306_v2  ;;  %v15025_v40 = vadd.f32 %v7211_v3, %v15007_v53  ;;  %v4930_v61 = vrot.slane %v4922_v45, %v17673_v38  ;;  %v7373_v14 = vadd.f32 %v7372_v8, %v7371_v56  ;;  %v15054_v2 = vpop.f32.mrf.mxu1 }
 0x442   : > { %v15033_v32 = vmul.f32 0.015625, %v7205_v60  ;;  %v7518_v55 = vmul.f32 %v7509_v57, %v14895_v42  ;;  %v7545_v22 = vrot.slane %v7509_v57, %v17674_v13  ;;  %v17676_v42 = vld [vmem:[#allocation143_spill] sm:$0xff]  ;;  %v15066_v57 = vadd.f32 %v6981_v12, %v6597_v41 }
 0x443   : > { %v15037_v36 = vadd.f32 %v7379_v6, %v7307_v49  ;;  %v4938_v23 = vcombine.low %v4930_v61, %v4937_v51  ;;  %v15039_v54 = vmul.f32 0.015625, %v7373_v14  ;;  %v17682_v51 = vld [vmem:[#allocation25_spill] sm:$0xff]  ;;  %v6603_v6 = vpop.f32.mrf.mxu0  ;;  %v6988_v61 = vpop.f32.mrf.mxu1 }
 0x444   : > { %v15043_v48 = vmul.f32 %v15033_v32, %v15033_v32  ;;  %v7526_v34 = vsub.f32 %v15030_v26, %v7518_v55  ;;  %v7582_v62 = vmul.f32 %v7545_v22, %v17675_v44  ;;  %v7583_v15 = vmul.f32 %v7545_v22, %v17676_v42  ;;  %17683 = vst [vmem:[#allocation205_spill] sm:$0xff] %v15066_v57 }
 0x445   : > { %v7584_v29 = vmul.f32 %v7545_v22, %v17677_v27  ;;  %v7585_v46 = vmul.f32 %v7545_v22, %v17678_v25  ;;  %v7586_v56 = vmul.f32 %v7545_v22, %v17679_v16  ;;  %v7587_v47 = vmul.f32 %v7545_v22, %v17680_v10  ;;  %v15068_v27 = vpop.f32.mrf.mxu0  ;;  %v15070_v25 = vpop.f32.mrf.mxu1 }
 0x446   : > { %v7657_v3 = vrot.slane %v7526_v34, %v17674_v13  ;;  %v7588_v45 = vmul.f32 %v7545_v22, %v17681_v63  ;;  %v7589_v60 = vmul.f32 %v7545_v22, %v17682_v51  ;;  %v15064_v8 = vrot.slane %v4938_v23, %v17673_v38 }
 0x448   : > { %v7694_v14 = vadd.f32 %v7657_v3, %v7582_v62  ;;  %v7695_v58 = vadd.f32 %v7657_v3, %v7583_v15  ;;  %v7696_v55 = vadd.f32 %v7657_v3, %v7584_v29  ;;  %v7697_v9 = vadd.f32 %v7657_v3, %v7585_v46  ;;  %v6608_v62 = vpop.f32.mrf.mxu0  ;;  %v6993_v15 = vpop.f32.mrf.mxu1 }
 0x449   : > { %v7698_v28 = vadd.f32 %v7657_v3, %v7586_v56  ;;  %v7699_v34 = vadd.f32 %v7657_v3, %v7587_v47  ;;  %v7700_v44 = vadd.f32 %v7657_v3, %v7588_v45  ;;  %v7701_v42 = vadd.f32 %v7657_v3, %v7589_v60 }
 0x44a   : > { %v7758_v22 = vmax.f32 %v7694_v14, 0.0  ;;  %v7759_v16 = vmax.f32 %v7695_v58, 0.0  ;;  %v7760_v23 = vmax.f32 %v7696_v55, 0.0  ;;  %v7761_v10 = vmax.f32 %v7697_v9, 0.0  ;;  %v15072_v61 = vpop.f32.mrf.mxu0  ;;  %v15074_v14 = vpop.f32.mrf.mxu1 }
 0x44b   : > { %v7762_v12 = vmax.f32 %v7698_v28, 0.0  ;;  %v7763_v41 = vmax.f32 %v7699_v34, 0.0  ;;  %v7764_v63 = vmax.f32 %v7700_v44, 0.0  ;;  %v7765_v51 = vmax.f32 %v7701_v42, 0.0  ;;  %17684 = vst [vmem:[#allocation228_spill] sm:$0xff] %v15074_v14 }
 0x44c   : > { %v7822_v29 = vrot.slane %v7758_v22, 4  ;;  %v7828_v46 = vrot.slane %v7759_v16, 4  ;;  %v7834_v56 = vrot.slane %v7760_v23, 4  ;;  %v7840_v47 = vrot.slane %v7761_v10, 4  ;;  %v6613_v15 = vpop.f32.mrf.mxu0  ;;  %v6998_v49 = vpop.f32.mrf.mxu1 }
 0x44d   : > { %v7846_v45 = vrot.slane %v7762_v12, 4  ;;  %v7852_v3 = vrot.slane %v7763_v41, 4  ;;  %v7858_v60 = vrot.slane %v7764_v63, 4  ;;  %v7864_v6 = vrot.slane %v7765_v51, 4 }
 0x44e   : > { %v7823_v58 = vmax.f32 %v7758_v22, %v7822_v29  ;;  %v7829_v55 = vmax.f32 %v7759_v16, %v7828_v46  ;;  %v7835_v9 = vmax.f32 %v7760_v23, %v7834_v56  ;;  %v7841_v28 = vmax.f32 %v7761_v10, %v7840_v47  ;;  %v15076_v16 = vpop.f32.mrf.mxu0  ;;  %v15078_v23 = vpop.f32.mrf.mxu1 }
 0x44f   : > { %v7847_v34 = vmax.f32 %v7762_v12, %v7846_v45  ;;  %v7853_v44 = vmax.f32 %v7763_v41, %v7852_v3  ;;  %v7859_v42 = vmax.f32 %v7764_v63, %v7858_v60  ;;  %v7865_v62 = vmax.f32 %v7765_v51, %v7864_v6  ;;  %17685 = vst [vmem:[#allocation26_spill] sm:$0xff] %v15076_v16 }
 0x450   : > { %v7824_v7 = vrot.slane %v7823_v58, 2  ;;  %v7830_v53 = vrot.slane %v7829_v55, 2  ;;  %v7836_v5 = vrot.slane %v7835_v9, 2  ;;  %v7842_v33 = vrot.slane %v7841_v28, 2  ;;  %17686 = vst [vmem:[#allocation178_spill] sm:$0xff] %v15078_v23  ;;  %v6618_v56 = vpop.f32.mrf.mxu0  ;;  %v7003_v47 = vpop.f32.mrf.mxu1  ;;  %v17724_v23 = vld [vmem:[#allocation61_spill] sm:$0xff] }
 0x451   : > { %v7848_v50 = vrot.slane %v7847_v34, 2  ;;  %v7854_v59 = vrot.slane %v7853_v44, 2  ;;  %v7860_v1 = vrot.slane %v7859_v42, 2  ;;  %v7866_v22 = vrot.slane %v7865_v62, 2 }
 0x452   : > { %v7825_v10 = vmax.f32 %v7823_v58, %v7824_v7  ;;  %v7831_v12 = vmax.f32 %v7829_v55, %v7830_v53  ;;  %v7837_v41 = vmax.f32 %v7835_v9, %v7836_v5  ;;  %v7843_v63 = vmax.f32 %v7841_v28, %v7842_v33 }
 0x453   : > { %v7849_v49 = vmax.f32 %v7847_v34, %v7848_v50  ;;  %v7855_v51 = vmax.f32 %v7853_v44, %v7854_v59  ;;  %v7861_v29 = vmax.f32 %v7859_v42, %v7860_v1  ;;  %v7867_v46 = vmax.f32 %v7865_v62, %v7866_v22  ;;  %v15085_v50 = vpop.f32.mrf.mxu0  ;;  %v15087_v59 = vpop.f32.mrf.mxu1  ;;  %v8647_v22 = vld [vmem:[%s15986_s5] sm:$0xf] }
 0x454   : > { %v7826_v45 = vrot.slane %v7825_v10, 1  ;;  %v7832_v3 = vrot.slane %v7831_v12, 1  ;;  %v7838_v60 = vrot.slane %v7837_v41, 1  ;;  %v7844_v6 = vrot.slane %v7843_v63, 1  ;;  %17688 = vst [vmem:[#allocation140_spill] sm:$0xff] %v15085_v50  ;;  %17689 = vst [vmem:[#allocation162_spill] sm:$0xff] %v15087_v59 }
 0x455   : > { %v7850_v15 = vrot.slane %v7849_v49, 1  ;;  %v7856_v19 = vrot.slane %v7855_v51, 1  ;;  %v17687_v7 = vrot.slane %v15025_v40, 4  ;;  %v6602_v33 = vadd.f32 %v14907_v31, %v15052_v30  ;;  %v6623_v44 = vpop.f32.mrf.mxu0  ;;  %v17723_v50 = vld [vmem:[#allocation295_spill] sm:$0xff] }
 0x456   : > { %v7827_v1 = vmax.f32 %v7825_v10, %v7826_v45  ;;  %v7833_v5 = vmax.f32 %v7831_v12, %v7832_v3  ;;  %v7839_v58 = vmax.f32 %v7837_v41, %v7838_v60  ;;  %v7845_v55 = vmax.f32 %v7843_v63, %v7844_v6  ;;  %v17694_v45 = vld [vmem:[#allocation16_spill] sm:$0xff] }
 0x457   : > { %v7214_v53 = vadd.f32 %v17687_v7, %v15025_v40  ;;  %v7862_v9 = vrot.slane %v7861_v29, 1  ;;  %v7868_v28 = vrot.slane %v7867_v46, 1  ;;  %v7381_v34 = vrot.slane %v15037_v36, 4  ;;  %v7008_v40 = vpop.f32.mrf.mxu1 }
 0x458   : > { %v7851_v42 = vmax.f32 %v7849_v49, %v7850_v15  ;;  %v7857_v62 = vmax.f32 %v7855_v51, %v7856_v19  ;;  %v8271_v30 = vsel %vm8270_vm3, %v7833_v5, %v7827_v1  ;;  %v4961_v10 = vmul.f32 %v8647_v22, %v15064_v8  ;;  %v15107_v49 = vpop.f32.mrf.mxu0 }
 0x459   : > { %v8273_v12 = vsel %vm8272_vm4, %v7839_v58, %v8271_v30  ;;  %v17690_v41 = vsub.f32 %v15039_v54, %v15043_v48  ;;  %v7215_v56 = vrot.slane %v7214_v53, 2  ;;  %v15105_v19 = vadd.f32 %v15054_v2, %v6602_v33  ;;  %17692 = vst [vmem:[#allocation179_spill] sm:$0xff] %v15107_v49  ;;  %v15109_v51 = vpop.f32.mrf.mxu1  ;;  %v17695_v2 = vld [vmem:[#allocation17_spill] sm:$0xff] }
 0x45a   : > { %17693 = vst [vmem:[#allocation141_spill] sm:$0xff] %v15109_v51  ;;  %v8275_v47 = vsel %vm8274_vm5, %v7845_v55, %v8273_v12  ;;  %v15113_v8 = vrot.slane %v4961_v10, %v17674_v13  ;;  %v5090_v3 = vrot.slane %v4961_v10, %v17694_v45  ;;  %v15117_v60 = vrot.slane %v4961_v10, %v17601_v21  ;;  %v6628_v7 = vpop.f32.mrf.mxu0  ;;  %v17696_v55 = vld [vmem:[#allocation14_spill] sm:$0xff]  ;;  %v17701_v12 = vld [vmem:[#allocation297_spill] sm:$0xff] }
 0x45b   : > { %v7485_v63 = vmax.f32 %v17690_v41, 0.0  ;;  %17691 = vst [vmem:[#allocation146_spill] sm:$0xff] %v15105_v19  ;;  %v7863_v54 = vmax.f32 %v7861_v29, %v7862_v9  ;;  %v7869_v48 = vmax.f32 %v7867_v46, %v7868_v28  ;;  %v8277_v6 = vsel %vm8276_vm6, %v7851_v42, %v8275_v47  ;;  %v7013_v33 = vpop.f32.mrf.mxu1  ;;  %v17697_v46 = vld [vmem:[#allocation38_spill] sm:$0xff]  ;;  %v17702_v47 = vld [vmem:[#allocation272_spill] sm:$0xff] }
 0x45c   : > { %v5098_v15 = vrot.slane %v4961_v10, %v17695_v2  ;;  %v8279_v1 = vsel %vm8278_vm7, %v7857_v62, %v8277_v6  ;;  %v5159_v5 = vmul.f32 %v15113_v8, %v14405_v4  ;;  %v5160_v58 = vmul.f32 %v5090_v3, %v14756_v52  ;;  %v15134_v42 = vpop.f32.mrf.mxu0  ;;  %v17703_v33 = vld [vmem:[#allocation290_spill] sm:$0xff] }
 0x45d   : > { %v5161_v44 = vmul.f32 %v15117_v60, %v17696_v55  ;;  %v8281_v29 = vsel %vm8280_vm8, %v7863_v54, %v8279_v1  ;;  %v15130_v28 = vadd.f32 %v7381_v34, %v15037_v36  ;;  %v7308_v40 = vmul.f32 %v15066_v57, %v15066_v57  ;;  %17698 = vst [vmem:[#allocation163_spill] sm:$0xff] %v15134_v42  ;;  %v15136_v62 = vpop.f32.mrf.mxu1  ;;  %v17700_v36 = vld [vmem:[#allocation260_spill] sm:$0xff]  ;;  %v17705_v1 = vld [vmem:[#allocation299_spill] sm:$0xff]  ;;  %v17706_v55 = vld [vmem:[#allocation273_spill] sm:$0xff] }
 0x45e   : > { %v5162_v9 = vmul.f32 %v5098_v15, %v17697_v46  ;;  %17699 = vst [vmem:[#allocation27_spill] sm:$0xff] %v15136_v62  ;;  %v8283_v4 = vsel %vm8282_vm9, %v7869_v48, %v8281_v29  ;;  %v5363_v52 = vcombine.low %v5159_v5, %v5160_v58  ;;  %v7494_v30 = vadd.f32 1e-05, %v7485_v63  ;;  %v6633_v6 = vpop.f32.mrf.mxu0  ;;  %v17704_v63 = vld [vmem:[#allocation270_spill] sm:$0xff]  ;;  %v17707_v29 = vld [vmem:[#allocation291_spill] sm:$0xff] }
 0x45f   : > { %v15139_v22 = vadd.f32 %v7215_v56, %v7214_v53  ;;  %8341 = vst [vmem:[%s15142_s22] sm:$0xff] %v8283_v4  ;;  %v5628_v34 = vmul.f32 %v5090_v3, %v17700_v36  ;;  %v5630_v41 = vmul.f32 %v5098_v15, %v17701_v12  ;;  %v5627_v54 = vmul.f32 %v15113_v8, %v17702_v47  ;;  %v7018_v7 = vpop.f32.mrf.mxu1  ;;  %v17709_v36 = vld [vmem:[#allocation301_spill] sm:$0xff] }
 0x460   : > { %v5364_v10 = vcombine.low %v5161_v44, %v5162_v9  ;;  %v5371_v48 = vrot.slane %v5363_v52, %v17673_v38  ;;  %v5629_v53 = vmul.f32 %v15117_v60, %v17703_v33  ;;  %v5632_v56 = vmul.f32 %v5090_v3, %v17704_v63  ;;  %v17708_v9 = vld [vmem:[#allocation64_spill] sm:$0xff]  ;;  %v17710_v52 = vld [vmem:[#allocation275_spill] sm:$0xff]  ;;  %v17711_v6 = vld [vmem:[#allocation293_spill] sm:$0xff] }
 0x461   : > { %v5634_v5 = vmul.f32 %v5098_v15, %v17705_v1  ;;  %v5631_v44 = vmul.f32 %v15113_v8, %v17706_v55  ;;  %v5633_v46 = vmul.f32 %v15117_v60, %v17707_v29  ;;  %v5636_v4 = vmul.f32 %v5090_v3, %v17708_v9  ;;  %v17712_v33 = vld [vmem:[#allocation65_spill] sm:$0xff] }
 0x462   : > { %v5378_v58 = vrot.slane %v5364_v10, %v17673_v38  ;;  %v5638_v12 = vmul.f32 %v5098_v15, %v17709_v36  ;;  %v5635_v47 = vmul.f32 %v15113_v8, %v17710_v52  ;;  %v5637_v7 = vmul.f32 %v15117_v60, %v17711_v6  ;;  %v17713_v10 = vld [vmem:[#allocation305_spill] sm:$0xff]  ;;  %v17716_v36 = vld [vmem:[#allocation59_spill] sm:$0xff]  ;;  %v17718_v6 = vld [vmem:[#allocation278_spill] sm:$0xff] }
 0x463   : > { %v5640_v63 = vmul.f32 %v5090_v3, %v17712_v33  ;;  %v15167_v37 = vmul.f32 %v5098_v15, %v17713_v10  ;;  %v17714_v55 = vld [vmem:[#allocation69_spill] sm:$0xff]  ;;  %v15178_v42 = vmul.f32 %v5090_v3, %v17716_v36  ;;  %v17722_v36 = vld [vmem:[#allocation280_spill] sm:$0xff]  ;;  %v15207_v16 = vmul.f32 %v5090_v3, %v17724_v23 }
 0x464   : > { %v5379_v1 = vcombine.low %v5371_v48, %v5378_v58  ;;  %v15171_v62 = vmul.f32 %v15113_v8, %v17714_v55  ;;  %v17715_v29 = vld [vmem:[#allocation81_spill] sm:$0xff]  ;;  %v15185_v48 = vmul.f32 %v15113_v8, %v17718_v6  ;;  %v17719_v58 = vld [vmem:[#allocation294_spill] sm:$0xff]  ;;  %v17720_v55 = vld [vmem:[#allocation39_spill] sm:$0xff]  ;;  %v15204_v6 = vmul.f32 %v15117_v60, %v17723_v50 }
 0x465   : > { %v15175_v9 = vmul.f32 %v15117_v60, %v17715_v29  ;;  %v17717_v52 = vld [vmem:[#allocation9_spill] sm:$0xff]  ;;  %v15189_v33 = vmul.f32 %v15117_v60, %v17719_v58  ;;  %v15193_v59 = vmul.f32 %v5090_v3, %v17720_v55  ;;  %v17721_v29 = vld [vmem:[#allocation19_spill] sm:$0xff]  ;;  %v8648_v55 = vld [vmem:[%s15987_s6] sm:$0xf]  ;;  %v7309_v24 = vmul.f32 %v15105_v19, %v15105_v19 }
 0x466   : > { %v15181_v51 = vmul.f32 %v5098_v15, %v17717_v52  ;;  %v5386_v10 = vrot.slane %v5379_v1, %v17673_v38  ;;  %v15196_v49 = vmul.f32 %v5098_v15, %v17721_v29  ;;  %v15200_v52 = vmul.f32 %v15113_v8, %v17722_v36  ;;  %v17725_v58 = vld [vmem:[#allocation307_spill] sm:$0xff]  ;;  %v17726_v38 = vld [vmem:[#allocation282_spill] sm:$0xff]  ;;  %v17727_v36 = vld [vmem:[#allocation296_spill] sm:$0xff] }
 0x467   : > { %v15210_v14 = vmul.f32 %v5098_v15, %v17725_v58  ;;  %v15214_v1 = vmul.f32 %v15113_v8, %v17726_v38  ;;  %v15221_v20 = vmul.f32 %v15117_v60, %v17727_v36  ;;  %v17728_v50 = vld [vmem:[#allocation62_spill] sm:$0xff]  ;;  %v17729_v23 = vld [vmem:[#allocation308_spill] sm:$0xff]  ;;  %v7383_v58 = vrot.slane %v15130_v28, 2 }
 0x468   : > { %v5402_v29 = vsub.f32 %v8648_v55, %v5386_v10  ;;  %v15224_v35 = vmul.f32 %v5090_v3, %v17728_v50  ;;  %v15227_v17 = vmul.f32 %v5098_v15, %v17729_v23  ;;  %v15232_v38 = vadd.f32 %v15105_v19, %v15066_v57 }
 0x469   : > { %v6607_v10 = vadd.f32 %v14907_v31, %v15068_v27  ;;  %8627 = vrsqrt.f32 %v7494_v30  ;;  %v7217_v50 = vrot.slane %v15139_v22, 1  ;;  %v15251_v23 = vadd.f32 %v7309_v24, %v7308_v40 }
 0x46a   : > { %v15239_v55 = vrot.slane %v5402_v29, %v17694_v45  ;;  %v15242_v3 = vrot.slane %v5402_v29, %v17695_v2  ;;  %v15245_v15 = vrot.slane %v5402_v29, %v17674_v13  ;;  %v15248_v36 = vrot.slane %v5402_v29, %v17601_v21  ;;  %v17730_v29 = vld [vmem:[#allocation283_spill] sm:$0xff] }
 0x46b   : > { %v15254_v19 = vadd.f32 %v15070_v25, %v6607_v10  ;;  %v15265_v24 = vmul.f32 %v15113_v8, %v17730_v29 }
 0x46c   : > { %v6052_v27 = vadd.f32 %v15239_v55, %v5628_v34  ;;  %v6054_v45 = vadd.f32 %v15242_v3, %v5630_v41  ;;  %v6051_v2 = vadd.f32 %v15245_v15, %v5627_v54  ;;  %v6053_v57 = vadd.f32 %v15248_v36, %v5629_v53 }
 0x46d   : > { %v6056_v0 = vadd.f32 %v15239_v55, %v5632_v56  ;;  %v6058_v21 = vadd.f32 %v15242_v3, %v5634_v5  ;;  %v6055_v30 = vadd.f32 %v15245_v15, %v5631_v44  ;;  %v6057_v34 = vadd.f32 %v15248_v36, %v5633_v46 }
 0x46e   : > { %v6308_v25 = vmax.f32 %v6052_v27, 0.0  ;;  %v6310_v40 = vmax.f32 %v6054_v45, 0.0  ;;  %v15269_v41 = vadd.f32 %v7383_v58, %v15130_v28  ;;  %v6307_v54 = vmax.f32 %v6051_v2, 0.0 }
 0x46f   : > { %v6309_v10 = vmax.f32 %v6053_v57, 0.0  ;;  %v6312_v53 = vmax.f32 %v6056_v0, 0.0  ;;  %v7218_v56 = vadd.f32 %v7217_v50, %v15139_v22  ;;  %v6314_v5 = vmax.f32 %v6058_v21, 0.0  ;;  %v17731_v57 = vld [vmem:[#allocation298_spill] sm:$0xff] }
 0x470   : > { %6754 = vmatprep.mubr.f32.mxu0 %v6308_v25  ;;  %7139 = vmatprep.mubr.f32.mxu1 %v6310_v40  ;;  %v6060_v44 = vadd.f32 %v15239_v55, %v5636_v4  ;;  %v6062_v8 = vadd.f32 %v15242_v3, %v5638_v12  ;;  %v6059_v27 = vadd.f32 %v15245_v15, %v5635_v47  ;;  %v6311_v46 = vmax.f32 %v6055_v30, 0.0 }
 0x471   : > { %6755 = vmatmul.mubr.f32.gmra.mxu0 %v6307_v54  ;;  %7140 = vmatmul.mubr.f32.gmra.mxu1 %v6309_v10  ;;  %v6061_v28 = vadd.f32 %v15248_v36, %v5637_v7  ;;  %v6064_v58 = vadd.f32 %v15239_v55, %v5640_v63  ;;  %v15279_v0 = vmul.f32 %v15117_v60, %v17731_v57  ;;  %v6313_v22 = vmax.f32 %v6057_v34, 0.0 }
 0x472   : > { %6759 = vmatprep.mubr.f32.mxu0 %v6312_v53  ;;  %7144 = vmatprep.mubr.f32.mxu1 %v6314_v5  ;;  %v6066_v4 = vadd.f32 %v15242_v3, %v15167_v37  ;;  %v6063_v12 = vadd.f32 %v15245_v15, %v15171_v62  ;;  %v7385_v47 = vrot.slane %v15269_v41, 1  ;;  %v6316_v50 = vmax.f32 %v6060_v44, 0.0 }
 0x473   : > { %v6318_v45 = vmax.f32 %v6062_v8, 0.0  ;;  %v6065_v7 = vadd.f32 %v15248_v36, %v15175_v9  ;;  %v15288_v63 = vmul.f32 0.015625, %v7218_v56  ;;  %v6315_v60 = vmax.f32 %v6059_v27, 0.0 }
 0x474   : > { %v6068_v2 = vadd.f32 %v15239_v55, %v15178_v42  ;;  %v6070_v21 = vadd.f32 %v15242_v3, %v15181_v51  ;;  %v6067_v37 = vadd.f32 %v15245_v15, %v15185_v48  ;;  %v6317_v62 = vmax.f32 %v6061_v28, 0.0 }
 0x475   : > { %6760 = vmatmul.mubr.f32.gmra.mxu0 %v6311_v46  ;;  %7145 = vmatmul.mubr.f32.gmra.mxu1 %v6313_v22  ;;  %v6320_v30 = vmax.f32 %v6064_v58, 0.0  ;;  %v6069_v29 = vadd.f32 %v15248_v36, %v15189_v33  ;;  %v6072_v9 = vadd.f32 %v15239_v55, %v15193_v59  ;;  %v6322_v25 = vmax.f32 %v6066_v4, 0.0 }
 0x476   : > { %6764 = vmatprep.mubr.f32.mxu0 %v6316_v50  ;;  %7149 = vmatprep.mubr.f32.mxu1 %v6318_v45  ;;  %v6319_v42 = vmax.f32 %v6063_v12, 0.0  ;;  %v6074_v51 = vadd.f32 %v15242_v3, %v15196_v49  ;;  %v15304_v48 = vadd.f32 %v15245_v15, %v15200_v52  ;;  %v6321_v40 = vmax.f32 %v6065_v7, 0.0  ;;  %v8628_v10 = vpop.eup %8627  ;;  %v17732_v45 = vld [vmem:[#allocation29_spill] sm:$0xff] }
 0x477   : > { %v6324_v34 = vmax.f32 %v6068_v2, 0.0  ;;  %v6326_v54 = vmax.f32 %v6070_v21, 0.0  ;;  %v15308_v33 = vadd.f32 %v15248_v36, %v15204_v6  ;;  %v6323_v59 = vmax.f32 %v6067_v37, 0.0  ;;  %v17735_v21 = vld [vmem:[#allocation139_spill] sm:$0xff] }
 0x478   : > { %v15312_v53 = vadd.f32 %v15239_v55, %v15207_v16  ;;  %v15316_v49 = vadd.f32 %v15242_v3, %v15210_v14  ;;  %v15320_v52 = vadd.f32 %v15245_v15, %v15214_v1  ;;  %v6325_v56 = vmax.f32 %v6069_v29, 0.0 }
 0x479   : > { %6765 = vmatmul.mubr.f32.gmra.mxu0 %v6315_v60  ;;  %7150 = vmatmul.mubr.f32.gmra.mxu1 %v6317_v62  ;;  %v6328_v5 = vmax.f32 %v6072_v9, 0.0  ;;  %v15324_v6 = vadd.f32 %v15248_v36, %v15221_v20  ;;  %v15328_v16 = vadd.f32 %v15239_v55, %v15224_v35  ;;  %v6330_v14 = vmax.f32 %v6074_v51, 0.0  ;;  %v17734_v60 = vld [vmem:[#allocation124_spill] sm:$0xff]  ;;  %v17736_v62 = vld [vmem:[#allocation30_spill] sm:$0xff] }
 0x47a   : > { %6769 = vmatprep.mubr.f32.mxu0 %v6320_v30  ;;  %7154 = vmatprep.mubr.f32.mxu1 %v6322_v25  ;;  %v6327_v44 = vmax.f32 %v15304_v48, 0.0  ;;  %v6329_v1 = vmax.f32 %v15308_v33, 0.0  ;;  %v15334_v8 = vadd.f32 %v15242_v3, %v15227_v17  ;;  %v6332_v27 = vmax.f32 %v15312_v53, 0.0  ;;  %v17737_v9 = vld [vmem:[#allocation228_spill] sm:$0xff] }
 0x47b   : > { %v6334_v20 = vmax.f32 %v15316_v49, 0.0  ;;  %v6331_v46 = vmax.f32 %v15320_v52, 0.0  ;;  %v7510_v35 = vmul.f32 %v8628_v10, %v15017_v39  ;;  %v6333_v55 = vmax.f32 %v15324_v6, 0.0 }
 0x47c   : > { %v15343_v28 = vadd.f32 %v15245_v15, %v15265_v24  ;;  %v7386_v58 = vadd.f32 %v7385_v47, %v15269_v41  ;;  %v15348_v17 = vmul.f32 %v15288_v63, %v15288_v63  ;;  %v6336_v3 = vmax.f32 %v15328_v16, 0.0 }
 0x47d   : > { %6770 = vmatmul.mubr.f32.gmra.mxu0 %v6319_v42  ;;  %7155 = vmatmul.mubr.f32.gmra.mxu1 %v6321_v40  ;;  %v7519_v57 = vmul.f32 %v7510_v35, %v15033_v32  ;;  %v7549_v22 = vrot.slane %v7510_v35, %v17674_v13  ;;  %v15355_v4 = vadd.f32 %v15232_v38, %v15254_v19  ;;  %v17738_v42 = vld [vmem:[#allocation26_spill] sm:$0xff] }
 0x47e   : > { %6774 = vmatprep.mubr.f32.mxu0 %v6324_v34  ;;  %7159 = vmatprep.mubr.f32.mxu1 %v6326_v54  ;;  %v15359_v15 = vadd.f32 %v15248_v36, %v15279_v0  ;;  %v15361_v24 = vmul.f32 0.015625, %v7386_v58  ;;  %v7310_v41 = vmul.f32 %v15254_v19, %v15254_v19  ;;  %v6612_v32 = vadd.f32 %v14907_v31, %v15072_v61  ;;  %v17733_v36 = vld [vmem:[#allocation159_spill] sm:$0xff] }
 0x47f   : > { %v7527_v12 = vsub.f32 %v15030_v26, %v7519_v57  ;;  %v7590_v47 = vmul.f32 %v7549_v22, %v14867_v18  ;;  %v7591_v38 = vmul.f32 %v7549_v22, %v14872_v43  ;;  %v7592_v50 = vmul.f32 %v7549_v22, %v14878_v11 }
 0x480   : > { %v7593_v7 = vmul.f32 %v7549_v22, %v17732_v45  ;;  %v7594_v0 = vmul.f32 %v7549_v22, %v17733_v36  ;;  %v7595_v2 = vmul.f32 %v7549_v22, %v17734_v60  ;;  %v7596_v37 = vmul.f32 %v7549_v22, %v17735_v21 }
 0x481   : > { %6775 = vmatmul.mubr.f32.gmra.mxu0 %v6323_v59  ;;  %7160 = vmatmul.mubr.f32.gmra.mxu1 %v6325_v56  ;;  %v6338_v61 = vmax.f32 %v15334_v8, 0.0  ;;  %v7597_v30 = vmul.f32 %v7549_v22, %v17736_v62  ;;  %v7661_v18 = vrot.slane %v7527_v12, %v17674_v13  ;;  %v7478_v43 = vsub.f32 %v15361_v24, %v15348_v17 }
 0x482   : > { %6779 = vmatprep.mubr.f32.mxu0 %v6328_v5  ;;  %7164 = vmatprep.mubr.f32.mxu1 %v6330_v14  ;;  %v6335_v11 = vmax.f32 %v15343_v28, 0.0  ;;  %v15382_v29 = vadd.f32 %v15251_v23, %v7310_v41  ;;  %v15385_v25 = vadd.f32 %v17737_v9, %v6612_v32  ;;  %v15389_v51 = vadd.f32 %v14907_v31, %v17738_v42 }
 0x483   : > { %v7702_v48 = vadd.f32 %v7661_v18, %v7590_v47  ;;  %v7703_v40 = vadd.f32 %v7661_v18, %v7591_v38  ;;  %v7704_v34 = vadd.f32 %v7661_v18, %v7592_v50  ;;  %v7705_v54 = vadd.f32 %v7661_v18, %v7593_v7 }
 0x484   : > { %v7706_v33 = vadd.f32 %v7661_v18, %v7594_v0  ;;  %v7707_v10 = vadd.f32 %v7661_v18, %v7595_v2  ;;  %v7708_v59 = vadd.f32 %v7661_v18, %v7596_v37  ;;  %v7709_v53 = vadd.f32 %v7661_v18, %v7597_v30  ;;  %v15391_v22 = vpop.f32.mrf.mxu0  ;;  %v15393_v24 = vpop.f32.mrf.mxu1 }
 0x485   : > { %6780 = vmatmul.mubr.f32.gmra.mxu0 %v6327_v44  ;;  %7165 = vmatmul.mubr.f32.gmra.mxu1 %v6329_v1  ;;  %v7766_v49 = vmax.f32 %v7702_v48, 0.0  ;;  %v7767_v23 = vmax.f32 %v7703_v40, 0.0  ;;  %v7768_v56 = vmax.f32 %v7704_v34, 0.0  ;;  %v7769_v5 = vmax.f32 %v7705_v54, 0.0 }
 0x486   : > { %6784 = vmatprep.mubr.f32.mxu0 %v6332_v27  ;;  %7169 = vmatprep.mubr.f32.mxu1 %v6334_v20  ;;  %v7770_v14 = vmax.f32 %v7706_v33, 0.0  ;;  %v7771_v8 = vmax.f32 %v7707_v10, 0.0  ;;  %v7772_v31 = vmax.f32 %v7708_v59, 0.0  ;;  %v7773_v35 = vmax.f32 %v7709_v53, 0.0  ;;  %v6638_v38 = vpop.f32.mrf.mxu0  ;;  %v7023_v50 = vpop.f32.mrf.mxu1 }
 0x487   : > { %v7870_v28 = vrot.slane %v7766_v49, 4  ;;  %v7876_v58 = vrot.slane %v7767_v23, 4  ;;  %v7882_v17 = vrot.slane %v7768_v56, 4  ;;  %v7888_v57 = vrot.slane %v7769_v5, 4 }
 0x488   : > { %v7894_v44 = vrot.slane %v7770_v14, 4  ;;  %v7900_v1 = vrot.slane %v7771_v8, 4  ;;  %v7906_v41 = vrot.slane %v7772_v31, 4  ;;  %v7912_v32 = vrot.slane %v7773_v35, 4  ;;  %v15404_v2 = vpop.f32.mrf.mxu1 }
 0x489   : > { %6785 = vmatmul.mubr.f32.gmra.mxu0 %v6331_v46  ;;  %7170 = vmatmul.mubr.f32.gmra.mxu1 %v6333_v55  ;;  %v7871_v27 = vmax.f32 %v7766_v49, %v7870_v28  ;;  %v7877_v20 = vmax.f32 %v7767_v23, %v7876_v58  ;;  %v7883_v12 = vmax.f32 %v7768_v56, %v7882_v17  ;;  %v6337_v47 = vmax.f32 %v15359_v15, 0.0  ;;  %v15402_v55 = vpop.f32.mrf.mxu0 }
 0x48a   : > { %6789 = vmatprep.mubr.f32.mxu0 %v6336_v3  ;;  %7174 = vmatprep.mubr.f32.mxu1 %v6338_v61  ;;  %v7889_v45 = vmax.f32 %v7769_v5, %v7888_v57  ;;  %v7895_v7 = vmax.f32 %v7770_v14, %v7894_v44  ;;  %v7901_v36 = vmax.f32 %v7771_v8, %v7900_v1  ;;  %v7486_v0 = vmax.f32 %v7478_v43, 0.0  ;;  %v7028_v43 = vpop.f32.mrf.mxu1 }
 0x48b   : > { %v7872_v52 = vrot.slane %v7871_v27, 2  ;;  %v7878_v46 = vrot.slane %v7877_v20, 2  ;;  %v7884_v60 = vrot.slane %v7883_v12, 2  ;;  %v7907_v6 = vmax.f32 %v7772_v31, %v7906_v41  ;;  %v6643_v18 = vpop.f32.mrf.mxu0  ;;  %v17744_v43 = vld [vmem:[#allocation163_spill] sm:$0xff] }
 0x48c   : > { %v7890_v21 = vrot.slane %v7889_v45, 2  ;;  %v7896_v15 = vrot.slane %v7895_v7, 2  ;;  %v7902_v37 = vrot.slane %v7901_v36, 2  ;;  %v7913_v62 = vmax.f32 %v7773_v35, %v7912_v32  ;;  %v15406_v53 = vpop.f32.mrf.mxu1 }
 0x48d   : > { %6790 = vmatmul.mubr.f32.gmra.mxu0 %v6335_v11  ;;  %v7873_v16 = vmax.f32 %v7871_v27, %v7872_v52  ;;  %v7879_v3 = vmax.f32 %v7877_v20, %v7878_v46  ;;  %v7885_v61 = vmax.f32 %v7883_v12, %v7884_v60  ;;  %v7908_v30 = vrot.slane %v7907_v6, 2  ;;  %7175 = vmatmul.mubr.f32.gmra.mxu1 %v6337_v47  ;;  %v6646_v59 = vpop.f32.mrf.mxu0  ;;  %v17741_v46 = vld [vmem:[#allocation179_spill] sm:$0xff] }
 0x48e   : > { %v7891_v9 = vmax.f32 %v7889_v45, %v7890_v21  ;;  %v7897_v42 = vmax.f32 %v7895_v7, %v7896_v15  ;;  %v7903_v48 = vmax.f32 %v7901_v36, %v7902_v37  ;;  %v7914_v40 = vrot.slane %v7913_v62, 2  ;;  %v7033_v28 = vpop.f32.mrf.mxu1  ;;  %v17739_v45 = vld [vmem:[#allocation178_spill] sm:$0xff] }
 0x48f   : > { %v7874_v34 = vrot.slane %v7873_v16, 1  ;;  %v7880_v54 = vrot.slane %v7879_v3, 1  ;;  %v7886_v33 = vrot.slane %v7885_v61, 1  ;;  %v7909_v10 = vmax.f32 %v7907_v6, %v7908_v30  ;;  %v6648_v35 = vpop.f32.mrf.mxu0  ;;  %v17743_v30 = vld [vmem:[#allocation141_spill] sm:$0xff] }
 0x490   : > { %v7892_v49 = vrot.slane %v7891_v9, 1  ;;  %v7898_v11 = vrot.slane %v7897_v42, 1  ;;  %v7904_v23 = vrot.slane %v7903_v48, 1  ;;  %v7915_v56 = vmax.f32 %v7913_v62, %v7914_v40  ;;  %v7036_v12 = vpop.f32.mrf.mxu1 }
 0x491   : > { %v7875_v5 = vmax.f32 %v7873_v16, %v7874_v34  ;;  %v7881_v14 = vmax.f32 %v7879_v3, %v7880_v54  ;;  %v7887_v8 = vmax.f32 %v7885_v61, %v7886_v33  ;;  %v7910_v31 = vrot.slane %v7909_v10, 1  ;;  %v6651_v20 = vpop.f32.mrf.mxu0  ;;  %v17742_v3 = vld [vmem:[#allocation162_spill] sm:$0xff] }
 0x492   : > { %v7893_v58 = vmax.f32 %v7891_v9, %v7892_v49  ;;  %v7899_v17 = vmax.f32 %v7897_v42, %v7898_v11  ;;  %v7905_v57 = vmax.f32 %v7903_v48, %v7904_v23  ;;  %v7916_v44 = vrot.slane %v7915_v56, 1  ;;  %v7038_v21 = vpop.f32.mrf.mxu1 }
 0x493   : > { %v7911_v1 = vmax.f32 %v7909_v10, %v7910_v31  ;;  %v8284_v41 = vsel %vm8270_vm3, %v7881_v14, %v7875_v5  ;;  %v7495_v32 = vadd.f32 1e-05, %v7486_v0  ;;  %v7221_v27 = vadd.f32 %v15355_v4, %v15385_v25  ;;  %v15422_v0 = vld [vmem:[%s15989_s8] ss:$0 sm:$0xff]  ;;  %v6653_v6 = vpop.f32.mrf.mxu0  ;;  %v17745_v5 = vld [vmem:[#allocation27_spill] sm:$0xff] }
 0x494   : > { %v7917_v47 = vmax.f32 %v7915_v56, %v7916_v44  ;;  %v8285_v38 = vsel %vm8272_vm4, %v7887_v8, %v8284_v41  ;;  %v7311_v50 = vmul.f32 %v15385_v25, %v15385_v25  ;;  %v15416_v7 = vadd.f32 %v17739_v45, %v15389_v51  ;;  %v17740_v4 = vld [vmem:[#allocation140_spill] sm:$0xff]  ;;  %v7041_v48 = vpop.f32.mrf.mxu1 }
 0x495   : > { %v8286_v36 = vsel %vm8274_vm5, %v7893_v58, %v8285_v38  ;;  %8629 = vrsqrt.f32 %v7495_v32  ;;  %v6622_v52 = vadd.f32 %v15422_v0, %v17740_v4  ;;  %v6627_v60 = vadd.f32 %v15422_v0, %v17741_v46  ;;  %v6656_v42 = vpop.f32.mrf.mxu0 }
 0x496   : > { %v8287_v15 = vsel %vm8276_vm6, %v7899_v17, %v8286_v36  ;;  %v7389_v51 = vadd.f32 %v15382_v29, %v7311_v50  ;;  %v7222_v37 = vadd.f32 %v7221_v27, %v15416_v7  ;;  %v7312_v62 = vmul.f32 %v15416_v7, %v15416_v7  ;;  %v7043_v56 = vpop.f32.mrf.mxu1 }
 0x497   : > { %v8288_v16 = vsel %vm8278_vm7, %v7905_v57, %v8287_v15  ;;  %v15435_v61 = vadd.f32 %v17742_v3, %v6622_v52  ;;  %v15438_v18 = vadd.f32 %v17743_v30, %v6627_v60  ;;  %v6632_v9 = vadd.f32 %v15422_v0, %v17744_v43  ;;  %v6658_v23 = vpop.f32.mrf.mxu0 }
 0x498   : > { %v8289_v29 = vsel %vm8280_vm8, %v7911_v1, %v8288_v16  ;;  %v7390_v40 = vadd.f32 %v7389_v51, %v7312_v62  ;;  %v6637_v34 = vadd.f32 %v15422_v0, %v15391_v22  ;;  %v6642_v54 = vadd.f32 %v15422_v0, %v15402_v55  ;;  %v7046_v57 = vpop.f32.mrf.mxu1 }
 0x499   : > { %v8290_v33 = vsel %vm8282_vm9, %v7917_v47, %v8289_v29  ;;  %v7223_v10 = vadd.f32 %v7222_v37, %v15435_v61  ;;  %v7313_v49 = vmul.f32 %v15435_v61, %v15435_v61  ;;  %v7314_v11 = vmul.f32 %v15438_v18, %v15438_v18  ;;  %v6661_v17 = vpop.f32.mrf.mxu0 }
 0x49a   : > { %8342 = vst [vmem:[%s15142_s22 + $0x8] sm:$0xff] %v8290_v33  ;;  %v15455_v14 = vadd.f32 %v17745_v5, %v6632_v9  ;;  %v15458_v22 = vadd.f32 %v15393_v24, %v6637_v34  ;;  %v15461_v55 = vadd.f32 %v15404_v2, %v6642_v54  ;;  %v6647_v8 = vadd.f32 %v15422_v0, %v6646_v59  ;;  %v7048_v27 = vpop.f32.mrf.mxu1 }
 0x49b   : > { %v7391_v31 = vadd.f32 %v7390_v40, %v7313_v49  ;;  %v7224_v35 = vadd.f32 %v7223_v10, %v15438_v18  ;;  %v6652_v28 = vadd.f32 %v15422_v0, %v6651_v20  ;;  %v6657_v58 = vadd.f32 %v15422_v0, %v6656_v42  ;;  %v6663_v32 = vpop.f32.mrf.mxu0  ;;  %v17750_v27 = vld [vmem:[#allocation175_spill] sm:$0xff] }
 0x49c   : > { %v7315_v44 = vmul.f32 %v15455_v14, %v15455_v14  ;;  %v7317_v24 = vmul.f32 %v15461_v55, %v15461_v55  ;;  %v15473_v59 = vadd.f32 %v15406_v53, %v6647_v8  ;;  %v7316_v20 = vmul.f32 %v15458_v22, %v15458_v22 }
 0x49d   : > { %v7392_v1 = vadd.f32 %v7391_v31, %v7314_v11  ;;  %v7225_v2 = vadd.f32 %v7224_v35, %v15455_v14  ;;  %v15475_v41 = vadd.f32 %v7036_v12, %v6652_v28  ;;  %v7232_v47 = vadd.f32 %v15461_v55, %v15458_v22  ;;  %v6666_v4 = vpop.f32.mrf.mxu0  ;;  %v7051_v12 = vpop.f32.mrf.mxu1 }
 0x49e   : > { %v15481_v38 = vadd.f32 %v7041_v48, %v6657_v58  ;;  %v6662_v50 = vadd.f32 %v15422_v0, %v6661_v17  ;;  %v7318_v53 = vmul.f32 %v15473_v59, %v15473_v59  ;;  %v7400_v52 = vadd.f32 %v7317_v24, %v7316_v20  ;;  %v17746_v17 = vld [vmem:[#allocation161_spill] sm:$0xff]  ;;  %v17748_v24 = vld [vmem:[#allocation144_spill] sm:$0xff] }
 0x49f   : > { %v7226_v45 = vrot.slane %v7225_v2, 4  ;;  %v7393_v36 = vadd.f32 %v7392_v1, %v7315_v44  ;;  %v7233_v46 = vadd.f32 %v7232_v47, %v15473_v59  ;;  %v7319_v60 = vmul.f32 %v15475_v41, %v15475_v41  ;;  %v6668_v37 = vpop.f32.mrf.mxu0  ;;  %v7053_v62 = vpop.f32.mrf.mxu1  ;;  %v17747_v44 = vld [vmem:[#allocation126_spill] sm:$0xff]  ;;  %v17751_v47 = vld [vmem:[#allocation43_spill] sm:$0xff] }
 0x4a0   : > { %v15489_v6 = vadd.f32 %v7046_v57, %v6662_v50  ;;  %v6667_v51 = vadd.f32 %v15422_v0, %v6666_v4  ;;  %v7401_v3 = vadd.f32 %v7400_v52, %v7318_v53  ;;  %v7320_v43 = vmul.f32 %v15481_v38, %v15481_v38  ;;  %v17753_v53 = vld [vmem:[#allocation191_spill] sm:$0xff] }
 0x4a1   : > { %v7227_v21 = vadd.f32 %v7226_v45, %v7225_v2  ;;  %v7394_v15 = vrot.slane %v7393_v36, 4  ;;  %v7234_v30 = vadd.f32 %v7233_v46, %v15475_v41  ;;  %v6671_v29 = vpop.f32.mrf.mxu0  ;;  %v7056_v40 = vpop.f32.mrf.mxu1  ;;  %v17749_v2 = vld [vmem:[#allocation217_spill] sm:$0xff] }
 0x4a2   : > { %v8630_v16 = vpop.eup %8629  ;;  %v7402_v34 = vadd.f32 %v7401_v3, %v7319_v60  ;;  %v7321_v33 = vmul.f32 %v15489_v6, %v15489_v6  ;;  %v6672_v10 = vadd.f32 %v15422_v0, %v6671_v29  ;;  %v15504_v56 = vadd.f32 %v7051_v12, %v6667_v51  ;;  %v17752_v45 = vld [vmem:[#allocation49_spill] sm:$0xff] }
 0x4a3   : > { %v7511_v9 = vmul.f32 %v8630_v16, %v15017_v39  ;;  %v7228_v42 = vrot.slane %v7227_v21, 2  ;;  %v7395_v48 = vadd.f32 %v7394_v15, %v7393_v36  ;;  %v7235_v54 = vadd.f32 %v7234_v30, %v15481_v38  ;;  %v6673_v39 = vpop.f32.mrf.mxu0  ;;  %v7058_v5 = vpop.f32.mrf.mxu1 }
 0x4a4   : > { %v7403_v31 = vadd.f32 %v7402_v34, %v7320_v43  ;;  %v15507_v28 = vadd.f32 %v7056_v40, %v6672_v10  ;;  %v15522_v52 = vmul.f32 %v15504_v56, %v15504_v56 }
 0x4a5   : > { %v7520_v49 = vmul.f32 %v7511_v9, %v15288_v63  ;;  %v7553_v11 = vrot.slane %v7511_v9, %v17674_v13  ;;  %v15502_v23 = vadd.f32 %v7228_v42, %v7227_v21  ;;  %v7396_v8 = vrot.slane %v7395_v48, 2 }
 0x4a6   : > { %v7236_v35 = vadd.f32 %v7235_v54, %v15489_v6  ;;  %v15526_v60 = vadd.f32 %v7403_v31, %v7321_v33  ;;  %v15533_v15 = vmul.f32 %v15507_v28, %v15507_v28 }
 0x4a7   : > { %v7528_v58 = vsub.f32 %v15030_v26, %v7520_v49  ;;  %v7598_v57 = vmul.f32 %v7553_v11, %v17746_v17  ;;  %v7599_v63 = vmul.f32 %v7553_v11, %v17747_v44  ;;  %v7600_v1 = vmul.f32 %v7553_v11, %v17748_v24 }
 0x4a8   : > { %v7601_v32 = vmul.f32 %v7553_v11, %v17749_v2  ;;  %v7602_v20 = vmul.f32 %v7553_v11, %v17750_v27  ;;  %v7603_v50 = vmul.f32 %v7553_v11, %v17751_v47  ;;  %v7604_v36 = vmul.f32 %v7553_v11, %v17752_v45 }
 0x4a9   : > { %v7605_v4 = vmul.f32 %v7553_v11, %v17753_v53  ;;  %v7665_v12 = vrot.slane %v7528_v58, %v17674_v13  ;;  %v7230_v26 = vrot.slane %v15502_v23, 1  ;;  %v15524_v46 = vadd.f32 %v7396_v8, %v7395_v48 }
 0x4aa   : > { %v15529_v21 = vadd.f32 %v7236_v35, %v15504_v56 }
 0x4ab   : > { %v7710_v51 = vadd.f32 %v7665_v12, %v7598_v57  ;;  %v7711_v37 = vadd.f32 %v7665_v12, %v7599_v63  ;;  %v7712_v62 = vadd.f32 %v7665_v12, %v7600_v1  ;;  %v7713_v16 = vadd.f32 %v7665_v12, %v7601_v32 }
 0x4ac   : > { %v7714_v3 = vadd.f32 %v7665_v12, %v7602_v20  ;;  %v7715_v30 = vadd.f32 %v7665_v12, %v7603_v50  ;;  %v7716_v43 = vadd.f32 %v7665_v12, %v7604_v36  ;;  %v7717_v9 = vadd.f32 %v7665_v12, %v7605_v4  ;;  %v15535_v49 = vpop.f32.mrf.mxu0  ;;  %v15537_v11 = vpop.f32.mrf.mxu1 }
 0x4ad   : > { %v7774_v42 = vmax.f32 %v7710_v51, 0.0  ;;  %v7775_v48 = vmax.f32 %v7711_v37, 0.0  ;;  %v7776_v29 = vmax.f32 %v7712_v62, 0.0  ;;  %v7777_v40 = vmax.f32 %v7713_v16, 0.0 }
 0x4ae   : > { %v7778_v34 = vmax.f32 %v7714_v3, 0.0  ;;  %v7779_v54 = vmax.f32 %v7715_v30, 0.0  ;;  %v7780_v33 = vmax.f32 %v7716_v43, 0.0  ;;  %v7781_v10 = vmax.f32 %v7717_v9, 0.0  ;;  %v6678_v44 = vpop.f32.mrf.mxu0  ;;  %v7063_v63 = vpop.f32.mrf.mxu1 }
 0x4af   : > { %v7918_v39 = vrot.slane %v7774_v42, 4  ;;  %v7924_v5 = vrot.slane %v7775_v48, 4  ;;  %v7930_v8 = vrot.slane %v7776_v29, 4  ;;  %v7936_v31 = vrot.slane %v7777_v40, 4 }
 0x4b0   : > { %v7942_v35 = vrot.slane %v7778_v34, 4  ;;  %v7948_v58 = vrot.slane %v7779_v54, 4  ;;  %v7954_v17 = vrot.slane %v7780_v33, 4  ;;  %v7960_v57 = vrot.slane %v7781_v10, 4  ;;  %v6681_v45 = vpop.f32.mrf.mxu0  ;;  %v7066_v36 = vpop.f32.mrf.mxu1 }
 0x4b1   : > { %v7919_v24 = vmax.f32 %v7774_v42, %v7918_v39  ;;  %v7925_v1 = vmax.f32 %v7775_v48, %v7924_v5  ;;  %v7931_v2 = vmax.f32 %v7776_v29, %v7930_v8  ;;  %v7937_v32 = vmax.f32 %v7777_v40, %v7936_v31 }
 0x4b2   : > { %v7943_v27 = vmax.f32 %v7778_v34, %v7942_v35  ;;  %v7949_v20 = vmax.f32 %v7779_v54, %v7948_v58  ;;  %v7955_v47 = vmax.f32 %v7780_v33, %v7954_v17  ;;  %v7961_v50 = vmax.f32 %v7781_v10, %v7960_v57  ;;  %v6683_v30 = vpop.f32.mrf.mxu0  ;;  %v7068_v43 = vpop.f32.mrf.mxu1 }
 0x4b3   : > { %v7920_v53 = vrot.slane %v7919_v24, 2  ;;  %v7926_v4 = vrot.slane %v7925_v1, 2  ;;  %v7932_v12 = vrot.slane %v7931_v2, 2  ;;  %v7938_v51 = vrot.slane %v7937_v32, 2 }
 0x4b4   : > { %v7944_v37 = vrot.slane %v7943_v27, 2  ;;  %v7950_v62 = vrot.slane %v7949_v20, 2  ;;  %v7956_v16 = vrot.slane %v7955_v47, 2  ;;  %v7962_v3 = vrot.slane %v7961_v50, 2  ;;  %v6686_v10 = vpop.f32.mrf.mxu0  ;;  %v15539_v39 = vpop.f32.mrf.mxu1 }
 0x4b5   : > { %v7921_v9 = vmax.f32 %v7919_v24, %v7920_v53  ;;  %v7927_v42 = vmax.f32 %v7925_v1, %v7926_v4  ;;  %v7933_v48 = vmax.f32 %v7931_v2, %v7932_v12  ;;  %v7939_v29 = vmax.f32 %v7937_v32, %v7938_v51 }
 0x4b6   : > { %v7945_v40 = vmax.f32 %v7943_v27, %v7944_v37  ;;  %v7951_v34 = vmax.f32 %v7949_v20, %v7950_v62  ;;  %v7957_v54 = vmax.f32 %v7955_v47, %v7956_v16  ;;  %v7963_v33 = vmax.f32 %v7961_v50, %v7962_v3  ;;  %v6688_v63 = vpop.f32.mrf.mxu0  ;;  %v7073_v24 = vpop.f32.mrf.mxu1 }
 0x4b7   : > { %v7922_v5 = vrot.slane %v7921_v9, 1  ;;  %v7928_v8 = vrot.slane %v7927_v42, 1  ;;  %v7934_v31 = vrot.slane %v7933_v48, 1  ;;  %v7940_v35 = vrot.slane %v7939_v29, 1 }
 0x4b8   : > { %v7946_v58 = vrot.slane %v7945_v40, 1  ;;  %v7952_v17 = vrot.slane %v7951_v34, 1  ;;  %v7958_v57 = vrot.slane %v7957_v54, 1  ;;  %v7964_v44 = vrot.slane %v7963_v33, 1  ;;  %v6691_v4 = vpop.f32.mrf.mxu0  ;;  %v7076_v12 = vpop.f32.mrf.mxu1 }
 0x4b9   : > { %v7923_v1 = vmax.f32 %v7921_v9, %v7922_v5  ;;  %v7929_v2 = vmax.f32 %v7927_v42, %v7928_v8  ;;  %v7935_v32 = vmax.f32 %v7933_v48, %v7934_v31  ;;  %v7941_v27 = vmax.f32 %v7939_v29, %v7940_v35 }
 0x4ba   : > { %v7947_v20 = vmax.f32 %v7945_v40, %v7946_v58  ;;  %v7953_v47 = vmax.f32 %v7951_v34, %v7952_v17  ;;  %v7959_v50 = vmax.f32 %v7957_v54, %v7958_v57  ;;  %v7965_v53 = vmax.f32 %v7963_v33, %v7964_v44  ;;  %v6693_v42 = vpop.f32.mrf.mxu0  ;;  %v7078_v48 = vpop.f32.mrf.mxu1 }
 0x4bb   : > { %v8291_v51 = vsel %vm8270_vm3, %v7929_v2, %v7923_v1  ;;  %v7231_v37 = vadd.f32 %v7230_v26, %v15502_v23  ;;  %v7398_v62 = vrot.slane %v15524_v46, 1  ;;  %v7405_v16 = vadd.f32 %v15526_v60, %v15522_v52 }
 0x4bc   : > { %v8292_v3 = vsel %vm8272_vm4, %v7935_v32, %v8291_v51  ;;  %v7238_v30 = vadd.f32 %v15529_v21, %v15507_v28  ;;  %v6677_v43 = vadd.f32 %v15422_v0, %v15535_v49  ;;  %v6682_v9 = vadd.f32 %v15422_v0, %v6681_v45  ;;  %v6696_v49 = vpop.f32.mrf.mxu0  ;;  %v7081_v45 = vpop.f32.mrf.mxu1 }
 0x4bd   : > { %v8293_v29 = vsel %vm8274_vm5, %v7941_v27, %v8292_v3  ;;  %v7399_v23 = vadd.f32 %v7398_v62, %v15524_v46  ;;  %v15556_v26 = vmul.f32 0.015625, %v7231_v37  ;;  %v7406_v52 = vadd.f32 %v7405_v16, %v15533_v15 }
 0x4be   : > { %v8294_v60 = vsel %vm8276_vm6, %v7947_v20, %v8293_v29  ;;  %v7239_v40 = vrot.slane %v7238_v30, 4  ;;  %v15561_v21 = vadd.f32 %v15537_v11, %v6677_v43  ;;  %v15563_v34 = vadd.f32 %v7066_v36, %v6682_v9  ;;  %v6698_v11 = vpop.f32.mrf.mxu0  ;;  %v7083_v35 = vpop.f32.mrf.mxu1 }
 0x4bf   : > { %v8295_v54 = vsel %vm8278_vm7, %v7953_v47, %v8294_v60  ;;  %v7463_v33 = vmul.f32 0.015625, %v7399_v23  ;;  %v7471_v46 = vmul.f32 %v15556_v26, %v15556_v26  ;;  %v7407_v5 = vrot.slane %v7406_v52, 4 }
 0x4c0   : > { %v8296_v15 = vsel %vm8280_vm8, %v7959_v50, %v8295_v54  ;;  %v7240_v8 = vadd.f32 %v7239_v40, %v7238_v30  ;;  %v7324_v31 = vmul.f32 %v15561_v21, %v15561_v21  ;;  %v7325_v57 = vmul.f32 %v15563_v34, %v15563_v34  ;;  %v6701_v2 = vpop.f32.mrf.mxu0  ;;  %v7086_v32 = vpop.f32.mrf.mxu1 }
 0x4c1   : > { %v8297_v36 = vsel %vm8282_vm9, %v7965_v53, %v8296_v15  ;;  %v7479_v58 = vsub.f32 %v7463_v33, %v7471_v46  ;;  %v7408_v17 = vadd.f32 %v7407_v5, %v7406_v52  ;;  %v6687_v63 = vadd.f32 %v15422_v0, %v6686_v10 }
 0x4c2   : > { %8343 = vst [vmem:[%s15142_s22 + $0x10] sm:$0xff] %v8297_v36  ;;  %v7241_v44 = vrot.slane %v7240_v8, 2  ;;  %v6692_v24 = vadd.f32 %v15422_v0, %v6691_v4  ;;  %v6697_v1 = vadd.f32 %v15422_v0, %v6696_v49  ;;  %v7245_v47 = vadd.f32 %v15563_v34, %v15561_v21  ;;  %v6703_v4 = vpop.f32.mrf.mxu0  ;;  %v7088_v62 = vpop.f32.mrf.mxu1 }
 0x4c3   : > { %v7487_v27 = vmax.f32 %v7479_v58, 0.0  ;;  %v7409_v20 = vrot.slane %v7408_v17, 2  ;;  %v6702_v50 = vadd.f32 %v15422_v0, %v6701_v2  ;;  %v15582_v51 = vadd.f32 %v15539_v39, %v6687_v63 }
 0x4c4   : > { %v7242_v53 = vadd.f32 %v7241_v44, %v7240_v8  ;;  %v15584_v37 = vadd.f32 %v7076_v12, %v6692_v24  ;;  %v15586_v10 = vadd.f32 %v7081_v45, %v6697_v1  ;;  %v7413_v30 = vadd.f32 %v7325_v57, %v7324_v31  ;;  %v6706_v12 = vpop.f32.mrf.mxu0  ;;  %v7091_v29 = vpop.f32.mrf.mxu1 }
 0x4c5   : > { %v7496_v16 = vadd.f32 1e-05, %v7487_v27  ;;  %v7410_v3 = vadd.f32 %v7409_v20, %v7408_v17  ;;  %v15588_v43 = vadd.f32 %v7086_v32, %v6702_v50  ;;  %v7246_v42 = vadd.f32 %v7245_v47, %v15582_v51 }
 0x4c6   : > { %17754 = vst [vmem:[#allocation182_spill] sm:$0xff] %v15586_v10  ;;  %v7243_v9 = vrot.slane %v7242_v53, 1  ;;  %v7326_v48 = vmul.f32 %v15582_v51, %v15582_v51  ;;  %v7327_v39 = vmul.f32 %v15584_v37, %v15584_v37  ;;  %v7328_v52 = vmul.f32 %v15586_v10, %v15586_v10  ;;  %v6708_v54 = vpop.f32.mrf.mxu0  ;;  %v7093_v33 = vpop.f32.mrf.mxu1 }
 0x4c7   : > { %17755 = vst [vmem:[#allocation145_spill] sm:$0xff] %v15588_v43  ;;  %8631 = vrsqrt.f32 %v7496_v16  ;;  %v7411_v23 = vrot.slane %v7410_v3, 1  ;;  %v7247_v49 = vadd.f32 %v7246_v42, %v15584_v37  ;;  %v6707_v45 = vadd.f32 %v15422_v0, %v6706_v12 }
 0x4c8   : > { %v7244_v60 = vadd.f32 %v7243_v9, %v7242_v53  ;;  %v7414_v40 = vadd.f32 %v7413_v30, %v7326_v48  ;;  %v7329_v5 = vmul.f32 %v15588_v43, %v15588_v43  ;;  %v6711_v35 = vpop.f32.mrf.mxu0  ;;  %v7096_v36 = vpop.f32.mrf.mxu1  ;;  %v15621_v48 = vld [vmem:[%s15990_s9] sm:$0x1] }
 0x4c9   : > { %v7412_v46 = vadd.f32 %v7411_v23, %v7410_v3  ;;  %v7248_v31 = vadd.f32 %v7247_v49, %v15586_v10  ;;  %v15604_v11 = vadd.f32 %v7091_v29, %v6707_v45  ;;  %v6712_v17 = vadd.f32 %v15422_v0, %v6711_v35 }
 0x4ca   : > { %v15601_v15 = vmul.f32 0.015625, %v7244_v60  ;;  %v7415_v8 = vadd.f32 %v7414_v40, %v7327_v39  ;;  %v6713_v1 = vpop.f32.mrf.mxu0  ;;  %v7098_v2 = vpop.f32.mrf.mxu1 }
 0x4cb   : > { %17756 = vst [vmem:[#allocation164_spill] sm:$0xff] %v15604_v11  ;;  %v7464_v58 = vmul.f32 0.015625, %v7412_v46  ;;  %v7249_v63 = vadd.f32 %v7248_v31, %v15588_v43  ;;  %v7330_v24 = vmul.f32 %v15604_v11, %v15604_v11  ;;  %v15612_v32 = vadd.f32 %v7096_v36, %v6712_v17  ;;  %v15634_v31 = vld [vmem:[%s15991_s10] sm:$0x1]  ;;  %v17758_v36 = vld [vmem:[#allocation205_spill] sm:$0xff] }
 0x4cc   : > { %v7472_v57 = vmul.f32 %v15601_v15, %v15601_v15  ;;  %v7416_v44 = vadd.f32 %v7415_v8, %v7328_v52 }
 0x4cd   : > { %17757 = vst [vmem:[#allocation35_spill] sm:$0xff] %v15612_v32  ;;  %v7250_v20 = vadd.f32 %v7249_v63, %v15604_v11  ;;  %v7331_v50 = vmul.f32 %v15612_v32, %v15612_v32 }
 0x4ce   : > { %v7417_v27 = vadd.f32 %v7416_v44, %v7329_v5  ;;  %v7480_v47 = vsub.f32 %v7464_v58, %v7472_v57 }
 0x4cf   : > { %v7251_v4 = vadd.f32 %v7250_v20, %v15612_v32 }
 0x4d0   : > { %v7418_v53 = vadd.f32 %v7417_v27, %v7330_v24  ;;  %v7488_v3 = vmax.f32 %v7480_v47, 0.0 }
 0x4d1   : > { %v7252_v62 = vrot.slane %v7251_v4, 4 }
 0x4d2   : > { %v7419_v16 = vadd.f32 %v7418_v53, %v7331_v50  ;;  %v7497_v45 = vadd.f32 1e-05, %v7488_v3 }
 0x4d3   : > { %v7253_v9 = vadd.f32 %v7252_v62, %v7251_v4 }
 0x4d4   : > { %v8632_v30 = vpop.eup %8631  ;;  %v7420_v42 = vrot.slane %v7419_v16, 4  ;;  %v6716_v12 = vpop.f32.mrf.mxu0  ;;  %8633 = vrsqrt.f32 %v7497_v45 }
 0x4d5   : > { %v7512_v39 = vmul.f32 %v15621_v48, %v8632_v30  ;;  %v7101_v29 = vpop.f32.mrf.mxu1  ;;  %v7254_v23 = vrot.slane %v7253_v9, 2  ;;  %v6717_v60 = vadd.f32 %v15422_v0, %v6716_v12 }
 0x4d6   : > { %v7421_v52 = vadd.f32 %v7420_v42, %v7419_v16  ;;  %v6718_v54 = vpop.f32.mrf.mxu0 }
 0x4d7   : > { %v7521_v40 = vmul.f32 %v7512_v39, %v15556_v26  ;;  %v7557_v49 = vrot.slane %v7512_v39, %v17674_v13  ;;  %v7103_v33 = vpop.f32.mrf.mxu1  ;;  %v15627_v46 = vadd.f32 %v7254_v23, %v7253_v9  ;;  %v15629_v8 = vadd.f32 %v7101_v29, %v6717_v60  ;;  %v17759_v26 = vld [vmem:[#allocation146_spill] sm:$0xff] }
 0x4d8   : > { %v7422_v5 = vrot.slane %v7421_v52, 2  ;;  %v6721_v44 = vpop.f32.mrf.mxu0 }
 0x4d9   : > { %v7529_v35 = vsub.f32 %v15634_v31, %v7521_v40  ;;  %v7606_v58 = vmul.f32 %v7557_v49, %v17758_v36  ;;  %v7607_v17 = vmul.f32 %v7557_v49, %v17759_v26  ;;  %v7608_v57 = vmul.f32 %v7557_v49, %v15254_v19  ;;  %v15640_v63 = vpop.f32.mrf.mxu1 }
 0x4da   : > { %v7609_v24 = vmul.f32 %v7557_v49, %v15385_v25  ;;  %v7610_v1 = vmul.f32 %v7557_v49, %v15416_v7  ;;  %v7611_v2 = vmul.f32 %v7557_v49, %v15435_v61  ;;  %v7612_v27 = vmul.f32 %v7557_v49, %v15438_v18  ;;  %v6723_v50 = vpop.f32.mrf.mxu0 }
 0x4db   : > { %v7613_v20 = vmul.f32 %v7557_v49, %v15455_v14  ;;  %v7669_v47 = vrot.slane %v7529_v35, %v17674_v13  ;;  %v7108_v53 = vpop.f32.mrf.mxu1  ;;  %v15649_v4 = vadd.f32 %v7422_v5, %v7421_v52  ;;  %v15653_v25 = vmul.f32 %v15629_v8, %v15629_v8 }
 0x4dc   : > { %v15656_v7 = vadd.f32 %v15422_v0, %v6721_v44  ;;  %v15658_v16 = vpop.f32.mrf.mxu0 }
 0x4dd   : > { %v7718_v61 = vadd.f32 %v7669_v47, %v7606_v58  ;;  %v7719_v18 = vadd.f32 %v7669_v47, %v7607_v17  ;;  %v7720_v62 = vadd.f32 %v7669_v47, %v7608_v57  ;;  %v7721_v14 = vadd.f32 %v7669_v47, %v7609_v24  ;;  %v15660_v3 = vpop.f32.mrf.mxu1 }
 0x4de   : > { %v7722_v30 = vadd.f32 %v7669_v47, %v7610_v1  ;;  %v7723_v9 = vadd.f32 %v7669_v47, %v7611_v2  ;;  %v7724_v42 = vadd.f32 %v7669_v47, %v7612_v27  ;;  %v7725_v39 = vadd.f32 %v7669_v47, %v7613_v20  ;;  %v6728_v60 = vpop.f32.mrf.mxu0 }
 0x4df   : > { %v7782_v12 = vmax.f32 %v7718_v61, 0.0  ;;  %v7783_v29 = vmax.f32 %v7719_v18, 0.0  ;;  %v7784_v23 = vmax.f32 %v7720_v62, 0.0  ;;  %v7785_v52 = vmax.f32 %v7721_v14, 0.0  ;;  %v7113_v40 = vpop.f32.mrf.mxu1 }
 0x4e0   : > { %v7786_v49 = vmax.f32 %v7722_v30, 0.0  ;;  %v7787_v45 = vmax.f32 %v7723_v9, 0.0  ;;  %v7788_v54 = vmax.f32 %v7724_v42, 0.0  ;;  %v7789_v33 = vmax.f32 %v7725_v39, 0.0  ;;  %v15662_v26 = vpop.f32.mrf.mxu0 }
 0x4e1   : > { %v7966_v5 = vrot.slane %v7782_v12, 4  ;;  %v7972_v35 = vrot.slane %v7783_v29, 4  ;;  %v7978_v36 = vrot.slane %v7784_v23, 4  ;;  %v7984_v58 = vrot.slane %v7785_v52, 4  ;;  %v15664_v17 = vpop.f32.mrf.mxu1 }
 0x4e2   : > { %v7990_v57 = vrot.slane %v7786_v49, 4  ;;  %v7996_v44 = vrot.slane %v7787_v45, 4  ;;  %v8002_v24 = vrot.slane %v7788_v54, 4  ;;  %v8008_v1 = vrot.slane %v7789_v33, 4  ;;  %v6733_v50 = vpop.f32.mrf.mxu0 }
 0x4e3   : > { %v7967_v2 = vmax.f32 %v7782_v12, %v7966_v5  ;;  %v7973_v27 = vmax.f32 %v7783_v29, %v7972_v35  ;;  %v7979_v20 = vmax.f32 %v7784_v23, %v7978_v36  ;;  %v7985_v47 = vmax.f32 %v7785_v52, %v7984_v58  ;;  %v7118_v53 = vpop.f32.mrf.mxu1 }
 0x4e4   : > { %v7991_v61 = vmax.f32 %v7786_v49, %v7990_v57  ;;  %v7997_v18 = vmax.f32 %v7787_v45, %v7996_v44  ;;  %v8003_v62 = vmax.f32 %v7788_v54, %v8002_v24  ;;  %v8009_v14 = vmax.f32 %v7789_v33, %v8008_v1  ;;  %v15666_v60 = vpop.f32.mrf.mxu0  ;;  %v8634_v54 = vpop.eup %8633 }
 0x4e5   : > { %v7968_v30 = vrot.slane %v7967_v2, 2  ;;  %v7974_v9 = vrot.slane %v7973_v27, 2  ;;  %v7980_v42 = vrot.slane %v7979_v20, 2  ;;  %v7986_v39 = vrot.slane %v7985_v47, 2  ;;  %v15668_v40 = vpop.f32.mrf.mxu1 }
 0x4e6   : > { %v7992_v19 = vrot.slane %v7991_v61, 2  ;;  %v7998_v32 = vrot.slane %v7997_v18, 2  ;;  %v8004_v12 = vrot.slane %v8003_v62, 2  ;;  %v8010_v29 = vrot.slane %v8009_v14, 2  ;;  %v6738_v49 = vpop.f32.mrf.mxu0 }
 0x4e7   : > { %v7969_v23 = vmax.f32 %v7967_v2, %v7968_v30  ;;  %v7975_v52 = vmax.f32 %v7973_v27, %v7974_v9  ;;  %v7981_v5 = vmax.f32 %v7979_v20, %v7980_v42  ;;  %v7987_v35 = vmax.f32 %v7985_v47, %v7986_v39  ;;  %v7123_v45 = vpop.f32.mrf.mxu1 }
 0x4e8   : > { %v7993_v33 = vmax.f32 %v7991_v61, %v7992_v19  ;;  %v7999_v36 = vmax.f32 %v7997_v18, %v7998_v32  ;;  %v8005_v58 = vmax.f32 %v8003_v62, %v8004_v12  ;;  %v8011_v57 = vmax.f32 %v8009_v14, %v8010_v29  ;;  %v6741_v53 = vpop.f32.mrf.mxu0 }
 0x4e9   : > { %v7970_v44 = vrot.slane %v7969_v23, 1  ;;  %v7976_v24 = vrot.slane %v7975_v52, 1  ;;  %v7982_v1 = vrot.slane %v7981_v5, 1  ;;  %v7988_v50 = vrot.slane %v7987_v35, 1  ;;  %v15670_v11 = vpop.f32.mrf.mxu1 }
 0x4ea   : > { %v7994_v43 = vrot.slane %v7993_v33, 1  ;;  %v8000_v10 = vrot.slane %v7999_v36, 1  ;;  %v8006_v2 = vrot.slane %v8005_v58, 1  ;;  %v8012_v27 = vrot.slane %v8011_v57, 1  ;;  %v6743_v42 = vpop.f32.mrf.mxu0 }
 0x4eb   : > { %v7971_v20 = vmax.f32 %v7969_v23, %v7970_v44  ;;  %v7977_v47 = vmax.f32 %v7975_v52, %v7976_v24  ;;  %v7983_v30 = vmax.f32 %v7981_v5, %v7982_v1  ;;  %v7989_v9 = vmax.f32 %v7987_v35, %v7988_v50  ;;  %v7128_v19 = vpop.f32.mrf.mxu1 }
 0x4ec   : > { %v7995_v32 = vmax.f32 %v7993_v33, %v7994_v43  ;;  %v8001_v61 = vmax.f32 %v7999_v36, %v8000_v10  ;;  %v8007_v18 = vmax.f32 %v8005_v58, %v8006_v2  ;;  %v8013_v62 = vmax.f32 %v8011_v57, %v8012_v27  ;;  %v15678_v23 = vpop.f32.mrf.mxu0 }
 0x4ed   : > { %v8298_v14 = vsel %vm8270_vm3, %v7977_v47, %v7971_v20  ;;  %v7513_v39 = vmul.f32 %v15621_v48, %v8634_v54  ;;  %v17760_v12 = vrot.slane %v15627_v46, 1  ;;  %v7424_v49 = vrot.slane %v15649_v4, 1  ;;  %v15680_v52 = vpop.f32.mrf.mxu1 }
 0x4ee   : > { %v8299_v5 = vsel %vm8272_vm4, %v7983_v30, %v8298_v14  ;;  %v15685_v10 = vadd.f32 %v15640_v63, %v15656_v7  ;;  %v6727_v43 = vadd.f32 %v15422_v0, %v15658_v16  ;;  %v6732_v35 = vadd.f32 %v15422_v0, %v15662_v26  ;;  %v6748_v36 = vpop.f32.mrf.mxu0 }
 0x4ef   : > { %v7257_v29 = vadd.f32 %v17760_v12, %v15627_v46  ;;  %v8300_v46 = vsel %vm8274_vm5, %v7989_v9, %v8299_v5  ;;  %v7522_v45 = vmul.f32 %v7513_v39, %v15601_v15  ;;  %v7561_v54 = vrot.slane %v7513_v39, %v17674_v13  ;;  %v7133_v58 = vpop.f32.mrf.mxu1 }
 0x4f0   : > { %v7425_v33 = vadd.f32 %v7424_v49, %v15649_v4  ;;  %v8301_v57 = vsel %vm8276_vm6, %v7995_v32, %v8300_v46  ;;  %v15700_v7 = vadd.f32 %v15685_v10, %v15629_v8  ;;  %v7333_v16 = vmul.f32 %v15685_v10, %v15685_v10  ;;  %v15708_v24 = vpop.f32.mrf.mxu0 }
 0x4f1   : > { %v15696_v63 = vmul.f32 0.015625, %v7257_v29  ;;  %v8302_v26 = vsel %vm8278_vm7, %v8001_v61, %v8301_v57  ;;  %v7530_v15 = vsub.f32 %v15634_v31, %v7522_v45  ;;  %v7614_v4 = vmul.f32 %v7561_v54, %v15458_v22  ;;  %v15710_v1 = vpop.f32.mrf.mxu1 }
 0x4f2   : > { %v7615_v44 = vmul.f32 %v7561_v54, %v15461_v55  ;;  %v8303_v50 = vsel %vm8280_vm8, %v8007_v18, %v8302_v26  ;;  %v7616_v2 = vmul.f32 %v7561_v54, %v15473_v59  ;;  %v7617_v27 = vmul.f32 %v7561_v54, %v15475_v41  ;;  %v6753_v9 = vpop.f32.mrf.mxu0 }
 0x4f3   : > { %v7618_v20 = vmul.f32 %v7561_v54, %v15481_v38  ;;  %v8304_v47 = vsel %vm8282_vm9, %v8013_v62, %v8303_v50  ;;  %v7619_v30 = vmul.f32 %v7561_v54, %v15489_v6  ;;  %v7620_v22 = vmul.f32 %v7561_v54, %v15504_v56  ;;  %v7138_v42 = vpop.f32.mrf.mxu1 }
 0x4f4   : > { %v7621_v55 = vmul.f32 %v7561_v54, %v15507_v28  ;;  %8344 = vst [vmem:[%s15142_s22 + $0x18] sm:$0xff] %v8304_v47  ;;  %v7673_v19 = vrot.slane %v7530_v15, %v17674_v13  ;;  %v15722_v32 = vmul.f32 0.015625, %v7425_v33  ;;  %v15726_v59 = vmul.f32 %v15696_v63, %v15696_v63 }
 0x4f5   : > { %v15729_v41 = vadd.f32 %v7333_v16, %v15653_v25  ;;  %v15732_v38 = vadd.f32 %v15660_v3, %v6727_v43  ;;  %v15735_v6 = vadd.f32 %v15664_v17, %v6732_v35  ;;  %v15739_v56 = vadd.f32 %v15422_v0, %v15666_v60 }
 0x4f6   : > { %v15742_v28 = vadd.f32 %v15422_v0, %v6741_v53  ;;  %v7726_v61 = vadd.f32 %v7673_v19, %v7614_v4  ;;  %v7727_v18 = vadd.f32 %v7673_v19, %v7615_v44  ;;  %v7728_v62 = vadd.f32 %v7673_v19, %v7616_v2 }
 0x4f7   : > { %v7729_v14 = vadd.f32 %v7673_v19, %v7617_v27  ;;  %v7730_v39 = vadd.f32 %v7673_v19, %v7618_v20  ;;  %v7731_v25 = vadd.f32 %v7673_v19, %v7619_v30  ;;  %v7732_v12 = vadd.f32 %v7673_v19, %v7620_v22 }
 0x4f8   : > { %v7733_v29 = vadd.f32 %v7673_v19, %v7621_v55  ;;  %v7790_v3 = vmax.f32 %v7726_v61, 0.0  ;;  %v7791_v49 = vmax.f32 %v7727_v18, 0.0  ;;  %v7792_v5 = vmax.f32 %v7728_v62, 0.0 }
 0x4f9   : > { %v7793_v17 = vmax.f32 %v7729_v14, 0.0  ;;  %v7794_v43 = vmax.f32 %v7730_v39, 0.0  ;;  %v7795_v35 = vmax.f32 %v7731_v25, 0.0  ;;  %v7796_v46 = vmax.f32 %v7732_v12, 0.0 }
 0x4fa   : > { %v7797_v60 = vmax.f32 %v7733_v29, 0.0  ;;  %v8014_v45 = vrot.slane %v7790_v3, 4  ;;  %v8020_v54 = vrot.slane %v7791_v49, 4  ;;  %v8026_v0 = vrot.slane %v7792_v5, 4 }
 0x4fb   : > { %v8032_v53 = vrot.slane %v7793_v17, 4  ;;  %v8038_v33 = vrot.slane %v7794_v43, 4  ;;  %v8044_v36 = vrot.slane %v7795_v35, 4  ;;  %v8050_v58 = vrot.slane %v7796_v46, 4 }
 0x4fc   : > { %v8056_v57 = vrot.slane %v7797_v60, 4  ;;  %v8015_v16 = vmax.f32 %v7790_v3, %v8014_v45  ;;  %v8021_v26 = vmax.f32 %v7791_v49, %v8020_v54  ;;  %v8027_v15 = vmax.f32 %v7792_v5, %v8026_v0 }
 0x4fd   : > { %v8033_v4 = vmax.f32 %v7793_v17, %v8032_v53  ;;  %v8039_v44 = vmax.f32 %v7794_v43, %v8038_v33  ;;  %v8045_v50 = vmax.f32 %v7795_v35, %v8044_v36  ;;  %v8051_v2 = vmax.f32 %v7796_v46, %v8050_v58 }
 0x4fe   : > { %v8057_v27 = vmax.f32 %v7797_v60, %v8056_v57  ;;  %v8016_v20 = vrot.slane %v8015_v16, 2  ;;  %v8022_v47 = vrot.slane %v8021_v26, 2  ;;  %v8028_v30 = vrot.slane %v8027_v15, 2 }
 0x4ff   : > { %v8034_v22 = vrot.slane %v8033_v4, 2  ;;  %v8040_v55 = vrot.slane %v8039_v44, 2  ;;  %v8046_v9 = vrot.slane %v8045_v50, 2  ;;  %v8052_v42 = vrot.slane %v8051_v2, 2 }
 0x500   : > { %v8058_v19 = vrot.slane %v8057_v27, 2  ;;  %v8017_v61 = vmax.f32 %v8015_v16, %v8016_v20  ;;  %v8023_v18 = vmax.f32 %v8021_v26, %v8022_v47  ;;  %v8029_v62 = vmax.f32 %v8027_v15, %v8028_v30 }
 0x501   : > { %v8035_v14 = vmax.f32 %v8033_v4, %v8034_v22  ;;  %v8041_v39 = vmax.f32 %v8039_v44, %v8040_v55  ;;  %v8047_v25 = vmax.f32 %v8045_v50, %v8046_v9  ;;  %v8053_v12 = vmax.f32 %v8051_v2, %v8052_v42 }
 0x502   : > { %v8059_v29 = vmax.f32 %v8057_v27, %v8058_v19  ;;  %v8018_v3 = vrot.slane %v8017_v61, 1  ;;  %v8024_v49 = vrot.slane %v8023_v18, 1  ;;  %v8030_v5 = vrot.slane %v8029_v62, 1 }
 0x503   : > { %v8036_v17 = vrot.slane %v8035_v14, 1  ;;  %v8042_v43 = vrot.slane %v8041_v39, 1  ;;  %v8048_v35 = vrot.slane %v8047_v25, 1  ;;  %v8054_v46 = vrot.slane %v8053_v12, 1 }
 0x504   : > { %v8060_v60 = vrot.slane %v8059_v29, 1  ;;  %v8019_v45 = vmax.f32 %v8017_v61, %v8018_v3  ;;  %v8025_v54 = vmax.f32 %v8023_v18, %v8024_v49  ;;  %v8031_v0 = vmax.f32 %v8029_v62, %v8030_v5 }
 0x505   : > { %v8037_v53 = vmax.f32 %v8035_v14, %v8036_v17  ;;  %v8043_v33 = vmax.f32 %v8041_v39, %v8042_v43  ;;  %v8049_v36 = vmax.f32 %v8047_v25, %v8048_v35  ;;  %v8055_v58 = vmax.f32 %v8053_v12, %v8054_v46 }
 0x506   : > { %v8061_v57 = vmax.f32 %v8059_v29, %v8060_v60  ;;  %v8305_v16 = vsel %vm8270_vm3, %v8025_v54, %v8019_v45  ;;  %v7481_v26 = vsub.f32 %v15722_v32, %v15726_v59  ;;  %v7259_v15 = vadd.f32 %v15700_v7, %v15732_v38 }
 0x507   : > { %v7334_v4 = vmul.f32 %v15732_v38, %v15732_v38  ;;  %v8306_v44 = vsel %vm8272_vm4, %v8031_v0, %v8305_v16  ;;  %v7335_v50 = vmul.f32 %v15735_v6, %v15735_v6  ;;  %v15756_v2 = vadd.f32 %v15668_v40, %v15739_v56 }
 0x508   : > { %v15760_v27 = vadd.f32 %v15670_v11, %v15742_v28  ;;  %v8307_v32 = vsel %vm8274_vm5, %v8037_v53, %v8306_v44  ;;  %v7489_v59 = vmax.f32 %v7481_v26, 0.0  ;;  %v7260_v20 = vadd.f32 %v7259_v15, %v15735_v6  ;;  %v15773_v11 = vld [vmem:[%s15989_s8] ss:$0 sm:$0xff] }
 0x509   : > { %v7427_v7 = vadd.f32 %v15729_v41, %v7334_v4  ;;  %v8308_v47 = vsel %vm8276_vm6, %v8043_v33, %v8307_v32  ;;  %v7336_v30 = vmul.f32 %v15756_v2, %v15756_v2  ;;  %v6747_v56 = vadd.f32 %v15773_v11, %v15678_v23  ;;  %v17761_v4 = vld [vmem:[#allocation182_spill] sm:$0xff] }
 0x50a   : > { %v7337_v40 = vmul.f32 %v15760_v27, %v15760_v27  ;;  %v8309_v41 = vsel %vm8278_vm7, %v8049_v36, %v8308_v47  ;;  %v7498_v28 = vadd.f32 1e-05, %v7489_v59  ;;  %v7261_v55 = vadd.f32 %v7260_v20, %v15756_v2  ;;  %v17763_v59 = vld [vmem:[#allocation164_spill] sm:$0xff]  ;;  %v17764_v20 = vld [vmem:[#allocation35_spill] sm:$0xff] }
 0x50b   : > { %v7428_v22 = vadd.f32 %v7427_v7, %v7335_v50  ;;  %v8310_v9 = vsel %vm8280_vm8, %v8055_v58, %v8309_v41  ;;  %v15781_v42 = vadd.f32 %v15680_v52, %v6747_v56  ;;  %v6752_v19 = vadd.f32 %v15773_v11, %v15708_v24  ;;  %v17762_v50 = vld [vmem:[#allocation145_spill] sm:$0xff] }
 0x50c   : > { %v8311_v61 = vsel %vm8282_vm9, %v8061_v57, %v8310_v9  ;;  %8635 = vrsqrt.f32 %v7498_v28  ;;  %v7262_v23 = vadd.f32 %v7261_v55, %v15760_v27 }
 0x50d   : > { %v7429_v18 = vadd.f32 %v7428_v22, %v7336_v30  ;;  %8345 = vst [vmem:[%s15142_s22 + $0x20] sm:$0xff] %v8311_v61  ;;  %v7338_v62 = vmul.f32 %v15781_v42, %v15781_v42  ;;  %v15791_v14 = vadd.f32 %v15710_v1, %v6752_v19 }
 0x50e   : > { %v7263_v52 = vadd.f32 %v7262_v23, %v15781_v42 }
 0x50f   : > { %v7430_v39 = vadd.f32 %v7429_v18, %v7337_v40  ;;  %v7339_v25 = vmul.f32 %v15791_v14, %v15791_v14 }
 0x510   : > { %v7264_v12 = vadd.f32 %v7263_v52, %v15791_v14 }
 0x511   : > { %v7431_v24 = vadd.f32 %v7430_v39, %v7338_v62 }
 0x512   : > { %v7265_v29 = vrot.slane %v7264_v12, 4 }
 0x513   : > { %v7432_v3 = vadd.f32 %v7431_v24, %v7339_v25 }
 0x514   : > { %v7266_v49 = vadd.f32 %v7265_v29, %v7264_v12 }
 0x515   : > { %v7433_v5 = vrot.slane %v7432_v3, 4 }
 0x516   : > { %v7267_v17 = vrot.slane %v7266_v49, 2 }
 0x517   : > { %v7434_v43 = vadd.f32 %v7433_v5, %v7432_v3 }
 0x518   : > { %v7268_v35 = vadd.f32 %v7267_v17, %v7266_v49 }
 0x519   : > { %v7435_v46 = vrot.slane %v7434_v43, 2  ;;  %v8636_v60 = vpop.eup %8635 }
 0x51a   : > { %v7514_v1 = vmul.f32 %v15621_v48, %v8636_v60  ;;  %v7269_v45 = vrot.slane %v7268_v35, 1 }
 0x51b   : > { %v7436_v54 = vadd.f32 %v7435_v46, %v7434_v43 }
 0x51c   : > { %v7523_v0 = vmul.f32 %v7514_v1, %v15696_v63  ;;  %v7565_v53 = vrot.slane %v7514_v1, %v17674_v13  ;;  %v7270_v33 = vadd.f32 %v7269_v45, %v7268_v35 }
 0x51d   : > { %v7437_v36 = vrot.slane %v7436_v54, 1 }
 0x51e   : > { %v7531_v58 = vsub.f32 %v15634_v31, %v7523_v0  ;;  %v7622_v57 = vmul.f32 %v7565_v53, %v15561_v21  ;;  %v7623_v16 = vmul.f32 %v7565_v53, %v15563_v34  ;;  %v7624_v26 = vmul.f32 %v7565_v53, %v15582_v51 }
 0x51f   : > { %v7625_v15 = vmul.f32 %v7565_v53, %v15584_v37  ;;  %v7626_v44 = vmul.f32 %v7565_v53, %v17761_v4  ;;  %v7627_v32 = vmul.f32 %v7565_v53, %v17762_v50  ;;  %v7628_v7 = vmul.f32 %v7565_v53, %v17763_v59 }
 0x520   : > { %v7677_v63 = vrot.slane %v7531_v58, %v17674_v13  ;;  %v7629_v47 = vmul.f32 %v7565_v53, %v17764_v20  ;;  %v15810_v30 = vadd.f32 %v7437_v36, %v7436_v54  ;;  %v15812_v40 = vmul.f32 0.015625, %v7270_v33 }
 0x522   : > { %v7734_v21 = vadd.f32 %v7677_v63, %v7622_v57  ;;  %v7735_v34 = vadd.f32 %v7677_v63, %v7623_v16  ;;  %v7736_v56 = vadd.f32 %v7677_v63, %v7624_v26  ;;  %v7737_v51 = vadd.f32 %v7677_v63, %v7625_v15 }
 0x523   : > { %v7738_v41 = vadd.f32 %v7677_v63, %v7626_v44  ;;  %v7739_v37 = vadd.f32 %v7677_v63, %v7627_v32  ;;  %v7740_v28 = vadd.f32 %v7677_v63, %v7628_v7  ;;  %v7741_v22 = vadd.f32 %v7677_v63, %v7629_v47 }
 0x524   : > { %v7798_v55 = vmax.f32 %v7734_v21, 0.0  ;;  %v7799_v9 = vmax.f32 %v7735_v34, 0.0  ;;  %v7800_v19 = vmax.f32 %v7736_v56, 0.0  ;;  %v7801_v61 = vmax.f32 %v7737_v51, 0.0 }
 0x525   : > { %v7802_v18 = vmax.f32 %v7738_v41, 0.0  ;;  %v7803_v23 = vmax.f32 %v7739_v37, 0.0  ;;  %v7804_v62 = vmax.f32 %v7740_v28, 0.0  ;;  %v7805_v39 = vmax.f32 %v7741_v22, 0.0 }
 0x526   : > { %v8062_v52 = vrot.slane %v7798_v55, 4  ;;  %v8068_v25 = vrot.slane %v7799_v9, 4  ;;  %v8074_v24 = vrot.slane %v7800_v19, 4  ;;  %v8080_v12 = vrot.slane %v7801_v61, 4 }
 0x527   : > { %v8086_v29 = vrot.slane %v7802_v18, 4  ;;  %v8092_v3 = vrot.slane %v7803_v23, 4  ;;  %v8098_v49 = vrot.slane %v7804_v62, 4  ;;  %v8104_v5 = vrot.slane %v7805_v39, 4 }
 0x528   : > { %v8063_v17 = vmax.f32 %v7798_v55, %v8062_v52  ;;  %v8069_v43 = vmax.f32 %v7799_v9, %v8068_v25  ;;  %v8075_v35 = vmax.f32 %v7800_v19, %v8074_v24  ;;  %v8081_v46 = vmax.f32 %v7801_v61, %v8080_v12 }
 0x529   : > { %v8087_v60 = vmax.f32 %v7802_v18, %v8086_v29  ;;  %v8093_v1 = vmax.f32 %v7803_v23, %v8092_v3  ;;  %v8099_v45 = vmax.f32 %v7804_v62, %v8098_v49  ;;  %v8105_v54 = vmax.f32 %v7805_v39, %v8104_v5 }
 0x52a   : > { %v8064_v0 = vrot.slane %v8063_v17, 2  ;;  %v8070_v53 = vrot.slane %v8069_v43, 2  ;;  %v8076_v33 = vrot.slane %v8075_v35, 2  ;;  %v8082_v36 = vrot.slane %v8081_v46, 2 }
 0x52b   : > { %v8088_v58 = vrot.slane %v8087_v60, 2  ;;  %v8094_v57 = vrot.slane %v8093_v1, 2  ;;  %v8100_v16 = vrot.slane %v8099_v45, 2  ;;  %v8106_v26 = vrot.slane %v8105_v54, 2 }
 0x52c   : > { %v8065_v15 = vmax.f32 %v8063_v17, %v8064_v0  ;;  %v8071_v4 = vmax.f32 %v8069_v43, %v8070_v53  ;;  %v8077_v44 = vmax.f32 %v8075_v35, %v8076_v33  ;;  %v8083_v50 = vmax.f32 %v8081_v46, %v8082_v36 }
 0x52d   : > { %v8089_v32 = vmax.f32 %v8087_v60, %v8088_v58  ;;  %v8095_v63 = vmax.f32 %v8093_v1, %v8094_v57  ;;  %v8101_v59 = vmax.f32 %v8099_v45, %v8100_v16  ;;  %v8107_v7 = vmax.f32 %v8105_v54, %v8106_v26 }
 0x52e   : > { %v8066_v20 = vrot.slane %v8065_v15, 1  ;;  %v8072_v47 = vrot.slane %v8071_v4, 1  ;;  %v8078_v21 = vrot.slane %v8077_v44, 1  ;;  %v8084_v34 = vrot.slane %v8083_v50, 1 }
 0x52f   : > { %v8090_v56 = vrot.slane %v8089_v32, 1  ;;  %v8096_v28 = vrot.slane %v8095_v63, 1  ;;  %v8102_v22 = vrot.slane %v8101_v59, 1  ;;  %v8108_v55 = vrot.slane %v8107_v7, 1 }
 0x530   : > { %v8067_v51 = vmax.f32 %v8065_v15, %v8066_v20  ;;  %v8073_v41 = vmax.f32 %v8071_v4, %v8072_v47  ;;  %v8079_v37 = vmax.f32 %v8077_v44, %v8078_v21  ;;  %v8085_v61 = vmax.f32 %v8083_v50, %v8084_v34 }
 0x531   : > { %v6756_v9 = vpop.f32.mrf.mxu0  ;;  %v7141_v19 = vpop.f32.mrf.mxu1  ;;  %v7466_v23 = vmul.f32 0.015625, %v15810_v30  ;;  %v7474_v62 = vmul.f32 %v15812_v40, %v15812_v40  ;;  %v8091_v39 = vmax.f32 %v8089_v32, %v8090_v56  ;;  %v8097_v12 = vmax.f32 %v8095_v63, %v8096_v28 }
 0x532   : > { %v8312_v18 = vsel %vm8270_vm3, %v8073_v41, %v8067_v51  ;;  %v8103_v49 = vmax.f32 %v8101_v59, %v8102_v22  ;;  %v8109_v35 = vmax.f32 %v8107_v7, %v8108_v55  ;;  %v6757_v16 = vadd.f32 %v15773_v11, %v6756_v9 }
 0x533   : > { %v8313_v52 = vsel %vm8272_vm4, %v8079_v37, %v8312_v18  ;;  %v6758_v25 = vpop.f32.mrf.mxu0  ;;  %v7143_v24 = vpop.f32.mrf.mxu1  ;;  %v7482_v3 = vsub.f32 %v7466_v23, %v7474_v62 }
 0x534   : > { %v8314_v29 = vsel %vm8274_vm5, %v8085_v61, %v8313_v52  ;;  %v15831_v59 = vadd.f32 %v7141_v19, %v6757_v16 }
 0x535   : > { %v8315_v5 = vsel %vm8276_vm6, %v8091_v39, %v8314_v29  ;;  %v6761_v17 = vpop.f32.mrf.mxu0  ;;  %v7146_v43 = vpop.f32.mrf.mxu1  ;;  %v7490_v46 = vmax.f32 %v7482_v3, 0.0 }
 0x536   : > { %v8316_v30 = vsel %vm8278_vm7, %v8097_v12, %v8315_v5  ;;  %v6762_v36 = vadd.f32 %v15773_v11, %v6761_v17  ;;  %v7340_v37 = vmul.f32 %v15831_v59, %v15831_v59 }
 0x537   : > { %v8317_v60 = vsel %vm8280_vm8, %v8103_v49, %v8316_v30  ;;  %v6763_v1 = vpop.f32.mrf.mxu0  ;;  %v7148_v45 = vpop.f32.mrf.mxu1  ;;  %v7499_v0 = vadd.f32 1e-05, %v7490_v46 }
 0x538   : > { %v8318_v54 = vsel %vm8282_vm9, %v8109_v35, %v8317_v60  ;;  %v15828_v44 = vadd.f32 %v7146_v43, %v6762_v36 }
 0x539   : > { %8346 = vst [vmem:[%s15142_s22 + $0x28] sm:$0xff] %v8318_v54  ;;  %v6766_v53 = vpop.f32.mrf.mxu0  ;;  %v7151_v33 = vpop.f32.mrf.mxu1  ;;  %8637 = vrsqrt.f32 %v7499_v0 }
 0x53a   : > { %v6767_v4 = vadd.f32 %v15773_v11, %v6766_v53  ;;  %v7341_v21 = vmul.f32 %v15828_v44, %v15828_v44  ;;  %v7271_v55 = vadd.f32 %v15828_v44, %v15831_v59 }
 0x53b   : > { %v6768_v58 = vpop.f32.mrf.mxu0  ;;  %v7153_v57 = vpop.f32.mrf.mxu1 }
 0x53c   : > { %v15833_v47 = vadd.f32 %v7151_v33, %v6767_v4  ;;  %v7439_v18 = vadd.f32 %v7341_v21, %v7340_v37 }
 0x53d   : > { %v6771_v26 = vpop.f32.mrf.mxu0  ;;  %v7156_v15 = vpop.f32.mrf.mxu1 }
 0x53e   : > { %v6772_v63 = vadd.f32 %v15773_v11, %v6771_v26  ;;  %v7342_v9 = vmul.f32 %v15833_v47, %v15833_v47  ;;  %v7272_v52 = vadd.f32 %v7271_v55, %v15833_v47 }
 0x53f   : > { %v6773_v50 = vpop.f32.mrf.mxu0  ;;  %v7158_v32 = vpop.f32.mrf.mxu1 }
 0x540   : > { %v15837_v51 = vadd.f32 %v7156_v15, %v6772_v63  ;;  %v7440_v17 = vadd.f32 %v7439_v18, %v7342_v9 }
 0x541   : > { %v6776_v7 = vpop.f32.mrf.mxu0  ;;  %v7161_v20 = vpop.f32.mrf.mxu1 }
 0x542   : > { %v6777_v41 = vadd.f32 %v15773_v11, %v6776_v7  ;;  %v7343_v25 = vmul.f32 %v15837_v51, %v15837_v51  ;;  %v7273_v43 = vadd.f32 %v7272_v52, %v15837_v51 }
 0x543   : > { %v6778_v34 = vpop.f32.mrf.mxu0  ;;  %v7163_v56 = vpop.f32.mrf.mxu1 }
 0x544   : > { %v15851_v24 = vadd.f32 %v7161_v20, %v6777_v41  ;;  %v15860_v60 = vadd.f32 %v7440_v17, %v7343_v25 }
 0x545   : > { %v6781_v28 = vpop.f32.mrf.mxu0  ;;  %v7166_v22 = vpop.f32.mrf.mxu1 }
 0x546   : > { %v6782_v19 = vadd.f32 %v15773_v11, %v6781_v28  ;;  %v8638_v61 = vpop.eup %8637  ;;  %v15863_v1 = vadd.f32 %v7273_v43, %v15851_v24  ;;  %v15867_v45 = vmul.f32 %v15851_v24, %v15851_v24 }
 0x547   : > { %v6783_v23 = vpop.f32.mrf.mxu0  ;;  %v7168_v62 = vpop.f32.mrf.mxu1  ;;  %v7515_v39 = vmul.f32 %v15621_v48, %v8638_v61 }
 0x548   : > { %v15853_v12 = vadd.f32 %v7166_v22, %v6782_v19 }
 0x549   : > { %v6786_v29 = vpop.f32.mrf.mxu0  ;;  %v7171_v3 = vpop.f32.mrf.mxu1  ;;  %v7524_v49 = vmul.f32 %v7515_v39, %v15812_v40  ;;  %v7569_v5 = vrot.slane %v7515_v39, %v17674_v13 }
 0x54a   : > { %v6787_v48 = vadd.f32 %v15773_v11, %v6786_v29  ;;  %v15874_v53 = vmul.f32 %v15853_v12, %v15853_v12 }
 0x54b   : > { %v6788_v35 = vpop.f32.mrf.mxu0  ;;  %v7173_v30 = vpop.f32.mrf.mxu1  ;;  %v7532_v46 = vsub.f32 %v15634_v31, %v7524_v49  ;;  %v7630_v40 = vmul.f32 %v7569_v5, %v15629_v8  ;;  %v7631_v54 = vmul.f32 %v7569_v5, %v15685_v10  ;;  %v7632_v0 = vmul.f32 %v7569_v5, %v15732_v38 }
 0x54c   : > { %v7633_v36 = vmul.f32 %v7569_v5, %v15735_v6  ;;  %v7634_v58 = vmul.f32 %v7569_v5, %v15756_v2  ;;  %v7635_v57 = vmul.f32 %v7569_v5, %v15760_v27  ;;  %v7636_v8 = vmul.f32 %v7569_v5, %v15781_v42 }
 0x54d   : > { %v6791_v31 = vpop.f32.mrf.mxu0  ;;  %v15876_v33 = vpop.f32.mrf.mxu1  ;;  %v7681_v16 = vrot.slane %v7532_v46, %v17674_v13  ;;  %v7637_v10 = vmul.f32 %v7569_v5, %v15791_v14  ;;  %v15884_v38 = vadd.f32 %v7171_v3, %v6787_v48 }
 0x54e   : > { %v15887_v26 = vadd.f32 %v15773_v11, %v6791_v31 }
 0x54f   : > { %v6793_v15 = vpop.f32.mrf.mxu0  ;;  %v7178_v4 = vpop.f32.mrf.mxu1  ;;  %v7742_v50 = vadd.f32 %v7681_v16, %v7630_v40  ;;  %v7743_v32 = vadd.f32 %v7681_v16, %v7631_v54  ;;  %v7744_v6 = vadd.f32 %v7681_v16, %v7632_v0  ;;  %v7745_v63 = vadd.f32 %v7681_v16, %v7633_v36 }
 0x550   : > { %v7746_v2 = vadd.f32 %v7681_v16, %v7634_v58  ;;  %v7747_v7 = vadd.f32 %v7681_v16, %v7635_v57  ;;  %v7748_v27 = vadd.f32 %v7681_v16, %v7636_v8  ;;  %v7749_v20 = vadd.f32 %v7681_v16, %v7637_v10 }
 0x551   : > { %v7806_v21 = vmax.f32 %v7742_v50, 0.0  ;;  %v7807_v34 = vmax.f32 %v7743_v32, 0.0  ;;  %v7808_v42 = vmax.f32 %v7744_v6, 0.0  ;;  %v7809_v56 = vmax.f32 %v7745_v63, 0.0 }
 0x552   : > { %v7810_v14 = vmax.f32 %v7746_v2, 0.0  ;;  %v7811_v41 = vmax.f32 %v7747_v7, 0.0  ;;  %v7812_v37 = vmax.f32 %v7748_v27, 0.0  ;;  %v7813_v28 = vmax.f32 %v7749_v20, 0.0 }
 0x553   : > { %v8110_v11 = vrot.slane %v7806_v21, 4  ;;  %v8116_v22 = vrot.slane %v7807_v34, 4  ;;  %v8122_v55 = vrot.slane %v7808_v42, 4  ;;  %v8128_v9 = vrot.slane %v7809_v56, 4 }
 0x554   : > { %v8134_v19 = vrot.slane %v7810_v14, 4  ;;  %v8140_v61 = vrot.slane %v7811_v41, 4  ;;  %v8146_v18 = vrot.slane %v7812_v37, 4  ;;  %v8152_v23 = vrot.slane %v7813_v28, 4 }
 0x555   : > { %v8111_v62 = vmax.f32 %v7806_v21, %v8110_v11  ;;  %v8117_v39 = vmax.f32 %v7807_v34, %v8116_v22  ;;  %v8123_v52 = vmax.f32 %v7808_v42, %v8122_v55  ;;  %v8129_v25 = vmax.f32 %v7809_v56, %v8128_v9 }
 0x556   : > { %v8135_v29 = vmax.f32 %v7810_v14, %v8134_v19  ;;  %v8141_v3 = vmax.f32 %v7811_v41, %v8140_v61  ;;  %v8147_v49 = vmax.f32 %v7812_v37, %v8146_v18  ;;  %v8153_v5 = vmax.f32 %v7813_v28, %v8152_v23 }
 0x557   : > { %v8112_v17 = vrot.slane %v8111_v62, 2  ;;  %v8118_v43 = vrot.slane %v8117_v39, 2  ;;  %v8124_v48 = vrot.slane %v8123_v52, 2  ;;  %v8130_v35 = vrot.slane %v8129_v25, 2 }
 0x558   : > { %v8136_v30 = vrot.slane %v8135_v29, 2  ;;  %v8142_v46 = vrot.slane %v8141_v3, 2  ;;  %v8148_v40 = vrot.slane %v8147_v49, 2  ;;  %v8154_v54 = vrot.slane %v8153_v5, 2 }
 0x559   : > { %v8113_v0 = vmax.f32 %v8111_v62, %v8112_v17  ;;  %v8119_v31 = vmax.f32 %v8117_v39, %v8118_v43  ;;  %v8125_v36 = vmax.f32 %v8123_v52, %v8124_v48  ;;  %v8131_v58 = vmax.f32 %v8129_v25, %v8130_v35 }
 0x55a   : > { %v8137_v57 = vmax.f32 %v8135_v29, %v8136_v30  ;;  %v8143_v16 = vmax.f32 %v8141_v3, %v8142_v46  ;;  %v8149_v8 = vmax.f32 %v8147_v49, %v8148_v40  ;;  %v8155_v10 = vmax.f32 %v8153_v5, %v8154_v54 }
 0x55b   : > { %v8114_v15 = vrot.slane %v8113_v0, 1  ;;  %v8120_v4 = vrot.slane %v8119_v31, 1  ;;  %v8126_v50 = vrot.slane %v8125_v36, 1  ;;  %v8132_v32 = vrot.slane %v8131_v58, 1 }
 0x55c   : > { %v8138_v6 = vrot.slane %v8137_v57, 1  ;;  %v8144_v63 = vrot.slane %v8143_v16, 1  ;;  %v7442_v2 = vadd.f32 %v15860_v60, %v15867_v45  ;;  %v7275_v21 = vadd.f32 %v15863_v1, %v15853_v12 }
 0x55d   : > { %v8115_v7 = vmax.f32 %v8113_v0, %v8114_v15  ;;  %v8121_v27 = vmax.f32 %v8119_v31, %v8120_v4  ;;  %v8127_v20 = vmax.f32 %v8125_v36, %v8126_v50  ;;  %v8133_v34 = vmax.f32 %v8131_v58, %v8132_v32  ;;  %v8654_v15 = vld [vmem:[%s15991_s10] sm:$0x1] }
 0x55e   : > { %v8150_v42 = vrot.slane %v8149_v8, 1  ;;  %v8156_v56 = vrot.slane %v8155_v10, 1  ;;  %v7443_v14 = vadd.f32 %v7442_v2, %v15874_v53  ;;  %v7276_v37 = vadd.f32 %v7275_v21, %v15884_v38 }
 0x55f   : > { %v8319_v41 = vsel %vm8270_vm3, %v8121_v27, %v8115_v7  ;;  %v7346_v28 = vmul.f32 %v15884_v38, %v15884_v38  ;;  %v7177_v60 = vadd.f32 %v15876_v33, %v15887_v26  ;;  %v8139_v45 = vmax.f32 %v8137_v57, %v8138_v6  ;;  %v8653_v57 = vld [vmem:[%s15990_s9] sm:$0x1] }
 0x560   : > { %v8145_v11 = vmax.f32 %v8143_v16, %v8144_v63  ;;  %v8320_v1 = vsel %vm8272_vm4, %v8127_v20, %v8319_v41  ;;  %v8151_v19 = vmax.f32 %v8149_v8, %v8150_v42  ;;  %v8157_v18 = vmax.f32 %v8155_v10, %v8156_v56 }
 0x561   : > { %v8321_v22 = vsel %vm8274_vm5, %v8133_v34, %v8320_v1  ;;  %v7444_v55 = vadd.f32 %v7443_v14, %v7346_v28  ;;  %v7277_v9 = vadd.f32 %v7276_v37, %v7177_v60  ;;  %v7347_v53 = vmul.f32 %v7177_v60, %v7177_v60 }
 0x562   : > { %v8322_v61 = vsel %vm8276_vm6, %v8139_v45, %v8321_v22 }
 0x563   : > { %v8323_v23 = vsel %vm8278_vm7, %v8145_v11, %v8322_v61  ;;  %v7278_v62 = vrot.slane %v7277_v9, 4  ;;  %v7445_v39 = vadd.f32 %v7444_v55, %v7347_v53 }
 0x564   : > { %v8324_v33 = vsel %vm8280_vm8, %v8151_v19, %v8323_v23 }
 0x565   : > { %v8325_v26 = vsel %vm8282_vm9, %v8157_v18, %v8324_v33  ;;  %v7279_v52 = vadd.f32 %v7278_v62, %v7277_v9  ;;  %v7446_v25 = vrot.slane %v7445_v39, 4 }
 0x566   : > { %8347 = vst [vmem:[%s15142_s22 + $0x30] sm:$0xff] %v8325_v26 }
 0x567   : > { %v7280_v29 = vrot.slane %v7279_v52, 2  ;;  %v7447_v3 = vadd.f32 %v7446_v25, %v7445_v39 }
 0x569   : > { %v7281_v49 = vadd.f32 %v7280_v29, %v7279_v52  ;;  %v7448_v5 = vrot.slane %v7447_v3, 2 }
 0x56b   : > { %v7282_v17 = vrot.slane %v7281_v49, 1  ;;  %v7449_v43 = vadd.f32 %v7448_v5, %v7447_v3 }
 0x56d   : > { %v7283_v48 = vadd.f32 %v7282_v17, %v7281_v49  ;;  %v7450_v35 = vrot.slane %v7449_v43, 1 }
 0x56f   : > { %v7451_v30 = vadd.f32 %v7450_v35, %v7449_v43  ;;  %v7459_v46 = vmul.f32 0.015625, %v7283_v48 }
 0x571   : > { %v7467_v40 = vmul.f32 0.015625, %v7451_v30  ;;  %v7475_v54 = vmul.f32 %v7459_v46, %v7459_v46 }
 0x573   : > { %v7483_v0 = vsub.f32 %v7467_v40, %v7475_v54 }
 0x575   : > { %v7491_v31 = vmax.f32 %v7483_v0, 0.0 }
 0x577   : > { %v7500_v36 = vadd.f32 1e-05, %v7491_v31 }
 0x579   : > { %8639 = vrsqrt.f32 %v7500_v36 }
 0x586   : > { %v8640_v58 = vpop.eup %8639 }
 0x587   : > { %v7516_v16 = vmul.f32 %v8653_v57, %v8640_v58 }
 0x589   : > { %v7525_v8 = vmul.f32 %v7516_v16, %v7459_v46  ;;  %v7573_v10 = vrot.slane %v7516_v16, %v17674_v13 }
 0x58b   : > { %v7533_v4 = vsub.f32 %v8654_v15, %v7525_v8  ;;  %v7638_v50 = vmul.f32 %v7573_v10, %v15831_v59  ;;  %v7639_v32 = vmul.f32 %v7573_v10, %v15828_v44  ;;  %v7640_v6 = vmul.f32 %v7573_v10, %v15833_v47 }
 0x58c   : > { %v7641_v63 = vmul.f32 %v7573_v10, %v15837_v51  ;;  %v7642_v7 = vmul.f32 %v7573_v10, %v15851_v24  ;;  %v7643_v27 = vmul.f32 %v7573_v10, %v15853_v12  ;;  %v7644_v20 = vmul.f32 %v7573_v10, %v15884_v38 }
 0x58d   : > { %v7685_v2 = vrot.slane %v7533_v4, %v17674_v13  ;;  %v7645_v21 = vmul.f32 %v7573_v10, %v7177_v60 }
 0x58f   : > { %v7750_v34 = vadd.f32 %v7685_v2, %v7638_v50  ;;  %v7751_v42 = vadd.f32 %v7685_v2, %v7639_v32  ;;  %v7752_v56 = vadd.f32 %v7685_v2, %v7640_v6  ;;  %v7753_v14 = vadd.f32 %v7685_v2, %v7641_v63 }
 0x590   : > { %v7754_v59 = vadd.f32 %v7685_v2, %v7642_v7  ;;  %v7755_v41 = vadd.f32 %v7685_v2, %v7643_v27  ;;  %v7756_v44 = vadd.f32 %v7685_v2, %v7644_v20  ;;  %v7757_v37 = vadd.f32 %v7685_v2, %v7645_v21 }
 0x591   : > { %v7814_v47 = vmax.f32 %v7750_v34, 0.0  ;;  %v7815_v28 = vmax.f32 %v7751_v42, 0.0  ;;  %v7816_v51 = vmax.f32 %v7752_v56, 0.0  ;;  %v7817_v45 = vmax.f32 %v7753_v14, 0.0 }
 0x592   : > { %v7818_v13 = vmax.f32 %v7754_v59, 0.0  ;;  %v7819_v11 = vmax.f32 %v7755_v41, 0.0  ;;  %v7820_v24 = vmax.f32 %v7756_v44, 0.0  ;;  %v7821_v1 = vmax.f32 %v7757_v37, 0.0 }
 0x593   : > { %v8158_v12 = vrot.slane %v7814_v47, 4  ;;  %v8164_v22 = vrot.slane %v7815_v28, 4  ;;  %v8170_v38 = vrot.slane %v7816_v51, 4  ;;  %v8176_v60 = vrot.slane %v7817_v45, 4 }
 0x594   : > { %v8182_v55 = vrot.slane %v7818_v13, 4  ;;  %v8188_v9 = vrot.slane %v7819_v11, 4  ;;  %v8194_v53 = vrot.slane %v7820_v24, 4  ;;  %v8200_v19 = vrot.slane %v7821_v1, 4 }
 0x595   : > { %v8159_v61 = vmax.f32 %v7814_v47, %v8158_v12  ;;  %v8165_v18 = vmax.f32 %v7815_v28, %v8164_v22  ;;  %v8171_v23 = vmax.f32 %v7816_v51, %v8170_v38  ;;  %v8177_v62 = vmax.f32 %v7817_v45, %v8176_v60 }
 0x596   : > { %v8183_v39 = vmax.f32 %v7818_v13, %v8182_v55  ;;  %v8189_v33 = vmax.f32 %v7819_v11, %v8188_v9  ;;  %v8195_v26 = vmax.f32 %v7820_v24, %v8194_v53  ;;  %v8201_v52 = vmax.f32 %v7821_v1, %v8200_v19 }
 0x597   : > { %v8160_v25 = vrot.slane %v8159_v61, 2  ;;  %v8166_v29 = vrot.slane %v8165_v18, 2  ;;  %v8172_v3 = vrot.slane %v8171_v23, 2  ;;  %v8178_v49 = vrot.slane %v8177_v62, 2 }
 0x598   : > { %v8184_v5 = vrot.slane %v8183_v39, 2  ;;  %v8190_v17 = vrot.slane %v8189_v33, 2  ;;  %v8196_v43 = vrot.slane %v8195_v26, 2  ;;  %v8202_v48 = vrot.slane %v8201_v52, 2 }
 0x599   : > { %v8161_v35 = vmax.f32 %v8159_v61, %v8160_v25  ;;  %v8167_v30 = vmax.f32 %v8165_v18, %v8166_v29  ;;  %v8173_v46 = vmax.f32 %v8171_v23, %v8172_v3  ;;  %v8179_v40 = vmax.f32 %v8177_v62, %v8178_v49 }
 0x59a   : > { %v8185_v54 = vmax.f32 %v8183_v39, %v8184_v5  ;;  %v8191_v0 = vmax.f32 %v8189_v33, %v8190_v17  ;;  %v8197_v31 = vmax.f32 %v8195_v26, %v8196_v43  ;;  %v8203_v36 = vmax.f32 %v8201_v52, %v8202_v48 }
 0x59b   : > { %v8162_v58 = vrot.slane %v8161_v35, 1  ;;  %v8168_v57 = vrot.slane %v8167_v30, 1  ;;  %v8174_v16 = vrot.slane %v8173_v46, 1  ;;  %v8180_v8 = vrot.slane %v8179_v40, 1 }
 0x59c   : > { %v8186_v10 = vrot.slane %v8185_v54, 1  ;;  %v8192_v32 = vrot.slane %v8191_v0, 1  ;;  %v8198_v6 = vrot.slane %v8197_v31, 1  ;;  %v8204_v2 = vrot.slane %v8203_v36, 1 }
 0x59d   : > { %v8163_v15 = vmax.f32 %v8161_v35, %v8162_v58  ;;  %v8169_v4 = vmax.f32 %v8167_v30, %v8168_v57  ;;  %v8175_v50 = vmax.f32 %v8173_v46, %v8174_v16  ;;  %v8181_v63 = vmax.f32 %v8179_v40, %v8180_v8 }
 0x59e   : > { %v8187_v27 = vmax.f32 %v8185_v54, %v8186_v10  ;;  %v8193_v21 = vmax.f32 %v8191_v0, %v8192_v32  ;;  %v8199_v42 = vmax.f32 %v8197_v31, %v8198_v6  ;;  %v8205_v14 = vmax.f32 %v8203_v36, %v8204_v2 }
 0x59f   : > { %v8326_v7 = vsel %vm8270_vm3, %v8169_v4, %v8163_v15 }
 0x5a0   : > { %v8327_v20 = vsel %vm8272_vm4, %v8175_v50, %v8326_v7 }
 0x5a1   : > { %v8328_v34 = vsel %vm8274_vm5, %v8181_v63, %v8327_v20 }
 0x5a2   : > { %v8329_v56 = vsel %vm8276_vm6, %v8187_v27, %v8328_v34 }
 0x5a3   : > { %v8330_v59 = vsel %vm8278_vm7, %v8193_v21, %v8329_v56 }
 0x5a4   : > { %v8331_v41 = vsel %vm8280_vm8, %v8199_v42, %v8330_v59 }
 0x5a5   : > { %v8332_v44 = vsel %vm8282_vm9, %v8205_v14, %v8331_v41 }
 0x5a6   : > { %8348 = vst [vmem:[%s15142_s22 + $0x38] sm:$0xff] %v8332_v44 }
 0x5a7   : > { %8694 = shalt.err (!%p8691_p0)
}
 0x5a8   : > { %s8695_s12 = scalar_lea.hbm %s15932_s14, 1024  ;;  %s8699_s24 = scalar_lea.hbm %s15992_s11, 2048 }
 0x5a9   : > { %p8696_p1 = scmp.ne.s32.totalorder %s15932_s14, %s8695_s12  ;;  %p8700_p4 = scmp.lt.s32.totalorder %s15932_s14, %s15992_s11 }
 0x5aa   : > { %p8701_p7 = scmp.lt.s32.totalorder %s8699_s24, %s8695_s12 }
 0x5ab   : > { %p8697_p2 = pnand %p8696_p1, %p8854_p5 }
 0x5ac   : > { %p8702_p6 = por %p8701_p7, %p8700_p4 }
 0x5ad   : > { %p8698_p3 = pneg %p8697_p2 }
 0x5af   : > { %p8703_p8 = pnand %p8702_p6, %p8698_p3 }
 0x5b1   : > { %8706 = shalt.err (!%p8703_p8)
}
 0x5b2   : > { %s8754_s25 = smov 128   ;;  %s8755_s13 = smov 8  }
 0x5b3   : > { %8507 = dma.vmem_to_hbm [thread:$0]  (%p8854_p5), %s15934_s16, 1024, %s15932_s14, %s15941_s21, %s8754_s25, %s8754_s25, %s8755_s13  }
 0x5b4 PF: > { %p8519_p9 = scmp.ge.s32.totalorder %s8745_s20, 2  ;;  %s8378_s15 = sand.u32 1, %s8733_s17  }
 0x5b5   : > { %p17765_p10 = scmp.ne.s32.totalorder %s16525_s28, 0  ;;  %s8379_s0 = scalar_lea.sflag [#allocation4], %s8378_s15 }
 0x5b7   : > { %p8514_p11 = pnand %p8519_p9, %p17765_p10 }
 0x5b9   : > { %p8515_p12 = pneg %p8514_p11 }
 0x5bb   : > { %8728 = dma.done.wait (%p8515_p12), %s8379_s0, 1024  }
 0x5bc   : > { %8730 = vsyncadd (%p8515_p12), %s8379_s0, 4294966272  ;;  %p22_p13 = scmp.ge.s32.totalorder %s8841_s23, 4   ;;  %s17766_s17 = smov %s8737_s18 }
 0x5bd   : > { %s17767_s18 = smov %s8741_s19  ;;  %s17768_s19 = smov %s8852_s26 }
 0x5be   : > { %s17769_s20 = smov %s8841_s23  ;;  %24 = sbr.rel (!%p22_p13) target bundleno = 6 (0x6), region = 107 }
 0x5c3   :  { %8384 = vsyncpa [#allocation3], 1 }
 0x5c4   :  { %8386 = vsyncpa [#allocation3 + $0x1], 1 }
 0x5c5   :  { %8387 = vsyncpa [#allocation4], 1 }
 0x5c6   :  { %8389 = vsyncpa [#allocation4 + $0x1], 1 }

</bundles_post_ra>
